<compile_context>
chip_gen: v7x
topology: tpu7x:2x2x1
jax: 0.10.0
libtpu: 0.0.40
codegen_flags: <defaults>
</compile_context>

<pallas_src>
import numpy as np
import jax
import jax.numpy as jnp
from jax import lax
from jax.experimental import pallas as pl
from jax.experimental.pallas import tpu as pltpu

BN_EPS = 1e-5
C1P = 128        # conv1 output channels, padded to full lane width
C2P = 128        # conv2 output channels, padded to full lane width
HP = 256         # fc1 hidden width, padded (150 -> 256)
OP = 128         # class logits, padded (10 -> 128)
K2 = 16 * C1P    # conv2 im2col width  (4x4 taps  x padded in-channels)
K3 = 9 * C2P     # fc1 input width     (3x3 spatial x padded channels)


# ------------------------------ Pallas kernel -------------------------------

def _pool2x2(y, out_h, out_w, npad):
    """2x2 max-pool.  y: (2*out_h * 2*out_w * npad, C) with rows in (h, w, n)
    row-major order.  Returns (out_h, out_w, npad, C).  Every reshape keeps the
    trailing (npad, C) dims tile-aligned, so they are layout no-ops."""
    c = y.shape[-1]
    y = y.reshape(2 * out_h, out_w, 2, npad, c)           # split w -> (w/2, dw)
    y = jnp.maximum(y[:, :, 0], y[:, :, 1])               # (2*out_h, out_w, npad, c)
    y = y.reshape(out_h, 2, out_w, npad, c)               # split h -> (h/2, dh)
    return jnp.maximum(y[:, 0], y[:, 1])                  # (out_h, out_w, npad, c)


def cnn14x14_fused_kernel(p1_ref, w1_ref, b1_ref, w2_ref, b2_ref,
                          w3_ref, b3_ref, w4_ref, b4_ref, o_ref,
                          y1p_ref, lhs2_ref, feat_ref):
    npad = o_ref.shape[0]
    c1 = y1p_ref.shape[-1]

    # ---- stage 1: conv1 (im2col matmul, BN folded) + ReLU + 2x2 max-pool ----
    y = jnp.dot(p1_ref[...], w1_ref[...], preferred_element_type=jnp.float32)
    y = jnp.maximum(y + b1_ref[...], 0.0)                 # (14*14*npad, 128)
    y1 = _pool2x2(y, 7, 7, npad)                          # (7, 7, npad, 128)

    # ---- zero-padded stage-1 activation stays resident in VMEM scratch ------
    y1p_ref[...] = jnp.zeros_like(y1p_ref)                # (9, 9, npad, 128)
    y1p_ref[1:8, 1:8, :, :] = y1

    # ---- stage 2: conv2 (4x4, pad 1) as ONE matmul over an in-VMEM im2col.
    # 16 tile-aligned lane-block copies build a (36*npad, 16*128) slab; the
    # MXU accumulates over taps internally (K = 2048), so there is no long
    # VPU accumulation chain and no accumulator spill pressure. -----------------
    for t in range(16):
        ky, kx = divmod(t, 4)
        win = y1p_ref[ky:ky + 6, kx:kx + 6, :, :]          # (6, 6, npad, 128)
        lhs2_ref[:, t * c1:(t + 1) * c1] = win.reshape(36 * npad, c1)
    y2 = jnp.dot(lhs2_ref[...], w2_ref[...], preferred_element_type=jnp.float32)
    y2 = jnp.maximum(y2 + b2_ref[...], 0.0)               # (6*6*npad, 128)
    y2 = _pool2x2(y2, 3, 3, npad)                         # (3, 3, npad, 128)

    # ---- fc1: NCHW .view(-1,360) permutation is baked into w3; the ReLU on
    # the flatten is a no-op because y2 >= 0 already.  Single matmul, K = 1152.
    c2 = y2.shape[-1]
    for t in range(9):
        i, j = divmod(t, 3)
        feat_ref[:, t * c2:(t + 1) * c2] = y2[i, j]        # (npad, 128) tiles
    h = jnp.dot(feat_ref[...], w3_ref[...], preferred_element_type=jnp.float32)
    h = h + b3_ref[...]                                    # (npad, 256)

    # ---- fc2 + softmax (padded class lanes carry a -1e30 bias -> prob 0) ----
    logits = jnp.dot(h, w4_ref[...], preferred_element_type=jnp.float32) + b4_ref[...]
    m = jnp.max(logits, axis=1, keepdims=True)
    e = jnp.exp(logits - m)
    d = jnp.sum(e, axis=1, keepdims=True)
    r = pl.reciprocal(d, approx=True)                      # EUP reciprocal
    r = r * (2.0 - d * r)                                  # one Newton step -> f32-accurate
    o_ref[...] = e * r


# ------------------------------ pallas_call glue -----------------------------

def _full_spec(shape):
    nd = len(shape)
    return pl.BlockSpec(shape, lambda i, _nd=nd: (0,) * _nd)


def _fold_bn(gamma, beta, mean, var, conv_b):
    scale = gamma / jnp.sqrt(var + BN_EPS)
    bias = scale * (conv_b - mean) + beta
    return scale, bias


def cnn14x14_forward(x_nchw, p):
    n = x_nchw.shape[0]
    npad = -(-n // 8) * 8                                  # pad batch to sublane tile

    # ---- input: NCHW (C=1) -> zero-padded (npad, 16, 16) -> one im2col slab
    x = x_nchw.reshape(n, 14, 14).astype(jnp.float32)
    x = jnp.pad(x, ((0, npad - n), (1, 1), (1, 1)))
    cols = [x[:, ky:ky + 14, kx:kx + 14] for ky in range(3) for kx in range(3)]
    p1 = jnp.transpose(jnp.stack(cols, axis=-1), (1, 2, 0, 3))   # (14,14,npad,9)
    p1 = p1.reshape(14 * 14 * npad, 9)                           # rows in (h,w,n) order

    # ---- conv1 + BN1 folded, padded to 128 output lanes
    s1, b1 = _fold_bn(p['bn1_gamma'], p['bn1_beta'], p['bn1_mean'], p['bn1_var'],
                      p['conv1_b'])
    w1 = jnp.transpose(p['conv1_w'], (2, 3, 1, 0)).reshape(9, 20) * s1[None, :]
    w1 = jnp.pad(w1, ((0, 0), (0, C1P - 20)))
    b1 = jnp.pad(b1, (0, C1P - 20)).reshape(1, C1P)

    # ---- conv2 + BN2 folded: one (16*128, 128) matrix, rows = [tap, in-chan]
    s2, b2 = _fold_bn(p['bn2_gamma'], p['bn2_beta'], p['bn2_mean'], p['bn2_var'],
                      p['conv2_b'])
    w2 = jnp.transpose(p['conv2_w'], (2, 3, 1, 0)).reshape(16, 20, 40) * s2[None, None, :]
    w2 = jnp.pad(w2, ((0, 0), (0, C1P - 20), (0, C2P - 40))).reshape(K2, C2P)
    b2 = jnp.pad(b2, (0, C2P - 40)).reshape(1, C2P)

    # ---- fc1: bake the NCHW .view(-1,360) permutation into a (9*128, 256) weight
    w3 = p['fc1_w'].T.reshape(40, 3, 3, 150)                     # [c, h, w, out]
    w3 = jnp.transpose(w3, (1, 2, 0, 3)).reshape(9, 40, 150)     # [(h,w), c, out]
    w3 = jnp.pad(w3, ((0, 0), (0, C2P - 40), (0, HP - 150))).reshape(K3, HP)
    b3 = jnp.pad(p['fc1_b'], (0, HP - 150)).reshape(1, HP)

    # ---- fc2: padded class lanes get a -1e30 bias so softmax assigns them 0
    w4 = jnp.pad(p['fc2_w'].T, ((0, HP - 150), (0, OP - 10)))
    b4 = jnp.pad(p['fc2_b'], (0, OP - 10), constant_values=-1e30).reshape(1, OP)

    args = (p1, w1, b1, w2, b2, w3, b3, w4, b4)
    out = pl.pallas_call(
        cnn14x14_fused_kernel,
        out_shape=jax.ShapeDtypeStruct((npad, OP), jnp.float32),
        grid=(1,),
        in_specs=[_full_spec(a.shape) for a in args],
        out_specs=_full_spec((npad, OP)),
        scratch_shapes=[
            pltpu.VMEM((9, 9, npad, C1P), jnp.float32),    # padded stage-1 act
            pltpu.VMEM((36 * npad, K2), jnp.float32),      # conv2 im2col slab
            pltpu.VMEM((npad, K3), jnp.float32),           # fc1 feature slab
        ],
        compiler_params=pltpu.CompilerParams(
            dimension_semantics=("arbitrary",),
            vmem_limit_bytes=32 * 1024 * 1024),
    )(*args)
    return out[:n, :10]


# --------------------------- parameters & reference --------------------------

def init_params(key):
    keys = jax.random.split(key, 16)

    def nrm(k, shape, s):
        return (s * jax.random.normal(k, shape)).astype(jnp.float32)

    return {
        'conv1_w': nrm(keys[0], (20, 1, 3, 3), 0.3),
        'conv1_b': nrm(keys[1], (20,), 0.1),
        'bn1_gamma': 1.0 + nrm(keys[2], (20,), 0.1),
        'bn1_beta': nrm(keys[3], (20,), 0.1),
        'bn1_mean': nrm(keys[4], (20,), 0.1),
        'bn1_var': (1.0 + 0.5 * jax.nn.sigmoid(jax.random.normal(keys[5], (20,)))
                    ).astype(jnp.float32),
        'conv2_w': nrm(keys[6], (40, 20, 4, 4), 0.1),
        'conv2_b': nrm(keys[7], (40,), 0.1),
        'bn2_gamma': 1.0 + nrm(keys[8], (40,), 0.1),
        'bn2_beta': nrm(keys[9], (40,), 0.1),
        'bn2_mean': nrm(keys[10], (40,), 0.1),
        'bn2_var': (1.0 + 0.5 * jax.nn.sigmoid(jax.random.normal(keys[11], (40,)))
                    ).astype(jnp.float32),
        'fc1_w': nrm(keys[12], (150, 360), 0.05),
        'fc1_b': nrm(keys[13], (150,), 0.1),
        'fc2_w': nrm(keys[14], (10, 150), 0.1),
        'fc2_b': nrm(keys[15], (10,), 0.1),
    }


def reference_forward(x_nchw, p):
    """Pure-JAX replica of the PyTorch forward (inference-mode BN)."""
    def conv(x, w, b, pad):
        y = lax.conv_general_dilated(x, w, (1, 1), [(pad, pad), (pad, pad)],
                                     dimension_numbers=('NCHW', 'OIHW', 'NCHW'))
        return y + b[None, :, None, None]

    def bn(x, g, bt, m, v):
        return (g[None, :, None, None] * (x - m[None, :, None, None])
                / jnp.sqrt(v[None, :, None, None] + BN_EPS)
                + bt[None, :, None, None])

    def pool(x):
        n, c, h, w = x.shape
        return x.reshape(n, c, h // 2, 2, w // 2, 2).max(axis=(3, 5))

    y = jnp.maximum(bn(conv(x_nchw, p['conv1_w'], p['conv1_b'], 1),
                       p['bn1_gamma'], p['bn1_beta'], p['bn1_mean'], p['bn1_var']), 0.0)
    y = pool(y)
    y = jnp.maximum(bn(conv(y, p['conv2_w'], p['conv2_b'], 1),
                       p['bn2_gamma'], p['bn2_beta'], p['bn2_mean'], p['bn2_var']), 0.0)
    y = pool(y)
    flat = jnp.maximum(y.reshape(y.shape[0], -1), 0.0)
    h = flat @ p['fc1_w'].T + p['fc1_b']
    logits = h @ p['fc2_w'].T + p['fc2_b']
    return jax.nn.softmax(logits, axis=1)


if __name__ == "__main__":
    key = jax.random.PRNGKey(0)
    k_params, k_x = jax.random.split(key)
    params = init_params(k_params)
    # fc1 expects 360 = 40*3*3 features, which implies 14x14 single-channel input.
    x = jax.random.normal(k_x, (2, 1, 14, 14), dtype=jnp.float32)     # NCHW

    out = jax.jit(cnn14x14_forward)(x, params)
    out = jax.block_until_ready(out)

    ref = reference_forward(x, params)
    assert out.shape == (2, 10)
    np.testing.assert_allclose(np.asarray(out), np.asarray(ref), rtol=1e-3, atol=1e-3)
    np.testing.assert_allclose(np.asarray(out).sum(axis=1), np.ones(2),
                               rtol=1e-3, atol=1e-3)
    print("KERNEL_OK")
</pallas_src>

<mosaic_0001>
module attributes {stable_mosaic.version = 11 : i64} {
  func.func @cnn14x14_fused_kernel(%arg0: i32, %arg1: memref<1568x9xf32, #tpu.memory_space<vmem>>, %arg2: memref<9x128xf32, #tpu.memory_space<vmem>>, %arg3: memref<1x128xf32, #tpu.memory_space<vmem>>, %arg4: memref<2048x128xf32, #tpu.memory_space<vmem>>, %arg5: memref<1x128xf32, #tpu.memory_space<vmem>>, %arg6: memref<1152x256xf32, #tpu.memory_space<vmem>>, %arg7: memref<1x256xf32, #tpu.memory_space<vmem>>, %arg8: memref<256x128xf32, #tpu.memory_space<vmem>>, %arg9: memref<1x128xf32, #tpu.memory_space<vmem>>, %arg10: memref<8x128xf32, #tpu.memory_space<vmem>>, %arg11: memref<9x9x8x128xf32, #tpu.memory_space<vmem>>, %arg12: memref<288x2048xf32, #tpu.memory_space<vmem>>, %arg13: memref<8x1152xf32, #tpu.memory_space<vmem>>) attributes {dimension_semantics = [#tpu.dimension_semantics<arbitrary>], iteration_bounds = array<i64: 1>, scalar_prefetch = 0 : i64, scratch_operands = 3 : i64, tpu.core_type = #tpu.core_type<tc>, window_params = [{pipeline_mode = #tpu.pipeline_mode<synchronous>, transform_indices = @transform_0, window_bounds = array<i64: 1568, 9>}, {pipeline_mode = #tpu.pipeline_mode<synchronous>, transform_indices = @transform_1, window_bounds = array<i64: 9, 128>}, {pipeline_mode = #tpu.pipeline_mode<synchronous>, transform_indices = @transform_2, window_bounds = array<i64: 1, 128>}, {pipeline_mode = #tpu.pipeline_mode<synchronous>, transform_indices = @transform_3, window_bounds = array<i64: 2048, 128>}, {pipeline_mode = #tpu.pipeline_mode<synchronous>, transform_indices = @transform_4, window_bounds = array<i64: 1, 128>}, {pipeline_mode = #tpu.pipeline_mode<synchronous>, transform_indices = @transform_5, window_bounds = array<i64: 1152, 256>}, {pipeline_mode = #tpu.pipeline_mode<synchronous>, transform_indices = @transform_6, window_bounds = array<i64: 1, 256>}, {pipeline_mode = #tpu.pipeline_mode<synchronous>, transform_indices = @transform_7, window_bounds = array<i64: 256, 128>}, {pipeline_mode = #tpu.pipeline_mode<synchronous>, transform_indices = @transform_8, window_bounds = array<i64: 1, 128>}, {pipeline_mode = #tpu.pipeline_mode<synchronous>, transform_indices = @transform_9, window_bounds = array<i64: 8, 128>}]} {
    %c0 = arith.constant 0 : index
    %c0_0 = arith.constant 0 : index
    %0 = vector.load %arg1[%c0, %c0_0] : memref<1568x9xf32, #tpu.memory_space<vmem>>, vector<1568x9xf32>
    %c0_1 = arith.constant 0 : index
    %c0_2 = arith.constant 0 : index
    %1 = vector.load %arg2[%c0_1, %c0_2] : memref<9x128xf32, #tpu.memory_space<vmem>>, vector<9x128xf32>
    %cst = arith.constant dense<0.000000e+00> : vector<1568x128xf32>
    %2 = tpu.matmul %0, %1, %cst {dimension_numbers = #tpu.dot_dimension_numbers<[1], [0], [0], [1], [0, 0, 1, 1], [], []>} : vector<1568x9xf32>, vector<9x128xf32>, vector<1568x128xf32> -> vector<1568x128xf32>
    %c0_3 = arith.constant 0 : index
    %c0_4 = arith.constant 0 : index
    %3 = vector.load %arg3[%c0_3, %c0_4] : memref<1x128xf32, #tpu.memory_space<vmem>>, vector<1x128xf32>
    %4 = vector.broadcast %3 : vector<1x128xf32> to vector<1568x128xf32>
    %5 = arith.addf %2, %4 : vector<1568x128xf32>
    %cst_5 = arith.constant 0.000000e+00 : f32
    %6 = vector.broadcast %cst_5 : f32 to vector<1568x128xf32>
    %7 = arith.maximumf %5, %6 : vector<1568x128xf32>
    %8 = vector.shape_cast %7 : vector<1568x128xf32> to vector<14x7x2x8x128xf32>
    %9 = vector.extract_strided_slice %8 {offsets = [0, 0, 0, 0, 0], sizes = [14, 7, 1, 8, 128], strides = [1, 1, 1, 1, 1]} : vector<14x7x2x8x128xf32> to vector<14x7x1x8x128xf32>
    %10 = vector.shape_cast %9 : vector<14x7x1x8x128xf32> to vector<14x7x8x128xf32>
    %11 = vector.extract_strided_slice %8 {offsets = [0, 0, 1, 0, 0], sizes = [14, 7, 1, 8, 128], strides = [1, 1, 1, 1, 1]} : vector<14x7x2x8x128xf32> to vector<14x7x1x8x128xf32>
    %12 = vector.shape_cast %11 : vector<14x7x1x8x128xf32> to vector<14x7x8x128xf32>
    %13 = arith.maximumf %10, %12 : vector<14x7x8x128xf32>
    %14 = vector.shape_cast %13 : vector<14x7x8x128xf32> to vector<7x2x7x8x128xf32>
    %15 = vector.extract_strided_slice %14 {offsets = [0, 0, 0, 0, 0], sizes = [7, 1, 7, 8, 128], strides = [1, 1, 1, 1, 1]} : vector<7x2x7x8x128xf32> to vector<7x1x7x8x128xf32>
    %16 = vector.shape_cast %15 : vector<7x1x7x8x128xf32> to vector<7x7x8x128xf32>
    %17 = vector.extract_strided_slice %14 {offsets = [0, 1, 0, 0, 0], sizes = [7, 1, 7, 8, 128], strides = [1, 1, 1, 1, 1]} : vector<7x2x7x8x128xf32> to vector<7x1x7x8x128xf32>
    %18 = vector.shape_cast %17 : vector<7x1x7x8x128xf32> to vector<7x7x8x128xf32>
    %19 = arith.maximumf %16, %18 : vector<7x7x8x128xf32>
    %cst_6 = arith.constant 0.000000e+00 : f32
    %20 = vector.broadcast %cst_6 : f32 to vector<9x9x8x128xf32>
    %c0_7 = arith.constant 0 : index
    %c0_8 = arith.constant 0 : index
    %c0_9 = arith.constant 0 : index
    %c0_10 = arith.constant 0 : index
    %21 = vector.load %arg11[%c0_7, %c0_8, %c0_9, %c0_10] : memref<9x9x8x128xf32, #tpu.memory_space<vmem>>, vector<9x9x8x128xf32>
    tpu.vector_store %arg11[%c0_7, %c0_8, %c0_9, %c0_10], %20 {strides = array<i32>} : memref<9x9x8x128xf32, #tpu.memory_space<vmem>>, vector<9x9x8x128xf32>,
    %c1 = arith.constant 1 : index
    %c1_11 = arith.constant 1 : index
    %c0_12 = arith.constant 0 : index
    %c0_13 = arith.constant 0 : index
    %22 = vector.load %arg11[%c1, %c1_11, %c0_12, %c0_13] : memref<9x9x8x128xf32, #tpu.memory_space<vmem>>, vector<7x7x8x128xf32>
    tpu.vector_store %arg11[%c1, %c1_11, %c0_12, %c0_13], %19 {strides = array<i32>} : memref<9x9x8x128xf32, #tpu.memory_space<vmem>>, vector<7x7x8x128xf32>,
    %c0_14 = arith.constant 0 : index
    %c0_15 = arith.constant 0 : index
    %c0_16 = arith.constant 0 : index
    %c0_17 = arith.constant 0 : index
    %23 = vector.load %arg11[%c0_14, %c0_15, %c0_16, %c0_17] : memref<9x9x8x128xf32, #tpu.memory_space<vmem>>, vector<6x6x8x128xf32>
    %24 = vector.shape_cast %23 : vector<6x6x8x128xf32> to vector<288x128xf32>
    %c0_18 = arith.constant 0 : index
    %c0_19 = arith.constant 0 : index
    %25 = vector.load %arg12[%c0_18, %c0_19] : memref<288x2048xf32, #tpu.memory_space<vmem>>, vector<288x128xf32>
    tpu.vector_store %arg12[%c0_18, %c0_19], %24 {strides = array<i32>} : memref<288x2048xf32, #tpu.memory_space<vmem>>, vector<288x128xf32>,
    %c0_20 = arith.constant 0 : index
    %c1_21 = arith.constant 1 : index
    %c0_22 = arith.constant 0 : index
    %c0_23 = arith.constant 0 : index
    %26 = vector.load %arg11[%c0_20, %c1_21, %c0_22, %c0_23] : memref<9x9x8x128xf32, #tpu.memory_space<vmem>>, vector<6x6x8x128xf32>
    %27 = vector.shape_cast %26 : vector<6x6x8x128xf32> to vector<288x128xf32>
    %c0_24 = arith.constant 0 : index
    %c128 = arith.constant 128 : index
    %28 = vector.load %arg12[%c0_24, %c128] : memref<288x2048xf32, #tpu.memory_space<vmem>>, vector<288x128xf32>
    tpu.vector_store %arg12[%c0_24, %c128], %27 {strides = array<i32>} : memref<288x2048xf32, #tpu.memory_space<vmem>>, vector<288x128xf32>,
    %c0_25 = arith.constant 0 : index
    %c2 = arith.constant 2 : index
    %c0_26 = arith.constant 0 : index
    %c0_27 = arith.constant 0 : index
    %29 = vector.load %arg11[%c0_25, %c2, %c0_26, %c0_27] : memref<9x9x8x128xf32, #tpu.memory_space<vmem>>, vector<6x6x8x128xf32>
    %30 = vector.shape_cast %29 : vector<6x6x8x128xf32> to vector<288x128xf32>
    %c0_28 = arith.constant 0 : index
    %c256 = arith.constant 256 : index
    %31 = vector.load %arg12[%c0_28, %c256] : memref<288x2048xf32, #tpu.memory_space<vmem>>, vector<288x128xf32>
    tpu.vector_store %arg12[%c0_28, %c256], %30 {strides = array<i32>} : memref<288x2048xf32, #tpu.memory_space<vmem>>, vector<288x128xf32>,
    %c0_29 = arith.constant 0 : index
    %c3 = arith.constant 3 : index
    %c0_30 = arith.constant 0 : index
    %c0_31 = arith.constant 0 : index
    %32 = vector.load %arg11[%c0_29, %c3, %c0_30, %c0_31] : memref<9x9x8x128xf32, #tpu.memory_space<vmem>>, vector<6x6x8x128xf32>
    %33 = vector.shape_cast %32 : vector<6x6x8x128xf32> to vector<288x128xf32>
    %c0_32 = arith.constant 0 : index
    %c384 = arith.constant 384 : index
    %34 = vector.load %arg12[%c0_32, %c384] : memref<288x2048xf32, #tpu.memory_space<vmem>>, vector<288x128xf32>
    tpu.vector_store %arg12[%c0_32, %c384], %33 {strides = array<i32>} : memref<288x2048xf32, #tpu.memory_space<vmem>>, vector<288x128xf32>,
    %c1_33 = arith.constant 1 : index
    %c0_34 = arith.constant 0 : index
    %c0_35 = arith.constant 0 : index
    %c0_36 = arith.constant 0 : index
    %35 = vector.load %arg11[%c1_33, %c0_34, %c0_35, %c0_36] : memref<9x9x8x128xf32, #tpu.memory_space<vmem>>, vector<6x6x8x128xf32>
    %36 = vector.shape_cast %35 : vector<6x6x8x128xf32> to vector<288x128xf32>
    %c0_37 = arith.constant 0 : index
    %c512 = arith.constant 512 : index
    %37 = vector.load %arg12[%c0_37, %c512] : memref<288x2048xf32, #tpu.memory_space<vmem>>, vector<288x128xf32>
    tpu.vector_store %arg12[%c0_37, %c512], %36 {strides = array<i32>} : memref<288x2048xf32, #tpu.memory_space<vmem>>, vector<288x128xf32>,
    %c1_38 = arith.constant 1 : index
    %c1_39 = arith.constant 1 : index
    %c0_40 = arith.constant 0 : index
    %c0_41 = arith.constant 0 : index
    %38 = vector.load %arg11[%c1_38, %c1_39, %c0_40, %c0_41] : memref<9x9x8x128xf32, #tpu.memory_space<vmem>>, vector<6x6x8x128xf32>
    %39 = vector.shape_cast %38 : vector<6x6x8x128xf32> to vector<288x128xf32>
    %c0_42 = arith.constant 0 : index
    %c640 = arith.constant 640 : index
    %40 = vector.load %arg12[%c0_42, %c640] : memref<288x2048xf32, #tpu.memory_space<vmem>>, vector<288x128xf32>
    tpu.vector_store %arg12[%c0_42, %c640], %39 {strides = array<i32>} : memref<288x2048xf32, #tpu.memory_space<vmem>>, vector<288x128xf32>,
    %c1_43 = arith.constant 1 : index
    %c2_44 = arith.constant 2 : index
    %c0_45 = arith.constant 0 : index
    %c0_46 = arith.constant 0 : index
    %41 = vector.load %arg11[%c1_43, %c2_44, %c0_45, %c0_46] : memref<9x9x8x128xf32, #tpu.memory_space<vmem>>, vector<6x6x8x128xf32>
    %42 = vector.shape_cast %41 : vector<6x6x8x128xf32> to vector<288x128xf32>
    %c0_47 = arith.constant 0 : index
    %c768 = arith.constant 768 : index
    %43 = vector.load %arg12[%c0_47, %c768] : memref<288x2048xf32, #tpu.memory_space<vmem>>, vector<288x128xf32>
    tpu.vector_store %arg12[%c0_47, %c768], %42 {strides = array<i32>} : memref<288x2048xf32, #tpu.memory_space<vmem>>, vector<288x128xf32>,
    %c1_48 = arith.constant 1 : index
    %c3_49 = arith.constant 3 : index
    %c0_50 = arith.constant 0 : index
    %c0_51 = arith.constant 0 : index
    %44 = vector.load %arg11[%c1_48, %c3_49, %c0_50, %c0_51] : memref<9x9x8x128xf32, #tpu.memory_space<vmem>>, vector<6x6x8x128xf32>
    %45 = vector.shape_cast %44 : vector<6x6x8x128xf32> to vector<288x128xf32>
    %c0_52 = arith.constant 0 : index
    %c896 = arith.constant 896 : index
    %46 = vector.load %arg12[%c0_52, %c896] : memref<288x2048xf32, #tpu.memory_space<vmem>>, vector<288x128xf32>
    tpu.vector_store %arg12[%c0_52, %c896], %45 {strides = array<i32>} : memref<288x2048xf32, #tpu.memory_space<vmem>>, vector<288x128xf32>,
    %c2_53 = arith.constant 2 : index
    %c0_54 = arith.constant 0 : index
    %c0_55 = arith.constant 0 : index
    %c0_56 = arith.constant 0 : index
    %47 = vector.load %arg11[%c2_53, %c0_54, %c0_55, %c0_56] : memref<9x9x8x128xf32, #tpu.memory_space<vmem>>, vector<6x6x8x128xf32>
    %48 = vector.shape_cast %47 : vector<6x6x8x128xf32> to vector<288x128xf32>
    %c0_57 = arith.constant 0 : index
    %c1024 = arith.constant 1024 : index
    %49 = vector.load %arg12[%c0_57, %c1024] : memref<288x2048xf32, #tpu.memory_space<vmem>>, vector<288x128xf32>
    tpu.vector_store %arg12[%c0_57, %c1024], %48 {strides = array<i32>} : memref<288x2048xf32, #tpu.memory_space<vmem>>, vector<288x128xf32>,
    %c2_58 = arith.constant 2 : index
    %c1_59 = arith.constant 1 : index
    %c0_60 = arith.constant 0 : index
    %c0_61 = arith.constant 0 : index
    %50 = vector.load %arg11[%c2_58, %c1_59, %c0_60, %c0_61] : memref<9x9x8x128xf32, #tpu.memory_space<vmem>>, vector<6x6x8x128xf32>
    %51 = vector.shape_cast %50 : vector<6x6x8x128xf32> to vector<288x128xf32>
    %c0_62 = arith.constant 0 : index
    %c1152 = arith.constant 1152 : index
    %52 = vector.load %arg12[%c0_62, %c1152] : memref<288x2048xf32, #tpu.memory_space<vmem>>, vector<288x128xf32>
    tpu.vector_store %arg12[%c0_62, %c1152], %51 {strides = array<i32>} : memref<288x2048xf32, #tpu.memory_space<vmem>>, vector<288x128xf32>,
    %c2_63 = arith.constant 2 : index
    %c2_64 = arith.constant 2 : index
    %c0_65 = arith.constant 0 : index
    %c0_66 = arith.constant 0 : index
    %53 = vector.load %arg11[%c2_63, %c2_64, %c0_65, %c0_66] : memref<9x9x8x128xf32, #tpu.memory_space<vmem>>, vector<6x6x8x128xf32>
    %54 = vector.shape_cast %53 : vector<6x6x8x128xf32> to vector<288x128xf32>
    %c0_67 = arith.constant 0 : index
    %c1280 = arith.constant 1280 : index
    %55 = vector.load %arg12[%c0_67, %c1280] : memref<288x2048xf32, #tpu.memory_space<vmem>>, vector<288x128xf32>
    tpu.vector_store %arg12[%c0_67, %c1280], %54 {strides = array<i32>} : memref<288x2048xf32, #tpu.memory_space<vmem>>, vector<288x128xf32>,
    %c2_68 = arith.constant 2 : index
    %c3_69 = arith.constant 3 : index
    %c0_70 = arith.constant 0 : index
    %c0_71 = arith.constant 0 : index
    %56 = vector.load %arg11[%c2_68, %c3_69, %c0_70, %c0_71] : memref<9x9x8x128xf32, #tpu.memory_space<vmem>>, vector<6x6x8x128xf32>
    %57 = vector.shape_cast %56 : vector<6x6x8x128xf32> to vector<288x128xf32>
    %c0_72 = arith.constant 0 : index
    %c1408 = arith.constant 1408 : index
    %58 = vector.load %arg12[%c0_72, %c1408] : memref<288x2048xf32, #tpu.memory_space<vmem>>, vector<288x128xf32>
    tpu.vector_store %arg12[%c0_72, %c1408], %57 {strides = array<i32>} : memref<288x2048xf32, #tpu.memory_space<vmem>>, vector<288x128xf32>,
    %c3_73 = arith.constant 3 : index
    %c0_74 = arith.constant 0 : index
    %c0_75 = arith.constant 0 : index
    %c0_76 = arith.constant 0 : index
    %59 = vector.load %arg11[%c3_73, %c0_74, %c0_75, %c0_76] : memref<9x9x8x128xf32, #tpu.memory_space<vmem>>, vector<6x6x8x128xf32>
    %60 = vector.shape_cast %59 : vector<6x6x8x128xf32> to vector<288x128xf32>
    %c0_77 = arith.constant 0 : index
    %c1536 = arith.constant 1536 : index
    %61 = vector.load %arg12[%c0_77, %c1536] : memref<288x2048xf32, #tpu.memory_space<vmem>>, vector<288x128xf32>
    tpu.vector_store %arg12[%c0_77, %c1536], %60 {strides = array<i32>} : memref<288x2048xf32, #tpu.memory_space<vmem>>, vector<288x128xf32>,
    %c3_78 = arith.constant 3 : index
    %c1_79 = arith.constant 1 : index
    %c0_80 = arith.constant 0 : index
    %c0_81 = arith.constant 0 : index
    %62 = vector.load %arg11[%c3_78, %c1_79, %c0_80, %c0_81] : memref<9x9x8x128xf32, #tpu.memory_space<vmem>>, vector<6x6x8x128xf32>
    %63 = vector.shape_cast %62 : vector<6x6x8x128xf32> to vector<288x128xf32>
    %c0_82 = arith.constant 0 : index
    %c1664 = arith.constant 1664 : index
    %64 = vector.load %arg12[%c0_82, %c1664] : memref<288x2048xf32, #tpu.memory_space<vmem>>, vector<288x128xf32>
    tpu.vector_store %arg12[%c0_82, %c1664], %63 {strides = array<i32>} : memref<288x2048xf32, #tpu.memory_space<vmem>>, vector<288x128xf32>,
    %c3_83 = arith.constant 3 : index
    %c2_84 = arith.constant 2 : index
    %c0_85 = arith.constant 0 : index
    %c0_86 = arith.constant 0 : index
    %65 = vector.load %arg11[%c3_83, %c2_84, %c0_85, %c0_86] : memref<9x9x8x128xf32, #tpu.memory_space<vmem>>, vector<6x6x8x128xf32>
    %66 = vector.shape_cast %65 : vector<6x6x8x128xf32> to vector<288x128xf32>
    %c0_87 = arith.constant 0 : index
    %c1792 = arith.constant 1792 : index
    %67 = vector.load %arg12[%c0_87, %c1792] : memref<288x2048xf32, #tpu.memory_space<vmem>>, vector<288x128xf32>
    tpu.vector_store %arg12[%c0_87, %c1792], %66 {strides = array<i32>} : memref<288x2048xf32, #tpu.memory_space<vmem>>, vector<288x128xf32>,
    %c3_88 = arith.constant 3 : index
    %c3_89 = arith.constant 3 : index
    %c0_90 = arith.constant 0 : index
    %c0_91 = arith.constant 0 : index
    %68 = vector.load %arg11[%c3_88, %c3_89, %c0_90, %c0_91] : memref<9x9x8x128xf32, #tpu.memory_space<vmem>>, vector<6x6x8x128xf32>
    %69 = vector.shape_cast %68 : vector<6x6x8x128xf32> to vector<288x128xf32>
    %c0_92 = arith.constant 0 : index
    %c1920 = arith.constant 1920 : index
    %70 = vector.load %arg12[%c0_92, %c1920] : memref<288x2048xf32, #tpu.memory_space<vmem>>, vector<288x128xf32>
    tpu.vector_store %arg12[%c0_92, %c1920], %69 {strides = array<i32>} : memref<288x2048xf32, #tpu.memory_space<vmem>>, vector<288x128xf32>,
    %c0_93 = arith.constant 0 : index
    %c0_94 = arith.constant 0 : index
    %71 = vector.load %arg12[%c0_93, %c0_94] : memref<288x2048xf32, #tpu.memory_space<vmem>>, vector<288x2048xf32>
    %c0_95 = arith.constant 0 : index
    %c0_96 = arith.constant 0 : index
    %72 = vector.load %arg4[%c0_95, %c0_96] : memref<2048x128xf32, #tpu.memory_space<vmem>>, vector<2048x128xf32>
    %cst_97 = arith.constant dense<0.000000e+00> : vector<288x128xf32>
    %73 = tpu.matmul %71, %72, %cst_97 {dimension_numbers = #tpu.dot_dimension_numbers<[1], [0], [0], [1], [0, 0, 1, 1], [], []>} : vector<288x2048xf32>, vector<2048x128xf32>, vector<288x128xf32> -> vector<288x128xf32>
    %c0_98 = arith.constant 0 : index
    %c0_99 = arith.constant 0 : index
    %74 = vector.load %arg5[%c0_98, %c0_99] : memref<1x128xf32, #tpu.memory_space<vmem>>, vector<1x128xf32>
    %75 = vector.broadcast %74 : vector<1x128xf32> to vector<288x128xf32>
    %76 = arith.addf %73, %75 : vector<288x128xf32>
    %cst_100 = arith.constant 0.000000e+00 : f32
    %77 = vector.broadcast %cst_100 : f32 to vector<288x128xf32>
    %78 = arith.maximumf %76, %77 : vector<288x128xf32>
    %79 = vector.shape_cast %78 : vector<288x128xf32> to vector<6x3x2x8x128xf32>
    %80 = vector.extract_strided_slice %79 {offsets = [0, 0, 0, 0, 0], sizes = [6, 3, 1, 8, 128], strides = [1, 1, 1, 1, 1]} : vector<6x3x2x8x128xf32> to vector<6x3x1x8x128xf32>
    %81 = vector.shape_cast %80 : vector<6x3x1x8x128xf32> to vector<6x3x8x128xf32>
    %82 = vector.extract_strided_slice %79 {offsets = [0, 0, 1, 0, 0], sizes = [6, 3, 1, 8, 128], strides = [1, 1, 1, 1, 1]} : vector<6x3x2x8x128xf32> to vector<6x3x1x8x128xf32>
    %83 = vector.shape_cast %82 : vector<6x3x1x8x128xf32> to vector<6x3x8x128xf32>
    %84 = arith.maximumf %81, %83 : vector<6x3x8x128xf32>
    %85 = vector.shape_cast %84 : vector<6x3x8x128xf32> to vector<3x2x3x8x128xf32>
    %86 = vector.extract_strided_slice %85 {offsets = [0, 0, 0, 0, 0], sizes = [3, 1, 3, 8, 128], strides = [1, 1, 1, 1, 1]} : vector<3x2x3x8x128xf32> to vector<3x1x3x8x128xf32>
    %87 = vector.shape_cast %86 : vector<3x1x3x8x128xf32> to vector<3x3x8x128xf32>
    %88 = vector.extract_strided_slice %85 {offsets = [0, 1, 0, 0, 0], sizes = [3, 1, 3, 8, 128], strides = [1, 1, 1, 1, 1]} : vector<3x2x3x8x128xf32> to vector<3x1x3x8x128xf32>
    %89 = vector.shape_cast %88 : vector<3x1x3x8x128xf32> to vector<3x3x8x128xf32>
    %90 = arith.maximumf %87, %89 : vector<3x3x8x128xf32>
    %91 = vector.extract_strided_slice %90 {offsets = [0, 0, 0, 0], sizes = [1, 1, 8, 128], strides = [1, 1, 1, 1]} : vector<3x3x8x128xf32> to vector<1x1x8x128xf32>
    %92 = vector.shape_cast %91 : vector<1x1x8x128xf32> to vector<8x128xf32>
    %c0_101 = arith.constant 0 : index
    %c0_102 = arith.constant 0 : index
    %93 = vector.load %arg13[%c0_101, %c0_102] : memref<8x1152xf32, #tpu.memory_space<vmem>>, vector<8x128xf32>
    tpu.vector_store %arg13[%c0_101, %c0_102], %92 {strides = array<i32>} : memref<8x1152xf32, #tpu.memory_space<vmem>>, vector<8x128xf32>,
    %94 = vector.extract_strided_slice %90 {offsets = [0, 1, 0, 0], sizes = [1, 1, 8, 128], strides = [1, 1, 1, 1]} : vector<3x3x8x128xf32> to vector<1x1x8x128xf32>
    %95 = vector.shape_cast %94 : vector<1x1x8x128xf32> to vector<8x128xf32>
    %c0_103 = arith.constant 0 : index
    %c128_104 = arith.constant 128 : index
    %96 = vector.load %arg13[%c0_103, %c128_104] : memref<8x1152xf32, #tpu.memory_space<vmem>>, vector<8x128xf32>
    tpu.vector_store %arg13[%c0_103, %c128_104], %95 {strides = array<i32>} : memref<8x1152xf32, #tpu.memory_space<vmem>>, vector<8x128xf32>,
    %97 = vector.extract_strided_slice %90 {offsets = [0, 2, 0, 0], sizes = [1, 1, 8, 128], strides = [1, 1, 1, 1]} : vector<3x3x8x128xf32> to vector<1x1x8x128xf32>
    %98 = vector.shape_cast %97 : vector<1x1x8x128xf32> to vector<8x128xf32>
    %c0_105 = arith.constant 0 : index
    %c256_106 = arith.constant 256 : index
    %99 = vector.load %arg13[%c0_105, %c256_106] : memref<8x1152xf32, #tpu.memory_space<vmem>>, vector<8x128xf32>
    tpu.vector_store %arg13[%c0_105, %c256_106], %98 {strides = array<i32>} : memref<8x1152xf32, #tpu.memory_space<vmem>>, vector<8x128xf32>,
    %100 = vector.extract_strided_slice %90 {offsets = [1, 0, 0, 0], sizes = [1, 1, 8, 128], strides = [1, 1, 1, 1]} : vector<3x3x8x128xf32> to vector<1x1x8x128xf32>
    %101 = vector.shape_cast %100 : vector<1x1x8x128xf32> to vector<8x128xf32>
    %c0_107 = arith.constant 0 : index
    %c384_108 = arith.constant 384 : index
    %102 = vector.load %arg13[%c0_107, %c384_108] : memref<8x1152xf32, #tpu.memory_space<vmem>>, vector<8x128xf32>
    tpu.vector_store %arg13[%c0_107, %c384_108], %101 {strides = array<i32>} : memref<8x1152xf32, #tpu.memory_space<vmem>>, vector<8x128xf32>,
    %103 = vector.extract_strided_slice %90 {offsets = [1, 1, 0, 0], sizes = [1, 1, 8, 128], strides = [1, 1, 1, 1]} : vector<3x3x8x128xf32> to vector<1x1x8x128xf32>
    %104 = vector.shape_cast %103 : vector<1x1x8x128xf32> to vector<8x128xf32>
    %c0_109 = arith.constant 0 : index
    %c512_110 = arith.constant 512 : index
    %105 = vector.load %arg13[%c0_109, %c512_110] : memref<8x1152xf32, #tpu.memory_space<vmem>>, vector<8x128xf32>
    tpu.vector_store %arg13[%c0_109, %c512_110], %104 {strides = array<i32>} : memref<8x1152xf32, #tpu.memory_space<vmem>>, vector<8x128xf32>,
    %106 = vector.extract_strided_slice %90 {offsets = [1, 2, 0, 0], sizes = [1, 1, 8, 128], strides = [1, 1, 1, 1]} : vector<3x3x8x128xf32> to vector<1x1x8x128xf32>
    %107 = vector.shape_cast %106 : vector<1x1x8x128xf32> to vector<8x128xf32>
    %c0_111 = arith.constant 0 : index
    %c640_112 = arith.constant 640 : index
    %108 = vector.load %arg13[%c0_111, %c640_112] : memref<8x1152xf32, #tpu.memory_space<vmem>>, vector<8x128xf32>
    tpu.vector_store %arg13[%c0_111, %c640_112], %107 {strides = array<i32>} : memref<8x1152xf32, #tpu.memory_space<vmem>>, vector<8x128xf32>,
    %109 = vector.extract_strided_slice %90 {offsets = [2, 0, 0, 0], sizes = [1, 1, 8, 128], strides = [1, 1, 1, 1]} : vector<3x3x8x128xf32> to vector<1x1x8x128xf32>
    %110 = vector.shape_cast %109 : vector<1x1x8x128xf32> to vector<8x128xf32>
    %c0_113 = arith.constant 0 : index
    %c768_114 = arith.constant 768 : index
    %111 = vector.load %arg13[%c0_113, %c768_114] : memref<8x1152xf32, #tpu.memory_space<vmem>>, vector<8x128xf32>
    tpu.vector_store %arg13[%c0_113, %c768_114], %110 {strides = array<i32>} : memref<8x1152xf32, #tpu.memory_space<vmem>>, vector<8x128xf32>,
    %112 = vector.extract_strided_slice %90 {offsets = [2, 1, 0, 0], sizes = [1, 1, 8, 128], strides = [1, 1, 1, 1]} : vector<3x3x8x128xf32> to vector<1x1x8x128xf32>
    %113 = vector.shape_cast %112 : vector<1x1x8x128xf32> to vector<8x128xf32>
    %c0_115 = arith.constant 0 : index
    %c896_116 = arith.constant 896 : index
    %114 = vector.load %arg13[%c0_115, %c896_116] : memref<8x1152xf32, #tpu.memory_space<vmem>>, vector<8x128xf32>
    tpu.vector_store %arg13[%c0_115, %c896_116], %113 {strides = array<i32>} : memref<8x1152xf32, #tpu.memory_space<vmem>>, vector<8x128xf32>,
    %115 = vector.extract_strided_slice %90 {offsets = [2, 2, 0, 0], sizes = [1, 1, 8, 128], strides = [1, 1, 1, 1]} : vector<3x3x8x128xf32> to vector<1x1x8x128xf32>
    %116 = vector.shape_cast %115 : vector<1x1x8x128xf32> to vector<8x128xf32>
    %c0_117 = arith.constant 0 : index
    %c1024_118 = arith.constant 1024 : index
    %117 = vector.load %arg13[%c0_117, %c1024_118] : memref<8x1152xf32, #tpu.memory_space<vmem>>, vector<8x128xf32>
    tpu.vector_store %arg13[%c0_117, %c1024_118], %116 {strides = array<i32>} : memref<8x1152xf32, #tpu.memory_space<vmem>>, vector<8x128xf32>,
    %c0_119 = arith.constant 0 : index
    %c0_120 = arith.constant 0 : index
    %118 = vector.load %arg13[%c0_119, %c0_120] : memref<8x1152xf32, #tpu.memory_space<vmem>>, vector<8x1152xf32>
    %c0_121 = arith.constant 0 : index
    %c0_122 = arith.constant 0 : index
    %119 = vector.load %arg6[%c0_121, %c0_122] : memref<1152x256xf32, #tpu.memory_space<vmem>>, vector<1152x256xf32>
    %cst_123 = arith.constant dense<0.000000e+00> : vector<8x256xf32>
    %120 = tpu.matmul %118, %119, %cst_123 {dimension_numbers = #tpu.dot_dimension_numbers<[1], [0], [0], [1], [0, 0, 1, 1], [], []>} : vector<8x1152xf32>, vector<1152x256xf32>, vector<8x256xf32> -> vector<8x256xf32>
    %c0_124 = arith.constant 0 : index
    %c0_125 = arith.constant 0 : index
    %121 = vector.load %arg7[%c0_124, %c0_125] : memref<1x256xf32, #tpu.memory_space<vmem>>, vector<1x256xf32>
    %122 = vector.broadcast %121 : vector<1x256xf32> to vector<8x256xf32>
    %123 = arith.addf %120, %122 : vector<8x256xf32>
    %c0_126 = arith.constant 0 : index
    %c0_127 = arith.constant 0 : index
    %124 = vector.load %arg8[%c0_126, %c0_127] : memref<256x128xf32, #tpu.memory_space<vmem>>, vector<256x128xf32>
    %cst_128 = arith.constant dense<0.000000e+00> : vector<8x128xf32>
    %125 = tpu.matmul %123, %124, %cst_128 {dimension_numbers = #tpu.dot_dimension_numbers<[1], [0], [0], [1], [0, 0, 1, 1], [], []>} : vector<8x256xf32>, vector<256x128xf32>, vector<8x128xf32> -> vector<8x128xf32>
    %c0_129 = arith.constant 0 : index
    %c0_130 = arith.constant 0 : index
    %126 = vector.load %arg9[%c0_129, %c0_130] : memref<1x128xf32, #tpu.memory_space<vmem>>, vector<1x128xf32>
    %127 = vector.broadcast %126 : vector<1x128xf32> to vector<8x128xf32>
    %128 = arith.addf %125, %127 : vector<8x128xf32>
    %cst_131 = arith.constant dense<0xFF800000> : vector<8xf32>
    %129 = vector.multi_reduction <maximumf>, %128, %cst_131 [1] : vector<8x128xf32> to vector<8xf32>
    %130 = vector.shape_cast %129 : vector<8xf32> to vector<8x1xf32>
    %131 = vector.broadcast %130 : vector<8x1xf32> to vector<8x128xf32>
    %132 = arith.subf %128, %131 : vector<8x128xf32>
    %133 = math.exp %132 : vector<8x128xf32>
    %cst_132 = arith.constant dense<0.000000e+00> : vector<8xf32>
    %134 = vector.multi_reduction <add>, %133, %cst_132 [1] : vector<8x128xf32> to vector<8xf32>
    %135 = vector.shape_cast %134 : vector<8xf32> to vector<8x1xf32>
    %136 = tpu.reciprocal %135 {approx = true} : vector<8x1xf32> -> vector<8x1xf32>
    %137 = arith.mulf %135, %136 : vector<8x1xf32>
    %cst_133 = arith.constant 2.000000e+00 : f32
    %138 = vector.broadcast %cst_133 : f32 to vector<8x1xf32>
    %139 = arith.subf %138, %137 : vector<8x1xf32>
    %140 = arith.mulf %136, %139 : vector<8x1xf32>
    %141 = vector.broadcast %140 : vector<8x1xf32> to vector<8x128xf32>
    %142 = arith.mulf %133, %141 : vector<8x128xf32>
    %c0_134 = arith.constant 0 : index
    %c0_135 = arith.constant 0 : index
    %143 = vector.load %arg10[%c0_134, %c0_135] : memref<8x128xf32, #tpu.memory_space<vmem>>, vector<8x128xf32>
    tpu.vector_store %arg10[%c0_134, %c0_135], %142 {strides = array<i32>} : memref<8x128xf32, #tpu.memory_space<vmem>>, vector<8x128xf32>,
    return
  }
  func.func @transform_0(%arg0: i32) -> (i32, i32) {
    %c0_i32 = arith.constant 0 : i32
    %c0_i32_0 = arith.constant 0 : i32
    %c0_i32_1 = arith.constant 0 : i32
    return %c0_i32, %c0_i32_0 : i32, i32
  }
  func.func @transform_1(%arg0: i32) -> (i32, i32) {
    %c0_i32 = arith.constant 0 : i32
    %c0_i32_0 = arith.constant 0 : i32
    %c0_i32_1 = arith.constant 0 : i32
    return %c0_i32, %c0_i32_0 : i32, i32
  }
  func.func @transform_2(%arg0: i32) -> (i32, i32) {
    %c0_i32 = arith.constant 0 : i32
    %c0_i32_0 = arith.constant 0 : i32
    %c0_i32_1 = arith.constant 0 : i32
    return %c0_i32, %c0_i32_0 : i32, i32
  }
  func.func @transform_3(%arg0: i32) -> (i32, i32) {
    %c0_i32 = arith.constant 0 : i32
    %c0_i32_0 = arith.constant 0 : i32
    %c0_i32_1 = arith.constant 0 : i32
    return %c0_i32, %c0_i32_0 : i32, i32
  }
  func.func @transform_4(%arg0: i32) -> (i32, i32) {
    %c0_i32 = arith.constant 0 : i32
    %c0_i32_0 = arith.constant 0 : i32
    %c0_i32_1 = arith.constant 0 : i32
    return %c0_i32, %c0_i32_0 : i32, i32
  }
  func.func @transform_5(%arg0: i32) -> (i32, i32) {
    %c0_i32 = arith.constant 0 : i32
    %c0_i32_0 = arith.constant 0 : i32
    %c0_i32_1 = arith.constant 0 : i32
    return %c0_i32, %c0_i32_0 : i32, i32
  }
  func.func @transform_6(%arg0: i32) -> (i32, i32) {
    %c0_i32 = arith.constant 0 : i32
    %c0_i32_0 = arith.constant 0 : i32
    %c0_i32_1 = arith.constant 0 : i32
    return %c0_i32, %c0_i32_0 : i32, i32
  }
  func.func @transform_7(%arg0: i32) -> (i32, i32) {
    %c0_i32 = arith.constant 0 : i32
    %c0_i32_0 = arith.constant 0 : i32
    %c0_i32_1 = arith.constant 0 : i32
    return %c0_i32, %c0_i32_0 : i32, i32
  }
  func.func @transform_8(%arg0: i32) -> (i32, i32) {
    %c0_i32 = arith.constant 0 : i32
    %c0_i32_0 = arith.constant 0 : i32
    %c0_i32_1 = arith.constant 0 : i32
    return %c0_i32, %c0_i32_0 : i32, i32
  }
  func.func @transform_9(%arg0: i32) -> (i32, i32) {
    %c0_i32 = arith.constant 0 : i32
    %c0_i32_0 = arith.constant 0 : i32
    %c0_i32_1 = arith.constant 0 : i32
    return %c0_i32, %c0_i32_0 : i32, i32
  }
}

</mosaic_0001>

<bundles_post_ra>
// kernel: cnn14x14_forward.1
= control target key start
LH: loop header
LB: loop body
LE: loop exit
PB: predicated region body
PF: predicated region fallthrough
CT: control target
= control target key end

     0   :  { %vm826_vm0 = vcmask 1040384   ;;  %vm237_vm1 = vcmask 72704   ;;  %vm9138_vm2 = vmmov 1   ;;  %v13274_v29 = vmov 0.0|0.0   ;;  %s13264_s1 = inlined_call_operand.vmem [shape: f32[9,128], index: 1, kind: input, shape index: {}]   ;;  %s13265_s0 = inlined_call_operand.vmem [shape: f32[1568,9], index: 0, kind: input, shape index: {}]   ;;  %s13266_s3 = inlined_call_operand.vmem [shape: f32[2048,128], index: 3, kind: input, shape index: {}]   ;;  %s13267_s2 = inlined_call_operand.vmem [shape: f32[1,128], index: 2, kind: input, shape index: {}]   ;;  %s13268_s5 = inlined_call_operand.vmem [shape: f32[1152,256], index: 5, kind: input, shape index: {}]   ;;  %s13269_s4 = inlined_call_operand.vmem [shape: f32[1,128], index: 4, kind: input, shape index: {}]   ;;  %s13270_s7 = inlined_call_operand.vmem [shape: f32[256,128], index: 7, kind: input, shape index: {}]   ;;  %s13271_s6 = inlined_call_operand.vmem [shape: f32[1,256], index: 6, kind: input, shape index: {}]   ;;  %s13272_s8 = inlined_call_operand.vmem [shape: f32[1,128], index: 8, kind: input, shape index: {}]   ;;  %s13273_s9 = inlined_call_operand.vmem [shape: f32[8,128], index: 9, kind: output, shape index: {}]  }
   0x1   :  { %v228_v0 = vld [vmem:[%s13264_s1] sm:$0xff]  ;;  %v229_v1 = vld [vmem:[%s13264_s1 + $0x8] sm:$0x1]  ;;  %vm7908_vm3 = vmpackc.low %vm826_vm0, %vm9138_vm2  ;;  %7961 = vmatprep.subr.bf16.mxu1 %v13274_v29 }
   0x2   :  { %v7907_v2 = vpack.c.bf16 %v229_v1, %v228_v0  ;;  %v32_v3 = vld [vmem:[%s13265_s0] sm:$0xff]  ;;  %v33_v4 = vld [vmem:[%s13265_s0 + $0x8] sm:$0xff]  ;;  %v34_v5 = vld [vmem:[%s13265_s0 + $0x10] sm:$0xff] }
   0x3   :  { %7613 = vmatprep.mubr.msk.f32.mxu0 %vm237_vm1, %v32_v3  ;;  %v35_v6 = vld [vmem:[%s13265_s0 + $0x18] sm:$0xff]  ;;  %v36_v7 = vld [vmem:[%s13265_s0 + $0x20] sm:$0xff]  ;;  %v37_v8 = vld [vmem:[%s13265_s0 + $0x28] sm:$0xff] }
   0x4   :  { %7909 = vmatprep.subr.msk.bf16.mxu0 %vm7908_vm3, %v7907_v2  ;;  %v38_v9 = vld [vmem:[%s13265_s0 + $0x30] sm:$0xff]  ;;  %v39_v10 = vld [vmem:[%s13265_s0 + $0x38] sm:$0xff]  ;;  %v40_v11 = vld [vmem:[%s13265_s0 + $0x40] sm:$0xff] }
   0x5   :  { %7912 = vmatpush3.bf16.msk.msra.mxu0 %vm7908_vm3, %v7907_v2  ;;  %v41_v12 = vld [vmem:[%s13265_s0 + $0x48] sm:$0xff]  ;;  %v42_v13 = vld [vmem:[%s13265_s0 + $0x50] sm:$0xff]  ;;  %v43_v14 = vld [vmem:[%s13265_s0 + $0x58] sm:$0xff] }
   0x6   :  { %v44_v15 = vld [vmem:[%s13265_s0 + $0x60] sm:$0xff]  ;;  %v45_v16 = vld [vmem:[%s13265_s0 + $0x68] sm:$0xff]  ;;  %v46_v17 = vld [vmem:[%s13265_s0 + $0x70] sm:$0xff]  ;;  %7913 = vmatprep.subr.bf16.mxu0 %v13274_v29 }
   0x7   :  { %v47_v18 = vld [vmem:[%s13265_s0 + $0x78] sm:$0xff]  ;;  %v48_v19 = vld [vmem:[%s13265_s0 + $0x80] sm:$0xff]  ;;  %v49_v20 = vld [vmem:[%s13265_s0 + $0x88] sm:$0xff] }
   0x8   :  { %7614 = vmatmul.mubr.msk.f32.vlgmr.msra.gmra.mrb[0].mxu0 %vm237_vm1, %v33_v4  ;;  %v50_v21 = vld [vmem:[%s13265_s0 + $0x90] sm:$0xff]  ;;  %v51_v22 = vld [vmem:[%s13265_s0 + $0x98] sm:$0xff]  ;;  %v52_v23 = vld [vmem:[%s13265_s0 + $0xa0] sm:$0xff] }
   0x9   :  { %7616 = vmatprep.mubr.msk.f32.mxu0 %vm237_vm1, %v34_v5  ;;  %v53_v24 = vld [vmem:[%s13265_s0 + $0xa8] sm:$0xff]  ;;  %v54_v25 = vld [vmem:[%s13265_s0 + $0xb0] sm:$0xff]  ;;  %v4123_v26 = vld [vmem:[%s13266_s3 + $0x100] sm:$0xff] }
   0xa   :  { %v4124_v27 = vld [vmem:[%s13266_s3 + $0x108] sm:$0xff]  ;;  %v55_v28 = vld [vmem:[%s13265_s0 + $0xb8] sm:$0xff]  ;;  %v56_v31 = vld [vmem:[%s13265_s0 + $0xc0] sm:$0xff] }
   0xb   :  { %v7962_v30 = vpack.c.bf16 %v4124_v27, %v4123_v26  ;;  %v4125_v32 = vld [vmem:[%s13266_s3 + $0x110] sm:$0xff]  ;;  %v4126_v33 = vld [vmem:[%s13266_s3 + $0x118] sm:$0xff]  ;;  %v57_v34 = vld [vmem:[%s13265_s0 + $0xc8] sm:$0xff] }
   0xc   :  { %7617 = vmatmul.mubr.msk.f32.gmra.mrb[2].mxu0 %vm237_vm1, %v35_v6  ;;  %v7965_v35 = vpack.c.bf16 %v4126_v33, %v4125_v32  ;;  %v58_v36 = vld [vmem:[%s13265_s0 + $0xd0] sm:$0xff]  ;;  %v4127_v37 = vld [vmem:[%s13266_s3 + $0x120] sm:$0xff]  ;;  %v4128_v38 = vld [vmem:[%s13266_s3 + $0x128] sm:$0xff] }
   0xd   :  { %7619 = vmatprep.mubr.msk.f32.mxu0 %vm237_vm1, %v36_v7  ;;  %7963 = vmatpush1.bf16.msra.mxu1 %v7962_v30  ;;  %v59_v39 = vld [vmem:[%s13265_s0 + $0xd8] sm:$0xff]  ;;  %v7968_v40 = vpack.c.bf16 %v4128_v38, %v4127_v37  ;;  %v60_v41 = vld [vmem:[%s13265_s0 + $0xe0] sm:$0xff]  ;;  %v4129_v42 = vld [vmem:[%s13266_s3 + $0x130] sm:$0xff] }
   0xe   :  { %7964 = vmatprep.subr.bf16.mxu1 %v13274_v29  ;;  %v4130_v43 = vld [vmem:[%s13266_s3 + $0x138] sm:$0xff]  ;;  %v61_v44 = vld [vmem:[%s13265_s0 + $0xe8] sm:$0xff]  ;;  %v62_v46 = vld [vmem:[%s13265_s0 + $0xf0] sm:$0xff] }
   0xf   :  { %v7971_v45 = vpack.c.bf16 %v4130_v43, %v4129_v42  ;;  %v4131_v47 = vld [vmem:[%s13266_s3 + $0x140] sm:$0xff]  ;;  %v4132_v48 = vld [vmem:[%s13266_s3 + $0x148] sm:$0xff]  ;;  %v63_v49 = vld [vmem:[%s13265_s0 + $0xf8] sm:$0xff] }
  0x10   :  { %7620 = vmatmul.mubr.msk.f32.gmra.mrb[4].mxu0 %vm237_vm1, %v37_v8  ;;  %v7974_v50 = vpack.c.bf16 %v4132_v48, %v4131_v47  ;;  %v64_v51 = vld [vmem:[%s13265_s0 + $0x100] sm:$0xff]  ;;  %v4133_v52 = vld [vmem:[%s13266_s3 + $0x150] sm:$0xff]  ;;  %v4134_v53 = vld [vmem:[%s13266_s3 + $0x158] sm:$0xff] }
  0x11   :  { %7622 = vmatprep.mubr.msk.f32.mxu0 %vm237_vm1, %v38_v9  ;;  %7966 = vmatpush1.bf16.msra.mxu1 %v7965_v35  ;;  %v65_v54 = vld [vmem:[%s13265_s0 + $0x108] sm:$0xff]  ;;  %v7977_v55 = vpack.c.bf16 %v4134_v53, %v4133_v52  ;;  %v66_v56 = vld [vmem:[%s13265_s0 + $0x110] sm:$0xff]  ;;  %v4135_v57 = vld [vmem:[%s13266_s3 + $0x160] sm:$0xff] }
  0x12   :  { %7967 = vmatprep.subr.bf16.mxu1 %v13274_v29  ;;  %v4136_v58 = vld [vmem:[%s13266_s3 + $0x168] sm:$0xff]  ;;  %v67_v59 = vld [vmem:[%s13265_s0 + $0x118] sm:$0xff]  ;;  %v68_v61 = vld [vmem:[%s13265_s0 + $0x120] sm:$0xff] }
  0x13   :  { %v7980_v60 = vpack.c.bf16 %v4136_v58, %v4135_v57  ;;  %v4137_v62 = vld [vmem:[%s13266_s3 + $0x170] sm:$0xff]  ;;  %v4138_v63 = vld [vmem:[%s13266_s3 + $0x178] sm:$0xff]  ;;  %v69_v0 = vld [vmem:[%s13265_s0 + $0x128] sm:$0xff] }
  0x14   :  { %7623 = vmatmul.mubr.msk.f32.gmra.mrb[6].mxu0 %vm237_vm1, %v39_v10  ;;  %v7983_v1 = vpack.c.bf16 %v4138_v63, %v4137_v62  ;;  %v70_v2 = vld [vmem:[%s13265_s0 + $0x130] sm:$0xff]  ;;  %v4139_v3 = vld [vmem:[%s13266_s3 + $0x180] sm:$0xff]  ;;  %v4140_v4 = vld [vmem:[%s13266_s3 + $0x188] sm:$0xff] }
  0x15   :  { %7625 = vmatprep.mubr.msk.f32.mxu0 %vm237_vm1, %v40_v11  ;;  %7969 = vmatpush1.bf16.msra.mxu1 %v7968_v40  ;;  %v71_v5 = vld [vmem:[%s13265_s0 + $0x138] sm:$0xff]  ;;  %v7986_v6 = vpack.c.bf16 %v4140_v4, %v4139_v3  ;;  %v72_v7 = vld [vmem:[%s13265_s0 + $0x140] sm:$0xff]  ;;  %v4141_v8 = vld [vmem:[%s13266_s3 + $0x190] sm:$0xff] }
  0x16   :  { %7970 = vmatprep.subr.bf16.mxu1 %v13274_v29  ;;  %v4142_v9 = vld [vmem:[%s13266_s3 + $0x198] sm:$0xff]  ;;  %v73_v10 = vld [vmem:[%s13265_s0 + $0x148] sm:$0xff]  ;;  %v80_v27 = vld [vmem:[%s13265_s0 + $0x180] sm:$0xff] }
  0x17   :  { %v7989_v11 = vpack.c.bf16 %v4142_v9, %v4141_v8  ;;  %v4150_v30 = vld [vmem:[%s13266_s3 + $0x1d8] sm:$0xff]  ;;  %v82_v33 = vld [vmem:[%s13265_s0 + $0x190] sm:$0xff]  ;;  %v4152_v35 = vld [vmem:[%s13266_s3 + $0x1e8] sm:$0xff] }
  0x18   :  { %7626 = vmatmul.mubr.msk.f32.gmra.mrb[8].mxu0 %vm237_vm1, %v41_v12  ;;  %v74_v12 = vld [vmem:[%s13265_s0 + $0x150] sm:$0xff]  ;;  %v84_v38 = vld [vmem:[%s13265_s0 + $0x1a0] sm:$0xff]  ;;  %v4154_v40 = vld [vmem:[%s13266_s3 + $0x1f8] sm:$0xff] }
  0x19   :  { %7628 = vmatprep.mubr.msk.f32.mxu0 %vm237_vm1, %v42_v13  ;;  %7972 = vmatpush1.bf16.msra.mxu1 %v7971_v45  ;;  %v4143_v13 = vld [vmem:[%s13266_s3 + $0x1a0] sm:$0xff]  ;;  %v86_v43 = vld [vmem:[%s13265_s0 + $0x1b0] sm:$0xff]  ;;  %v13276_v45 = vmov 0.0   ;;  %v89_v47 = vld [vmem:[%s13265_s0 + $0x1c8] sm:$0xff] }
  0x1a   :  { %7973 = vmatprep.subr.bf16.mxu1 %v13274_v29  ;;  %4663 = vmatprep.mubr.f32.mxu1 %v13276_v45  ;;  %v90_v48 = vld [vmem:[%s13265_s0 + $0x1d0] sm:$0xff]  ;;  %v95_v53 = vld [vmem:[%s13265_s0 + $0x1f8] sm:$0xff]  ;;  %v100_v58 = vld [vmem:[%s13265_s0 + $0x220] sm:$0xff] }
  0x1b   :  { %v94_v52 = vld [vmem:[%s13265_s0 + $0x1f0] sm:$0xff]  ;;  %v99_v57 = vld [vmem:[%s13265_s0 + $0x218] sm:$0xff]  ;;  %v104_v62 = vld [vmem:[%s13265_s0 + $0x240] sm:$0xff] }
  0x1c   :  { %7629 = vmatmul.mubr.msk.f32.gmra.mrb[10].mxu0 %vm237_vm1, %v43_v14  ;;  %v4144_v14 = vld [vmem:[%s13266_s3 + $0x1a8] sm:$0xff]  ;;  %v110_v4 = vld [vmem:[%s13265_s0 + $0x270] sm:$0xff]  ;;  %v115_v9 = vld [vmem:[%s13265_s0 + $0x298] sm:$0xff] }
  0x1d   :  { %7631 = vmatprep.mubr.msk.f32.mxu0 %vm237_vm1, %v44_v15  ;;  %7975 = vmatpush1.bf16.msra.mxu1 %v7974_v50  ;;  %v75_v15 = vld [vmem:[%s13265_s0 + $0x158] sm:$0xff]  ;;  %v92_v50 = vld [vmem:[%s13265_s0 + $0x1e0] sm:$0xff]  ;;  %v105_v63 = vld [vmem:[%s13265_s0 + $0x248] sm:$0xff] }
  0x1e   :  { %7976 = vmatprep.subr.bf16.mxu1 %v13274_v29  ;;  %v109_v3 = vld [vmem:[%s13265_s0 + $0x268] sm:$0xff]  ;;  %v114_v8 = vld [vmem:[%s13265_s0 + $0x290] sm:$0xff] }
  0x20   :  { %7632 = vmatmul.mubr.msk.f32.gmra.mrb[12].mxu0 %vm237_vm1, %v45_v16  ;;  %v7992_v16 = vpack.c.bf16 %v4144_v14, %v4143_v13  ;;  %v119_v13 = vld [vmem:[%s13265_s0 + $0x2b8] sm:$0xff]  ;;  %v120_v14 = vld [vmem:[%s13265_s0 + $0x2c0] sm:$0xff] }
  0x21   :  { %7634 = vmatprep.mubr.msk.f32.mxu0 %vm237_vm1, %v46_v17  ;;  %7978 = vmatpush1.bf16.msra.mxu1 %v7977_v55  ;;  %v76_v17 = vld [vmem:[%s13265_s0 + $0x160] sm:$0xff]  ;;  %v97_v55 = vld [vmem:[%s13265_s0 + $0x208] sm:$0xff] }
  0x22   :  { %7979 = vmatprep.subr.bf16.mxu1 %v13274_v29 }
  0x24   :  { %7635 = vmatmul.mubr.msk.f32.gmra.mrb[14].mxu0 %vm237_vm1, %v47_v18  ;;  %v4145_v18 = vld [vmem:[%s13266_s3 + $0x1b0] sm:$0xff] }
  0x25   :  { %7637 = vmatprep.mubr.msk.f32.mxu0 %vm237_vm1, %v48_v19  ;;  %7981 = vmatpush1.bf16.msra.mxu1 %v7980_v60  ;;  %v4146_v19 = vld [vmem:[%s13266_s3 + $0x1b8] sm:$0xff]  ;;  %v102_v60 = vld [vmem:[%s13265_s0 + $0x230] sm:$0xff] }
  0x26   :  { %7982 = vmatprep.subr.bf16.mxu1 %v13274_v29 }
  0x28   :  { %7638 = vmatmul.mubr.msk.f32.gmra.mrb[16].mxu0 %vm237_vm1, %v49_v20  ;;  %v77_v20 = vld [vmem:[%s13265_s0 + $0x168] sm:$0xff] }
  0x29   :  { %7640 = vmatprep.mubr.msk.f32.mxu0 %vm237_vm1, %v50_v21  ;;  %7984 = vmatpush1.bf16.msra.mxu1 %v7983_v1  ;;  %v7995_v21 = vpack.c.bf16 %v4146_v19, %v4145_v18  ;;  %v107_v1 = vld [vmem:[%s13265_s0 + $0x258] sm:$0xff]  ;;  %v124_v18 = vld [vmem:[%s13265_s0 + $0x2e0] sm:$0xff]  ;;  %v125_v19 = vld [vmem:[%s13265_s0 + $0x2e8] sm:$0xff] }
  0x2a   :  { %7985 = vmatprep.subr.bf16.mxu1 %v13274_v29 }
  0x2c   :  { %7641 = vmatmul.mubr.msk.f32.gmra.mrb[18].mxu0 %vm237_vm1, %v51_v22  ;;  %v78_v22 = vld [vmem:[%s13265_s0 + $0x170] sm:$0xff] }
  0x2d   :  { %7643 = vmatprep.mubr.msk.f32.mxu0 %vm237_vm1, %v52_v23  ;;  %7987 = vmatpush1.bf16.msra.mxu1 %v7986_v6  ;;  %v4147_v23 = vld [vmem:[%s13266_s3 + $0x1c0] sm:$0xff] }
  0x2e   :  { %7988 = vmatprep.subr.bf16.mxu1 %v13274_v29  ;;  %v112_v6 = vld [vmem:[%s13265_s0 + $0x280] sm:$0xff] }
  0x30   :  { %7644 = vmatmul.mubr.msk.f32.gmra.mrb[20].mxu0 %vm237_vm1, %v53_v24  ;;  %v4148_v24 = vld [vmem:[%s13266_s3 + $0x1c8] sm:$0xff] }
  0x31   :  { %7646 = vmatprep.mubr.msk.f32.mxu0 %vm237_vm1, %v54_v25  ;;  %7990 = vmatpush1.bf16.msra.mxu1 %v7989_v11  ;;  %v79_v25 = vld [vmem:[%s13265_s0 + $0x178] sm:$0xff]  ;;  %v7998_v26 = vpack.c.bf16 %v4148_v24, %v4147_v23  ;;  %v117_v11 = vld [vmem:[%s13265_s0 + $0x2a8] sm:$0xff]  ;;  %v130_v24 = vld [vmem:[%s13265_s0 + $0x310] sm:$0xff] }
  0x32   :  { %7991 = vmatprep.subr.bf16.mxu1 %v13274_v29  ;;  %v129_v23 = vld [vmem:[%s13265_s0 + $0x308] sm:$0xff] }
  0x34   :  { %7647 = vmatmul.mubr.msk.f32.gmra.mrb[22].mxu0 %vm237_vm1, %v55_v28  ;;  %v4149_v28 = vld [vmem:[%s13266_s3 + $0x1d0] sm:$0xff] }
  0x35   :  { %7649 = vmatprep.mubr.msk.f32.mxu0 %vm237_vm1, %v56_v31  ;;  %7993 = vmatpush1.bf16.msra.mxu1 %v7992_v16  ;;  %v81_v31 = vld [vmem:[%s13265_s0 + $0x188] sm:$0xff]  ;;  %v8001_v32 = vpack.c.bf16 %v4150_v30, %v4149_v28  ;;  %v122_v16 = vld [vmem:[%s13265_s0 + $0x2d0] sm:$0xff]  ;;  %v4091_v30 = vld [vmem:[%s13266_s3] sm:$0xff] }
  0x36   :  { %7994 = vmatprep.subr.bf16.mxu1 %v13274_v29  ;;  %v134_v28 = vld [vmem:[%s13265_s0 + $0x330] sm:$0xff] }
  0x38   :  { %7650 = vmatmul.mubr.msk.f32.gmra.mrb[24].mxu0 %vm237_vm1, %v57_v34  ;;  %v4151_v34 = vld [vmem:[%s13266_s3 + $0x1e0] sm:$0xff] }
  0x39   :  { %7652 = vmatprep.mubr.msk.f32.mxu0 %vm237_vm1, %v58_v36  ;;  %7996 = vmatpush1.bf16.msra.mxu1 %v7995_v21  ;;  %v83_v36 = vld [vmem:[%s13265_s0 + $0x198] sm:$0xff]  ;;  %v8004_v37 = vpack.c.bf16 %v4152_v35, %v4151_v34  ;;  %v136_v34 = vld [vmem:[%s13265_s0 + $0x340] sm:$0xff]  ;;  %v4093_v35 = vld [vmem:[%s13266_s3 + $0x10] sm:$0xff] }
  0x3a   :  { %7997 = vmatprep.subr.bf16.mxu1 %v13274_v29  ;;  %v127_v21 = vld [vmem:[%s13265_s0 + $0x2f8] sm:$0xff] }
  0x3c   :  { %7653 = vmatmul.mubr.msk.f32.gmra.mrb[26].mxu0 %vm237_vm1, %v59_v39  ;;  %v4153_v39 = vld [vmem:[%s13266_s3 + $0x1f0] sm:$0xff] }
  0x3d   :  { %7655 = vmatprep.mubr.msk.f32.mxu0 %vm237_vm1, %v60_v41  ;;  %7999 = vmatpush1.bf16.msra.mxu1 %v7998_v26  ;;  %v85_v41 = vld [vmem:[%s13265_s0 + $0x1a8] sm:$0xff]  ;;  %v8007_v42 = vpack.c.bf16 %v4154_v40, %v4153_v39  ;;  %v132_v26 = vld [vmem:[%s13265_s0 + $0x320] sm:$0xff]  ;;  %v138_v39 = vld [vmem:[%s13265_s0 + $0x350] sm:$0xff] }
  0x3e   :  { %8000 = vmatprep.subr.bf16.mxu1 %v13274_v29  ;;  %v4095_v40 = vld [vmem:[%s13266_s3 + $0x20] sm:$0xff] }
  0x40   :  { %7656 = vmatmul.mubr.msk.f32.gmra.mrb[28].mxu0 %vm237_vm1, %v61_v44  ;;  %v87_v44 = vld [vmem:[%s13265_s0 + $0x1b8] sm:$0xff] }
  0x41   :  { %7658 = vmatprep.mubr.msk.f32.mxu0 %vm237_vm1, %v62_v46  ;;  %8002 = vmatpush1.bf16.msra.mxu1 %v8001_v32  ;;  %v88_v46 = vld [vmem:[%s13265_s0 + $0x1c0] sm:$0xff] }
  0x42   :  { %8003 = vmatprep.subr.bf16.mxu1 %v13274_v29 }
  0x44   :  { %7659 = vmatmul.mubr.msk.f32.gmra.mrb[30].mxu0 %vm237_vm1, %v63_v49  ;;  %v91_v49 = vld [vmem:[%s13265_s0 + $0x1d8] sm:$0xff] }
  0x45   :  { %7661 = vmatprep.mubr.msk.f32.mxu0 %vm237_vm1, %v64_v51  ;;  %8005 = vmatpush1.bf16.msra.mxu1 %v8004_v37  ;;  %v93_v51 = vld [vmem:[%s13265_s0 + $0x1e8] sm:$0xff] }
  0x46   :  { %8006 = vmatprep.subr.bf16.mxu1 %v13274_v29 }
  0x48   :  { %7662 = vmatmul.mubr.msk.f32.gmra.mrb[32].mxu0 %vm237_vm1, %v65_v54  ;;  %v96_v54 = vld [vmem:[%s13265_s0 + $0x200] sm:$0xff] }
  0x49   :  { %7664 = vmatprep.mubr.msk.f32.mxu0 %vm237_vm1, %v66_v56  ;;  %8008 = vmatpush1.bf16.msra.mxu1 %v8007_v42  ;;  %v98_v56 = vld [vmem:[%s13265_s0 + $0x210] sm:$0xff] }
  0x4a   :  { %8009 = vmatprep.subr.bf16.mxu1 %v13274_v29 }
  0x4c   :  { %7665 = vmatmul.mubr.msk.f32.gmra.mrb[34].mxu0 %vm237_vm1, %v67_v59  ;;  %4664 = vmatmul.mubr.f32.vlgmr.msra.gmra.mrb[0].mxu1 %v13276_v45  ;;  %v101_v59 = vld [vmem:[%s13265_s0 + $0x228] sm:$0xff] }
  0x4d   :  { %7667 = vmatprep.mubr.msk.f32.mxu0 %vm237_vm1, %v68_v61  ;;  %4668 = vmatprep.mubr.f32.mxu1 %v13276_v45  ;;  %v103_v61 = vld [vmem:[%s13265_s0 + $0x238] sm:$0xff] }
  0x50   :  { %7668 = vmatmul.mubr.msk.f32.gmra.mrb[36].mxu0 %vm237_vm1, %v69_v0  ;;  %4669 = vmatmul.mubr.f32.gmra.mrb[2].mxu1 %v13276_v45  ;;  %v106_v0 = vld [vmem:[%s13265_s0 + $0x250] sm:$0xff] }
  0x51   :  { %7670 = vmatprep.mubr.msk.f32.mxu0 %vm237_vm1, %v70_v2  ;;  %4673 = vmatprep.mubr.f32.mxu1 %v13276_v45  ;;  %v108_v2 = vld [vmem:[%s13265_s0 + $0x260] sm:$0xff] }
  0x54   :  { %7671 = vmatmul.mubr.msk.f32.gmra.mrb[38].mxu0 %vm237_vm1, %v71_v5  ;;  %4674 = vmatmul.mubr.f32.gmra.mrb[4].mxu1 %v13276_v45  ;;  %v111_v5 = vld [vmem:[%s13265_s0 + $0x278] sm:$0xff] }
  0x55   :  { %7673 = vmatprep.mubr.msk.f32.mxu0 %vm237_vm1, %v72_v7  ;;  %4678 = vmatprep.mubr.f32.mxu1 %v13276_v45  ;;  %v113_v7 = vld [vmem:[%s13265_s0 + $0x288] sm:$0xff] }
  0x58   :  { %7674 = vmatmul.mubr.msk.f32.gmra.mrb[40].mxu0 %vm237_vm1, %v73_v10  ;;  %4679 = vmatmul.mubr.f32.gmra.mrb[6].mxu1 %v13276_v45  ;;  %v116_v10 = vld [vmem:[%s13265_s0 + $0x2a0] sm:$0xff] }
  0x59   :  { %7676 = vmatprep.mubr.msk.f32.mxu0 %vm237_vm1, %v74_v12  ;;  %4683 = vmatprep.mubr.f32.mxu1 %v13276_v45  ;;  %v118_v12 = vld [vmem:[%s13265_s0 + $0x2b0] sm:$0xff] }
  0x5c   :  { %7677 = vmatmul.mubr.msk.f32.gmra.mrb[42].mxu0 %vm237_vm1, %v75_v15  ;;  %4684 = vmatmul.mubr.f32.gmra.mrb[8].mxu1 %v13276_v45  ;;  %v121_v15 = vld [vmem:[%s13265_s0 + $0x2c8] sm:$0xff] }
  0x5d   :  { %7679 = vmatprep.mubr.msk.f32.mxu0 %vm237_vm1, %v76_v17  ;;  %4688 = vmatprep.mubr.f32.mxu1 %v13276_v45  ;;  %v123_v17 = vld [vmem:[%s13265_s0 + $0x2d8] sm:$0xff] }
  0x60   :  { %7680 = vmatmul.mubr.msk.f32.gmra.mrb[44].mxu0 %vm237_vm1, %v77_v20  ;;  %4689 = vmatmul.mubr.f32.gmra.mrb[10].mxu1 %v13276_v45  ;;  %v126_v20 = vld [vmem:[%s13265_s0 + $0x2f0] sm:$0xff] }
  0x61   :  { %7682 = vmatprep.mubr.msk.f32.mxu0 %vm237_vm1, %v78_v22  ;;  %v128_v22 = vld [vmem:[%s13265_s0 + $0x300] sm:$0xff] }
  0x64   :  { %7683 = vmatmul.mubr.msk.f32.gmra.mrb[46].mxu0 %vm237_vm1, %v79_v25  ;;  %v131_v25 = vld [vmem:[%s13265_s0 + $0x318] sm:$0xff] }
  0x65   :  { %7685 = vmatprep.mubr.msk.f32.mxu0 %vm237_vm1, %v80_v27  ;;  %v133_v27 = vld [vmem:[%s13265_s0 + $0x328] sm:$0xff] }
  0x68   :  { %7686 = vmatmul.mubr.msk.f32.gmra.mrb[48].mxu0 %vm237_vm1, %v81_v31  ;;  %v4092_v31 = vld [vmem:[%s13266_s3 + $0x8] sm:$0xff] }
  0x69   :  { %7688 = vmatprep.mubr.msk.f32.mxu0 %vm237_vm1, %v82_v33  ;;  %v7914_v32 = vpack.c.bf16 %v4092_v31, %v4091_v30  ;;  %v135_v33 = vld [vmem:[%s13265_s0 + $0x338] sm:$0xff]  ;;  %v4105_v30 = vld [vmem:[%s13266_s3 + $0x70] sm:$0xff] }
  0x6a   :  { %v4106_v31 = vld [vmem:[%s13266_s3 + $0x78] sm:$0xff] }
  0x6b   :  { %7915 = vmatpush1.bf16.msra.mxu0 %v7914_v32 }
  0x6c   :  { %7689 = vmatmul.mubr.msk.f32.gmra.mrb[50].mxu0 %vm237_vm1, %v83_v36  ;;  %7916 = vmatprep.subr.bf16.mxu0 %v13274_v29  ;;  %v4094_v36 = vld [vmem:[%s13266_s3 + $0x18] sm:$0xff] }
  0x6d   :  { %7691 = vmatprep.mubr.msk.f32.mxu0 %vm237_vm1, %v84_v38  ;;  %v7917_v37 = vpack.c.bf16 %v4094_v36, %v4093_v35  ;;  %v137_v38 = vld [vmem:[%s13265_s0 + $0x348] sm:$0xff] }
  0x6f   :  { %7918 = vmatpush1.bf16.msra.mxu0 %v7917_v37 }
  0x70   :  { %7692 = vmatmul.mubr.msk.f32.gmra.mrb[52].mxu0 %vm237_vm1, %v85_v41  ;;  %7919 = vmatprep.subr.bf16.mxu0 %v13274_v29  ;;  %v4096_v41 = vld [vmem:[%s13266_s3 + $0x28] sm:$0xff] }
  0x71   :  { %7694 = vmatprep.mubr.msk.f32.mxu0 %vm237_vm1, %v86_v43  ;;  %v7920_v42 = vpack.c.bf16 %v4096_v41, %v4095_v40  ;;  %v9773_v43 = vld [vmem:[%s13267_s2] ss:$0 sm:$0xff]  ;;  %v150_v41 = vld [vmem:[%s13265_s0 + $0x3b0] sm:$0xff] }
  0x73   :  { %7921 = vmatpush1.bf16.msra.mxu0 %v7920_v42  ;;  %v4107_v42 = vld [vmem:[%s13266_s3 + $0x80] sm:$0xff] }
  0x74   :  { %7695 = vmatmul.mubr.msk.f32.gmra.mrb[54].mxu0 %vm237_vm1, %v87_v44  ;;  %v139_v44 = vld [vmem:[%s13265_s0 + $0x358] sm:$0xff]  ;;  %7922 = vmatprep.subr.bf16.mxu0 %v13274_v29 }
  0x75   :  { %7697 = vmatprep.mubr.msk.f32.mxu0 %vm237_vm1, %v88_v46  ;;  %v140_v46 = vld [vmem:[%s13265_s0 + $0x360] sm:$0xff] }
  0x78   :  { %7698 = vmatmul.mubr.msk.f32.gmra.mrb[56].mxu0 %vm237_vm1, %v89_v47  ;;  %v4097_v47 = vld [vmem:[%s13266_s3 + $0x30] sm:$0xff] }
  0x79   :  { %7700 = vmatprep.mubr.msk.f32.mxu0 %vm237_vm1, %v90_v48  ;;  %v4098_v48 = vld [vmem:[%s13266_s3 + $0x38] sm:$0xff] }
  0x7c   :  { %7701 = vmatmul.mubr.msk.f32.gmra.mrb[58].mxu0 %vm237_vm1, %v91_v49 }
  0x7d   :  { %7703 = vmatprep.mubr.msk.f32.mxu0 %vm237_vm1, %v92_v50  ;;  %v7923_v50 = vpack.c.bf16 %v4098_v48, %v4097_v47 }
  0x7f   :  { %7924 = vmatpush1.bf16.msra.mxu0 %v7923_v50 }
  0x80   :  { %7704 = vmatmul.mubr.msk.f32.gmra.mrb[60].mxu0 %vm237_vm1, %v93_v51  ;;  %7925 = vmatprep.subr.bf16.mxu0 %v13274_v29 }
  0x81   :  { %7706 = vmatprep.mubr.msk.f32.mxu0 %vm237_vm1, %v94_v52 }
  0x84   :  { %7707 = vmatmul.mubr.msk.f32.gmra.mrb[62].mxu0 %vm237_vm1, %v95_v53 }
  0x85   :  { %7709 = vmatprep.mubr.msk.f32.mxu0 %vm237_vm1, %v96_v54  ;;  %v141_v54 = vld [vmem:[%s13265_s0 + $0x368] sm:$0xff] }
  0x88   :  { %7710 = vmatmul.mubr.msk.f32.gmra.mrb[64].mxu0 %vm237_vm1, %v97_v55 }
  0x89   :  { %7712 = vmatprep.mubr.msk.f32.mxu0 %vm237_vm1, %v98_v56  ;;  %v142_v56 = vld [vmem:[%s13265_s0 + $0x370] sm:$0xff] }
  0x8c   :  { %7713 = vmatmul.mubr.msk.f32.gmra.mrb[66].mxu0 %vm237_vm1, %v99_v57  ;;  %v4099_v57 = vld [vmem:[%s13266_s3 + $0x40] sm:$0xff] }
  0x8d   :  { %7715 = vmatprep.mubr.msk.f32.mxu0 %vm237_vm1, %v100_v58  ;;  %v4100_v58 = vld [vmem:[%s13266_s3 + $0x48] sm:$0xff] }
  0x90   :  { %7716 = vmatmul.mubr.msk.f32.gmra.mrb[68].mxu0 %vm237_vm1, %v101_v59 }
  0x91   :  { %7718 = vmatprep.mubr.msk.f32.mxu0 %vm237_vm1, %v102_v60 }
  0x94   :  { %7719 = vmatmul.mubr.msk.f32.gmra.mrb[70].mxu0 %vm237_vm1, %v103_v61  ;;  %v7926_v61 = vpack.c.bf16 %v4100_v58, %v4099_v57  ;;  %v4110_v57 = vld [vmem:[%s13266_s3 + $0x98] sm:$0xff] }
  0x95   :  { %7721 = vmatprep.mubr.msk.f32.mxu0 %vm237_vm1, %v104_v62 }
  0x96   :  { %7927 = vmatpush1.bf16.msra.mxu0 %v7926_v61 }
  0x97   :  { %7928 = vmatprep.subr.bf16.mxu0 %v13274_v29 }
  0x98   :  { %7722 = vmatmul.mubr.msk.f32.gmra.mrb[72].mxu0 %vm237_vm1, %v105_v63 }
  0x99   :  { %7724 = vmatprep.mubr.msk.f32.mxu0 %vm237_vm1, %v106_v0 }
  0x9c   :  { %7725 = vmatmul.mubr.msk.f32.gmra.mrb[74].mxu0 %vm237_vm1, %v107_v1 }
  0x9d   :  { %7727 = vmatprep.mubr.msk.f32.mxu0 %vm237_vm1, %v108_v2  ;;  %v143_v2 = vld [vmem:[%s13265_s0 + $0x378] sm:$0xff] }
  0xa0   :  { %7728 = vmatmul.mubr.msk.f32.gmra.mrb[76].mxu0 %vm237_vm1, %v109_v3 }
  0xa1   :  { %7730 = vmatprep.mubr.msk.f32.mxu0 %vm237_vm1, %v110_v4  ;;  %v144_v4 = vld [vmem:[%s13265_s0 + $0x380] sm:$0xff] }
  0xa4   :  { %7731 = vmatmul.mubr.msk.f32.gmra.mrb[78].mxu0 %vm237_vm1, %v111_v5  ;;  %v4101_v5 = vld [vmem:[%s13266_s3 + $0x50] sm:$0xff] }
  0xa5   :  { %7733 = vmatprep.mubr.msk.f32.mxu0 %vm237_vm1, %v112_v6  ;;  %v4102_v6 = vld [vmem:[%s13266_s3 + $0x58] sm:$0xff] }
  0xa8   :  { %7734 = vmatmul.mubr.msk.f32.gmra.mrb[80].mxu0 %vm237_vm1, %v113_v7 }
  0xa9   :  { %7736 = vmatprep.mubr.msk.f32.mxu0 %vm237_vm1, %v114_v8 }
  0xac   :  { %7737 = vmatmul.mubr.msk.f32.gmra.mrb[82].mxu0 %vm237_vm1, %v115_v9  ;;  %v7929_v9 = vpack.c.bf16 %v4102_v6, %v4101_v5  ;;  %v4111_v5 = vld [vmem:[%s13266_s3 + $0xa0] sm:$0xff]  ;;  %v4112_v6 = vld [vmem:[%s13266_s3 + $0xa8] sm:$0xff] }
  0xad   :  { %7739 = vmatprep.mubr.msk.f32.mxu0 %vm237_vm1, %v116_v10 }
  0xae   :  { %7930 = vmatpush1.bf16.msra.mxu0 %v7929_v9  ;;  %v4155_v9 = vld [vmem:[%s13266_s3 + $0x200] sm:$0xff] }
  0xaf   :  { %7931 = vmatprep.subr.bf16.mxu0 %v13274_v29 }
  0xb0   :  { %7740 = vmatmul.mubr.msk.f32.gmra.mrb[84].mxu0 %vm237_vm1, %v117_v11 }
  0xb1   :  { %7742 = vmatprep.mubr.msk.f32.mxu0 %vm237_vm1, %v118_v12 }
  0xb4   :  { %7743 = vmatmul.mubr.msk.f32.gmra.mrb[86].mxu0 %vm237_vm1, %v119_v13 }
  0xb5   :  { %7745 = vmatprep.mubr.msk.f32.mxu0 %vm237_vm1, %v120_v14  ;;  %v145_v14 = vld [vmem:[%s13265_s0 + $0x388] sm:$0xff] }
  0xb8   :  { %7746 = vmatmul.mubr.msk.f32.gmra.mrb[88].mxu0 %vm237_vm1, %v121_v15 }
  0xb9   :  { %7748 = vmatprep.mubr.msk.f32.mxu0 %vm237_vm1, %v122_v16  ;;  %v146_v16 = vld [vmem:[%s13265_s0 + $0x390] sm:$0xff] }
  0xbc   :  { %7749 = vmatmul.mubr.msk.f32.gmra.mrb[90].mxu0 %vm237_vm1, %v123_v17  ;;  %v4103_v17 = vld [vmem:[%s13266_s3 + $0x60] sm:$0xff] }
  0xbd   :  { %7751 = vmatprep.mubr.msk.f32.mxu0 %vm237_vm1, %v124_v18  ;;  %v4104_v18 = vld [vmem:[%s13266_s3 + $0x68] sm:$0xff] }
  0xc0   :  { %7752 = vmatmul.mubr.msk.f32.gmra.mrb[92].mxu0 %vm237_vm1, %v125_v19 }
  0xc1   :  { %7754 = vmatprep.mubr.msk.f32.mxu0 %vm237_vm1, %v126_v20 }
  0xc4   :  { %7755 = vmatmul.mubr.msk.f32.gmra.mrb[94].mxu0 %vm237_vm1, %v127_v21  ;;  %v7932_v21 = vpack.c.bf16 %v4104_v18, %v4103_v17  ;;  %v155_v18 = vld [vmem:[%s13265_s0 + $0x3d8] sm:$0xff] }
  0xc5   :  { %7757 = vmatprep.mubr.msk.f32.mxu0 %vm237_vm1, %v128_v22 }
  0xc6   :  { %7933 = vmatpush1.bf16.msra.mxu0 %v7932_v21  ;;  %v4113_v21 = vld [vmem:[%s13266_s3 + $0xb0] sm:$0xff] }
  0xc7   :  { %7934 = vmatprep.subr.bf16.mxu0 %v13274_v29 }
  0xc8   :  { %7758 = vmatmul.mubr.msk.f32.gmra.mrb[96].mxu0 %vm237_vm1, %v129_v23 }
  0xc9   :  { %7760 = vmatprep.mubr.msk.f32.mxu0 %vm237_vm1, %v130_v24 }
  0xcc   :  { %7761 = vmatmul.mubr.msk.f32.gmra.mrb[98].mxu0 %vm237_vm1, %v131_v25 }
  0xcd   :  { %7763 = vmatprep.mubr.msk.f32.mxu0 %vm237_vm1, %v132_v26  ;;  %v147_v26 = vld [vmem:[%s13265_s0 + $0x398] sm:$0xff] }
  0xd0   :  { %7764 = vmatmul.mubr.msk.f32.gmra.mrb[100].mxu0 %vm237_vm1, %v133_v27 }
  0xd1   :  { %7766 = vmatprep.mubr.msk.f32.mxu0 %vm237_vm1, %v134_v28  ;;  %v148_v28 = vld [vmem:[%s13265_s0 + $0x3a0] sm:$0xff] }
  0xd4   :  { %7767 = vmatmul.mubr.msk.f32.gmra.mrb[102].mxu0 %vm237_vm1, %v135_v33 }
  0xd5   :  { %7769 = vmatprep.mubr.msk.f32.mxu0 %vm237_vm1, %v136_v34  ;;  %v7935_v34 = vpack.c.bf16 %v4106_v31, %v4105_v30 }
  0xd7   :  { %7936 = vmatpush1.bf16.msra.mxu0 %v7935_v34  ;;  %v158_v34 = vld [vmem:[%s13265_s0 + $0x3f0] sm:$0xff] }
  0xd8   :  { %7770 = vmatmul.mubr.msk.f32.gmra.mrb[104].mxu0 %vm237_vm1, %v137_v38  ;;  %7937 = vmatprep.subr.bf16.mxu0 %v13274_v29 }
  0xd9   :  { %7772 = vmatprep.mubr.msk.f32.mxu0 %vm237_vm1, %v138_v39  ;;  %v149_v39 = vld [vmem:[%s13265_s0 + $0x3a8] sm:$0xff] }
  0xdb   :  { %v7615_v49 = vpop.f32.mrb[0].mxu0 }
  0xdc   :  { %v902_v51 = vadd.f32 %v7615_v49, %v9773_v43  ;;  %v896_v52 = vpop.f32.mrb[1].mxu0  ;;  %7773 = vmatmul.mubr.msk.f32.gmra.mrb[106].mxu0 %vm237_vm1, %v139_v44  ;;  %v4108_v44 = vld [vmem:[%s13266_s3 + $0x88] sm:$0xff] }
  0xdd   :  { %v897_v53 = vadd.f32 %v9773_v43, %v896_v52  ;;  %7775 = vmatprep.mubr.msk.f32.mxu0 %vm237_vm1, %v140_v46  ;;  %v7938_v48 = vpack.c.bf16 %v4108_v44, %v4107_v42 }
  0xde   :  { %v1876_v55 = vmax.f32 %v902_v51, 0.0 }
  0xdf   :  { %v1875_v59 = vmax.f32 %v897_v53, 0.0  ;;  %v7618_v60 = vpop.f32.mrb[2].mxu0  ;;  %v151_v53 = vld [vmem:[%s13265_s0 + $0x3b8] sm:$0xff]  ;;  %7939 = vmatpush1.bf16.msra.mxu0 %v7938_v48 }
  0xe0   :  { %v912_v62 = vadd.f32 %v7618_v60, %v9773_v43  ;;  %v906_v63 = vpop.f32.mrb[3].mxu0  ;;  %7776 = vmatmul.mubr.msk.f32.gmra.mrb[108].mxu0 %vm237_vm1, %v141_v54  ;;  %7940 = vmatprep.subr.bf16.mxu0 %v13274_v29 }
  0xe1   :  { %v9808_v0 = vmax.f32 %v1875_v59, %v1876_v55  ;;  %v907_v1 = vadd.f32 %v9773_v43, %v906_v63  ;;  %7778 = vmatprep.mubr.msk.f32.mxu0 %vm237_vm1, %v142_v56  ;;  %v152_v55 = vld [vmem:[%s13265_s0 + $0x3c0] sm:$0xff]  ;;  %v4109_v56 = vld [vmem:[%s13266_s3 + $0x90] sm:$0xff] }
  0xe2   :  { %v1878_v3 = vmax.f32 %v912_v62, 0.0  ;;  %v7941_v60 = vpack.c.bf16 %v4110_v57, %v4109_v56 }
  0xe3   :  { %v1877_v7 = vmax.f32 %v907_v1, 0.0  ;;  %v7621_v8 = vpop.f32.mrb[4].mxu0 }
  0xe4   :  { %v922_v10 = vadd.f32 %v7621_v8, %v9773_v43  ;;  %v916_v11 = vpop.f32.mrb[5].mxu0  ;;  %7779 = vmatmul.mubr.msk.f32.gmra.mrb[110].mxu0 %vm237_vm1, %v143_v2  ;;  %v153_v2 = vld [vmem:[%s13265_s0 + $0x3c8] sm:$0xff] }
  0xe5   :  { %v9827_v12 = vmax.f32 %v1877_v7, %v1878_v3  ;;  %v917_v13 = vadd.f32 %v9773_v43, %v916_v11  ;;  %7781 = vmatprep.mubr.msk.f32.mxu0 %vm237_vm1, %v144_v4  ;;  %7942 = vmatpush1.bf16.msra.mxu0 %v7941_v60  ;;  %v154_v4 = vld [vmem:[%s13265_s0 + $0x3d0] sm:$0xff]  ;;  %v7944_v11 = vpack.c.bf16 %v4112_v6, %v4111_v5  ;;  %v4120_v5 = vld [vmem:[%s13266_s3 + $0xe8] sm:$0xff] }
  0xe6   :  { %v1880_v15 = vmax.f32 %v922_v10, 0.0  ;;  %7943 = vmatprep.subr.bf16.mxu0 %v13274_v29  ;;  %v4156_v10 = vld [vmem:[%s13266_s3 + $0x208] sm:$0xff] }
  0xe7   :  { %v1879_v19 = vmax.f32 %v917_v13, 0.0  ;;  %v7624_v20 = vpop.f32.mrb[6].mxu0 }
  0xe8   :  { %v932_v22 = vadd.f32 %v7624_v20, %v9773_v43  ;;  %v926_v23 = vpop.f32.mrb[7].mxu0  ;;  %7782 = vmatmul.mubr.msk.f32.gmra.mrb[112].mxu0 %vm237_vm1, %v145_v14  ;;  %v156_v20 = vld [vmem:[%s13265_s0 + $0x3e0] sm:$0xff] }
  0xe9   :  { %v9846_v24 = vmax.f32 %v1879_v19, %v1880_v15  ;;  %v927_v25 = vadd.f32 %v9773_v43, %v926_v23  ;;  %7784 = vmatprep.mubr.msk.f32.mxu0 %vm237_vm1, %v146_v16  ;;  %v8010_v15 = vpack.c.bf16 %v4156_v10, %v4155_v9  ;;  %7945 = vmatpush1.bf16.msra.mxu0 %v7944_v11 }
  0xea   :  { %v1882_v27 = vmax.f32 %v932_v22, 0.0  ;;  %7946 = vmatprep.subr.bf16.mxu0 %v13274_v29  ;;  %v4114_v22 = vld [vmem:[%s13266_s3 + $0xb8] sm:$0xff] }
  0xeb   :  { %v1881_v32 = vmax.f32 %v927_v25, 0.0  ;;  %v7627_v33 = vpop.f32.mrb[8].mxu0  ;;  %8011 = vmatpush1.bf16.msra.mxu1 %v8010_v15  ;;  %v4159_v15 = vld [vmem:[%s13266_s3 + $0x220] sm:$0xff] }
  0xec   :  { %v942_v35 = vadd.f32 %v7627_v33, %v9773_v43  ;;  %v936_v36 = vpop.f32.mrb[9].mxu0  ;;  %7785 = vmatmul.mubr.msk.f32.gmra.mrb[114].mxu0 %vm237_vm1, %v147_v26  ;;  %8012 = vmatprep.subr.bf16.mxu1 %v13274_v29  ;;  %v7947_v26 = vpack.c.bf16 %v4114_v22, %v4113_v21  ;;  %v4121_v21 = vld [vmem:[%s13266_s3 + $0xf0] sm:$0xff]  ;;  %v4122_v22 = vld [vmem:[%s13266_s3 + $0xf8] sm:$0xff] }
  0xed   :  { %v9865_v37 = vmax.f32 %v1881_v32, %v1882_v27  ;;  %v937_v38 = vadd.f32 %v9773_v43, %v936_v36  ;;  %7787 = vmatprep.mubr.msk.f32.mxu0 %vm237_vm1, %v148_v28  ;;  %v157_v32 = vld [vmem:[%s13265_s0 + $0x3e8] sm:$0xff] }
  0xee   :  { %v1884_v40 = vmax.f32 %v942_v35, 0.0  ;;  %7948 = vmatpush1.bf16.msra.mxu0 %v7947_v26  ;;  %v4115_v35 = vld [vmem:[%s13266_s3 + $0xc0] sm:$0xff]  ;;  %v4116_v36 = vld [vmem:[%s13266_s3 + $0xc8] sm:$0xff] }
  0xef   :  { %v1883_v46 = vmax.f32 %v937_v38, 0.0  ;;  %v7630_v47 = vpop.f32.mrb[10].mxu0  ;;  %7949 = vmatprep.subr.bf16.mxu0 %v13274_v29  ;;  %v7950_v42 = vpack.c.bf16 %v4116_v36, %v4115_v35 }
  0xf0   :  { %v952_v49 = vadd.f32 %v7630_v47, %v9773_v43  ;;  %v946_v50 = vpop.f32.mrb[11].mxu0  ;;  %7788 = vmatmul.mubr.msk.f32.gmra.mrb[116].mxu0 %vm237_vm1, %v149_v39 }
  0xf1   :  { %v9884_v51 = vmax.f32 %v1883_v46, %v1884_v40  ;;  %v947_v52 = vadd.f32 %v9773_v43, %v946_v50  ;;  %7790 = vmatprep.mubr.msk.f32.mxu0 %vm237_vm1, %v150_v41  ;;  %v4157_v40 = vld [vmem:[%s13266_s3 + $0x210] sm:$0xff]  ;;  %v4158_v41 = vld [vmem:[%s13266_s3 + $0x218] sm:$0xff] }
  0xf2   :  { %v1886_v54 = vmax.f32 %v952_v49, 0.0  ;;  %v8013_v48 = vpack.c.bf16 %v4158_v41, %v4157_v40  ;;  %7951 = vmatpush1.bf16.msra.mxu0 %v7950_v42 }
  0xf3   :  { %v1885_v58 = vmax.f32 %v947_v52, 0.0  ;;  %v7633_v59 = vpop.f32.mrb[12].mxu0  ;;  %v159_v52 = vld [vmem:[%s13265_s0 + $0x3f8] sm:$0xff]  ;;  %7952 = vmatprep.subr.bf16.mxu0 %v13274_v29 }
  0xf4   :  { %v962_v61 = vadd.f32 %v7633_v59, %v9773_v43  ;;  %v956_v62 = vpop.f32.mrb[13].mxu0  ;;  %7791 = vmatmul.mubr.msk.f32.gmra.mrb[118].mxu0 %vm237_vm1, %v151_v53  ;;  %8014 = vmatpush1.bf16.msra.mxu1 %v8013_v48 }
  0xf5   :  { %v9903_v63 = vmax.f32 %v1885_v58, %v1886_v54  ;;  %v957_v1 = vadd.f32 %v9773_v43, %v956_v62  ;;  %7793 = vmatprep.mubr.msk.f32.mxu0 %vm237_vm1, %v152_v55  ;;  %v4117_v54 = vld [vmem:[%s13266_s3 + $0xd0] sm:$0xff]  ;;  %v4118_v55 = vld [vmem:[%s13266_s3 + $0xd8] sm:$0xff]  ;;  %8015 = vmatprep.subr.bf16.mxu1 %v13274_v29 }
  0xf6   :  { %v1888_v3 = vmax.f32 %v962_v61, 0.0  ;;  %v7953_v59 = vpack.c.bf16 %v4118_v55, %v4117_v54 }
  0xf7   :  { %v1887_v7 = vmax.f32 %v957_v1, 0.0  ;;  %v7636_v8 = vpop.f32.mrb[14].mxu0 }
  0xf8   :  { %v972_v13 = vadd.f32 %v7636_v8, %v9773_v43  ;;  %v966_v14 = vpop.f32.mrb[15].mxu0  ;;  %7794 = vmatmul.mubr.msk.f32.gmra.mrb[120].mxu0 %vm237_vm1, %v153_v2 }
  0xf9   :  { %v9928_v16 = vmax.f32 %v1887_v7, %v1888_v3  ;;  %v967_v17 = vadd.f32 %v9773_v43, %v966_v14  ;;  %7796 = vmatprep.mubr.msk.f32.mxu0 %vm237_vm1, %v154_v4  ;;  %7954 = vmatpush1.bf16.msra.mxu0 %v7953_v59  ;;  %v162_v3 = vld [vmem:[%s13265_s0 + $0x410] sm:$0xff]  ;;  %v4119_v4 = vld [vmem:[%s13266_s3 + $0xe0] sm:$0xff] }
  0xfa   :  { %v1890_v19 = vmax.f32 %v972_v13, 0.0  ;;  %7955 = vmatprep.subr.bf16.mxu0 %v13274_v29  ;;  %v7956_v9 = vpack.c.bf16 %v4120_v5, %v4119_v4  ;;  %v171_v5 = vld [vmem:[%s13265_s0 + $0x458] sm:$0xff] }
  0xfb   :  { %v1889_v23 = vmax.f32 %v967_v17, 0.0  ;;  %v7639_v25 = vpop.f32.mrb[16].mxu0  ;;  %v4160_v17 = vld [vmem:[%s13266_s3 + $0x228] sm:$0xff] }
  0xfc   :  { %v982_v27 = vadd.f32 %v7639_v25, %v9773_v43  ;;  %v976_v28 = vpop.f32.mrb[17].mxu0  ;;  %7797 = vmatmul.mubr.msk.f32.gmra.mrb[122].mxu0 %vm237_vm1, %v155_v18 }
  0xfd   :  { %v2078_v30 = vmax.f32 %v1889_v23, %v1890_v19  ;;  %v977_v31 = vadd.f32 %v9773_v43, %v976_v28  ;;  %7799 = vmatprep.mubr.msk.f32.mxu0 %vm237_vm1, %v156_v20  ;;  %v164_v19 = vld [vmem:[%s13265_s0 + $0x420] sm:$0xff]  ;;  %v8016_v20 = vpack.c.bf16 %v4160_v17, %v4159_v15  ;;  %7957 = vmatpush1.bf16.msra.mxu0 %v7956_v9 }
  0xfe   :  { %v1892_v33 = vmax.f32 %v982_v27, 0.0  ;;  %7958 = vmatprep.subr.bf16.mxu0 %v13274_v29  ;;  %v7959_v27 = vpack.c.bf16 %v4122_v22, %v4121_v21  ;;  %v172_v9 = vld [vmem:[%s13265_s0 + $0x460] sm:$0xff] }
  0xff   :  { %v1891_v38 = vmax.f32 %v977_v31, 0.0  ;;  %v7642_v39 = vpop.f32.mrb[18].mxu0  ;;  %v9970_v44 = vmax.f32 %v9808_v0, %v2078_v30  ;;  %v160_v0 = vld [vmem:[%s13265_s0 + $0x400] sm:$0xff]  ;;  %8017 = vmatpush1.bf16.msra.mxu1 %v8016_v20  ;;  %v174_v20 = vld [vmem:[%s13265_s0 + $0x470] sm:$0xff] }
 0x100   :  { %v992_v46 = vadd.f32 %v7642_v39, %v9773_v43  ;;  %v986_v47 = vpop.f32.mrb[19].mxu0  ;;  %7800 = vmatmul.mubr.msk.f32.gmra.mrb[124].mxu0 %vm237_vm1, %v157_v32  ;;  %8018 = vmatprep.subr.bf16.mxu1 %v13274_v29 }
 0x101   :  { %v2079_v49 = vmax.f32 %v1891_v38, %v1892_v33  ;;  %v987_v50 = vadd.f32 %v9773_v43, %v986_v47  ;;  %7802 = vmatprep.mubr.msk.f32.mxu0 %vm237_vm1, %v158_v34  ;;  %v166_v34 = vld [vmem:[%s13265_s0 + $0x430] sm:$0xff]  ;;  %7960 = vmatpush1.bf16.msra.mxu0 %v7959_v27  ;;  %v4162_v47 = vld [vmem:[%s13266_s3 + $0x238] sm:$0xff] }
 0x102   :  { %v1894_v53 = vmax.f32 %v992_v46, 0.0  ;;  %8249 = vmatprep.subr.bf16.mxu0 %v13274_v29  ;;  %v4161_v46 = vld [vmem:[%s13266_s3 + $0x230] sm:$0xff] }
 0x103   :  { %v9990_v56 = vmax.f32 %v9827_v12, %v2079_v49  ;;  %v1893_v57 = vmax.f32 %v987_v50, 0.0  ;;  %v7645_v58 = vpop.f32.mrb[20].mxu0  ;;  %v161_v12 = vld [vmem:[%s13265_s0 + $0x408] sm:$0xff]  ;;  %v168_v49 = vld [vmem:[%s13265_s0 + $0x440] sm:$0xff]  ;;  %v8019_v50 = vpack.c.bf16 %v4162_v47, %v4161_v46  ;;  %v178_v47 = vld [vmem:[%s13265_s0 + $0x490] sm:$0xff] }
 0x104   :  { %v1002_v60 = vadd.f32 %v7645_v58, %v9773_v43  ;;  %v996_v61 = vpop.f32.mrb[21].mxu0  ;;  %7803 = vmatmul.mubr.msk.f32.gmra.mrb[126].mxu0 %vm237_vm1, %v159_v52 }
 0x105   :  { %v2080_v62 = vmax.f32 %v1893_v57, %v1894_v53  ;;  %v997_v1 = vadd.f32 %v9773_v43, %v996_v61  ;;  %7805 = vmatprep.mubr.msk.f32.mxu0 %vm237_vm1, %v160_v0  ;;  %8020 = vmatpush1.bf16.msra.mxu1 %v8019_v50 }
 0x106   :  { %v1896_v2 = vmax.f32 %v1002_v60, 0.0  ;;  %v170_v60 = vld [vmem:[%s13265_s0 + $0x450] sm:$0xff]  ;;  %8021 = vmatprep.subr.bf16.mxu1 %v13274_v29 }
 0x107   :  { %v10011_v6 = vmax.f32 %v9846_v24, %v2080_v62  ;;  %v1895_v7 = vmax.f32 %v997_v1, 0.0  ;;  %v7648_v8 = vpop.f32.mrb[22].mxu0  ;;  %v163_v24 = vld [vmem:[%s13265_s0 + $0x418] sm:$0xff] }
 0x108   :  { %v1012_v10 = vadd.f32 %v7648_v8, %v9773_v43  ;;  %v1006_v11 = vpop.f32.mrb[23].mxu0  ;;  %7806 = vmatmul.mubr.msk.f32.gmra.mrb[128].mxu0 %vm237_vm1, %v161_v12 }
 0x109   :  { %v2081_v13 = vmax.f32 %v1895_v7, %v1896_v2  ;;  %v1007_v14 = vadd.f32 %v9773_v43, %v1006_v11  ;;  %4693 = vmatprep.mubr.f32.mxu1 %v10011_v6  ;;  %7808 = vmatprep.mubr.msk.f32.mxu0 %vm237_vm1, %v162_v3  ;;  %v4164_v7 = vld [vmem:[%s13266_s3 + $0x248] sm:$0xff] }
 0x10a   :  { %v1898_v18 = vmax.f32 %v1012_v10, 0.0  ;;  %4694 = vmatmul.mubr.f32.gmra.mrb[12].mxu1 %v9990_v56 }
 0x10b   :  { %v10038_v23 = vmax.f32 %v9865_v37, %v2081_v13  ;;  %v1897_v25 = vmax.f32 %v1007_v14, 0.0  ;;  %v7651_v26 = vpop.f32.mrb[24].mxu0  ;;  %v165_v37 = vld [vmem:[%s13265_s0 + $0x428] sm:$0xff] }
 0x10c   :  { %v1022_v28 = vadd.f32 %v7651_v26, %v9773_v43  ;;  %v1016_v30 = vpop.f32.mrb[25].mxu0  ;;  %7809 = vmatmul.mubr.msk.f32.gmra.mrb[130].mxu0 %vm237_vm1, %v163_v24 }
 0x10d   :  { %v2082_v31 = vmax.f32 %v1897_v25, %v1898_v18  ;;  %v1017_v32 = vadd.f32 %v9773_v43, %v1016_v30  ;;  %4698 = vmatprep.mubr.f32.mxu1 %v10038_v23  ;;  %7811 = vmatprep.mubr.msk.f32.mxu0 %vm237_vm1, %v164_v19  ;;  %v173_v18 = vld [vmem:[%s13265_s0 + $0x468] sm:$0xff]  ;;  %v175_v30 = vld [vmem:[%s13265_s0 + $0x478] sm:$0xff] }
 0x10e   :  { %v1900_v33 = vmax.f32 %v1022_v28, 0.0  ;;  %4699 = vmatmul.mubr.f32.gmra.mrb[14].mxu1 %v10011_v6 }
 0x10f   :  { %v10055_v35 = vmax.f32 %v9884_v51, %v2082_v31  ;;  %v1899_v36 = vmax.f32 %v1017_v32, 0.0  ;;  %v7654_v38 = vpop.f32.mrb[26].mxu0  ;;  %v167_v51 = vld [vmem:[%s13265_s0 + $0x438] sm:$0xff]  ;;  %v176_v32 = vld [vmem:[%s13265_s0 + $0x480] sm:$0xff] }
 0x110   :  { %v1032_v39 = vadd.f32 %v7654_v38, %v9773_v43  ;;  %v1026_v40 = vpop.f32.mrb[27].mxu0  ;;  %7812 = vmatmul.mubr.msk.f32.gmra.mrb[132].mxu0 %vm237_vm1, %v165_v37  ;;  %v4165_v37 = vld [vmem:[%s13266_s3 + $0x250] sm:$0xff] }
 0x111   :  { %v2083_v41 = vmax.f32 %v1899_v36, %v1900_v33  ;;  %v1027_v42 = vadd.f32 %v9773_v43, %v1026_v40  ;;  %4703 = vmatprep.mubr.f32.mxu1 %v10055_v35  ;;  %7814 = vmatprep.mubr.msk.f32.mxu0 %vm237_vm1, %v166_v34  ;;  %v4166_v33 = vld [vmem:[%s13266_s3 + $0x258] sm:$0xff] }
 0x112   :  { %v1902_v48 = vmax.f32 %v1032_v39, 0.0  ;;  %4704 = vmatmul.mubr.f32.gmra.mrb[16].mxu1 %v10038_v23  ;;  %v8025_v38 = vpack.c.bf16 %v4166_v33, %v4165_v37 }
 0x113   :  { %v10077_v52 = vmax.f32 %v9903_v63, %v2083_v41  ;;  %v1901_v53 = vmax.f32 %v1027_v42, 0.0  ;;  %v7657_v0 = vpop.f32.mrb[28].mxu0  ;;  %v169_v63 = vld [vmem:[%s13265_s0 + $0x448] sm:$0xff] }
 0x114   :  { %v1042_v54 = vadd.f32 %v7657_v0, %v9773_v43  ;;  %v1036_v55 = vpop.f32.mrb[29].mxu0  ;;  %7815 = vmatmul.mubr.msk.f32.gmra.mrb[134].mxu0 %vm237_vm1, %v167_v51  ;;  %v177_v51 = vld [vmem:[%s13265_s0 + $0x488] sm:$0xff] }
 0x115   :  { %v2084_v57 = vmax.f32 %v1901_v53, %v1902_v48  ;;  %v1037_v58 = vadd.f32 %v9773_v43, %v1036_v55  ;;  %4708 = vmatprep.mubr.f32.mxu1 %v10077_v52  ;;  %7817 = vmatprep.mubr.msk.f32.mxu0 %vm237_vm1, %v168_v49  ;;  %v179_v55 = vld [vmem:[%s13265_s0 + $0x498] sm:$0xff] }
 0x116   :  { %v1904_v59 = vmax.f32 %v1042_v54, 0.0  ;;  %4709 = vmatmul.mubr.f32.gmra.mrb[18].mxu1 %v10055_v35 }
 0x117   :  { %v1903_v61 = vmax.f32 %v1037_v58, 0.0  ;;  %v7660_v62 = vpop.f32.mrb[30].mxu0  ;;  %v10093_v1 = vmax.f32 %v9928_v16, %v2084_v57  ;;  %v4163_v16 = vld [vmem:[%s13266_s3 + $0x240] sm:$0xff] }
 0x118   :  { %v1052_v12 = vadd.f32 %v7660_v62, %v9773_v43  ;;  %v1046_v2 = vpop.f32.mrb[31].mxu0  ;;  %7818 = vmatmul.mubr.msk.f32.gmra.mrb[136].mxu0 %vm237_vm1, %v169_v63  ;;  %v8022_v10 = vpack.c.bf16 %v4164_v7, %v4163_v16  ;;  %v180_v58 = vld [vmem:[%s13265_s0 + $0x4a0] sm:$0xff] }
 0x119   :  { %v10097_v3 = vmax.f32 %v1903_v61, %v1904_v59  ;;  %v1047_v4 = vadd.f32 %v9773_v43, %v1046_v2  ;;  %4713 = vmatprep.mubr.f32.mxu1 %v10093_v1  ;;  %7820 = vmatprep.mubr.msk.f32.mxu0 %vm237_vm1, %v170_v60  ;;  %v181_v2 = vld [vmem:[%s13265_s0 + $0x4a8] sm:$0xff] }
 0x11a   :  { %v1906_v8 = vmax.f32 %v1052_v12, 0.0  ;;  %4714 = vmatmul.mubr.f32.gmra.mrb[20].mxu1 %v10077_v52 }
 0x11b   :  { %v1905_v11 = vmax.f32 %v1047_v4, 0.0  ;;  %v7663_v13 = vpop.f32.mrb[32].mxu0  ;;  %4718 = vmatprep.mubr.f32.mxu1 %v13276_v45  ;;  %8023 = vmatpush1.bf16.msra.mxu1 %v8022_v10 }
 0x11c   :  { %v1062_v14 = vadd.f32 %v7663_v13, %v9773_v43  ;;  %v1056_v24 = vpop.f32.mrb[33].mxu0  ;;  %7821 = vmatmul.mubr.msk.f32.gmra.mrb[138].mxu0 %vm237_vm1, %v171_v5  ;;  %8024 = vmatprep.subr.bf16.mxu1 %v13274_v29  ;;  %v182_v5 = vld [vmem:[%s13265_s0 + $0x4b0] sm:$0xff] }
 0x11d   :  { %v10118_v15 = vmax.f32 %v1905_v11, %v1906_v8  ;;  %v1057_v17 = vadd.f32 %v9773_v43, %v1056_v24  ;;  %7823 = vmatprep.mubr.msk.f32.mxu0 %vm237_vm1, %v172_v9  ;;  %v4167_v8 = vld [vmem:[%s13266_s3 + $0x260] sm:$0xff]  ;;  %v4168_v9 = vld [vmem:[%s13266_s3 + $0x268] sm:$0xff] }
 0x11e   :  { %v1908_v19 = vmax.f32 %v1062_v14, 0.0  ;;  %4719 = vmatmul.mubr.f32.gmra.mrb[22].mxu1 %v10093_v1  ;;  %v8028_v13 = vpack.c.bf16 %v4168_v9, %v4167_v8  ;;  %v191_v9 = vld [vmem:[%s13265_s0 + $0x4f8] sm:$0xff] }
 0x11f   :  { %v1907_v21 = vmax.f32 %v1057_v17, 0.0  ;;  %v7666_v22 = vpop.f32.mrb[34].mxu0  ;;  %8026 = vmatpush1.bf16.msra.mxu1 %v8025_v38  ;;  %v183_v17 = vld [vmem:[%s13265_s0 + $0x4b8] sm:$0xff] }
 0x120   :  { %v1072_v25 = vadd.f32 %v7666_v22, %v9773_v43  ;;  %v1066_v26 = vpop.f32.mrb[35].mxu0  ;;  %7824 = vmatmul.mubr.msk.f32.gmra.mrb[140].mxu0 %vm237_vm1, %v173_v18  ;;  %8027 = vmatprep.subr.bf16.mxu1 %v13274_v29  ;;  %v4170_v38 = vld [vmem:[%s13266_s3 + $0x278] sm:$0xff] }
 0x121   :  { %v10132_v27 = vmax.f32 %v1907_v21, %v1908_v19  ;;  %v1067_v28 = vadd.f32 %v9773_v43, %v1066_v26  ;;  %7826 = vmatprep.mubr.msk.f32.mxu0 %vm237_vm1, %v174_v20  ;;  %v184_v19 = vld [vmem:[%s13265_s0 + $0x4c0] sm:$0xff] }
 0x122   :  { %v1910_v31 = vmax.f32 %v1072_v25, 0.0 }
 0x123   :  { %v1909_v34 = vmax.f32 %v1067_v28, 0.0  ;;  %v7669_v36 = vpop.f32.mrb[36].mxu0  ;;  %8029 = vmatpush1.bf16.msra.mxu1 %v8028_v13 }
 0x124   :  { %v1082_v39 = vadd.f32 %v7669_v36, %v9773_v43  ;;  %v1076_v40 = vpop.f32.mrb[37].mxu0  ;;  %7827 = vmatmul.mubr.msk.f32.gmra.mrb[142].mxu0 %vm237_vm1, %v175_v30  ;;  %8030 = vmatprep.subr.bf16.mxu1 %v13274_v29  ;;  %v185_v30 = vld [vmem:[%s13265_s0 + $0x4c8] sm:$0xff]  ;;  %v4169_v36 = vld [vmem:[%s13266_s3 + $0x270] sm:$0xff] }
 0x125   :  { %v10150_v41 = vmax.f32 %v1909_v34, %v1910_v31  ;;  %v1077_v42 = vadd.f32 %v9773_v43, %v1076_v40  ;;  %7829 = vmatprep.mubr.msk.f32.mxu0 %vm237_vm1, %v176_v32  ;;  %v186_v32 = vld [vmem:[%s13265_s0 + $0x4d0] sm:$0xff] }
 0x126   :  { %v1912_v46 = vmax.f32 %v1082_v39, 0.0 }
 0x127   :  { %v1911_v48 = vmax.f32 %v1077_v42, 0.0  ;;  %v7672_v49 = vpop.f32.mrb[38].mxu0  ;;  %v8031_v42 = vpack.c.bf16 %v4170_v38, %v4169_v36 }
 0x128   :  { %v1092_v50 = vadd.f32 %v7672_v49, %v9773_v43  ;;  %v1086_v53 = vpop.f32.mrb[39].mxu0  ;;  %7830 = vmatmul.mubr.msk.f32.gmra.mrb[144].mxu0 %vm237_vm1, %v177_v51 }
 0x129   :  { %v10163_v0 = vmax.f32 %v1911_v48, %v1912_v46  ;;  %v1087_v54 = vadd.f32 %v9773_v43, %v1086_v53  ;;  %7832 = vmatprep.mubr.msk.f32.mxu0 %vm237_vm1, %v178_v47  ;;  %v187_v46 = vld [vmem:[%s13265_s0 + $0x4d8] sm:$0xff]  ;;  %v188_v48 = vld [vmem:[%s13265_s0 + $0x4e0] sm:$0xff]  ;;  %8032 = vmatpush1.bf16.msra.mxu1 %v8031_v42 }
 0x12a   :  { %v1914_v57 = vmax.f32 %v1092_v50, 0.0  ;;  %8033 = vmatprep.subr.bf16.mxu1 %v13274_v29  ;;  %v196_v42 = vld [vmem:[%s13265_s0 + $0x520] sm:$0xff] }
 0x12b   :  { %v1913_v63 = vmax.f32 %v1087_v54, 0.0  ;;  %v7675_v59 = vpop.f32.mrb[40].mxu0 }
 0x12c   :  { %v1102_v60 = vadd.f32 %v7675_v59, %v9773_v43  ;;  %v1096_v61 = vpop.f32.mrb[41].mxu0  ;;  %7833 = vmatmul.mubr.msk.f32.gmra.mrb[146].mxu0 %vm237_vm1, %v179_v55  ;;  %v190_v59 = vld [vmem:[%s13265_s0 + $0x4f0] sm:$0xff] }
 0x12d   :  { %v10175_v62 = vmax.f32 %v1913_v63, %v1914_v57  ;;  %v1097_v12 = vadd.f32 %v9773_v43, %v1096_v61  ;;  %7835 = vmatprep.mubr.msk.f32.mxu0 %vm237_vm1, %v180_v58  ;;  %v189_v63 = vld [vmem:[%s13265_s0 + $0x4e8] sm:$0xff] }
 0x12e   :  { %v1916_v4 = vmax.f32 %v1102_v60, 0.0 }
 0x12f   :  { %v1915_v16 = vmax.f32 %v1097_v12, 0.0  ;;  %v7678_v7 = vpop.f32.mrb[42].mxu0 }
 0x130   :  { %v1112_v10 = vadd.f32 %v7678_v7, %v9773_v43  ;;  %v1106_v11 = vpop.f32.mrb[43].mxu0  ;;  %7836 = vmatmul.mubr.msk.f32.gmra.mrb[148].mxu0 %vm237_vm1, %v181_v2  ;;  %v4171_v2 = vld [vmem:[%s13266_s3 + $0x280] sm:$0xff] }
 0x131   :  { %v10193_v14 = vmax.f32 %v1915_v16, %v1916_v4  ;;  %v1107_v24 = vadd.f32 %v9773_v43, %v1106_v11  ;;  %7838 = vmatprep.mubr.msk.f32.mxu0 %vm237_vm1, %v182_v5  ;;  %v4172_v4 = vld [vmem:[%s13266_s3 + $0x288] sm:$0xff]  ;;  %v192_v11 = vld [vmem:[%s13265_s0 + $0x500] sm:$0xff] }
 0x132   :  { %v1918_v18 = vmax.f32 %v1112_v10, 0.0  ;;  %v8034_v7 = vpack.c.bf16 %v4172_v4, %v4171_v2  ;;  %v4175_v2 = vld [vmem:[%s13266_s3 + $0x2a0] sm:$0xff]  ;;  %v4176_v4 = vld [vmem:[%s13266_s3 + $0x2a8] sm:$0xff] }
 0x133   :  { %v1917_v20 = vmax.f32 %v1107_v24, 0.0  ;;  %v7681_v21 = vpop.f32.mrb[44].mxu0 }
 0x134   :  { %v1122_v22 = vadd.f32 %v7681_v21, %v9773_v43  ;;  %v1116_v25 = vpop.f32.mrb[45].mxu0  ;;  %7839 = vmatmul.mubr.msk.f32.gmra.mrb[150].mxu0 %vm237_vm1, %v183_v17  ;;  %8035 = vmatpush1.bf16.msra.mxu1 %v8034_v7  ;;  %v8040_v7 = vpack.c.bf16 %v4176_v4, %v4175_v2  ;;  %v4179_v2 = vld [vmem:[%s13266_s3 + $0x2c0] sm:$0xff]  ;;  %v4180_v4 = vld [vmem:[%s13266_s3 + $0x2c8] sm:$0xff] }
 0x135   :  { %v2092_v26 = vmax.f32 %v1917_v20, %v1918_v18  ;;  %v1117_v28 = vadd.f32 %v9773_v43, %v1116_v25  ;;  %7841 = vmatprep.mubr.msk.f32.mxu0 %vm237_vm1, %v184_v19  ;;  %8036 = vmatprep.subr.bf16.mxu1 %v13274_v29  ;;  %v194_v25 = vld [vmem:[%s13265_s0 + $0x510] sm:$0xff] }
 0x136   :  { %v1920_v31 = vmax.f32 %v1122_v22, 0.0 }
 0x137   :  { %v10215_v37 = vmax.f32 %v10097_v3, %v2092_v26  ;;  %v1919_v33 = vmax.f32 %v1117_v28, 0.0  ;;  %v7684_v34 = vpop.f32.mrb[46].mxu0  ;;  %v4173_v26 = vld [vmem:[%s13266_s3 + $0x290] sm:$0xff]  ;;  %v4174_v28 = vld [vmem:[%s13266_s3 + $0x298] sm:$0xff] }
 0x138   :  { %v1132_v39 = vadd.f32 %v7684_v34, %v9773_v43  ;;  %v1126_v40 = vpop.f32.mrb[47].mxu0  ;;  %7842 = vmatmul.mubr.msk.f32.gmra.mrb[152].mxu0 %vm237_vm1, %v185_v30 }
 0x139   :  { %v2093_v51 = vmax.f32 %v1919_v33, %v1920_v31  ;;  %v1127_v3 = vadd.f32 %v9773_v43, %v1126_v40  ;;  %7844 = vmatprep.mubr.msk.f32.mxu0 %vm237_vm1, %v186_v32  ;;  %v8037_v33 = vpack.c.bf16 %v4174_v28, %v4173_v26  ;;  %v203_v28 = vld [vmem:[%s13265_s0 + $0x558] sm:$0xff] }
 0x13a   :  { %v1922_v47 = vmax.f32 %v1132_v39, 0.0 }
 0x13b   :  { %v10234_v49 = vmax.f32 %v10118_v15, %v2093_v51  ;;  %v1921_v50 = vmax.f32 %v1127_v3, 0.0  ;;  %v7687_v53 = vpop.f32.mrb[48].mxu0  ;;  %8038 = vmatpush1.bf16.msra.mxu1 %v8037_v33 }
 0x13c   :  { %v1142_v54 = vadd.f32 %v7687_v53, %v9773_v43  ;;  %v1136_v55 = vpop.f32.mrb[49].mxu0  ;;  %7845 = vmatmul.mubr.msk.f32.gmra.mrb[154].mxu0 %vm237_vm1, %v187_v46  ;;  %8039 = vmatprep.subr.bf16.mxu1 %v13274_v29 }
 0x13d   :  { %v2094_v57 = vmax.f32 %v1921_v50, %v1922_v47  ;;  %v1137_v58 = vadd.f32 %v9773_v43, %v1136_v55  ;;  %7847 = vmatprep.mubr.msk.f32.mxu0 %vm237_vm1, %v188_v48  ;;  %v198_v55 = vld [vmem:[%s13265_s0 + $0x530] sm:$0xff] }
 0x13e   :  { %v1924_v15 = vmax.f32 %v1142_v54, 0.0 }
 0x13f   :  { %v10248_v60 = vmax.f32 %v10132_v27, %v2094_v57  ;;  %v1923_v61 = vmax.f32 %v1137_v58, 0.0  ;;  %v7690_v12 = vpop.f32.mrb[50].mxu0  ;;  %8041 = vmatpush1.bf16.msra.mxu1 %v8040_v7  ;;  %v8046_v7 = vpack.c.bf16 %v4180_v4, %v4179_v2 }
 0x140   :  { %v1152_v5 = vadd.f32 %v7690_v12, %v9773_v43  ;;  %v1146_v16 = vpop.f32.mrb[51].mxu0  ;;  %7848 = vmatmul.mubr.msk.f32.gmra.mrb[156].mxu0 %vm237_vm1, %v189_v63  ;;  %8042 = vmatprep.subr.bf16.mxu1 %v13274_v29 }
 0x141   :  { %v2095_v8 = vmax.f32 %v1923_v61, %v1924_v15  ;;  %v1147_v27 = vadd.f32 %v9773_v43, %v1146_v16  ;;  %4723 = vmatprep.mubr.f32.mxu1 %v10248_v60  ;;  %7850 = vmatprep.mubr.msk.f32.mxu0 %vm237_vm1, %v190_v59  ;;  %v200_v16 = vld [vmem:[%s13265_s0 + $0x540] sm:$0xff] }
 0x142   :  { %v1926_v10 = vmax.f32 %v1152_v5, 0.0  ;;  %4724 = vmatmul.mubr.f32.gmra.mrb[24].mxu1 %v10234_v49 }
 0x143   :  { %v10269_v13 = vmax.f32 %v10150_v41, %v2095_v8  ;;  %v1925_v24 = vmax.f32 %v1147_v27, 0.0  ;;  %v7693_v17 = vpop.f32.mrb[52].mxu0  ;;  %v193_v41 = vld [vmem:[%s13265_s0 + $0x508] sm:$0xff] }
 0x144   :  { %v1162_v18 = vadd.f32 %v7693_v17, %v9773_v43  ;;  %v1156_v19 = vpop.f32.mrb[53].mxu0  ;;  %7851 = vmatmul.mubr.msk.f32.gmra.mrb[158].mxu0 %vm237_vm1, %v191_v9  ;;  %v201_v17 = vld [vmem:[%s13265_s0 + $0x548] sm:$0xff] }
 0x145   :  { %v2096_v20 = vmax.f32 %v1925_v24, %v1926_v10  ;;  %v1157_v21 = vadd.f32 %v9773_v43, %v1156_v19  ;;  %4728 = vmatprep.mubr.f32.mxu1 %v10269_v13  ;;  %7853 = vmatprep.mubr.msk.f32.mxu0 %vm237_vm1, %v192_v11  ;;  %v202_v19 = vld [vmem:[%s13265_s0 + $0x550] sm:$0xff] }
 0x146   :  { %v1928_v22 = vmax.f32 %v1162_v18, 0.0  ;;  %4729 = vmatmul.mubr.f32.gmra.mrb[26].mxu1 %v10248_v60 }
 0x147   :  { %v10291_v30 = vmax.f32 %v10163_v0, %v2096_v20  ;;  %v1927_v31 = vmax.f32 %v1157_v21, 0.0  ;;  %v7696_v32 = vpop.f32.mrb[54].mxu0  ;;  %v195_v0 = vld [vmem:[%s13265_s0 + $0x518] sm:$0xff] }
 0x148   :  { %v1172_v34 = vadd.f32 %v7696_v32, %v9773_v43  ;;  %v1166_v36 = vpop.f32.mrb[55].mxu0  ;;  %7854 = vmatmul.mubr.msk.f32.gmra.mrb[160].mxu0 %vm237_vm1, %v193_v41  ;;  %v4178_v32 = vld [vmem:[%s13266_s3 + $0x2b8] sm:$0xff] }
 0x149   :  { %v2097_v38 = vmax.f32 %v1927_v31, %v1928_v22  ;;  %v1167_v39 = vadd.f32 %v9773_v43, %v1166_v36  ;;  %4733 = vmatprep.mubr.f32.mxu1 %v10291_v30  ;;  %7856 = vmatprep.mubr.msk.f32.mxu0 %vm237_vm1, %v194_v25  ;;  %v4177_v31 = vld [vmem:[%s13266_s3 + $0x2b0] sm:$0xff] }
 0x14a   :  { %v1930_v40 = vmax.f32 %v1172_v34, 0.0  ;;  %4734 = vmatmul.mubr.f32.gmra.mrb[28].mxu1 %v10269_v13  ;;  %v204_v34 = vld [vmem:[%s13265_s0 + $0x560] sm:$0xff] }
 0x14b   :  { %v10306_v51 = vmax.f32 %v10175_v62, %v2097_v38  ;;  %v1929_v3 = vmax.f32 %v1167_v39, 0.0  ;;  %v7699_v46 = vpop.f32.mrb[56].mxu0  ;;  %v197_v62 = vld [vmem:[%s13265_s0 + $0x528] sm:$0xff]  ;;  %v10380_v39 = vld [vmem:[%s13267_s2] ss:$0 sm:$0xff] }
 0x14c   :  { %v1182_v47 = vadd.f32 %v7699_v46, %v9773_v43  ;;  %v1176_v48 = vpop.f32.mrb[57].mxu0  ;;  %7857 = vmatmul.mubr.msk.f32.gmra.mrb[162].mxu0 %vm237_vm1, %v195_v0  ;;  %v205_v46 = vld [vmem:[%s13265_s0 + $0x568] sm:$0xff] }
 0x14d   :  { %v2098_v50 = vmax.f32 %v1929_v3, %v1930_v40  ;;  %v1177_v53 = vadd.f32 %v9773_v43, %v1176_v48  ;;  %4738 = vmatprep.mubr.f32.mxu1 %v10306_v51  ;;  %7859 = vmatprep.mubr.msk.f32.mxu0 %vm237_vm1, %v196_v42  ;;  %v206_v48 = vld [vmem:[%s13265_s0 + $0x570] sm:$0xff] }
 0x14e   :  { %v1932_v54 = vmax.f32 %v1182_v47, 0.0  ;;  %4739 = vmatmul.mubr.f32.gmra.mrb[30].mxu1 %v10291_v30 }
 0x14f   :  { %v10322_v57 = vmax.f32 %v10193_v14, %v2098_v50  ;;  %v1931_v58 = vmax.f32 %v1177_v53, 0.0  ;;  %v7702_v63 = vpop.f32.mrb[58].mxu0  ;;  %v199_v14 = vld [vmem:[%s13265_s0 + $0x538] sm:$0xff] }
 0x150   :  { %v1192_v15 = vadd.f32 %v7702_v63, %v9773_v43  ;;  %v1186_v59 = vpop.f32.mrb[59].mxu0  ;;  %7860 = vmatmul.mubr.msk.f32.gmra.mrb[164].mxu0 %vm237_vm1, %v197_v62  ;;  %v207_v63 = vld [vmem:[%s13265_s0 + $0x578] sm:$0xff] }
 0x151   :  { %v10326_v61 = vmax.f32 %v1931_v58, %v1932_v54  ;;  %v1187_v12 = vadd.f32 %v9773_v43, %v1186_v59  ;;  %4743 = vmatprep.mubr.f32.mxu1 %v10322_v57  ;;  %7862 = vmatprep.mubr.msk.f32.mxu0 %vm237_vm1, %v198_v55  ;;  %v208_v59 = vld [vmem:[%s13265_s0 + $0x580] sm:$0xff] }
 0x152   :  { %v1934_v5 = vmax.f32 %v1192_v15, 0.0  ;;  %4744 = vmatmul.mubr.f32.gmra.mrb[32].mxu1 %v10306_v51 }
 0x153   :  { %v1933_v8 = vmax.f32 %v1187_v12, 0.0  ;;  %v7705_v27 = vpop.f32.mrb[60].mxu0  ;;  %4748 = vmatprep.mubr.f32.mxu1 %v13276_v45 }
 0x154   :  { %v1202_v9 = vadd.f32 %v7705_v27, %v9773_v43  ;;  %v1196_v10 = vpop.f32.mrb[61].mxu0  ;;  %7863 = vmatmul.mubr.msk.f32.gmra.mrb[166].mxu0 %vm237_vm1, %v199_v14 }
 0x155   :  { %v10347_v11 = vmax.f32 %v1933_v8, %v1934_v5  ;;  %v1197_v24 = vadd.f32 %v9773_v43, %v1196_v10  ;;  %7865 = vmatprep.mubr.msk.f32.mxu0 %vm237_vm1, %v200_v16 }
 0x156   :  { %v1936_v18 = vmax.f32 %v1202_v9, 0.0  ;;  %4749 = vmatmul.mubr.f32.gmra.mrb[34].mxu1 %v10322_v57  ;;  %v209_v9 = vld [vmem:[%s13265_s0 + $0x588] sm:$0xff] }
 0x157   :  { %v1935_v20 = vmax.f32 %v1197_v24, 0.0  ;;  %v7708_v21 = vpop.f32.mrb[62].mxu0  ;;  %v210_v24 = vld [vmem:[%s13265_s0 + $0x590] sm:$0xff] }
 0x158   :  { %v1212_v41 = vadd.f32 %v7708_v21, %v9773_v43  ;;  %v1206_v22 = vpop.f32.mrb[63].mxu0  ;;  %7866 = vmatmul.mubr.msk.f32.gmra.mrb[168].mxu0 %vm237_vm1, %v201_v17 }
 0x159   :  { %v10361_v25 = vmax.f32 %v1935_v20, %v1936_v18  ;;  %v1207_v26 = vadd.f32 %v9773_v43, %v1206_v22  ;;  %7868 = vmatprep.mubr.msk.f32.mxu0 %vm237_vm1, %v202_v19  ;;  %v8043_v43 = vpack.c.bf16 %v4178_v32, %v4177_v31  ;;  %v211_v22 = vld [vmem:[%s13265_s0 + $0x598] sm:$0xff] }
 0x15a   :  { %v1938_v33 = vmax.f32 %v1212_v41, 0.0 }
 0x15b   :  { %v1937_v36 = vmax.f32 %v1207_v26, 0.0  ;;  %v7711_v38 = vpop.f32.mrb[64].mxu0  ;;  %8044 = vmatpush1.bf16.msra.mxu1 %v8043_v43 }
 0x15c   :  { %v1222_v0 = vadd.f32 %v10380_v39, %v7711_v38  ;;  %v1216_v40 = vpop.f32.mrb[65].mxu0  ;;  %7869 = vmatmul.mubr.msk.f32.gmra.mrb[170].mxu0 %vm237_vm1, %v203_v28  ;;  %8045 = vmatprep.subr.bf16.mxu1 %v13274_v29  ;;  %v212_v28 = vld [vmem:[%s13265_s0 + $0x5a0] sm:$0xff] }
 0x15d   :  { %v10384_v42 = vmax.f32 %v1937_v36, %v1938_v33  ;;  %v1217_v3 = vadd.f32 %v10380_v39, %v1216_v40  ;;  %7871 = vmatprep.mubr.msk.f32.mxu0 %vm237_vm1, %v204_v34  ;;  %v4181_v33 = vld [vmem:[%s13266_s3 + $0x2d0] sm:$0xff]  ;;  %v4182_v34 = vld [vmem:[%s13266_s3 + $0x2d8] sm:$0xff] }
 0x15e   :  { %v1940_v47 = vmax.f32 %v1222_v0, 0.0  ;;  %v8049_v38 = vpack.c.bf16 %v4182_v34, %v4181_v33  ;;  %v220_v34 = vld [vmem:[%s13265_s0 + $0x5e0] sm:$0xff] }
 0x15f   :  { %v1939_v50 = vmax.f32 %v1217_v3, 0.0  ;;  %v7714_v53 = vpop.f32.mrb[66].mxu0  ;;  %8047 = vmatpush1.bf16.msra.mxu1 %v8046_v7  ;;  %v213_v3 = vld [vmem:[%s13265_s0 + $0x5a8] sm:$0xff] }
 0x160   :  { %v1232_v62 = vadd.f32 %v10380_v39, %v7714_v53  ;;  %v1226_v54 = vpop.f32.mrb[67].mxu0  ;;  %7872 = vmatmul.mubr.msk.f32.gmra.mrb[172].mxu0 %vm237_vm1, %v205_v46  ;;  %8048 = vmatprep.subr.bf16.mxu1 %v13274_v29 }
 0x161   :  { %v10397_v55 = vmax.f32 %v1939_v50, %v1940_v47  ;;  %v1227_v58 = vadd.f32 %v10380_v39, %v1226_v54  ;;  %7874 = vmatprep.mubr.msk.f32.mxu0 %vm237_vm1, %v206_v48  ;;  %v214_v47 = vld [vmem:[%s13265_s0 + $0x5b0] sm:$0xff] }
 0x162   :  { %v1942_v15 = vmax.f32 %v1232_v62, 0.0 }
 0x163   :  { %v1941_v12 = vmax.f32 %v1227_v58, 0.0  ;;  %v7717_v14 = vpop.f32.mrb[68].mxu0  ;;  %8050 = vmatpush1.bf16.msra.mxu1 %v8049_v38 }
 0x164   :  { %v1242_v5 = vadd.f32 %v10380_v39, %v7717_v14  ;;  %v1236_v16 = vpop.f32.mrb[69].mxu0  ;;  %7875 = vmatmul.mubr.msk.f32.gmra.mrb[174].mxu0 %vm237_vm1, %v207_v63  ;;  %8051 = vmatprep.subr.bf16.mxu1 %v13274_v29 }
 0x165   :  { %v10415_v8 = vmax.f32 %v1941_v12, %v1942_v15  ;;  %v1237_v27 = vadd.f32 %v10380_v39, %v1236_v16  ;;  %7877 = vmatprep.mubr.msk.f32.mxu0 %vm237_vm1, %v208_v59  ;;  %v215_v15 = vld [vmem:[%s13265_s0 + $0x5b8] sm:$0xff]  ;;  %v216_v59 = vld [vmem:[%s13265_s0 + $0x5c0] sm:$0xff] }
 0x166   :  { %v1944_v10 = vmax.f32 %v1242_v5, 0.0 }
 0x167   :  { %v1943_v17 = vmax.f32 %v1237_v27, 0.0  ;;  %v7720_v18 = vpop.f32.mrb[70].mxu0  ;;  %v217_v27 = vld [vmem:[%s13265_s0 + $0x5c8] sm:$0xff] }
 0x168   :  { %v1252_v19 = vadd.f32 %v10380_v39, %v7720_v18  ;;  %v1246_v20 = vpop.f32.mrb[71].mxu0  ;;  %7878 = vmatmul.mubr.msk.f32.gmra.mrb[176].mxu0 %vm237_vm1, %v209_v9  ;;  %v4183_v18 = vld [vmem:[%s13266_s3 + $0x2e0] sm:$0xff] }
 0x169   :  { %v10428_v21 = vmax.f32 %v1943_v17, %v1944_v10  ;;  %v1247_v41 = vadd.f32 %v10380_v39, %v1246_v20  ;;  %7880 = vmatprep.mubr.msk.f32.mxu0 %vm237_vm1, %v210_v24 }
 0x16a   :  { %v1946_v26 = vmax.f32 %v1252_v19, 0.0  ;;  %v4184_v19 = vld [vmem:[%s13266_s3 + $0x2e8] sm:$0xff] }
 0x16b   :  { %v1945_v31 = vmax.f32 %v1247_v41, 0.0  ;;  %v7723_v32 = vpop.f32.mrb[72].mxu0 }
 0x16c   :  { %v1262_v43 = vadd.f32 %v10380_v39, %v7723_v32  ;;  %v1256_v36 = vpop.f32.mrb[73].mxu0  ;;  %7881 = vmatmul.mubr.msk.f32.gmra.mrb[178].mxu0 %vm237_vm1, %v211_v22  ;;  %v8052_v22 = vpack.c.bf16 %v4184_v19, %v4183_v18  ;;  %v4186_v32 = vld [vmem:[%s13266_s3 + $0x2f8] sm:$0xff] }
 0x16d   :  { %v2106_v0 = vmax.f32 %v1945_v31, %v1946_v26  ;;  %v1257_v40 = vadd.f32 %v10380_v39, %v1256_v36  ;;  %7883 = vmatprep.mubr.msk.f32.mxu0 %vm237_vm1, %v212_v28  ;;  %v219_v28 = vld [vmem:[%s13265_s0 + $0x5d8] sm:$0xff]  ;;  %v4185_v31 = vld [vmem:[%s13266_s3 + $0x2f0] sm:$0xff] }
 0x16e   :  { %v1948_v46 = vmax.f32 %v1262_v43, 0.0  ;;  %8053 = vmatpush1.bf16.msra.mxu1 %v8052_v22 }
 0x16f   :  { %v10455_v48 = vmax.f32 %v10326_v61, %v2106_v0  ;;  %v1947_v50 = vmax.f32 %v1257_v40, 0.0  ;;  %v7726_v53 = vpop.f32.mrb[74].mxu0  ;;  %v8055_v0 = vpack.c.bf16 %v4186_v32, %v4185_v31  ;;  %8054 = vmatprep.subr.bf16.mxu1 %v13274_v29  ;;  %v4315_v31 = vld [vmem:[%s13266_s3 + $0x700] sm:$0xff]  ;;  %v4316_v32 = vld [vmem:[%s13266_s3 + $0x708] sm:$0xff] }
 0x170   :  { %v1272_v62 = vadd.f32 %v10380_v39, %v7726_v53  ;;  %v1266_v54 = vpop.f32.mrb[75].mxu0  ;;  %7884 = vmatmul.mubr.msk.f32.gmra.mrb[180].mxu0 %vm237_vm1, %v213_v3  ;;  %v222_v53 = vld [vmem:[%s13265_s0 + $0x5f0] sm:$0xff] }
 0x171   :  { %v2107_v58 = vmax.f32 %v1947_v50, %v1948_v46  ;;  %v1267_v63 = vadd.f32 %v10380_v39, %v1266_v54  ;;  %7886 = vmatprep.mubr.msk.f32.mxu0 %vm237_vm1, %v214_v47 }
 0x172   :  { %v1950_v61 = vmax.f32 %v1272_v62, 0.0  ;;  %8056 = vmatpush1.bf16.msra.mxu1 %v8055_v0 }
 0x173   :  { %v10469_v12 = vmax.f32 %v10347_v11, %v2107_v58  ;;  %v1949_v14 = vmax.f32 %v1267_v63, 0.0  ;;  %v7729_v2 = vpop.f32.mrb[76].mxu0  ;;  %v218_v11 = vld [vmem:[%s13265_s0 + $0x5d0] sm:$0xff]  ;;  %8057 = vmatprep.subr.bf16.mxu1 %v13274_v29 }
 0x174   :  { %v1282_v4 = vadd.f32 %v10380_v39, %v7729_v2  ;;  %v1276_v5 = vpop.f32.mrb[77].mxu0  ;;  %7887 = vmatmul.mubr.msk.f32.gmra.mrb[182].mxu0 %vm237_vm1, %v215_v15  ;;  %v224_v2 = vld [vmem:[%s13265_s0 + $0x600] sm:$0xff] }
 0x175   :  { %v2108_v16 = vmax.f32 %v1949_v14, %v1950_v61  ;;  %v1277_v7 = vadd.f32 %v10380_v39, %v1276_v5  ;;  %7889 = vmatprep.mubr.msk.f32.mxu0 %vm237_vm1, %v216_v59 }
 0x176   :  { %v1952_v9 = vmax.f32 %v1282_v4, 0.0 }
 0x177   :  { %v10482_v10 = vmax.f32 %v10361_v25, %v2108_v16  ;;  %v1951_v24 = vmax.f32 %v1277_v7, 0.0  ;;  %v7732_v17 = vpop.f32.mrb[78].mxu0 }
 0x178   :  { %v1292_v20 = vadd.f32 %v10380_v39, %v7732_v17  ;;  %v1286_v41 = vpop.f32.mrb[79].mxu0  ;;  %7890 = vmatmul.mubr.msk.f32.gmra.mrb[184].mxu0 %vm237_vm1, %v217_v27  ;;  %v226_v17 = vld [vmem:[%s13265_s0 + $0x610] sm:$0xff] }
 0x179   :  { %v2109_v26 = vmax.f32 %v1951_v24, %v1952_v9  ;;  %v1287_v25 = vadd.f32 %v10380_v39, %v1286_v41  ;;  %4753 = vmatprep.mubr.f32.mxu1 %v10482_v10  ;;  %7892 = vmatprep.mubr.msk.f32.mxu0 %vm237_vm1, %v218_v11  ;;  %v225_v24 = vld [vmem:[%s13265_s0 + $0x608] sm:$0xff] }
 0x17a   :  { %v1954_v33 = vmax.f32 %v1292_v20, 0.0  ;;  %4754 = vmatmul.mubr.f32.gmra.mrb[36].mxu1 %v10469_v12 }
 0x17b   :  { %v10509_v43 = vmax.f32 %v10384_v42, %v2109_v26  ;;  %v1953_v36 = vmax.f32 %v1287_v25, 0.0  ;;  %v7735_v38 = vpop.f32.mrb[80].mxu0  ;;  %v221_v42 = vld [vmem:[%s13265_s0 + $0x5e8] sm:$0xff] }
 0x17c   :  { %v1302_v40 = vadd.f32 %v10380_v39, %v7735_v38  ;;  %v1296_v3 = vpop.f32.mrb[81].mxu0  ;;  %7893 = vmatmul.mubr.msk.f32.gmra.mrb[186].mxu0 %vm237_vm1, %v219_v28 }
 0x17d   :  { %v2110_v46 = vmax.f32 %v1953_v36, %v1954_v33  ;;  %v1297_v47 = vadd.f32 %v10380_v39, %v1296_v3  ;;  %4758 = vmatprep.mubr.f32.mxu1 %v10509_v43  ;;  %7895 = vmatprep.mubr.msk.f32.mxu0 %vm237_vm1, %v220_v34  ;;  %v10582_v3 = vpack.c.bf16 %v4316_v32, %v4315_v31  ;;  %v4323_v32 = vld [vmem:[%s13266_s3 + $0x740] sm:$0xff] }
 0x17e   :  { %v1956_v50 = vmax.f32 %v1302_v40, 0.0  ;;  %4759 = vmatmul.mubr.f32.gmra.mrb[38].mxu1 %v10482_v10 }
 0x17f   :  { %v10525_v62 = vmax.f32 %v10397_v55, %v2110_v46  ;;  %v1955_v54 = vmax.f32 %v1297_v47, 0.0  ;;  %v7738_v58 = vpop.f32.mrb[82].mxu0  ;;  %v223_v55 = vld [vmem:[%s13265_s0 + $0x5f8] sm:$0xff]  ;;  %v4317_v47 = vld [vmem:[%s13266_s3 + $0x710] sm:$0xff] }
 0x180   :  { %v1312_v63 = vadd.f32 %v10380_v39, %v7738_v58  ;;  %v1306_v15 = vpop.f32.mrb[83].mxu0  ;;  %7896 = vmatmul.mubr.msk.f32.gmra.mrb[188].mxu0 %vm237_vm1, %v221_v42  ;;  %v4318_v42 = vld [vmem:[%s13266_s3 + $0x718] sm:$0xff] }
 0x181   :  { %v2111_v61 = vmax.f32 %v1955_v54, %v1956_v50  ;;  %v1307_v59 = vadd.f32 %v10380_v39, %v1306_v15  ;;  %4763 = vmatprep.mubr.f32.mxu1 %v10525_v62  ;;  %7898 = vmatprep.mubr.msk.f32.mxu0 %vm237_vm1, %v222_v53 }
 0x182   :  { %v1958_v14 = vmax.f32 %v1312_v63, 0.0  ;;  %4764 = vmatmul.mubr.f32.gmra.mrb[40].mxu1 %v10509_v43 }
 0x183   :  { %v10541_v4 = vmax.f32 %v10415_v8, %v2111_v61  ;;  %v1957_v5 = vmax.f32 %v1307_v59, 0.0  ;;  %v7741_v16 = vpop.f32.mrb[84].mxu0  ;;  %v10598_v61 = vpack.c.bf16 %v4318_v42, %v4317_v47 }
 0x184   :  { %v1322_v7 = vadd.f32 %v10380_v39, %v7741_v16  ;;  %v1316_v27 = vpop.f32.mrb[85].mxu0  ;;  %7899 = vmatmul.mubr.msk.f32.gmra.mrb[190].mxu0 %vm237_vm1, %v223_v55  ;;  %v4319_v55 = vld [vmem:[%s13266_s3 + $0x720] sm:$0xff] }
 0x185   :  { %v2112_v9 = vmax.f32 %v1957_v5, %v1958_v14  ;;  %v1317_v11 = vadd.f32 %v10380_v39, %v1316_v27  ;;  %4768 = vmatprep.mubr.f32.mxu1 %v10541_v4  ;;  %7901 = vmatprep.mubr.msk.f32.mxu0 %vm237_vm1, %v224_v2  ;;  %13293 = vst [vmem:[#allocation5_spill] sm:$0xff] %v10598_v61  ;;  %v4320_v14 = vld [vmem:[%s13266_s3 + $0x728] sm:$0xff] }
 0x186   :  { %v1960_v8 = vmax.f32 %v1322_v7, 0.0  ;;  %4769 = vmatmul.mubr.f32.gmra.mrb[42].mxu1 %v10525_v62 }
 0x187   :  { %v10556_v18 = vmax.f32 %v10428_v21, %v2112_v9  ;;  %v1959_v19 = vmax.f32 %v1317_v11, 0.0  ;;  %v7744_v20 = vpop.f32.mrb[86].mxu0  ;;  %v227_v21 = vld [vmem:[%s13265_s0 + $0x618] sm:$0xff]  ;;  %v10614_v11 = vpack.c.bf16 %v4320_v14, %v4319_v55 }
 0x188   :  { %v1332_v41 = vadd.f32 %v10380_v39, %v7744_v20  ;;  %v1326_v22 = vpop.f32.mrb[87].mxu0  ;;  %7902 = vmatmul.mubr.msk.f32.gmra.mrb[192].mxu0 %vm237_vm1, %v225_v24 }
 0x189   :  { %v10560_v26 = vmax.f32 %v1959_v19, %v1960_v8  ;;  %v1327_v25 = vadd.f32 %v10380_v39, %v1326_v22  ;;  %4773 = vmatprep.mubr.f32.mxu1 %v10556_v18  ;;  %7904 = vmatprep.mubr.msk.f32.mxu0 %vm237_vm1, %v226_v17  ;;  %13294 = vst [vmem:[#allocation6_spill] sm:$0xff] %v10614_v11  ;;  %v4321_v8 = vld [vmem:[%s13266_s3 + $0x730] sm:$0xff]  ;;  %v4322_v17 = vld [vmem:[%s13266_s3 + $0x738] sm:$0xff] }
 0x18a   :  { %v1962_v28 = vmax.f32 %v1332_v41, 0.0  ;;  %4774 = vmatmul.mubr.f32.gmra.mrb[44].mxu1 %v10541_v4 }
 0x18b   :  { %v1961_v33 = vmax.f32 %v1327_v25, 0.0  ;;  %v7747_v34 = vpop.f32.mrb[88].mxu0  ;;  %4778 = vmatprep.mubr.f32.mxu1 %v13276_v45 }
 0x18c   :  { %v1342_v36 = vadd.f32 %v10380_v39, %v7747_v34  ;;  %v1336_v38 = vpop.f32.mrb[89].mxu0  ;;  %7905 = vmatmul.mubr.msk.f32.gmra.mrb[194].mxu0 %vm237_vm1, %v227_v21 }
 0x18d   :  { %v10578_v0 = vmax.f32 %v1961_v33, %v1962_v28  ;;  %v1337_v40 = vadd.f32 %v10380_v39, %v1336_v38  ;;  %4418 = vmatprep.mubr.f32.mxu0 %v13276_v45  ;;  %v10630_v28 = vpack.c.bf16 %v4322_v17, %v4321_v8  ;;  %v4324_v33 = vld [vmem:[%s13266_s3 + $0x748] sm:$0xff] }
 0x18e   :  { %v1964_v46 = vmax.f32 %v1342_v36, 0.0  ;;  %4779 = vmatmul.mubr.f32.gmra.mrb[46].mxu1 %v10556_v18  ;;  %v10646_v42 = vpack.c.bf16 %v4324_v33, %v4323_v32  ;;  %v4330_v32 = vld [vmem:[%s13266_s3 + $0x778] sm:$0xff] }
 0x18f   :  { %v1963_v50 = vmax.f32 %v1337_v40, 0.0  ;;  %v7750_v53 = vpop.f32.mrb[90].mxu0  ;;  %13295 = vst [vmem:[#allocation7_spill] sm:$0xff] %v10630_v28 }
 0x190   :  { %v1352_v54 = vadd.f32 %v10380_v39, %v7750_v53  ;;  %v1346_v58 = vpop.f32.mrb[91].mxu0  ;;  %4419 = vmatmul.mubr.f32.vlgmr.msra.gmra.mrb[196].mxu0 %v13276_v45  ;;  %13296 = vst [vmem:[#allocation8_spill] sm:$0xff] %v10646_v42  ;;  %v4325_v53 = vld [vmem:[%s13266_s3 + $0x750] sm:$0xff] }
 0x191   :  { %v10593_v63 = vmax.f32 %v1963_v50, %v1964_v46  ;;  %v1347_v15 = vadd.f32 %v10380_v39, %v1346_v58  ;;  %4423 = vmatprep.mubr.f32.mxu0 %v13276_v45  ;;  %8251 = vmatpush1.bf16.msra.mxu0 %v10582_v3 }
 0x192   :  { %v1966_v59 = vmax.f32 %v1352_v54, 0.0  ;;  %8252 = vmatprep.subr.bf16.mxu0 %v13274_v29  ;;  %v4326_v54 = vld [vmem:[%s13266_s3 + $0x758] sm:$0xff] }
 0x193   :  { %v1965_v2 = vmax.f32 %v1347_v15, 0.0  ;;  %v7753_v5 = vpop.f32.mrb[92].mxu0 }
 0x194   :  { %v1362_v16 = vadd.f32 %v10380_v39, %v7753_v5  ;;  %v1356_v7 = vpop.f32.mrb[93].mxu0  ;;  %4424 = vmatmul.mubr.f32.gmra.mrb[198].mxu0 %v13276_v45  ;;  %v10662_v5 = vpack.c.bf16 %v4326_v54, %v4325_v53 }
 0x195   :  { %v10609_v27 = vmax.f32 %v1965_v2, %v1966_v59  ;;  %v1357_v9 = vadd.f32 %v10380_v39, %v1356_v7  ;;  %4428 = vmatprep.mubr.f32.mxu0 %v13276_v45  ;;  %8254 = vmatpush1.bf16.msra.mxu0 %v10598_v61  ;;  %v4327_v7 = vld [vmem:[%s13266_s3 + $0x760] sm:$0xff] }
 0x196   :  { %v1968_v24 = vmax.f32 %v1362_v16, 0.0  ;;  %8255 = vmatprep.subr.bf16.mxu0 %v13274_v29  ;;  %13297 = vst [vmem:[#allocation9_spill] sm:$0xff] %v10662_v5 }
 0x197   :  { %v1967_v19 = vmax.f32 %v1357_v9, 0.0  ;;  %v7756_v20 = vpop.f32.mrb[94].mxu0  ;;  %v4328_v9 = vld [vmem:[%s13266_s3 + $0x768] sm:$0xff] }
 0x198   :  { %v1372_v41 = vadd.f32 %v10380_v39, %v7756_v20  ;;  %v1366_v22 = vpop.f32.mrb[95].mxu0  ;;  %4429 = vmatmul.mubr.f32.gmra.mrb[200].mxu0 %v13276_v45 }
 0x199   :  { %v10625_v25 = vmax.f32 %v1967_v19, %v1968_v24  ;;  %v1367_v21 = vadd.f32 %v10380_v39, %v1366_v22  ;;  %4433 = vmatprep.mubr.f32.mxu0 %v13276_v45  ;;  %8257 = vmatpush1.bf16.msra.mxu0 %v10614_v11  ;;  %v10676_v22 = vpack.c.bf16 %v4328_v9, %v4327_v7 }
 0x19a   :  { %v1970_v31 = vmax.f32 %v1372_v41, 0.0  ;;  %8258 = vmatprep.subr.bf16.mxu0 %v13274_v29 }
 0x19b   :  { %v1969_v34 = vmax.f32 %v1367_v21, 0.0  ;;  %v7759_v36 = vpop.f32.mrb[96].mxu0  ;;  %13298 = vst [vmem:[#allocation10_spill] sm:$0xff] %v10676_v22 }
 0x19c   :  { %v1382_v38 = vadd.f32 %v10380_v39, %v7759_v36  ;;  %v1376_v40 = vpop.f32.mrb[97].mxu0  ;;  %4434 = vmatmul.mubr.f32.gmra.mrb[202].mxu0 %v13276_v45 }
 0x19d   :  { %v10641_v46 = vmax.f32 %v1969_v34, %v1970_v31  ;;  %v1377_v47 = vadd.f32 %v10380_v39, %v1376_v40  ;;  %4438 = vmatprep.mubr.f32.mxu0 %v13276_v45  ;;  %8260 = vmatpush1.bf16.msra.mxu0 %v10630_v28  ;;  %v4329_v31 = vld [vmem:[%s13266_s3 + $0x770] sm:$0xff] }
 0x19e   :  { %v1972_v50 = vmax.f32 %v1382_v38, 0.0  ;;  %8261 = vmatprep.subr.bf16.mxu0 %v13274_v29  ;;  %v10693_v53 = vpack.c.bf16 %v4330_v32, %v4329_v31 }
 0x19f   :  { %v1971_v58 = vmax.f32 %v1377_v47, 0.0  ;;  %v7762_v15 = vpop.f32.mrb[98].mxu0 }
 0x1a0   :  { %v1392_v59 = vadd.f32 %v10380_v39, %v7762_v15  ;;  %v1386_v55 = vpop.f32.mrb[99].mxu0  ;;  %4439 = vmatmul.mubr.f32.gmra.mrb[204].mxu0 %v13276_v45  ;;  %13299 = vst [vmem:[#allocation11_spill] sm:$0xff] %v10693_v53 }
 0x1a1   :  { %v10657_v14 = vmax.f32 %v1971_v58, %v1972_v50  ;;  %v1387_v2 = vadd.f32 %v10380_v39, %v1386_v55  ;;  %4443 = vmatprep.mubr.f32.mxu0 %v13276_v45  ;;  %8263 = vmatpush1.bf16.msra.mxu0 %v10646_v42  ;;  %v4332_v55 = vld [vmem:[%s13266_s3 + $0x788] sm:$0xff] }
 0x1a2   :  { %v1974_v16 = vmax.f32 %v1392_v59, 0.0  ;;  %8264 = vmatprep.subr.bf16.mxu0 %v13274_v29  ;;  %v4331_v59 = vld [vmem:[%s13266_s3 + $0x780] sm:$0xff] }
 0x1a3   :  { %v1973_v24 = vmax.f32 %v1387_v2, 0.0  ;;  %v7765_v8 = vpop.f32.mrb[100].mxu0 }
 0x1a4   :  { %v1402_v17 = vadd.f32 %v10380_v39, %v7765_v8  ;;  %v1396_v19 = vpop.f32.mrb[101].mxu0  ;;  %4444 = vmatmul.mubr.f32.gmra.mrb[206].mxu0 %v13276_v45 }
 0x1a5   :  { %v2120_v20 = vmax.f32 %v1973_v24, %v1974_v16  ;;  %v1397_v41 = vadd.f32 %v10380_v39, %v1396_v19  ;;  %4448 = vmatprep.mubr.f32.mxu0 %v9970_v44  ;;  %8266 = vmatpush1.bf16.msra.mxu0 %v10662_v5  ;;  %v10711_v24 = vpack.c.bf16 %v4332_v55, %v4331_v59 }
 0x1a6   :  { %v1976_v21 = vmax.f32 %v1402_v17, 0.0  ;;  %8267 = vmatprep.subr.bf16.mxu0 %v13274_v29 }
 0x1a7   :  { %v10686_v33 = vmax.f32 %v10560_v26, %v2120_v20  ;;  %v1975_v34 = vmax.f32 %v1397_v41, 0.0  ;;  %v7768_v36 = vpop.f32.mrb[102].mxu0  ;;  %13300 = vst [vmem:[#allocation12_spill] sm:$0xff] %v10711_v24  ;;  %v4333_v20 = vld [vmem:[%s13266_s3 + $0x790] sm:$0xff]  ;;  %v4334_v41 = vld [vmem:[%s13266_s3 + $0x798] sm:$0xff] }
 0x1a8   :  { %v1412_v38 = vadd.f32 %v10380_v39, %v7768_v36  ;;  %v1406_v40 = vpop.f32.mrb[103].mxu0  ;;  %4449 = vmatmul.mubr.f32.gmra.mrb[208].mxu0 %v13276_v45  ;;  %v10729_v36 = vpack.c.bf16 %v4334_v41, %v4333_v20 }
 0x1a9   :  { %v2121_v47 = vmax.f32 %v1975_v34, %v1976_v21  ;;  %v1407_v50 = vadd.f32 %v10380_v39, %v1406_v40  ;;  %4453 = vmatprep.mubr.f32.mxu0 %v9990_v56  ;;  %8269 = vmatpush1.bf16.msra.mxu0 %v10676_v22 }
 0x1aa   :  { %v1978_v54 = vmax.f32 %v1412_v38, 0.0  ;;  %8270 = vmatprep.subr.bf16.mxu0 %v13274_v29  ;;  %13301 = vst [vmem:[#allocation13_spill] sm:$0xff] %v10729_v36 }
 0x1ab   :  { %v10697_v26 = vmax.f32 %v10578_v0, %v2121_v47  ;;  %v1977_v58 = vmax.f32 %v1407_v50, 0.0  ;;  %v7771_v15 = vpop.f32.mrb[104].mxu0  ;;  %v4335_v50 = vld [vmem:[%s13266_s3 + $0x7a0] sm:$0xff] }
 0x1ac   :  { %v1422_v2 = vadd.f32 %v10380_v39, %v7771_v15  ;;  %v1416_v16 = vpop.f32.mrb[105].mxu0  ;;  %4454 = vmatmul.mubr.f32.gmra.mrb[210].mxu0 %v9970_v44 }
 0x1ad   :  { %v2122_v7 = vmax.f32 %v1977_v58, %v1978_v54  ;;  %v1417_v9 = vadd.f32 %v10380_v39, %v1416_v16  ;;  %4458 = vmatprep.mubr.f32.mxu0 %v10011_v6  ;;  %8272 = vmatpush1.bf16.msra.mxu0 %v10693_v53  ;;  %v4336_v54 = vld [vmem:[%s13266_s3 + $0x7a8] sm:$0xff] }
 0x1ae   :  { %v1980_v0 = vmax.f32 %v1422_v2, 0.0  ;;  %8273 = vmatprep.subr.bf16.mxu0 %v13274_v29  ;;  %v10748_v2 = vpack.c.bf16 %v4336_v54, %v4335_v50 }
 0x1af   :  { %v10714_v8 = vmax.f32 %v10593_v63, %v2122_v7  ;;  %v1979_v17 = vmax.f32 %v1417_v9, 0.0  ;;  %v7774_v19 = vpop.f32.mrb[106].mxu0 }
 0x1b0   :  { %v1432_v21 = vadd.f32 %v10380_v39, %v7774_v19  ;;  %v1426_v31 = vpop.f32.mrb[107].mxu0  ;;  %4459 = vmatmul.mubr.f32.gmra.mrb[212].mxu0 %v9990_v56  ;;  %13302 = vst [vmem:[#allocation14_spill] sm:$0xff] %v10748_v2 }
 0x1b1   :  { %v2123_v32 = vmax.f32 %v1979_v17, %v1980_v0  ;;  %v1427_v34 = vadd.f32 %v10380_v39, %v1426_v31  ;;  %4463 = vmatprep.mubr.f32.mxu0 %v10038_v23  ;;  %4783 = vmatprep.mubr.f32.mxu1 %v10714_v8  ;;  %v4337_v0 = vld [vmem:[%s13266_s3 + $0x7b0] sm:$0xff]  ;;  %v4338_v17 = vld [vmem:[%s13266_s3 + $0x7b8] sm:$0xff] }
 0x1b2   :  { %v1982_v63 = vmax.f32 %v1432_v21, 0.0  ;;  %4784 = vmatmul.mubr.f32.gmra.mrb[48].mxu1 %v10697_v26  ;;  %8275 = vmatpush1.bf16.msra.mxu0 %v10711_v24  ;;  %v10767_v31 = vpack.c.bf16 %v4338_v17, %v4337_v0  ;;  %v4342_v0 = vld [vmem:[%s13266_s3 + $0x7d8] sm:$0xff] }
 0x1b3   :  { %v10732_v38 = vmax.f32 %v10609_v27, %v2123_v32  ;;  %v1981_v40 = vmax.f32 %v1427_v34, 0.0  ;;  %v7777_v47 = vpop.f32.mrb[108].mxu0  ;;  %8276 = vmatprep.subr.bf16.mxu0 %v13274_v29 }
 0x1b4   :  { %v1442_v58 = vadd.f32 %v10380_v39, %v7777_v47  ;;  %v1436_v15 = vpop.f32.mrb[109].mxu0  ;;  %4464 = vmatmul.mubr.f32.gmra.mrb[214].mxu0 %v10011_v6  ;;  %13303 = vst [vmem:[#allocation15_spill] sm:$0xff] %v10767_v31  ;;  %v4340_v47 = vld [vmem:[%s13266_s3 + $0x7c8] sm:$0xff] }
 0x1b5   :  { %v2124_v59 = vmax.f32 %v1981_v40, %v1982_v63  ;;  %v1437_v27 = vadd.f32 %v10380_v39, %v1436_v15  ;;  %4468 = vmatprep.mubr.f32.mxu0 %v10055_v35  ;;  %4788 = vmatprep.mubr.f32.mxu1 %v10732_v38  ;;  %v4339_v40 = vld [vmem:[%s13266_s3 + $0x7c0] sm:$0xff] }
 0x1b6   :  { %v1984_v55 = vmax.f32 %v1442_v58, 0.0  ;;  %4789 = vmatmul.mubr.f32.gmra.mrb[50].mxu1 %v10714_v8  ;;  %8278 = vmatpush1.bf16.msra.mxu0 %v10729_v36 }
 0x1b7   :  { %v10751_v16 = vmax.f32 %v10625_v25, %v2124_v59  ;;  %v1983_v7 = vmax.f32 %v1437_v27, 0.0  ;;  %v7780_v9 = vpop.f32.mrb[110].mxu0  ;;  %8279 = vmatprep.subr.bf16.mxu0 %v13274_v29  ;;  %v10786_v59 = vpack.c.bf16 %v4340_v47, %v4339_v40  ;;  %v4344_v40 = vld [vmem:[%s13266_s3 + $0x7e8] sm:$0xff] }
 0x1b8   :  { %v1452_v19 = vadd.f32 %v10380_v39, %v7780_v9  ;;  %v1446_v20 = vpop.f32.mrb[111].mxu0  ;;  %4469 = vmatmul.mubr.f32.gmra.mrb[216].mxu0 %v10038_v23  ;;  %v4341_v9 = vld [vmem:[%s13266_s3 + $0x7d0] sm:$0xff] }
 0x1b9   :  { %v2125_v41 = vmax.f32 %v1983_v7, %v1984_v55  ;;  %v1447_v25 = vadd.f32 %v10380_v39, %v1446_v20  ;;  %4473 = vmatprep.mubr.f32.mxu0 %v10077_v52  ;;  %4793 = vmatprep.mubr.f32.mxu1 %v10751_v16  ;;  %13304 = vst [vmem:[#allocation16_spill] sm:$0xff] %v10786_v59 }
 0x1ba   :  { %v1986_v21 = vmax.f32 %v1452_v19, 0.0  ;;  %4794 = vmatmul.mubr.f32.gmra.mrb[52].mxu1 %v10732_v38  ;;  %8281 = vmatpush1.bf16.msra.mxu0 %v10748_v2  ;;  %v13309_v2 = vmov 0.0|0.0  }
 0x1bb   :  { %v10770_v32 = vmax.f32 %v10641_v46, %v2125_v41  ;;  %v1985_v34 = vmax.f32 %v1447_v25, 0.0  ;;  %v7783_v63 = vpop.f32.mrb[112].mxu0  ;;  %8282 = vmatprep.subr.bf16.mxu0 %v13274_v29  ;;  %v10807_v25 = vpack.c.bf16 %v4342_v0, %v4341_v9  ;;  %v4345_v9 = vld [vmem:[%s13266_s3 + $0x7f0] sm:$0xff]  ;;  %v4346_v0 = vld [vmem:[%s13266_s3 + $0x7f8] sm:$0xff] }
 0x1bc   :  { %v1462_v50 = vadd.f32 %v10380_v39, %v7783_v63  ;;  %v1456_v54 = vpop.f32.mrb[113].mxu0  ;;  %4474 = vmatmul.mubr.f32.gmra.mrb[218].mxu0 %v10055_v35  ;;  %v4343_v63 = vld [vmem:[%s13266_s3 + $0x7e0] sm:$0xff] }
 0x1bd   :  { %v2126_v58 = vmax.f32 %v1985_v34, %v1986_v21  ;;  %v1457_v46 = vadd.f32 %v10380_v39, %v1456_v54  ;;  %4478 = vmatprep.mubr.f32.mxu0 %v10215_v37  ;;  %4798 = vmatprep.mubr.f32.mxu1 %v10770_v32  ;;  %13305 = vst [vmem:[#allocation17_spill] sm:$0xff] %v10807_v25 }
 0x1be   :  { %v1988_v15 = vmax.f32 %v1462_v50, 0.0  ;;  %4799 = vmatmul.mubr.f32.gmra.mrb[54].mxu1 %v10751_v16  ;;  %8284 = vmatpush1.bf16.msra.mxu0 %v10767_v31 }
 0x1bf   :  { %v10789_v27 = vmax.f32 %v10657_v14, %v2126_v58  ;;  %v1987_v55 = vmax.f32 %v1457_v46, 0.0  ;;  %v7786_v7 = vpop.f32.mrb[114].mxu0  ;;  %8285 = vmatprep.subr.bf16.mxu0 %v13274_v29 }
 0x1c0   :  { %v1472_v17 = vadd.f32 %v10380_v39, %v7786_v7  ;;  %v1466_v19 = vpop.f32.mrb[115].mxu0  ;;  %4479 = vmatmul.mubr.f32.gmra.mrb[220].mxu0 %v13276_v45 }
 0x1c1   :  { %v10800_v20 = vmax.f32 %v1987_v55, %v1988_v15  ;;  %v1467_v14 = vadd.f32 %v10380_v39, %v1466_v19  ;;  %4483 = vmatprep.mubr.f32.mxu0 %v10234_v49  ;;  %4803 = vmatprep.mubr.f32.mxu1 %v10789_v27  ;;  %v10825_v15 = vpack.c.bf16 %v4344_v40, %v4343_v63 }
 0x1c2   :  { %v1990_v41 = vmax.f32 %v1472_v17, 0.0  ;;  %4804 = vmatmul.mubr.f32.gmra.mrb[56].mxu1 %v10770_v32  ;;  %8287 = vmatpush1.bf16.msra.mxu0 %v10786_v59 }
 0x1c3   :  { %v1989_v21 = vmax.f32 %v1467_v14, 0.0  ;;  %v7789_v34 = vpop.f32.mrb[116].mxu0  ;;  %4808 = vmatprep.mubr.f32.mxu1 %v13276_v45  ;;  %8288 = vmatprep.subr.bf16.mxu0 %v13274_v29  ;;  %13306 = vst [vmem:[#allocation18_spill] sm:$0xff] %v10825_v15 }
 0x1c4   :  { %v1482_v47 = vadd.f32 %v10380_v39, %v7789_v34  ;;  %v1476_v50 = vpop.f32.mrb[117].mxu0  ;;  %4484 = vmatmul.mubr.f32.gmra.mrb[222].mxu0 %v10215_v37  ;;  %v10841_v34 = vpack.c.bf16 %v4346_v0, %v4345_v9 }
 0x1c5   :  { %v10819_v54 = vmax.f32 %v1989_v21, %v1990_v41  ;;  %v1477_v58 = vadd.f32 %v10380_v39, %v1476_v50  ;;  %4488 = vmatprep.mubr.f32.mxu0 %v10248_v60 }
 0x1c6   :  { %v1992_v46 = vmax.f32 %v1482_v47, 0.0  ;;  %4809 = vmatmul.mubr.f32.gmra.mrb[58].mxu1 %v10789_v27  ;;  %8290 = vmatpush1.bf16.msra.mxu0 %v10807_v25  ;;  %13307 = vst [vmem:[#allocation19_spill] sm:$0xff] %v10841_v34 }
 0x1c7   :  { %v1991_v55 = vmax.f32 %v1477_v58, 0.0  ;;  %v7792_v7 = vpop.f32.mrb[118].mxu0  ;;  %8291 = vmatprep.subr.bf16.mxu0 %v13274_v29 }
 0x1c8   :  { %v1492_v17 = vadd.f32 %v10380_v39, %v7792_v7  ;;  %v1486_v19 = vpop.f32.mrb[119].mxu0  ;;  %4489 = vmatmul.mubr.f32.gmra.mrb[224].mxu0 %v10234_v49 }
 0x1c9   :  { %v10836_v14 = vmax.f32 %v1991_v55, %v1992_v46  ;;  %v1487_v41 = vadd.f32 %v10380_v39, %v1486_v19  ;;  %4493 = vmatprep.mubr.f32.mxu0 %v10269_v13 }
 0x1ca   :  { %v1994_v21 = vmax.f32 %v1492_v17, 0.0  ;;  %8293 = vmatpush1.bf16.msra.mxu0 %v10825_v15 }
 0x1cb   :  { %v1993_v63 = vmax.f32 %v1487_v41, 0.0  ;;  %v7795_v40 = vpop.f32.mrb[120].mxu0  ;;  %8294 = vmatprep.subr.bf16.mxu0 %v13274_v29 }
 0x1cc   :  { %v1502_v47 = vadd.f32 %v10380_v39, %v7795_v40  ;;  %v1496_v50 = vpop.f32.mrb[121].mxu0  ;;  %4494 = vmatmul.mubr.f32.gmra.mrb[226].mxu0 %v10248_v60 }
 0x1cd   :  { %v10846_v58 = vmax.f32 %v1993_v63, %v1994_v21  ;;  %v1497_v46 = vadd.f32 %v10380_v39, %v1496_v50  ;;  %4498 = vmatprep.mubr.f32.mxu0 %v10291_v30 }
 0x1ce   :  { %v1996_v55 = vmax.f32 %v1502_v47, 0.0  ;;  %8296 = vmatpush1.bf16.msra.mxu0 %v10841_v34 }
 0x1cf   :  { %v1995_v7 = vmax.f32 %v1497_v46, 0.0  ;;  %v7798_v9 = vpop.f32.mrb[122].mxu0 }
 0x1d0   :  { %v1512_v0 = vadd.f32 %v10380_v39, %v7798_v9  ;;  %v1506_v17 = vpop.f32.mrb[123].mxu0  ;;  %4499 = vmatmul.mubr.f32.gmra.mrb[228].mxu0 %v10269_v13 }
 0x1d1   :  { %v10853_v19 = vmax.f32 %v1995_v7, %v1996_v55  ;;  %v1507_v41 = vadd.f32 %v10380_v39, %v1506_v17  ;;  %4503 = vmatprep.mubr.f32.mxu0 %v10306_v51 }
 0x1d2   :  { %v1998_v21 = vmax.f32 %v1512_v0, 0.0  ;;  %v13308_v0 = vmov 0.0  }
 0x1d3   :  { %v1997_v63 = vmax.f32 %v1507_v41, 0.0  ;;  %v7801_v40 = vpop.f32.mrb[124].mxu0 }
 0x1d4   :  { %v1522_v47 = vadd.f32 %v10380_v39, %v7801_v40  ;;  %v1516_v50 = vpop.f32.mrb[125].mxu0  ;;  %4504 = vmatmul.mubr.f32.gmra.mrb[230].mxu0 %v10291_v30 }
 0x1d5   :  { %v10859_v46 = vmax.f32 %v1997_v63, %v1998_v21  ;;  %v1517_v9 = vadd.f32 %v10380_v39, %v1516_v50  ;;  %4508 = vmatprep.mubr.f32.mxu0 %v10455_v48 }
 0x1d6   :  { %v2000_v55 = vmax.f32 %v1522_v47, 0.0 }
 0x1d7   :  { %v1999_v7 = vmax.f32 %v1517_v9, 0.0  ;;  %v7804_v29 = vpop.f32.mrb[126].mxu0 }
 0x1d8   :  { %v1532_v17 = vadd.f32 %v10380_v39, %v7804_v29  ;;  %v1526_v45 = vpop.f32.mrb[127].mxu0  ;;  %4509 = vmatmul.mubr.f32.gmra.mrb[232].mxu0 %v13308_v0 }
 0x1d9   :  { %v10865_v41 = vmax.f32 %v1999_v7, %v2000_v55  ;;  %v1527_v40 = vadd.f32 %v10380_v39, %v1526_v45  ;;  %4513 = vmatprep.mubr.f32.mxu0 %v10469_v12 }
 0x1da   :  { %v2002_v21 = vmax.f32 %v1532_v17, 0.0 }
 0x1db   :  { %v2001_v63 = vmax.f32 %v1527_v40, 0.0  ;;  %v7807_v34 = vpop.f32.mrb[128].mxu0 }
 0x1dc   :  { %v1542_v50 = vadd.f32 %v10380_v39, %v7807_v34  ;;  %v1536_v15 = vpop.f32.mrb[129].mxu0  ;;  %4514 = vmatmul.mubr.f32.gmra.mrb[234].mxu0 %v10455_v48 }
 0x1dd   :  { %v2134_v47 = vmax.f32 %v2001_v63, %v2002_v21  ;;  %v1537_v29 = vadd.f32 %v10380_v39, %v1536_v15  ;;  %4518 = vmatprep.mubr.f32.mxu0 %v10482_v10 }
 0x1de   :  { %v2004_v9 = vmax.f32 %v1542_v50, 0.0 }
 0x1df   :  { %v10874_v55 = vmax.f32 %v10800_v20, %v2134_v47  ;;  %v2003_v45 = vmax.f32 %v1537_v29, 0.0  ;;  %v7810_v7 = vpop.f32.mrb[130].mxu0 }
 0x1e0   :  { %v1552_v17 = vadd.f32 %v10380_v39, %v7810_v7  ;;  %v1546_v40 = vpop.f32.mrb[131].mxu0  ;;  %4519 = vmatmul.mubr.f32.gmra.mrb[236].mxu0 %v10469_v12 }
 0x1e1   :  { %v2135_v34 = vmax.f32 %v2003_v45, %v2004_v9  ;;  %v1547_v25 = vadd.f32 %v10380_v39, %v1546_v40  ;;  %4523 = vmatprep.mubr.f32.mxu0 %v10509_v43 }
 0x1e2   :  { %v2006_v21 = vmax.f32 %v1552_v17, 0.0 }
 0x1e3   :  { %v10881_v15 = vmax.f32 %v10819_v54, %v2135_v34  ;;  %v2005_v63 = vmax.f32 %v1547_v25, 0.0  ;;  %v7813_v50 = vpop.f32.mrb[132].mxu0 }
 0x1e4   :  { %v1562_v20 = vadd.f32 %v10380_v39, %v7813_v50  ;;  %v1556_v47 = vpop.f32.mrb[133].mxu0  ;;  %4524 = vmatmul.mubr.f32.gmra.mrb[238].mxu0 %v10482_v10 }
 0x1e5   :  { %v2136_v29 = vmax.f32 %v2005_v63, %v2006_v21  ;;  %v1557_v7 = vadd.f32 %v10380_v39, %v1556_v47  ;;  %4528 = vmatprep.mubr.f32.mxu0 %v10525_v62 }
 0x1e6   :  { %v2008_v9 = vmax.f32 %v1562_v20, 0.0 }
 0x1e7   :  { %v10888_v45 = vmax.f32 %v10836_v14, %v2136_v29  ;;  %v2007_v17 = vmax.f32 %v1557_v7, 0.0  ;;  %v7816_v40 = vpop.f32.mrb[134].mxu0 }
 0x1e8   :  { %v1572_v54 = vadd.f32 %v10380_v39, %v7816_v40  ;;  %v1566_v25 = vpop.f32.mrb[135].mxu0  ;;  %4529 = vmatmul.mubr.f32.gmra.mrb[240].mxu0 %v10509_v43 }
 0x1e9   :  { %v2137_v34 = vmax.f32 %v2007_v17, %v2008_v9  ;;  %v1567_v50 = vadd.f32 %v10380_v39, %v1566_v25  ;;  %4533 = vmatprep.mubr.f32.mxu0 %v10541_v4  ;;  %4813 = vmatprep.mubr.f32.mxu1 %v10888_v45 }
 0x1ea   :  { %v2010_v21 = vmax.f32 %v1572_v54, 0.0  ;;  %4814 = vmatmul.mubr.f32.gmra.mrb[60].mxu1 %v10881_v15 }
 0x1eb   :  { %v10897_v14 = vmax.f32 %v10846_v58, %v2137_v34  ;;  %v2009_v63 = vmax.f32 %v1567_v50, 0.0  ;;  %v7819_v20 = vpop.f32.mrb[136].mxu0 }
 0x1ec   :  { %v1582_v47 = vadd.f32 %v10380_v39, %v7819_v20  ;;  %v1576_v29 = vpop.f32.mrb[137].mxu0  ;;  %4534 = vmatmul.mubr.f32.gmra.mrb[242].mxu0 %v10525_v62 }
 0x1ed   :  { %v2138_v7 = vmax.f32 %v2009_v63, %v2010_v21  ;;  %v1577_v9 = vadd.f32 %v10380_v39, %v1576_v29  ;;  %4538 = vmatprep.mubr.f32.mxu0 %v10686_v33  ;;  %4818 = vmatprep.mubr.f32.mxu1 %v10897_v14  ;;  %v10921_v29 = vld [vmem:[%s13267_s2] ss:$0 sm:$0xff] }
 0x1ee   :  { %v2012_v17 = vmax.f32 %v1582_v47, 0.0  ;;  %4819 = vmatmul.mubr.f32.gmra.mrb[62].mxu1 %v10888_v45 }
 0x1ef   :  { %v10906_v58 = vmax.f32 %v10853_v19, %v2138_v7  ;;  %v2011_v40 = vmax.f32 %v1577_v9, 0.0  ;;  %v7822_v54 = vpop.f32.mrb[138].mxu0 }
 0x1f0   :  { %v1592_v25 = vadd.f32 %v10380_v39, %v7822_v54  ;;  %v1586_v34 = vpop.f32.mrb[139].mxu0  ;;  %4539 = vmatmul.mubr.f32.gmra.mrb[244].mxu0 %v13308_v0 }
 0x1f1   :  { %v2139_v50 = vmax.f32 %v2011_v40, %v2012_v17  ;;  %v1587_v21 = vadd.f32 %v10380_v39, %v1586_v34  ;;  %4543 = vmatprep.mubr.f32.mxu0 %v10697_v26  ;;  %4823 = vmatprep.mubr.f32.mxu1 %v10906_v58 }
 0x1f2   :  { %v2014_v63 = vmax.f32 %v1592_v25, 0.0  ;;  %4824 = vmatmul.mubr.f32.gmra.mrb[64].mxu1 %v10897_v14 }
 0x1f3   :  { %v10915_v19 = vmax.f32 %v10859_v46, %v2139_v50  ;;  %v2013_v20 = vmax.f32 %v1587_v21, 0.0  ;;  %v7825_v47 = vpop.f32.mrb[140].mxu0 }
 0x1f4   :  { %4544 = vmatmul.mubr.f32.gmra.mrb[246].mxu0 %v10686_v33  ;;  %v1602_v39 = vadd.f32 %v10921_v29, %v7825_v47  ;;  %v1596_v7 = vpop.f32.mrb[141].mxu0 }
 0x1f5   :  { %v2140_v9 = vmax.f32 %v2013_v20, %v2014_v63  ;;  %4548 = vmatprep.mubr.f32.mxu0 %v10714_v8  ;;  %4828 = vmatprep.mubr.f32.mxu1 %v10915_v19  ;;  %v1597_v46 = vadd.f32 %v10921_v29, %v1596_v7  ;;  %v4188_v7 = vld [vmem:[%s13266_s3 + $0x308] sm:$0xff] }
 0x1f6   :  { %4829 = vmatmul.mubr.f32.gmra.mrb[66].mxu1 %v10906_v58  ;;  %v2016_v17 = vmax.f32 %v1602_v39, 0.0  ;;  %v4187_v39 = vld [vmem:[%s13266_s3 + $0x300] sm:$0xff] }
 0x1f7   :  { %v10929_v40 = vmax.f32 %v10865_v41, %v2140_v9  ;;  %v2015_v54 = vmax.f32 %v1597_v46, 0.0  ;;  %v7828_v25 = vpop.f32.mrb[142].mxu0 }
 0x1f8   :  { %4549 = vmatmul.mubr.f32.gmra.mrb[248].mxu0 %v10697_v26  ;;  %v1612_v34 = vadd.f32 %v10921_v29, %v7828_v25  ;;  %v1606_v50 = vpop.f32.mrb[143].mxu0 }
 0x1f9   :  { %4553 = vmatprep.mubr.f32.mxu0 %v10732_v38  ;;  %4833 = vmatprep.mubr.f32.mxu1 %v10929_v40  ;;  %v10935_v21 = vmax.f32 %v2015_v54, %v2016_v17  ;;  %v1607_v63 = vadd.f32 %v10921_v29, %v1606_v50 }
 0x1fa   :  { %4834 = vmatmul.mubr.f32.gmra.mrb[68].mxu1 %v10915_v19  ;;  %v2018_v20 = vmax.f32 %v1612_v34, 0.0  ;;  %v8058_v34 = vpack.c.bf16 %v4188_v7, %v4187_v39 }
 0x1fb   :  { %4838 = vmatprep.mubr.f32.mxu1 %v13308_v0  ;;  %v2017_v41 = vmax.f32 %v1607_v63, 0.0  ;;  %v7831_v47 = vpop.f32.mrb[144].mxu0 }
 0x1fc   :  { %4554 = vmatmul.mubr.f32.gmra.mrb[250].mxu0 %v10714_v8  ;;  %v1622_v9 = vadd.f32 %v10921_v29, %v7831_v47  ;;  %v1616_v46 = vpop.f32.mrb[145].mxu0  ;;  %v4189_v47 = vld [vmem:[%s13266_s3 + $0x310] sm:$0xff] }
 0x1fd   :  { %4558 = vmatprep.mubr.f32.mxu0 %v10751_v16  ;;  %v10949_v17 = vmax.f32 %v2017_v41, %v2018_v20  ;;  %v1617_v54 = vadd.f32 %v10921_v29, %v1616_v46  ;;  %v4190_v20 = vld [vmem:[%s13266_s3 + $0x318] sm:$0xff] }
 0x1fe   :  { %4839 = vmatmul.mubr.f32.gmra.mrb[70].mxu1 %v10929_v40  ;;  %v2020_v25 = vmax.f32 %v1622_v9, 0.0 }
 0x1ff   :  { %4908 = vmatprep.mubr.f32.mxu1 %v9970_v44  ;;  %v2019_v50 = vmax.f32 %v1617_v54, 0.0  ;;  %v7834_v63 = vpop.f32.mrb[146].mxu0  ;;  %v8061_v54 = vpack.c.bf16 %v4190_v20, %v4189_v47 }
 0x200   :  { %4559 = vmatmul.mubr.f32.gmra.mrb[252].mxu0 %v10732_v38  ;;  %v1632_v41 = vadd.f32 %v10921_v29, %v7834_v63  ;;  %v1626_v46 = vpop.f32.mrb[147].mxu0 }
 0x201   :  { %4563 = vmatprep.mubr.f32.mxu0 %v10770_v32  ;;  %v10963_v9 = vmax.f32 %v2019_v50, %v2020_v25  ;;  %v1627_v39 = vadd.f32 %v10921_v29, %v1626_v46  ;;  %v4191_v25 = vld [vmem:[%s13266_s3 + $0x320] sm:$0xff]  ;;  %v4192_v50 = vld [vmem:[%s13266_s3 + $0x328] sm:$0xff] }
 0x202   :  { %4909 = vmatmul.mubr.f32.vlgmr.msra.gmra.mrb[0].mxu1 %v13308_v0  ;;  %v2022_v7 = vmax.f32 %v1632_v41, 0.0  ;;  %v8064_v46 = vpack.c.bf16 %v4192_v50, %v4191_v25 }
 0x203   :  { %8059 = vmatpush1.bf16.msra.mxu1 %v8058_v34  ;;  %4913 = vmatprep.mubr.f32.mxu1 %v9990_v56  ;;  %v2021_v59 = vmax.f32 %v1627_v39, 0.0  ;;  %v7837_v31 = vpop.f32.mrb[148].mxu0 }
 0x204   :  { %4564 = vmatmul.mubr.f32.gmra.mrb[254].mxu0 %v10751_v16  ;;  %8060 = vmatprep.subr.bf16.mxu1 %v13309_v2  ;;  %v1642_v63 = vadd.f32 %v10921_v29, %v7837_v31  ;;  %v1636_v34 = vpop.f32.mrb[149].mxu0  ;;  %v4193_v31 = vld [vmem:[%s13266_s3 + $0x330] sm:$0xff] }
 0x205   :  { %4568 = vmatprep.mubr.f32.mxu0 %v10874_v55  ;;  %v10978_v47 = vmax.f32 %v2021_v59, %v2022_v7  ;;  %v1637_v20 = vadd.f32 %v10921_v29, %v1636_v34  ;;  %v4194_v59 = vld [vmem:[%s13266_s3 + $0x338] sm:$0xff] }
 0x206   :  { %4914 = vmatmul.mubr.f32.gmra.mrb[2].mxu1 %v9970_v44  ;;  %v2024_v41 = vmax.f32 %v1642_v63, 0.0  ;;  %v8067_v63 = vpack.c.bf16 %v4194_v59, %v4193_v31 }
 0x207   :  { %4918 = vmatprep.mubr.f32.mxu1 %v10011_v6  ;;  %8062 = vmatpush1.bf16.msra.mxu1 %v8061_v54  ;;  %v2023_v39 = vmax.f32 %v1637_v20, 0.0  ;;  %v7840_v36 = vpop.f32.mrb[150].mxu0 }
 0x208   :  { %4569 = vmatmul.mubr.f32.gmra.mrb[0].mxu0 %v13308_v0  ;;  %8063 = vmatprep.subr.bf16.mxu1 %v13309_v2  ;;  %v1652_v44 = vadd.f32 %v10921_v29, %v7840_v36  ;;  %v1646_v7 = vpop.f32.mrb[151].mxu0  ;;  %v4195_v36 = vld [vmem:[%s13266_s3 + $0x340] sm:$0xff] }
 0x209   :  { %4573 = vmatprep.mubr.f32.mxu0 %v10881_v15  ;;  %v10993_v54 = vmax.f32 %v2023_v39, %v2024_v41  ;;  %v1647_v25 = vadd.f32 %v10921_v29, %v1646_v7  ;;  %v4196_v41 = vld [vmem:[%s13266_s3 + $0x348] sm:$0xff] }
 0x20a   :  { %4919 = vmatmul.mubr.f32.gmra.mrb[4].mxu1 %v9990_v56  ;;  %v2026_v50 = vmax.f32 %v1652_v44, 0.0  ;;  %v8070_v7 = vpack.c.bf16 %v4196_v41, %v4195_v36 }
 0x20b   :  { %4923 = vmatprep.mubr.f32.mxu1 %v10038_v23  ;;  %8065 = vmatpush1.bf16.msra.mxu1 %v8064_v46  ;;  %v2025_v34 = vmax.f32 %v1647_v25, 0.0  ;;  %v7843_v20 = vpop.f32.mrb[152].mxu0 }
 0x20c   :  { %4574 = vmatmul.mubr.f32.gmra.mrb[2].mxu0 %v10874_v55  ;;  %8066 = vmatprep.subr.bf16.mxu1 %v13309_v2  ;;  %v1662_v39 = vadd.f32 %v10921_v29, %v7843_v20  ;;  %v1656_v44 = vpop.f32.mrb[153].mxu0 }
 0x20d   :  { %4578 = vmatprep.mubr.f32.mxu0 %v10888_v45  ;;  %v11008_v46 = vmax.f32 %v2025_v34, %v2026_v50  ;;  %v1657_v31 = vadd.f32 %v10921_v29, %v1656_v44  ;;  %v4197_v50 = vld [vmem:[%s13266_s3 + $0x350] sm:$0xff]  ;;  %v4198_v34 = vld [vmem:[%s13266_s3 + $0x358] sm:$0xff] }
 0x20e   :  { %4924 = vmatmul.mubr.f32.gmra.mrb[6].mxu1 %v10011_v6  ;;  %v2028_v59 = vmax.f32 %v1662_v39, 0.0  ;;  %v8073_v44 = vpack.c.bf16 %v4198_v34, %v4197_v50 }
 0x20f   :  { %4928 = vmatprep.mubr.f32.mxu1 %v10055_v35  ;;  %8068 = vmatpush1.bf16.msra.mxu1 %v8067_v63  ;;  %v2027_v25 = vmax.f32 %v1657_v31, 0.0  ;;  %v7846_v24 = vpop.f32.mrb[154].mxu0 }
 0x210   :  { %4579 = vmatmul.mubr.f32.gmra.mrb[4].mxu0 %v10881_v15  ;;  %8069 = vmatprep.subr.bf16.mxu1 %v13309_v2  ;;  %v1672_v20 = vadd.f32 %v10921_v29, %v7846_v24  ;;  %v1666_v39 = vpop.f32.mrb[155].mxu0  ;;  %v4199_v24 = vld [vmem:[%s13266_s3 + $0x360] sm:$0xff] }
 0x211   :  { %4583 = vmatprep.mubr.f32.mxu0 %v10897_v14  ;;  %v11023_v63 = vmax.f32 %v2027_v25, %v2028_v59  ;;  %v1667_v36 = vadd.f32 %v10921_v29, %v1666_v39  ;;  %v4200_v59 = vld [vmem:[%s13266_s3 + $0x368] sm:$0xff] }
 0x212   :  { %4929 = vmatmul.mubr.f32.gmra.mrb[8].mxu1 %v10038_v23  ;;  %v2030_v41 = vmax.f32 %v1672_v20, 0.0  ;;  %v8076_v39 = vpack.c.bf16 %v4200_v59, %v4199_v24 }
 0x213   :  { %4933 = vmatprep.mubr.f32.mxu1 %v10077_v52  ;;  %8071 = vmatpush1.bf16.msra.mxu1 %v8070_v7  ;;  %v2029_v31 = vmax.f32 %v1667_v36, 0.0  ;;  %v7849_v53 = vpop.f32.mrb[156].mxu0 }
 0x214   :  { %4584 = vmatmul.mubr.f32.gmra.mrb[6].mxu0 %v10888_v45  ;;  %8072 = vmatprep.subr.bf16.mxu1 %v13309_v2  ;;  %v1682_v25 = vadd.f32 %v10921_v29, %v7849_v53  ;;  %v1676_v20 = vpop.f32.mrb[157].mxu0  ;;  %v4201_v53 = vld [vmem:[%s13266_s3 + $0x370] sm:$0xff] }
 0x215   :  { %4588 = vmatprep.mubr.f32.mxu0 %v10906_v58  ;;  %v2148_v7 = vmax.f32 %v2029_v31, %v2030_v41  ;;  %v1677_v50 = vadd.f32 %v10921_v29, %v1676_v20  ;;  %v4202_v41 = vld [vmem:[%s13266_s3 + $0x378] sm:$0xff] }
 0x216   :  { %4934 = vmatmul.mubr.f32.gmra.mrb[10].mxu1 %v10055_v35  ;;  %v2032_v34 = vmax.f32 %v1682_v25, 0.0  ;;  %v8079_v25 = vpack.c.bf16 %v4202_v41, %v4201_v53 }
 0x217   :  { %4938 = vmatprep.mubr.f32.mxu1 %v10215_v37  ;;  %8074 = vmatpush1.bf16.msra.mxu1 %v8073_v44  ;;  %v11042_v36 = vmax.f32 %v10935_v21, %v2148_v7  ;;  %v2031_v22 = vmax.f32 %v1677_v50, 0.0  ;;  %v7852_v5 = vpop.f32.mrb[158].mxu0 }
 0x218   :  { %4589 = vmatmul.mubr.f32.gmra.mrb[8].mxu0 %v10897_v14  ;;  %8075 = vmatprep.subr.bf16.mxu1 %v13309_v2  ;;  %v1692_v44 = vadd.f32 %v10921_v29, %v7852_v5  ;;  %v1686_v31 = vpop.f32.mrb[159].mxu0  ;;  %v4203_v5 = vld [vmem:[%s13266_s3 + $0x380] sm:$0xff] }
 0x219   :  { %4593 = vmatprep.mubr.f32.mxu0 %v10915_v19  ;;  %v2149_v21 = vmax.f32 %v2031_v22, %v2032_v34  ;;  %v1687_v24 = vadd.f32 %v10921_v29, %v1686_v31  ;;  %v4204_v22 = vld [vmem:[%s13266_s3 + $0x388] sm:$0xff] }
 0x21a   :  { %4939 = vmatmul.mubr.f32.gmra.mrb[12].mxu1 %v13308_v0  ;;  %v2034_v59 = vmax.f32 %v1692_v44, 0.0  ;;  %v8082_v44 = vpack.c.bf16 %v4204_v22, %v4203_v5 }
 0x21b   :  { %4943 = vmatprep.mubr.f32.mxu1 %v10234_v49  ;;  %8077 = vmatpush1.bf16.msra.mxu1 %v8076_v39  ;;  %v11058_v20 = vmax.f32 %v10949_v17, %v2149_v21  ;;  %v2033_v7 = vmax.f32 %v1687_v24, 0.0  ;;  %v7855_v50 = vpop.f32.mrb[160].mxu0 }
 0x21c   :  { %4594 = vmatmul.mubr.f32.gmra.mrb[10].mxu0 %v10906_v58  ;;  %8078 = vmatprep.subr.bf16.mxu1 %v13309_v2  ;;  %v1702_v34 = vadd.f32 %v10921_v29, %v7855_v50  ;;  %v1696_v39 = vpop.f32.mrb[161].mxu0  ;;  %v4205_v50 = vld [vmem:[%s13266_s3 + $0x390] sm:$0xff] }
 0x21d   :  { %6133 = vmatprep.mubr.f32.mxu0 %v10482_v10  ;;  %v2150_v17 = vmax.f32 %v2033_v7, %v2034_v59  ;;  %v1697_v53 = vadd.f32 %v10921_v29, %v1696_v39 }
 0x21e   :  { %4944 = vmatmul.mubr.f32.gmra.mrb[14].mxu1 %v10215_v37  ;;  %v2036_v41 = vmax.f32 %v1702_v34, 0.0 }
 0x21f   :  { %4948 = vmatprep.mubr.f32.mxu1 %v10248_v60  ;;  %8080 = vmatpush1.bf16.msra.mxu1 %v8079_v25  ;;  %v11074_v31 = vmax.f32 %v10963_v9, %v2150_v17  ;;  %v2035_v21 = vmax.f32 %v1697_v53, 0.0  ;;  %v7858_v24 = vpop.f32.mrb[162].mxu0  ;;  %v4206_v25 = vld [vmem:[%s13266_s3 + $0x398] sm:$0xff] }
 0x220   :  { %6134 = vmatmul.mubr.f32.vlgmr.msra.gmra.mrb[12].mxu0 %v10469_v12  ;;  %8081 = vmatprep.subr.bf16.mxu1 %v13309_v2  ;;  %v1712_v59 = vadd.f32 %v10921_v29, %v7858_v24  ;;  %v1706_v7 = vpop.f32.mrb[163].mxu0  ;;  %v8085_v53 = vpack.c.bf16 %v4206_v25, %v4205_v50 }
 0x221   :  { %6138 = vmatprep.mubr.f32.mxu0 %v10509_v43  ;;  %v2151_v9 = vmax.f32 %v2035_v21, %v2036_v41  ;;  %v1707_v5 = vadd.f32 %v10921_v29, %v1706_v7  ;;  %v4207_v41 = vld [vmem:[%s13266_s3 + $0x3a0] sm:$0xff] }
 0x222   :  { %4949 = vmatmul.mubr.f32.gmra.mrb[16].mxu1 %v10234_v49  ;;  %v2038_v22 = vmax.f32 %v1712_v59, 0.0 }
 0x223   :  { %4953 = vmatprep.mubr.f32.mxu1 %v10269_v13  ;;  %8083 = vmatpush1.bf16.msra.mxu1 %v8082_v44  ;;  %v11090_v34 = vmax.f32 %v10978_v47, %v2151_v9  ;;  %v2037_v39 = vmax.f32 %v1707_v5, 0.0  ;;  %v7861_v17 = vpop.f32.mrb[164].mxu0  ;;  %v4208_v44 = vld [vmem:[%s13266_s3 + $0x3a8] sm:$0xff] }
 0x224   :  { %6139 = vmatmul.mubr.f32.gmra.mrb[14].mxu0 %v10482_v10  ;;  %v1722_v24 = vadd.f32 %v10921_v29, %v7861_v17  ;;  %v1716_v42 = vpop.f32.mrb[165].mxu0  ;;  %8084 = vmatprep.subr.bf16.mxu1 %v13309_v2  ;;  %v8088_v9 = vpack.c.bf16 %v4208_v44, %v4207_v41 }
 0x225   :  { %6143 = vmatprep.mubr.f32.mxu0 %v10525_v62  ;;  %v2152_v47 = vmax.f32 %v2037_v39, %v2038_v22  ;;  %v1717_v21 = vadd.f32 %v10921_v29, %v1716_v42  ;;  %v4209_v42 = vld [vmem:[%s13266_s3 + $0x3b0] sm:$0xff] }
 0x226   :  { %4954 = vmatmul.mubr.f32.gmra.mrb[18].mxu1 %v10248_v60  ;;  %v2040_v59 = vmax.f32 %v1722_v24, 0.0 }
 0x227   :  { %4958 = vmatprep.mubr.f32.mxu1 %v10291_v30  ;;  %v11106_v7 = vmax.f32 %v10993_v54, %v2152_v47  ;;  %v2039_v50 = vmax.f32 %v1717_v21, 0.0  ;;  %v7864_v25 = vpop.f32.mrb[166].mxu0  ;;  %8086 = vmatpush1.bf16.msra.mxu1 %v8085_v53  ;;  %v4210_v54 = vld [vmem:[%s13266_s3 + $0x3b8] sm:$0xff] }
 0x228   :  { %6144 = vmatmul.mubr.f32.gmra.mrb[16].mxu0 %v10509_v43  ;;  %v1732_v5 = vadd.f32 %v10921_v29, %v7864_v25  ;;  %v1726_v17 = vpop.f32.mrb[167].mxu0  ;;  %8087 = vmatprep.subr.bf16.mxu1 %v13309_v2  ;;  %v8091_v47 = vpack.c.bf16 %v4210_v54, %v4209_v42 }
 0x229   :  { %6148 = vmatprep.mubr.f32.mxu0 %v10541_v4  ;;  %v2153_v22 = vmax.f32 %v2039_v50, %v2040_v59  ;;  %v1727_v39 = vadd.f32 %v10921_v29, %v1726_v17  ;;  %v4211_v59 = vld [vmem:[%s13266_s3 + $0x3c0] sm:$0xff] }
 0x22a   :  { %4959 = vmatmul.mubr.f32.gmra.mrb[20].mxu1 %v10269_v13  ;;  %v2042_v53 = vmax.f32 %v1732_v5, 0.0 }
 0x22b   :  { %4963 = vmatprep.mubr.f32.mxu1 %v10306_v51  ;;  %v11122_v24 = vmax.f32 %v11008_v46, %v2153_v22  ;;  %v2041_v41 = vmax.f32 %v1727_v39, 0.0  ;;  %v7867_v44 = vpop.f32.mrb[168].mxu0  ;;  %8089 = vmatpush1.bf16.msra.mxu1 %v8088_v9  ;;  %v4212_v46 = vld [vmem:[%s13266_s3 + $0x3c8] sm:$0xff] }
 0x22c   :  { %6149 = vmatmul.mubr.f32.gmra.mrb[18].mxu0 %v10525_v62  ;;  %v1742_v21 = vadd.f32 %v10921_v29, %v7867_v44  ;;  %v1736_v25 = vpop.f32.mrb[169].mxu0  ;;  %8090 = vmatprep.subr.bf16.mxu1 %v13309_v2  ;;  %v8094_v22 = vpack.c.bf16 %v4212_v46, %v4211_v59 }
 0x22d   :  { %6153 = vmatprep.mubr.f32.mxu0 %v10556_v18  ;;  %v2154_v50 = vmax.f32 %v2041_v41, %v2042_v53  ;;  %v1737_v9 = vadd.f32 %v10921_v29, %v1736_v25  ;;  %v4213_v53 = vld [vmem:[%s13266_s3 + $0x3d0] sm:$0xff] }
 0x22e   :  { %4964 = vmatmul.mubr.f32.gmra.mrb[22].mxu1 %v10291_v30  ;;  %v2044_v5 = vmax.f32 %v1742_v21, 0.0 }
 0x22f   :  { %4968 = vmatprep.mubr.f32.mxu1 %v10455_v48  ;;  %v11138_v17 = vmax.f32 %v11023_v63, %v2154_v50  ;;  %v2043_v42 = vmax.f32 %v1737_v9, 0.0  ;;  %v7870_v54 = vpop.f32.mrb[170].mxu0  ;;  %8092 = vmatpush1.bf16.msra.mxu1 %v8091_v47  ;;  %v4214_v63 = vld [vmem:[%s13266_s3 + $0x3d8] sm:$0xff] }
 0x230   :  { %6154 = vmatmul.mubr.f32.gmra.mrb[20].mxu0 %v10541_v4  ;;  %v1752_v39 = vadd.f32 %v10921_v29, %v7870_v54  ;;  %v1746_v44 = vpop.f32.mrb[171].mxu0  ;;  %8093 = vmatprep.subr.bf16.mxu1 %v13309_v2  ;;  %v8097_v46 = vpack.c.bf16 %v4214_v63, %v4213_v53 }
 0x231   :  { %6158 = vmatprep.mubr.f32.mxu0 %v13308_v0  ;;  %v11150_v41 = vmax.f32 %v2043_v42, %v2044_v5  ;;  %v1747_v47 = vadd.f32 %v10921_v29, %v1746_v44  ;;  %v4215_v5 = vld [vmem:[%s13266_s3 + $0x3e0] sm:$0xff]  ;;  %v4216_v42 = vld [vmem:[%s13266_s3 + $0x3e8] sm:$0xff] }
 0x232   :  { %4969 = vmatmul.mubr.f32.gmra.mrb[24].mxu1 %v13308_v0  ;;  %v2046_v21 = vmax.f32 %v1752_v39, 0.0  ;;  %v8100_v63 = vpack.c.bf16 %v4216_v42, %v4215_v5 }
 0x233   :  { %4973 = vmatprep.mubr.f32.mxu1 %v10469_v12  ;;  %v2045_v25 = vmax.f32 %v1747_v47, 0.0  ;;  %v7873_v59 = vpop.f32.mrb[172].mxu0  ;;  %8095 = vmatpush1.bf16.msra.mxu1 %v8094_v22 }
 0x234   :  { %6159 = vmatmul.mubr.f32.gmra.mrb[22].mxu0 %v10556_v18  ;;  %v1762_v50 = vadd.f32 %v10921_v29, %v7873_v59  ;;  %v1756_v9 = vpop.f32.mrb[173].mxu0  ;;  %8096 = vmatprep.subr.bf16.mxu1 %v13309_v2 }
 0x235   :  { %6163 = vmatprep.mubr.f32.mxu0 %v10714_v8  ;;  %v11165_v54 = vmax.f32 %v2045_v25, %v2046_v21  ;;  %v1757_v22 = vadd.f32 %v10921_v29, %v1756_v9  ;;  %v4217_v21 = vld [vmem:[%s13266_s3 + $0x3f0] sm:$0xff]  ;;  %v4218_v25 = vld [vmem:[%s13266_s3 + $0x3f8] sm:$0xff] }
 0x236   :  { %4974 = vmatmul.mubr.f32.gmra.mrb[26].mxu1 %v10455_v48  ;;  %v2048_v39 = vmax.f32 %v1762_v50, 0.0 }
 0x237   :  { %4978 = vmatprep.mubr.f32.mxu1 %v10482_v10  ;;  %v2047_v44 = vmax.f32 %v1757_v22, 0.0  ;;  %v7876_v53 = vpop.f32.mrb[174].mxu0  ;;  %8098 = vmatpush1.bf16.msra.mxu1 %v8097_v46  ;;  %v8103_v22 = vpack.c.bf16 %v4218_v25, %v4217_v21 }
 0x238   :  { %6164 = vmatmul.mubr.f32.gmra.mrb[24].mxu0 %v10697_v26  ;;  %v1772_v47 = vadd.f32 %v10921_v29, %v7876_v53  ;;  %v1766_v59 = vpop.f32.mrb[175].mxu0  ;;  %8099 = vmatprep.subr.bf16.mxu1 %v13309_v2 }
 0x239   :  { %6168 = vmatprep.mubr.f32.mxu0 %v10732_v38  ;;  %v11180_v50 = vmax.f32 %v2047_v44, %v2048_v39  ;;  %v1767_v46 = vadd.f32 %v10921_v29, %v1766_v59 }
 0x23a   :  { %4979 = vmatmul.mubr.f32.gmra.mrb[28].mxu1 %v10469_v12  ;;  %v2050_v9 = vmax.f32 %v1772_v47, 0.0 }
 0x23b   :  { %4983 = vmatprep.mubr.f32.mxu1 %v10509_v43  ;;  %v2049_v5 = vmax.f32 %v1767_v46, 0.0  ;;  %v7879_v42 = vpop.f32.mrb[176].mxu0  ;;  %8101 = vmatpush1.bf16.msra.mxu1 %v8100_v63 }
 0x23c   :  { %6169 = vmatmul.mubr.f32.gmra.mrb[26].mxu0 %v10714_v8  ;;  %v1782_v53 = vadd.f32 %v10921_v29, %v7879_v42  ;;  %v1776_v28 = vpop.f32.mrb[177].mxu0  ;;  %8102 = vmatprep.subr.bf16.mxu1 %v13309_v2 }
 0x23d   :  { %6173 = vmatprep.mubr.f32.mxu0 %v10751_v16  ;;  %v11189_v39 = vmax.f32 %v2049_v5, %v2050_v9  ;;  %v1777_v44 = vadd.f32 %v10921_v29, %v1776_v28 }
 0x23e   :  { %4984 = vmatmul.mubr.f32.gmra.mrb[30].mxu1 %v10482_v10  ;;  %v2052_v47 = vmax.f32 %v1782_v53, 0.0 }
 0x23f   :  { %4988 = vmatprep.mubr.f32.mxu1 %v10525_v62  ;;  %v2051_v63 = vmax.f32 %v1777_v44, 0.0  ;;  %v7882_v59 = vpop.f32.mrb[178].mxu0  ;;  %8104 = vmatpush1.bf16.msra.mxu1 %v8103_v22 }
 0x240   :  { %6174 = vmatmul.mubr.f32.gmra.mrb[28].mxu0 %v10732_v38  ;;  %v1792_v21 = vadd.f32 %v10921_v29, %v7882_v59  ;;  %v1786_v25 = vpop.f32.mrb[179].mxu0  ;;  %8105 = vmatprep.subr.bf16.mxu1 %v13309_v2 }
 0x241   :  { %6178 = vmatprep.mubr.f32.mxu0 %v10770_v32  ;;  %v11198_v46 = vmax.f32 %v2051_v63, %v2052_v47  ;;  %v1787_v28 = vadd.f32 %v10921_v29, %v1786_v25 }
 0x242   :  { %4989 = vmatmul.mubr.f32.gmra.mrb[32].mxu1 %v10509_v43  ;;  %v2054_v9 = vmax.f32 %v1792_v21, 0.0 }
 0x243   :  { %4993 = vmatprep.mubr.f32.mxu1 %v10541_v4  ;;  %v2053_v5 = vmax.f32 %v1787_v28, 0.0  ;;  %v7885_v42 = vpop.f32.mrb[180].mxu0 }
 0x244   :  { %6179 = vmatmul.mubr.f32.gmra.mrb[30].mxu0 %v10751_v16  ;;  %v1802_v22 = vadd.f32 %v10921_v29, %v7885_v42  ;;  %v1796_v53 = vpop.f32.mrb[181].mxu0 }
 0x245   :  { %6183 = vmatprep.mubr.f32.mxu0 %v10789_v27  ;;  %v11206_v44 = vmax.f32 %v2053_v5, %v2054_v9  ;;  %v1797_v47 = vadd.f32 %v10921_v29, %v1796_v53 }
 0x246   :  { %4994 = vmatmul.mubr.f32.gmra.mrb[34].mxu1 %v10525_v62  ;;  %v2056_v63 = vmax.f32 %v1802_v22, 0.0 }
 0x247   :  { %4998 = vmatprep.mubr.f32.mxu1 %v10686_v33  ;;  %v2055_v59 = vmax.f32 %v1797_v47, 0.0  ;;  %v7888_v21 = vpop.f32.mrb[182].mxu0 }
 0x248   :  { %6184 = vmatmul.mubr.f32.gmra.mrb[32].mxu0 %v10770_v32  ;;  %v1812_v25 = vadd.f32 %v10921_v29, %v7888_v21  ;;  %v1806_v28 = vpop.f32.mrb[183].mxu0 }
 0x249   :  { %6188 = vmatprep.mubr.f32.mxu0 %v13308_v0  ;;  %v11214_v42 = vmax.f32 %v2055_v59, %v2056_v63  ;;  %v1807_v9 = vadd.f32 %v10921_v29, %v1806_v28 }
 0x24a   :  { %4999 = vmatmul.mubr.f32.gmra.mrb[36].mxu1 %v13308_v0  ;;  %v2058_v5 = vmax.f32 %v1812_v25, 0.0 }
 0x24b   :  { %5003 = vmatprep.mubr.f32.mxu1 %v10697_v26  ;;  %v2057_v22 = vmax.f32 %v1807_v9, 0.0  ;;  %v7891_v53 = vpop.f32.mrb[184].mxu0 }
 0x24c   :  { %6189 = vmatmul.mubr.f32.gmra.mrb[34].mxu0 %v10789_v27  ;;  %v1822_v47 = vadd.f32 %v10921_v29, %v7891_v53  ;;  %v1816_v11 = vpop.f32.mrb[185].mxu0 }
 0x24d   :  { %6193 = vmatprep.mubr.f32.mxu0 %v10888_v45  ;;  %v2162_v21 = vmax.f32 %v2057_v22, %v2058_v5  ;;  %v1817_v63 = vadd.f32 %v10921_v29, %v1816_v11 }
 0x24e   :  { %5004 = vmatmul.mubr.f32.gmra.mrb[38].mxu1 %v10686_v33  ;;  %v2060_v59 = vmax.f32 %v1822_v47, 0.0 }
 0x24f   :  { %5008 = vmatprep.mubr.f32.mxu1 %v10714_v8  ;;  %v11226_v25 = vmax.f32 %v11150_v41, %v2162_v21  ;;  %v2059_v28 = vmax.f32 %v1817_v63, 0.0  ;;  %v7894_v9 = vpop.f32.mrb[186].mxu0 }
 0x250   :  { %6194 = vmatmul.mubr.f32.gmra.mrb[36].mxu0 %v10881_v15  ;;  %v1832_v53 = vadd.f32 %v10921_v29, %v7894_v9  ;;  %v1826_v61 = vpop.f32.mrb[187].mxu0 }
 0x251   :  { %6198 = vmatprep.mubr.f32.mxu0 %v10897_v14  ;;  %v2163_v5 = vmax.f32 %v2059_v28, %v2060_v59  ;;  %v1827_v11 = vadd.f32 %v10921_v29, %v1826_v61 }
 0x252   :  { %5009 = vmatmul.mubr.f32.gmra.mrb[40].mxu1 %v10697_v26  ;;  %v2062_v22 = vmax.f32 %v1832_v53, 0.0 }
 0x253   :  { %5013 = vmatprep.mubr.f32.mxu1 %v10732_v38  ;;  %v11235_v41 = vmax.f32 %v11165_v54, %v2163_v5  ;;  %v2061_v47 = vmax.f32 %v1827_v11, 0.0  ;;  %v7897_v21 = vpop.f32.mrb[188].mxu0 }
 0x254   :  { %6199 = vmatmul.mubr.f32.gmra.mrb[38].mxu0 %v10888_v45  ;;  %v1842_v63 = vadd.f32 %v10921_v29, %v7897_v21  ;;  %v1836_v9 = vpop.f32.mrb[189].mxu0 }
 0x255   :  { %6203 = vmatprep.mubr.f32.mxu0 %v10906_v58  ;;  %v2164_v59 = vmax.f32 %v2061_v47, %v2062_v22  ;;  %v1837_v61 = vadd.f32 %v10921_v29, %v1836_v9 }
 0x256   :  { %5014 = vmatmul.mubr.f32.gmra.mrb[42].mxu1 %v10714_v8  ;;  %v2064_v28 = vmax.f32 %v1842_v63, 0.0 }
 0x257   :  { %5018 = vmatprep.mubr.f32.mxu1 %v10751_v16  ;;  %v11244_v54 = vmax.f32 %v11180_v50, %v2164_v59  ;;  %v2063_v53 = vmax.f32 %v1837_v61, 0.0  ;;  %v7900_v5 = vpop.f32.mrb[190].mxu0 }
 0x258   :  { %6204 = vmatmul.mubr.f32.gmra.mrb[40].mxu0 %v10897_v14  ;;  %v1852_v11 = vadd.f32 %v10921_v29, %v7900_v5  ;;  %v1846_v21 = vpop.f32.mrb[191].mxu0 }
 0x259   :  { %6208 = vmatprep.mubr.f32.mxu0 %v10915_v19  ;;  %v2165_v22 = vmax.f32 %v2063_v53, %v2064_v28  ;;  %v1847_v47 = vadd.f32 %v10921_v29, %v1846_v21 }
 0x25a   :  { %5019 = vmatmul.mubr.f32.gmra.mrb[44].mxu1 %v10732_v38  ;;  %v2066_v63 = vmax.f32 %v1852_v11, 0.0 }
 0x25b   :  { %5023 = vmatprep.mubr.f32.mxu1 %v10770_v32  ;;  %v11253_v50 = vmax.f32 %v11189_v39, %v2165_v22  ;;  %v2065_v9 = vmax.f32 %v1847_v47, 0.0  ;;  %v7903_v59 = vpop.f32.mrb[192].mxu0 }
 0x25c   :  { %6209 = vmatmul.mubr.f32.gmra.mrb[42].mxu0 %v10906_v58  ;;  %v1862_v61 = vadd.f32 %v10921_v29, %v7903_v59  ;;  %v1856_v5 = vpop.f32.mrb[193].mxu0 }
 0x25d   :  { %6213 = vmatprep.mubr.f32.mxu0 %v10929_v40  ;;  %v2166_v28 = vmax.f32 %v2065_v9, %v2066_v63  ;;  %v1857_v53 = vadd.f32 %v10921_v29, %v1856_v5 }
 0x25e   :  { %5024 = vmatmul.mubr.f32.gmra.mrb[46].mxu1 %v10751_v16  ;;  %v2068_v11 = vmax.f32 %v1862_v61, 0.0 }
 0x25f   :  { %5028 = vmatprep.mubr.f32.mxu1 %v10874_v55  ;;  %v11262_v39 = vmax.f32 %v11198_v46, %v2166_v28  ;;  %v2067_v21 = vmax.f32 %v1857_v53, 0.0  ;;  %v7906_v22 = vpop.f32.mrb[194].mxu0 }
 0x260   :  { %6214 = vmatmul.mubr.f32.gmra.mrb[44].mxu0 %v10915_v19  ;;  %v1872_v47 = vadd.f32 %v10921_v29, %v7906_v22  ;;  %v1866_v59 = vpop.f32.mrb[195].mxu0 }
 0x261   :  { %6218 = vmatprep.mubr.f32.mxu0 %v13308_v0  ;;  %v2167_v63 = vmax.f32 %v2067_v21, %v2068_v11  ;;  %v1867_v9 = vadd.f32 %v10921_v29, %v1866_v59 }
 0x262   :  { %5029 = vmatmul.mubr.f32.gmra.mrb[48].mxu1 %v13308_v0  ;;  %v2070_v61 = vmax.f32 %v1872_v47, 0.0 }
 0x263   :  { %5033 = vmatprep.mubr.f32.mxu1 %v10881_v15  ;;  %v11271_v46 = vmax.f32 %v11206_v44, %v2167_v63  ;;  %v2069_v5 = vmax.f32 %v1867_v9, 0.0  ;;  %v11273_v28 = vpop.f32.mrb[196].mxu0 }
 0x264   :  { %6219 = vmatmul.mubr.f32.gmra.mrb[46].mxu0 %v10929_v40  ;;  %v4422_v53 = vpop.f32.mrb[197].mxu0 }
 0x265   :  { %6223 = vmatprep.mubr.f32.mxu0 %v11074_v31  ;;  %v2168_v22 = vmax.f32 %v2069_v5, %v2070_v61 }
 0x266   :  { %5034 = vmatmul.mubr.f32.gmra.mrb[50].mxu1 %v10874_v55 }
 0x267   :  { %5038 = vmatprep.mubr.f32.mxu1 %v10888_v45  ;;  %v11280_v29 = vmax.f32 %v11214_v42, %v2168_v22  ;;  %v11282_v11 = vpop.f32.mrb[198].mxu0 }
 0x268   :  { %6224 = vmatmul.mubr.f32.gmra.mrb[48].mxu0 %v11058_v20  ;;  %v4427_v44 = vpop.f32.mrb[199].mxu0 }
 0x269   :  { %6228 = vmatprep.mubr.f32.mxu0 %v11090_v34 }
 0x26a   :  { %5039 = vmatmul.mubr.f32.gmra.mrb[52].mxu1 %v10881_v15 }
 0x26b   :  { %5043 = vmatprep.mubr.f32.mxu1 %v10897_v14  ;;  %v11288_v21 = vpop.f32.mrb[200].mxu0 }
 0x26c   :  { %6229 = vmatmul.mubr.f32.gmra.mrb[50].mxu0 %v11074_v31  ;;  %v4432_v47 = vpop.f32.mrb[201].mxu0 }
 0x26d   :  { %6233 = vmatprep.mubr.f32.mxu0 %v11106_v7 }
 0x26e   :  { %5044 = vmatmul.mubr.f32.gmra.mrb[54].mxu1 %v10888_v45 }
 0x26f   :  { %5048 = vmatprep.mubr.f32.mxu1 %v10906_v58  ;;  %v11294_v42 = vpop.f32.mrb[202].mxu0 }
 0x270   :  { %6234 = vmatmul.mubr.f32.gmra.mrb[52].mxu0 %v11090_v34  ;;  %v4437_v59 = vpop.f32.mrb[203].mxu0 }
 0x271   :  { %6238 = vmatprep.mubr.f32.mxu0 %v11122_v24 }
 0x272   :  { %5049 = vmatmul.mubr.f32.gmra.mrb[56].mxu1 %v10897_v14 }
 0x273   :  { %5053 = vmatprep.mubr.f32.mxu1 %v10915_v19  ;;  %v11300_v63 = vpop.f32.mrb[204].mxu0 }
 0x274   :  { %6239 = vmatmul.mubr.f32.gmra.mrb[54].mxu0 %v11106_v7  ;;  %v4442_v9 = vpop.f32.mrb[205].mxu0 }
 0x275   :  { %6243 = vmatprep.mubr.f32.mxu0 %v11138_v17 }
 0x276   :  { %5054 = vmatmul.mubr.f32.gmra.mrb[58].mxu1 %v10906_v58 }
 0x277   :  { %5058 = vmatprep.mubr.f32.mxu1 %v11042_v36  ;;  %v11306_v61 = vpop.f32.mrb[206].mxu0 }
 0x278   :  { %13310 = vst [vmem:[#allocation20_spill] sm:$0xff] %v11306_v61  ;;  %6244 = vmatmul.mubr.f32.gmra.mrb[56].mxu0 %v11122_v24  ;;  %v4447_v5 = vpop.f32.mrb[207].mxu0  ;;  %v4224_v61 = vld [vmem:[%s13266_s3 + $0x428] sm:$0xff] }
 0x279   :  { %6248 = vmatprep.mubr.f32.mxu0 %v13308_v0 }
 0x27a   :  { %5059 = vmatmul.mubr.f32.gmra.mrb[60].mxu1 %v13308_v0 }
 0x27b   :  { %5063 = vmatprep.mubr.f32.mxu1 %v11058_v20  ;;  %v11312_v53 = vpop.f32.mrb[208].mxu0 }
 0x27c   :  { %13311 = vst [vmem:[#allocation21_spill] sm:$0xff] %v11312_v53  ;;  %6249 = vmatmul.mubr.f32.gmra.mrb[58].mxu0 %v11138_v17  ;;  %v4452_v22 = vpop.f32.mrb[209].mxu0  ;;  %v4222_v53 = vld [vmem:[%s13266_s3 + $0x418] sm:$0xff] }
 0x27d   :  { %6253 = vmatprep.mubr.f32.mxu0 %v11244_v54 }
 0x27e   :  { %5064 = vmatmul.mubr.f32.gmra.mrb[62].mxu1 %v11042_v36 }
 0x27f   :  { %v11317_v44 = vpop.f32.mrb[210].mxu0  ;;  %5068 = vmatprep.mubr.f32.mxu1 %v11074_v31 }
 0x280   :  { %13312 = vst [vmem:[#allocation22_spill] sm:$0xff] %v11317_v44  ;;  %v4457_v47 = vpop.f32.mrb[211].mxu0  ;;  %6254 = vmatmul.mubr.f32.gmra.mrb[60].mxu0 %v11235_v41  ;;  %v4221_v44 = vld [vmem:[%s13266_s3 + $0x410] sm:$0xff] }
 0x281   :  { %6258 = vmatprep.mubr.f32.mxu0 %v11253_v50 }
 0x282   :  { %5069 = vmatmul.mubr.f32.gmra.mrb[64].mxu1 %v11058_v20 }
 0x283   :  { %v11323_v59 = vpop.f32.mrb[212].mxu0  ;;  %5073 = vmatprep.mubr.f32.mxu1 %v11090_v34 }
 0x284   :  { %13313 = vst [vmem:[#allocation23_spill] sm:$0xff] %v11323_v59  ;;  %v4462_v9 = vpop.f32.mrb[213].mxu0  ;;  %6259 = vmatmul.mubr.f32.gmra.mrb[62].mxu0 %v11244_v54  ;;  %v4219_v59 = vld [vmem:[%s13266_s3 + $0x400] sm:$0xff] }
 0x285   :  { %6263 = vmatprep.mubr.f32.mxu0 %v11262_v39 }
 0x286   :  { %5074 = vmatmul.mubr.f32.gmra.mrb[66].mxu1 %v11074_v31 }
 0x287   :  { %v11329_v5 = vpop.f32.mrb[214].mxu0  ;;  %5078 = vmatprep.mubr.f32.mxu1 %v11106_v7 }
 0x288   :  { %13314 = vst [vmem:[#allocation24_spill] sm:$0xff] %v11329_v5  ;;  %v4467_v22 = vpop.f32.mrb[215].mxu0  ;;  %6264 = vmatmul.mubr.f32.gmra.mrb[64].mxu0 %v11253_v50  ;;  %v4220_v5 = vld [vmem:[%s13266_s3 + $0x408] sm:$0xff] }
 0x289   :  { %6268 = vmatprep.mubr.f32.mxu0 %v11271_v46 }
 0x28a   :  { %5079 = vmatmul.mubr.f32.gmra.mrb[68].mxu1 %v11090_v34 }
 0x28b   :  { %v11335_v47 = vpop.f32.mrb[216].mxu0  ;;  %5083 = vmatprep.mubr.f32.mxu1 %v11122_v24 }
 0x28c   :  { %13315 = vst [vmem:[#allocation25_spill] sm:$0xff] %v11335_v47  ;;  %v4472_v9 = vpop.f32.mrb[217].mxu0  ;;  %6269 = vmatmul.mubr.f32.gmra.mrb[66].mxu0 %v11262_v39  ;;  %v8106_v47 = vpack.c.bf16 %v4220_v5, %v4219_v59  ;;  %v8109_v59 = vpack.c.bf16 %v4222_v53, %v4221_v44 }
 0x28d   :  { %6273 = vmatprep.mubr.f32.mxu0 %v11280_v29 }
 0x28e   :  { %5084 = vmatmul.mubr.f32.gmra.mrb[70].mxu1 %v11106_v7 }
 0x28f   :  { %v11347_v22 = vpop.f32.mrb[218].mxu0  ;;  %5153 = vmatprep.mubr.f32.mxu1 %v10011_v6 }
 0x290   :  { %13316 = vst [vmem:[#allocation26_spill] sm:$0xff] %v11347_v22  ;;  %v4477_v9 = vpop.f32.mrb[219].mxu0  ;;  %6274 = vmatmul.mubr.f32.gmra.mrb[68].mxu0 %v11271_v46 }
 0x291   :  { %6278 = vmatprep.mubr.f32.mxu0 %v13308_v0  ;;  %v4223_v9 = vld [vmem:[%s13266_s3 + $0x420] sm:$0xff] }
 0x292   :  { %5154 = vmatmul.mubr.f32.vlgmr.msra.gmra.mrb[0].mxu1 %v9990_v56  ;;  %v8112_v53 = vpack.c.bf16 %v4224_v61, %v4223_v9  ;;  %v4227_v9 = vld [vmem:[%s13266_s3 + $0x440] sm:$0xff] }
 0x293   :  { %8107 = vmatpush1.bf16.msra.mxu1 %v8106_v47  ;;  %5158 = vmatprep.mubr.f32.mxu1 %v10038_v23  ;;  %v11360_v22 = vpop.f32.mrb[220].mxu0  ;;  %v4225_v47 = vld [vmem:[%s13266_s3 + $0x430] sm:$0xff] }
 0x294   :  { %13317 = vst [vmem:[#allocation27_spill] sm:$0xff] %v11360_v22  ;;  %v4482_v5 = vpop.f32.mrb[221].mxu0  ;;  %8108 = vmatprep.subr.bf16.mxu1 %v13309_v2  ;;  %6279 = vmatmul.mubr.f32.gmra.mrb[70].mxu0 %v11280_v29 }
 0x295   :  { %6283 = vmatprep.mubr.f32.mxu0 %v13308_v0  ;;  %v4226_v5 = vld [vmem:[%s13266_s3 + $0x438] sm:$0xff] }
 0x296   :  { %5159 = vmatmul.mubr.f32.gmra.mrb[2].mxu1 %v10011_v6  ;;  %v8115_v61 = vpack.c.bf16 %v4226_v5, %v4225_v47  ;;  %v4229_v5 = vld [vmem:[%s13266_s3 + $0x450] sm:$0xff] }
 0x297   :  { %v11372_v56 = vpop.f32.mrb[222].mxu0  ;;  %5163 = vmatprep.mubr.f32.mxu1 %v10055_v35  ;;  %8110 = vmatpush1.bf16.msra.mxu1 %v8109_v59 }
 0x298   :  { %13318 = vst [vmem:[#allocation28_spill] sm:$0xff] %v11372_v56  ;;  %v4487_v44 = vpop.f32.mrb[223].mxu0  ;;  %8111 = vmatprep.subr.bf16.mxu1 %v13309_v2  ;;  %6284 = vmatmul.mubr.f32.gmra.mrb[72].mxu0 %v13308_v0 }
 0x299   :  { %6288 = vmatprep.mubr.f32.mxu0 %v13308_v0  ;;  %v4228_v44 = vld [vmem:[%s13266_s3 + $0x448] sm:$0xff] }
 0x29a   :  { %5164 = vmatmul.mubr.f32.gmra.mrb[4].mxu1 %v10038_v23 }
 0x29b   :  { %v11385_v6 = vpop.f32.mrb[224].mxu0  ;;  %5168 = vmatprep.mubr.f32.mxu1 %v10077_v52  ;;  %8113 = vmatpush1.bf16.msra.mxu1 %v8112_v53  ;;  %v8118_v53 = vpack.c.bf16 %v4228_v44, %v4227_v9  ;;  %v4231_v44 = vld [vmem:[%s13266_s3 + $0x460] sm:$0xff] }
 0x29c   :  { %13319 = vst [vmem:[#allocation29_spill] sm:$0xff] %v11385_v6  ;;  %v4492_v59 = vpop.f32.mrb[225].mxu0  ;;  %8114 = vmatprep.subr.bf16.mxu1 %v13309_v2  ;;  %6289 = vmatmul.mubr.f32.gmra.mrb[74].mxu0 %v13308_v0 }
 0x29d   :  { %6293 = vmatprep.mubr.f32.mxu0 %v13308_v0  ;;  %v4230_v59 = vld [vmem:[%s13266_s3 + $0x458] sm:$0xff] }
 0x29e   :  { %5169 = vmatmul.mubr.f32.gmra.mrb[6].mxu1 %v10055_v35 }
 0x29f   :  { %v11398_v23 = vpop.f32.mrb[226].mxu0  ;;  %5173 = vmatprep.mubr.f32.mxu1 %v10093_v1  ;;  %8116 = vmatpush1.bf16.msra.mxu1 %v8115_v61  ;;  %v8121_v61 = vpack.c.bf16 %v4230_v59, %v4229_v5  ;;  %v4233_v59 = vld [vmem:[%s13266_s3 + $0x470] sm:$0xff] }
 0x2a0   :  { %13320 = vst [vmem:[#allocation30_spill] sm:$0xff] %v11398_v23  ;;  %v4497_v47 = vpop.f32.mrb[227].mxu0  ;;  %8117 = vmatprep.subr.bf16.mxu1 %v13309_v2  ;;  %6294 = vmatmul.mubr.f32.gmra.mrb[76].mxu0 %v13308_v0 }
 0x2a1   :  { %6298 = vmatprep.mubr.f32.mxu0 %v13308_v0  ;;  %v4232_v47 = vld [vmem:[%s13266_s3 + $0x468] sm:$0xff] }
 0x2a2   :  { %5174 = vmatmul.mubr.f32.gmra.mrb[8].mxu1 %v10077_v52 }
 0x2a3   :  { %v11411_v35 = vpop.f32.mrb[228].mxu0  ;;  %5178 = vmatprep.mubr.f32.mxu1 %v13308_v0  ;;  %8119 = vmatpush1.bf16.msra.mxu1 %v8118_v53  ;;  %v8124_v53 = vpack.c.bf16 %v4232_v47, %v4231_v44  ;;  %v4235_v47 = vld [vmem:[%s13266_s3 + $0x480] sm:$0xff] }
 0x2a4   :  { %13321 = vst [vmem:[#allocation31_spill] sm:$0xff] %v11411_v35  ;;  %v4502_v9 = vpop.f32.mrb[229].mxu0  ;;  %8120 = vmatprep.subr.bf16.mxu1 %v13309_v2  ;;  %6299 = vmatmul.mubr.f32.gmra.mrb[78].mxu0 %v13308_v0 }
 0x2a5   :  { %v4234_v9 = vld [vmem:[%s13266_s3 + $0x478] sm:$0xff] }
 0x2a6   :  { %5179 = vmatmul.mubr.f32.gmra.mrb[10].mxu1 %v10093_v1 }
 0x2a7   :  { %v11423_v52 = vpop.f32.mrb[230].mxu0  ;;  %5183 = vmatprep.mubr.f32.mxu1 %v10248_v60  ;;  %8122 = vmatpush1.bf16.msra.mxu1 %v8121_v61  ;;  %v8127_v61 = vpack.c.bf16 %v4234_v9, %v4233_v59  ;;  %v4237_v9 = vld [vmem:[%s13266_s3 + $0x490] sm:$0xff] }
 0x2a8   :  { %13322 = vst [vmem:[#allocation32_spill] sm:$0xff] %v11423_v52  ;;  %v4507_v5 = vpop.f32.mrb[231].mxu0  ;;  %8123 = vmatprep.subr.bf16.mxu1 %v13309_v2 }
 0x2a9   :  { %v4236_v5 = vld [vmem:[%s13266_s3 + $0x488] sm:$0xff] }
 0x2aa   :  { %5184 = vmatmul.mubr.f32.gmra.mrb[12].mxu1 %v10234_v49 }
 0x2ab   :  { %5188 = vmatprep.mubr.f32.mxu1 %v10269_v13  ;;  %v11435_v1 = vpop.f32.mrb[232].mxu0  ;;  %8125 = vmatpush1.bf16.msra.mxu1 %v8124_v53  ;;  %v8130_v53 = vpack.c.bf16 %v4236_v5, %v4235_v47  ;;  %v4239_v5 = vld [vmem:[%s13266_s3 + $0x4a0] sm:$0xff] }
 0x2ac   :  { %13323 = vst [vmem:[#allocation33_spill] sm:$0xff] %v11435_v1  ;;  %v4512_v44 = vpop.f32.mrb[233].mxu0  ;;  %8126 = vmatprep.subr.bf16.mxu1 %v13309_v2 }
 0x2ad   :  { %v4238_v44 = vld [vmem:[%s13266_s3 + $0x498] sm:$0xff] }
 0x2ae   :  { %5189 = vmatmul.mubr.f32.gmra.mrb[14].mxu1 %v10248_v60 }
 0x2af   :  { %v11445_v52 = vpop.f32.mrb[234].mxu0  ;;  %5193 = vmatprep.mubr.f32.mxu1 %v10291_v30  ;;  %8128 = vmatpush1.bf16.msra.mxu1 %v8127_v61  ;;  %v8133_v61 = vpack.c.bf16 %v4238_v44, %v4237_v9  ;;  %v4241_v44 = vld [vmem:[%s13266_s3 + $0x4b0] sm:$0xff] }
 0x2b0   :  { %13324 = vst [vmem:[#allocation34_spill] sm:$0xff] %v11445_v52  ;;  %v4517_v59 = vpop.f32.mrb[235].mxu0  ;;  %8129 = vmatprep.subr.bf16.mxu1 %v13309_v2 }
 0x2b1   :  { %v4240_v59 = vld [vmem:[%s13266_s3 + $0x4a8] sm:$0xff] }
 0x2b2   :  { %5194 = vmatmul.mubr.f32.gmra.mrb[16].mxu1 %v10269_v13 }
 0x2b3   :  { %v11456_v1 = vpop.f32.mrb[236].mxu0  ;;  %5198 = vmatprep.mubr.f32.mxu1 %v10306_v51  ;;  %8131 = vmatpush1.bf16.msra.mxu1 %v8130_v53  ;;  %v8136_v53 = vpack.c.bf16 %v4240_v59, %v4239_v5  ;;  %v4243_v59 = vld [vmem:[%s13266_s3 + $0x4c0] sm:$0xff] }
 0x2b4   :  { %13325 = vst [vmem:[#allocation35_spill] sm:$0xff] %v11456_v1  ;;  %v4522_v47 = vpop.f32.mrb[237].mxu0  ;;  %8132 = vmatprep.subr.bf16.mxu1 %v13309_v2 }
 0x2b5   :  { %v4242_v47 = vld [vmem:[%s13266_s3 + $0x4b8] sm:$0xff] }
 0x2b6   :  { %5199 = vmatmul.mubr.f32.gmra.mrb[18].mxu1 %v10291_v30 }
 0x2b7   :  { %v11467_v52 = vpop.f32.mrb[238].mxu0  ;;  %5203 = vmatprep.mubr.f32.mxu1 %v10322_v57  ;;  %8134 = vmatpush1.bf16.msra.mxu1 %v8133_v61  ;;  %v8139_v61 = vpack.c.bf16 %v4242_v47, %v4241_v44  ;;  %v4245_v47 = vld [vmem:[%s13266_s3 + $0x4d0] sm:$0xff] }
 0x2b8   :  { %13326 = vst [vmem:[#allocation36_spill] sm:$0xff] %v11467_v52  ;;  %v4527_v9 = vpop.f32.mrb[239].mxu0  ;;  %8135 = vmatprep.subr.bf16.mxu1 %v13309_v2 }
 0x2b9   :  { %v4244_v9 = vld [vmem:[%s13266_s3 + $0x4c8] sm:$0xff] }
 0x2ba   :  { %5204 = vmatmul.mubr.f32.gmra.mrb[20].mxu1 %v10306_v51 }
 0x2bb   :  { %v11478_v1 = vpop.f32.mrb[240].mxu0  ;;  %5208 = vmatprep.mubr.f32.mxu1 %v13308_v0  ;;  %8137 = vmatpush1.bf16.msra.mxu1 %v8136_v53  ;;  %v8142_v53 = vpack.c.bf16 %v4244_v9, %v4243_v59  ;;  %v4247_v9 = vld [vmem:[%s13266_s3 + $0x4e0] sm:$0xff] }
 0x2bc   :  { %13327 = vst [vmem:[#allocation37_spill] sm:$0xff] %v11478_v1  ;;  %v4532_v5 = vpop.f32.mrb[241].mxu0  ;;  %8138 = vmatprep.subr.bf16.mxu1 %v13309_v2 }
 0x2bd   :  { %v4246_v5 = vld [vmem:[%s13266_s3 + $0x4d8] sm:$0xff] }
 0x2be   :  { %5209 = vmatmul.mubr.f32.gmra.mrb[22].mxu1 %v10322_v57 }
 0x2bf   :  { %v11489_v52 = vpop.f32.mrb[242].mxu0  ;;  %5213 = vmatprep.mubr.f32.mxu1 %v10482_v10  ;;  %8140 = vmatpush1.bf16.msra.mxu1 %v8139_v61  ;;  %v8145_v61 = vpack.c.bf16 %v4246_v5, %v4245_v47  ;;  %v4249_v5 = vld [vmem:[%s13266_s3 + $0x4f0] sm:$0xff] }
 0x2c0   :  { %13328 = vst [vmem:[#allocation38_spill] sm:$0xff] %v11489_v52  ;;  %v4537_v44 = vpop.f32.mrb[243].mxu0  ;;  %8141 = vmatprep.subr.bf16.mxu1 %v13309_v2 }
 0x2c1   :  { %v4248_v44 = vld [vmem:[%s13266_s3 + $0x4e8] sm:$0xff] }
 0x2c2   :  { %5214 = vmatmul.mubr.f32.gmra.mrb[24].mxu1 %v10469_v12 }
 0x2c3   :  { %5218 = vmatprep.mubr.f32.mxu1 %v10509_v43  ;;  %v11501_v52 = vpop.f32.mrb[244].mxu0  ;;  %8143 = vmatpush1.bf16.msra.mxu1 %v8142_v53  ;;  %v8148_v53 = vpack.c.bf16 %v4248_v44, %v4247_v9 }
 0x2c4   :  { %13329 = vst [vmem:[#allocation39_spill] sm:$0xff] %v11501_v52  ;;  %v4542_v59 = vpop.f32.mrb[245].mxu0  ;;  %8144 = vmatprep.subr.bf16.mxu1 %v13309_v2 }
 0x2c5   :  { %v4250_v59 = vld [vmem:[%s13266_s3 + $0x4f8] sm:$0xff] }
 0x2c6   :  { %5219 = vmatmul.mubr.f32.gmra.mrb[26].mxu1 %v10482_v10 }
 0x2c7   :  { %v11511_v1 = vpop.f32.mrb[246].mxu0  ;;  %5223 = vmatprep.mubr.f32.mxu1 %v10525_v62  ;;  %8146 = vmatpush1.bf16.msra.mxu1 %v8145_v61  ;;  %v8151_v61 = vpack.c.bf16 %v4250_v59, %v4249_v5 }
 0x2c8   :  { %13330 = vst [vmem:[#allocation40_spill] sm:$0xff] %v11511_v1  ;;  %v4547_v47 = vpop.f32.mrb[247].mxu0  ;;  %8147 = vmatprep.subr.bf16.mxu1 %v13309_v2 }
 0x2ca   :  { %5224 = vmatmul.mubr.f32.gmra.mrb[28].mxu1 %v10509_v43 }
 0x2cb   :  { %v11522_v52 = vpop.f32.mrb[248].mxu0  ;;  %5228 = vmatprep.mubr.f32.mxu1 %v10541_v4  ;;  %8149 = vmatpush1.bf16.msra.mxu1 %v8148_v53 }
 0x2cc   :  { %13331 = vst [vmem:[#allocation41_spill] sm:$0xff] %v11522_v52  ;;  %v4552_v9 = vpop.f32.mrb[249].mxu0  ;;  %8150 = vmatprep.subr.bf16.mxu1 %v13309_v2 }
 0x2ce   :  { %5229 = vmatmul.mubr.f32.gmra.mrb[30].mxu1 %v10525_v62 }
 0x2cf   :  { %v11527_v44 = vpop.f32.mrb[250].mxu0  ;;  %5233 = vmatprep.mubr.f32.mxu1 %v10556_v18  ;;  %8152 = vmatpush1.bf16.msra.mxu1 %v8151_v61 }
 0x2d0   :  { %13332 = vst [vmem:[#allocation42_spill] sm:$0xff] %v11527_v44  ;;  %v4557_v47 = vpop.f32.mrb[251].mxu0  ;;  %8153 = vmatprep.subr.bf16.mxu1 %v13309_v2 }
 0x2d2   :  { %5234 = vmatmul.mubr.f32.gmra.mrb[32].mxu1 %v10541_v4 }
 0x2d3   :  { %v11532_v52 = vpop.f32.mrb[252].mxu0  ;;  %5238 = vmatprep.mubr.f32.mxu1 %v13308_v0 }
 0x2d4   :  { %13333 = vst [vmem:[#allocation43_spill] sm:$0xff] %v11532_v52  ;;  %v4562_v53 = vpop.f32.mrb[253].mxu0 }
 0x2d6   :  { %5239 = vmatmul.mubr.f32.gmra.mrb[34].mxu1 %v10556_v18 }
 0x2d7   :  { %v11536_v5 = vpop.f32.mrb[254].mxu0  ;;  %5243 = vmatprep.mubr.f32.mxu1 %v10714_v8 }
 0x2d8   :  { %13334 = vst [vmem:[#allocation44_spill] sm:$0xff] %v11536_v5  ;;  %v4567_v59 = vpop.f32.mrb[255].mxu0 }
 0x2da   :  { %5244 = vmatmul.mubr.f32.gmra.mrb[36].mxu1 %v10697_v26 }
 0x2db   :  { %5248 = vmatprep.mubr.f32.mxu1 %v10732_v38  ;;  %v11541_v61 = vpop.f32.mrb[0].mxu0 }
 0x2dc   :  { %13335 = vst [vmem:[#allocation45_spill] sm:$0xff] %v11541_v61  ;;  %v4572_v9 = vpop.f32.mrb[1].mxu0 }
 0x2de   :  { %5249 = vmatmul.mubr.f32.gmra.mrb[38].mxu1 %v10714_v8 }
 0x2df   :  { %v11544_v47 = vpop.f32.mrb[2].mxu0  ;;  %5253 = vmatprep.mubr.f32.mxu1 %v10751_v16 }
 0x2e0   :  { %13336 = vst [vmem:[#allocation46_spill] sm:$0xff] %v11544_v47  ;;  %v4577_v53 = vpop.f32.mrb[3].mxu0 }
 0x2e2   :  { %5254 = vmatmul.mubr.f32.gmra.mrb[40].mxu1 %v10732_v38 }
 0x2e3   :  { %v11548_v5 = vpop.f32.mrb[4].mxu0  ;;  %5258 = vmatprep.mubr.f32.mxu1 %v10770_v32 }
 0x2e4   :  { %13337 = vst [vmem:[#allocation47_spill] sm:$0xff] %v11548_v5  ;;  %v4582_v59 = vpop.f32.mrb[5].mxu0 }
 0x2e6   :  { %5259 = vmatmul.mubr.f32.gmra.mrb[42].mxu1 %v10751_v16 }
 0x2e7   :  { %v11552_v52 = vpop.f32.mrb[6].mxu0  ;;  %5263 = vmatprep.mubr.f32.mxu1 %v10789_v27 }
 0x2e8   :  { %13338 = vst [vmem:[#allocation48_spill] sm:$0xff] %v11552_v52  ;;  %v4587_v9 = vpop.f32.mrb[7].mxu0 }
 0x2ea   :  { %5264 = vmatmul.mubr.f32.gmra.mrb[44].mxu1 %v10770_v32 }
 0x2eb   :  { %v11556_v47 = vpop.f32.mrb[8].mxu0  ;;  %5268 = vmatprep.mubr.f32.mxu1 %v13308_v0 }
 0x2ec   :  { %13339 = vst [vmem:[#allocation49_spill] sm:$0xff] %v11556_v47  ;;  %v4592_v53 = vpop.f32.mrb[9].mxu0 }
 0x2ee   :  { %5269 = vmatmul.mubr.f32.gmra.mrb[46].mxu1 %v10789_v27 }
 0x2ef   :  { %v11560_v5 = vpop.f32.mrb[10].mxu0  ;;  %5273 = vmatprep.mubr.f32.mxu1 %v10888_v45 }
 0x2f0   :  { %13340 = vst [vmem:[#allocation50_spill] sm:$0xff] %v11560_v5  ;;  %v4597_v59 = vpop.f32.mrb[11].mxu0 }
 0x2f2   :  { %5274 = vmatmul.mubr.f32.gmra.mrb[48].mxu1 %v10881_v15 }
 0x2f3   :  { %5278 = vmatprep.mubr.f32.mxu1 %v10897_v14  ;;  %v11565_v52 = vpop.f32.mrb[12].mxu0 }
 0x2f4   :  { %v6137_v9 = vpop.f32.mrb[13].mxu0 }
 0x2f6   :  { %5279 = vmatmul.mubr.f32.gmra.mrb[50].mxu1 %v10888_v45 }
 0x2f7   :  { %5283 = vmatprep.mubr.f32.mxu1 %v10906_v58  ;;  %v11569_v47 = vpop.f32.mrb[14].mxu0 }
 0x2f8   :  { %v6142_v53 = vpop.f32.mrb[15].mxu0 }
 0x2fa   :  { %5284 = vmatmul.mubr.f32.gmra.mrb[52].mxu1 %v10897_v14 }
 0x2fb   :  { %5288 = vmatprep.mubr.f32.mxu1 %v10915_v19  ;;  %v11573_v5 = vpop.f32.mrb[16].mxu0 }
 0x2fc   :  { %v6147_v59 = vpop.f32.mrb[17].mxu0 }
 0x2fe   :  { %5289 = vmatmul.mubr.f32.gmra.mrb[54].mxu1 %v10906_v58 }
 0x2ff   :  { %5293 = vmatprep.mubr.f32.mxu1 %v10929_v40  ;;  %v11577_v61 = vpop.f32.mrb[18].mxu0 }
 0x300   :  { %v6152_v9 = vpop.f32.mrb[19].mxu0 }
 0x302   :  { %5294 = vmatmul.mubr.f32.gmra.mrb[56].mxu1 %v10915_v19 }
 0x303   :  { %v11580_v44 = vpop.f32.mrb[20].mxu0  ;;  %5298 = vmatprep.mubr.f32.mxu1 %v13308_v0 }
 0x304   :  { %13341 = vst [vmem:[#allocation51_spill] sm:$0xff] %v11580_v44  ;;  %v6157_v53 = vpop.f32.mrb[21].mxu0 }
 0x306   :  { %5299 = vmatmul.mubr.f32.gmra.mrb[58].mxu1 %v10929_v40 }
 0x307   :  { %5303 = vmatprep.mubr.f32.mxu1 %v11074_v31  ;;  %v11585_v1 = vpop.f32.mrb[22].mxu0 }
 0x308   :  { %13342 = vst [vmem:[#allocation52_spill] sm:$0xff] %v11585_v1  ;;  %v6162_v59 = vpop.f32.mrb[23].mxu0 }
 0x30a   :  { %5304 = vmatmul.mubr.f32.gmra.mrb[60].mxu1 %v11058_v20 }
 0x30b   :  { %5308 = vmatprep.mubr.f32.mxu1 %v11090_v34  ;;  %v11589_v35 = vpop.f32.mrb[24].mxu0 }
 0x30c   :  { %13343 = vst [vmem:[#allocation53_spill] sm:$0xff] %v11589_v35  ;;  %v6167_v9 = vpop.f32.mrb[25].mxu0 }
 0x30e   :  { %5309 = vmatmul.mubr.f32.gmra.mrb[62].mxu1 %v11074_v31 }
 0x30f   :  { %5313 = vmatprep.mubr.f32.mxu1 %v11106_v7  ;;  %v11593_v23 = vpop.f32.mrb[26].mxu0 }
 0x310   :  { %13344 = vst [vmem:[#allocation54_spill] sm:$0xff] %v11593_v23  ;;  %v6172_v53 = vpop.f32.mrb[27].mxu0  ;;  %v4251_v23 = vld [vmem:[%s13266_s3 + $0x500] sm:$0xff] }
 0x312   :  { %5314 = vmatmul.mubr.f32.gmra.mrb[64].mxu1 %v11090_v34 }
 0x313   :  { %5318 = vmatprep.mubr.f32.mxu1 %v11122_v24  ;;  %v11597_v6 = vpop.f32.mrb[28].mxu0 }
 0x314   :  { %13345 = vst [vmem:[#allocation55_spill] sm:$0xff] %v11597_v6  ;;  %v6177_v59 = vpop.f32.mrb[29].mxu0 }
 0x315   :  { %v4252_v59 = vld [vmem:[%s13266_s3 + $0x508] sm:$0xff] }
 0x316   :  { %5319 = vmatmul.mubr.f32.gmra.mrb[66].mxu1 %v11106_v7 }
 0x317   :  { %5323 = vmatprep.mubr.f32.mxu1 %v11138_v17  ;;  %v11601_v56 = vpop.f32.mrb[30].mxu0 }
 0x318   :  { %13346 = vst [vmem:[#allocation56_spill] sm:$0xff] %v11601_v56  ;;  %v6182_v9 = vpop.f32.mrb[31].mxu0  ;;  %v8154_v56 = vpack.c.bf16 %v4252_v59, %v4251_v23  ;;  %v4256_v23 = vld [vmem:[%s13266_s3 + $0x528] sm:$0xff] }
 0x31a   :  { %5324 = vmatmul.mubr.f32.gmra.mrb[68].mxu1 %v11122_v24 }
 0x31b   :  { %v11604_v22 = vpop.f32.mrb[32].mxu0  ;;  %5328 = vmatprep.mubr.f32.mxu1 %v13308_v0 }
 0x31c   :  { %13347 = vst [vmem:[#allocation57_spill] sm:$0xff] %v11604_v22  ;;  %v6187_v53 = vpop.f32.mrb[33].mxu0  ;;  %v4254_v22 = vld [vmem:[%s13266_s3 + $0x518] sm:$0xff] }
 0x31d   :  { %v4253_v53 = vld [vmem:[%s13266_s3 + $0x510] sm:$0xff] }
 0x31e   :  { %5329 = vmatmul.mubr.f32.gmra.mrb[70].mxu1 %v11138_v17  ;;  %v8157_v1 = vpack.c.bf16 %v4254_v22, %v4253_v53  ;;  %v4258_v53 = vld [vmem:[%s13266_s3 + $0x538] sm:$0xff] }
 0x31f   :  { %5398 = vmatprep.mubr.f32.mxu1 %v10215_v37  ;;  %v11615_v9 = vpop.f32.mrb[34].mxu0 }
 0x320   :  { %v6192_v6 = vpop.f32.mrb[35].mxu0 }
 0x321   :  { %v4255_v6 = vld [vmem:[%s13266_s3 + $0x520] sm:$0xff] }
 0x322   :  { %5399 = vmatmul.mubr.f32.vlgmr.msra.gmra.mrb[0].mxu1 %v13308_v0  ;;  %v8160_v59 = vpack.c.bf16 %v4256_v23, %v4255_v6  ;;  %v4259_v23 = vld [vmem:[%s13266_s3 + $0x540] sm:$0xff] }
 0x323   :  { %8155 = vmatpush1.bf16.msra.mxu1 %v8154_v56  ;;  %5403 = vmatprep.mubr.f32.mxu1 %v10234_v49  ;;  %v11625_v35 = vpop.f32.mrb[36].mxu0 }
 0x324   :  { %v6197_v44 = vpop.f32.mrb[37].mxu0  ;;  %8156 = vmatprep.subr.bf16.mxu1 %v13309_v2 }
 0x325   :  { %v4257_v44 = vld [vmem:[%s13266_s3 + $0x530] sm:$0xff] }
 0x326   :  { %5404 = vmatmul.mubr.f32.gmra.mrb[2].mxu1 %v10215_v37 }
 0x327   :  { %5408 = vmatprep.mubr.f32.mxu1 %v10248_v60  ;;  %v11636_v56 = vpop.f32.mrb[38].mxu0  ;;  %8158 = vmatpush1.bf16.msra.mxu1 %v8157_v1  ;;  %v8163_v1 = vpack.c.bf16 %v4258_v53, %v4257_v44  ;;  %v4261_v53 = vld [vmem:[%s13266_s3 + $0x550] sm:$0xff] }
 0x328   :  { %13348 = vst [vmem:[#allocation58_spill] sm:$0xff] %v11636_v56  ;;  %v6202_v22 = vpop.f32.mrb[39].mxu0  ;;  %8159 = vmatprep.subr.bf16.mxu1 %v13309_v2 }
 0x329   :  { %v4260_v22 = vld [vmem:[%s13266_s3 + $0x548] sm:$0xff] }
 0x32a   :  { %5409 = vmatmul.mubr.f32.gmra.mrb[4].mxu1 %v10234_v49 }
 0x32b   :  { %5413 = vmatprep.mubr.f32.mxu1 %v10269_v13  ;;  %v11647_v37 = vpop.f32.mrb[40].mxu0  ;;  %8161 = vmatpush1.bf16.msra.mxu1 %v8160_v59  ;;  %v8166_v59 = vpack.c.bf16 %v4260_v22, %v4259_v23  ;;  %v4263_v22 = vld [vmem:[%s13266_s3 + $0x560] sm:$0xff] }
 0x32c   :  { %13349 = vst [vmem:[#allocation59_spill] sm:$0xff] %v11647_v37  ;;  %v6207_v6 = vpop.f32.mrb[41].mxu0  ;;  %8162 = vmatprep.subr.bf16.mxu1 %v13309_v2 }
 0x32d   :  { %v4262_v6 = vld [vmem:[%s13266_s3 + $0x558] sm:$0xff] }
 0x32e   :  { %5414 = vmatmul.mubr.f32.gmra.mrb[6].mxu1 %v10248_v60 }
 0x32f   :  { %5418 = vmatprep.mubr.f32.mxu1 %v10291_v30  ;;  %v11658_v56 = vpop.f32.mrb[42].mxu0  ;;  %8164 = vmatpush1.bf16.msra.mxu1 %v8163_v1  ;;  %v8169_v1 = vpack.c.bf16 %v4262_v6, %v4261_v53  ;;  %v4265_v6 = vld [vmem:[%s13266_s3 + $0x570] sm:$0xff] }
 0x330   :  { %13350 = vst [vmem:[#allocation60_spill] sm:$0xff] %v11658_v56  ;;  %v6212_v44 = vpop.f32.mrb[43].mxu0  ;;  %8165 = vmatprep.subr.bf16.mxu1 %v13309_v2 }
 0x331   :  { %v4264_v44 = vld [vmem:[%s13266_s3 + $0x568] sm:$0xff] }
 0x332   :  { %5419 = vmatmul.mubr.f32.gmra.mrb[8].mxu1 %v10269_v13 }
 0x333   :  { %5423 = vmatprep.mubr.f32.mxu1 %v10306_v51  ;;  %v11669_v37 = vpop.f32.mrb[44].mxu0  ;;  %8167 = vmatpush1.bf16.msra.mxu1 %v8166_v59  ;;  %v8172_v59 = vpack.c.bf16 %v4264_v44, %v4263_v22  ;;  %v4267_v44 = vld [vmem:[%s13266_s3 + $0x580] sm:$0xff] }
 0x334   :  { %13351 = vst [vmem:[#allocation61_spill] sm:$0xff] %v11669_v37  ;;  %v6217_v23 = vpop.f32.mrb[45].mxu0  ;;  %8168 = vmatprep.subr.bf16.mxu1 %v13309_v2 }
 0x335   :  { %v4266_v23 = vld [vmem:[%s13266_s3 + $0x578] sm:$0xff] }
 0x336   :  { %5424 = vmatmul.mubr.f32.gmra.mrb[10].mxu1 %v10291_v30 }
 0x337   :  { %5428 = vmatprep.mubr.f32.mxu1 %v10455_v48  ;;  %v11680_v56 = vpop.f32.mrb[46].mxu0  ;;  %8170 = vmatpush1.bf16.msra.mxu1 %v8169_v1  ;;  %v8175_v1 = vpack.c.bf16 %v4266_v23, %v4265_v6  ;;  %v4269_v23 = vld [vmem:[%s13266_s3 + $0x590] sm:$0xff] }
 0x338   :  { %13352 = vst [vmem:[#allocation62_spill] sm:$0xff] %v11680_v56  ;;  %v6222_v53 = vpop.f32.mrb[47].mxu0  ;;  %8171 = vmatprep.subr.bf16.mxu1 %v13309_v2 }
 0x339   :  { %v4268_v53 = vld [vmem:[%s13266_s3 + $0x588] sm:$0xff] }
 0x33a   :  { %5429 = vmatmul.mubr.f32.gmra.mrb[12].mxu1 %v13308_v0 }
 0x33b   :  { %5433 = vmatprep.mubr.f32.mxu1 %v10469_v12  ;;  %v11691_v37 = vpop.f32.mrb[48].mxu0  ;;  %8173 = vmatpush1.bf16.msra.mxu1 %v8172_v59  ;;  %v8178_v59 = vpack.c.bf16 %v4268_v53, %v4267_v44  ;;  %v4271_v53 = vld [vmem:[%s13266_s3 + $0x5a0] sm:$0xff] }
 0x33c   :  { %13353 = vst [vmem:[#allocation63_spill] sm:$0xff] %v11691_v37  ;;  %v6227_v22 = vpop.f32.mrb[49].mxu0  ;;  %8174 = vmatprep.subr.bf16.mxu1 %v13309_v2 }
 0x33d   :  { %v4270_v22 = vld [vmem:[%s13266_s3 + $0x598] sm:$0xff] }
 0x33e   :  { %5434 = vmatmul.mubr.f32.gmra.mrb[14].mxu1 %v10455_v48 }
 0x33f   :  { %5438 = vmatprep.mubr.f32.mxu1 %v10482_v10  ;;  %v11702_v56 = vpop.f32.mrb[50].mxu0  ;;  %8176 = vmatpush1.bf16.msra.mxu1 %v8175_v1  ;;  %v8181_v1 = vpack.c.bf16 %v4270_v22, %v4269_v23  ;;  %v4273_v22 = vld [vmem:[%s13266_s3 + $0x5b0] sm:$0xff] }
 0x340   :  { %13354 = vst [vmem:[#allocation64_spill] sm:$0xff] %v11702_v56  ;;  %v6232_v6 = vpop.f32.mrb[51].mxu0  ;;  %8177 = vmatprep.subr.bf16.mxu1 %v13309_v2 }
 0x341   :  { %v4272_v6 = vld [vmem:[%s13266_s3 + $0x5a8] sm:$0xff] }
 0x342   :  { %5439 = vmatmul.mubr.f32.gmra.mrb[16].mxu1 %v10469_v12 }
 0x343   :  { %5443 = vmatprep.mubr.f32.mxu1 %v10509_v43  ;;  %v11713_v37 = vpop.f32.mrb[52].mxu0  ;;  %8179 = vmatpush1.bf16.msra.mxu1 %v8178_v59  ;;  %v8184_v59 = vpack.c.bf16 %v4272_v6, %v4271_v53  ;;  %v4275_v6 = vld [vmem:[%s13266_s3 + $0x5c0] sm:$0xff] }
 0x344   :  { %13355 = vst [vmem:[#allocation65_spill] sm:$0xff] %v11713_v37  ;;  %v6237_v44 = vpop.f32.mrb[53].mxu0  ;;  %8180 = vmatprep.subr.bf16.mxu1 %v13309_v2 }
 0x345   :  { %v4274_v44 = vld [vmem:[%s13266_s3 + $0x5b8] sm:$0xff] }
 0x346   :  { %5444 = vmatmul.mubr.f32.gmra.mrb[18].mxu1 %v10482_v10 }
 0x347   :  { %5448 = vmatprep.mubr.f32.mxu1 %v10525_v62  ;;  %v11724_v56 = vpop.f32.mrb[54].mxu0  ;;  %8182 = vmatpush1.bf16.msra.mxu1 %v8181_v1  ;;  %v8187_v1 = vpack.c.bf16 %v4274_v44, %v4273_v22  ;;  %v4277_v44 = vld [vmem:[%s13266_s3 + $0x5d0] sm:$0xff] }
 0x348   :  { %13356 = vst [vmem:[#allocation66_spill] sm:$0xff] %v11724_v56  ;;  %v6242_v23 = vpop.f32.mrb[55].mxu0  ;;  %8183 = vmatprep.subr.bf16.mxu1 %v13309_v2 }
 0x349   :  { %v4276_v23 = vld [vmem:[%s13266_s3 + $0x5c8] sm:$0xff] }
 0x34a   :  { %5449 = vmatmul.mubr.f32.gmra.mrb[20].mxu1 %v10509_v43 }
 0x34b   :  { %5453 = vmatprep.mubr.f32.mxu1 %v10541_v4  ;;  %v11735_v37 = vpop.f32.mrb[56].mxu0  ;;  %8185 = vmatpush1.bf16.msra.mxu1 %v8184_v59  ;;  %v8190_v59 = vpack.c.bf16 %v4276_v23, %v4275_v6  ;;  %v4280_v6 = vld [vmem:[%s13266_s3 + $0x5e8] sm:$0xff] }
 0x34c   :  { %13357 = vst [vmem:[#allocation67_spill] sm:$0xff] %v11735_v37  ;;  %v6247_v53 = vpop.f32.mrb[57].mxu0  ;;  %8186 = vmatprep.subr.bf16.mxu1 %v13309_v2 }
 0x34d   :  { %v4278_v53 = vld [vmem:[%s13266_s3 + $0x5d8] sm:$0xff] }
 0x34e   :  { %5454 = vmatmul.mubr.f32.gmra.mrb[22].mxu1 %v10525_v62  ;;  %v8193_v37 = vpack.c.bf16 %v4278_v53, %v4277_v44  ;;  %v4284_v53 = vld [vmem:[%s13266_s3 + $0x608] sm:$0xff] }
 0x34f   :  { %5458 = vmatprep.mubr.f32.mxu1 %v10686_v33  ;;  %v11746_v56 = vpop.f32.mrb[58].mxu0  ;;  %8188 = vmatpush1.bf16.msra.mxu1 %v8187_v1  ;;  %v4279_v1 = vld [vmem:[%s13266_s3 + $0x5e0] sm:$0xff] }
 0x350   :  { %v6252_v22 = vpop.f32.mrb[59].mxu0  ;;  %8189 = vmatprep.subr.bf16.mxu1 %v13309_v2  ;;  %v8196_v23 = vpack.c.bf16 %v4280_v6, %v4279_v1  ;;  %v4285_v6 = vld [vmem:[%s13266_s3 + $0x610] sm:$0xff] }
 0x351   :  { %v4282_v22 = vld [vmem:[%s13266_s3 + $0x5f8] sm:$0xff] }
 0x352   :  { %5459 = vmatmul.mubr.f32.gmra.mrb[24].mxu1 %v13308_v0 }
 0x353   :  { %5463 = vmatprep.mubr.f32.mxu1 %v10697_v26  ;;  %8191 = vmatpush1.bf16.msra.mxu1 %v8190_v59  ;;  %v4281_v59 = vld [vmem:[%s13266_s3 + $0x5f0] sm:$0xff] }
 0x354   :  { %8192 = vmatprep.subr.bf16.mxu1 %v13309_v2  ;;  %v8199_v44 = vpack.c.bf16 %v4282_v22, %v4281_v59  ;;  %v4287_v22 = vld [vmem:[%s13266_s3 + $0x620] sm:$0xff] }
 0x356   :  { %5464 = vmatmul.mubr.f32.gmra.mrb[26].mxu1 %v10686_v33 }
 0x357   :  { %5468 = vmatprep.mubr.f32.mxu1 %v10714_v8  ;;  %8194 = vmatpush1.bf16.msra.mxu1 %v8193_v37  ;;  %v4283_v37 = vld [vmem:[%s13266_s3 + $0x600] sm:$0xff] }
 0x358   :  { %8195 = vmatprep.subr.bf16.mxu1 %v13309_v2  ;;  %v8202_v1 = vpack.c.bf16 %v4284_v53, %v4283_v37  ;;  %v4289_v37 = vld [vmem:[%s13266_s3 + $0x630] sm:$0xff]  ;;  %v4290_v53 = vld [vmem:[%s13266_s3 + $0x638] sm:$0xff] }
 0x35a   :  { %5469 = vmatmul.mubr.f32.gmra.mrb[28].mxu1 %v10697_v26 }
 0x35b   :  { %5473 = vmatprep.mubr.f32.mxu1 %v10732_v38  ;;  %8197 = vmatpush1.bf16.msra.mxu1 %v8196_v23  ;;  %v4286_v23 = vld [vmem:[%s13266_s3 + $0x618] sm:$0xff] }
 0x35c   :  { %8198 = vmatprep.subr.bf16.mxu1 %v13309_v2  ;;  %v8205_v59 = vpack.c.bf16 %v4286_v23, %v4285_v6  ;;  %v4292_v6 = vld [vmem:[%s13266_s3 + $0x648] sm:$0xff]  ;;  %v4293_v23 = vld [vmem:[%s13266_s3 + $0x650] sm:$0xff] }
 0x35e   :  { %5474 = vmatmul.mubr.f32.gmra.mrb[30].mxu1 %v10714_v8 }
 0x35f   :  { %5478 = vmatprep.mubr.f32.mxu1 %v10751_v16  ;;  %8200 = vmatpush1.bf16.msra.mxu1 %v8199_v44  ;;  %v4288_v44 = vld [vmem:[%s13266_s3 + $0x628] sm:$0xff] }
 0x360   :  { %8201 = vmatprep.subr.bf16.mxu1 %v13309_v2 }
 0x362   :  { %5479 = vmatmul.mubr.f32.gmra.mrb[32].mxu1 %v10732_v38 }
 0x363   :  { %5483 = vmatprep.mubr.f32.mxu1 %v10770_v32 }
 0x366   :  { %5484 = vmatmul.mubr.f32.gmra.mrb[34].mxu1 %v10751_v16 }
 0x367   :  { %5488 = vmatprep.mubr.f32.mxu1 %v10874_v55 }
 0x36a   :  { %5489 = vmatmul.mubr.f32.gmra.mrb[36].mxu1 %v13308_v0 }
 0x36b   :  { %5493 = vmatprep.mubr.f32.mxu1 %v10881_v15 }
 0x36e   :  { %5494 = vmatmul.mubr.f32.gmra.mrb[38].mxu1 %v10874_v55 }
 0x36f   :  { %5498 = vmatprep.mubr.f32.mxu1 %v10888_v45 }
 0x372   :  { %5499 = vmatmul.mubr.f32.gmra.mrb[40].mxu1 %v10881_v15 }
 0x373   :  { %5503 = vmatprep.mubr.f32.mxu1 %v10897_v14 }
 0x376   :  { %5504 = vmatmul.mubr.f32.gmra.mrb[42].mxu1 %v10888_v45 }
 0x377   :  { %5508 = vmatprep.mubr.f32.mxu1 %v10906_v58 }
 0x37a   :  { %5509 = vmatmul.mubr.f32.gmra.mrb[44].mxu1 %v10897_v14 }
 0x37b   :  { %5513 = vmatprep.mubr.f32.mxu1 %v10915_v19 }
 0x37e   :  { %5514 = vmatmul.mubr.f32.gmra.mrb[46].mxu1 %v10906_v58 }
 0x37f   :  { %5518 = vmatprep.mubr.f32.mxu1 %v11042_v36 }
 0x382   :  { %5519 = vmatmul.mubr.f32.gmra.mrb[48].mxu1 %v13308_v0 }
 0x383   :  { %5523 = vmatprep.mubr.f32.mxu1 %v11058_v20 }
 0x386   :  { %5524 = vmatmul.mubr.f32.gmra.mrb[50].mxu1 %v11042_v36 }
 0x387   :  { %5528 = vmatprep.mubr.f32.mxu1 %v11074_v31 }
 0x38a   :  { %5529 = vmatmul.mubr.f32.gmra.mrb[52].mxu1 %v11058_v20 }
 0x38b   :  { %5533 = vmatprep.mubr.f32.mxu1 %v11090_v34 }
 0x38e   :  { %5534 = vmatmul.mubr.f32.gmra.mrb[54].mxu1 %v11074_v31 }
 0x38f   :  { %5538 = vmatprep.mubr.f32.mxu1 %v11106_v7 }
 0x392   :  { %5539 = vmatmul.mubr.f32.gmra.mrb[56].mxu1 %v11090_v34 }
 0x393   :  { %5543 = vmatprep.mubr.f32.mxu1 %v11122_v24 }
 0x396   :  { %5544 = vmatmul.mubr.f32.gmra.mrb[58].mxu1 %v11106_v7 }
 0x397   :  { %5548 = vmatprep.mubr.f32.mxu1 %v11226_v25 }
 0x39a   :  { %5549 = vmatmul.mubr.f32.gmra.mrb[60].mxu1 %v13308_v0 }
 0x39b   :  { %5553 = vmatprep.mubr.f32.mxu1 %v11235_v41 }
 0x39e   :  { %5554 = vmatmul.mubr.f32.gmra.mrb[62].mxu1 %v11226_v25 }
 0x39f   :  { %5558 = vmatprep.mubr.f32.mxu1 %v11244_v54 }
 0x3a2   :  { %5559 = vmatmul.mubr.f32.gmra.mrb[64].mxu1 %v11235_v41 }
 0x3a3   :  { %5563 = vmatprep.mubr.f32.mxu1 %v11253_v50 }
 0x3a6   :  { %5564 = vmatmul.mubr.f32.gmra.mrb[66].mxu1 %v11244_v54 }
 0x3a7   :  { %5568 = vmatprep.mubr.f32.mxu1 %v11262_v39 }
 0x3aa   :  { %5569 = vmatmul.mubr.f32.gmra.mrb[68].mxu1 %v11253_v50 }
 0x3ab   :  { %5573 = vmatprep.mubr.f32.mxu1 %v11271_v46 }
 0x3ae   :  { %5574 = vmatmul.mubr.f32.gmra.mrb[70].mxu1 %v11262_v39 }
 0x3af   :  { %5643 = vmatprep.mubr.f32.mxu1 %v10248_v60 }
 0x3b2   :  { %5644 = vmatmul.mubr.f32.vlgmr.msra.gmra.mrb[0].mxu1 %v10234_v49  ;;  %v8208_v49 = vpack.c.bf16 %v4288_v44, %v4287_v22  ;;  %v4295_v22 = vld [vmem:[%s13266_s3 + $0x660] sm:$0xff]  ;;  %v4296_v44 = vld [vmem:[%s13266_s3 + $0x668] sm:$0xff] }
 0x3b3   :  { %8203 = vmatpush1.bf16.msra.mxu1 %v8202_v1  ;;  %5648 = vmatprep.mubr.f32.mxu1 %v10269_v13  ;;  %v4291_v1 = vld [vmem:[%s13266_s3 + $0x640] sm:$0xff] }
 0x3b4   :  { %8204 = vmatprep.subr.bf16.mxu1 %v13309_v2 }
 0x3b6   :  { %5649 = vmatmul.mubr.f32.gmra.mrb[2].mxu1 %v10248_v60  ;;  %v8211_v60 = vpack.c.bf16 %v4290_v53, %v4289_v37  ;;  %v4298_v37 = vld [vmem:[%s13266_s3 + $0x678] sm:$0xff]  ;;  %v4299_v53 = vld [vmem:[%s13266_s3 + $0x680] sm:$0xff] }
 0x3b7   :  { %5653 = vmatprep.mubr.f32.mxu1 %v10291_v30  ;;  %8206 = vmatpush1.bf16.msra.mxu1 %v8205_v59  ;;  %v4294_v59 = vld [vmem:[%s13266_s3 + $0x658] sm:$0xff] }
 0x3b8   :  { %8207 = vmatprep.subr.bf16.mxu1 %v13309_v2 }
 0x3ba   :  { %5654 = vmatmul.mubr.f32.gmra.mrb[4].mxu1 %v10269_v13  ;;  %v8214_v13 = vpack.c.bf16 %v4292_v6, %v4291_v1  ;;  %v4301_v6 = vld [vmem:[%s13266_s3 + $0x690] sm:$0xff] }
 0x3bb   :  { %5658 = vmatprep.mubr.f32.mxu1 %v10306_v51  ;;  %8209 = vmatpush1.bf16.msra.mxu1 %v8208_v49  ;;  %v4297_v49 = vld [vmem:[%s13266_s3 + $0x670] sm:$0xff] }
 0x3bc   :  { %8210 = vmatprep.subr.bf16.mxu1 %v13309_v2 }
 0x3be   :  { %5659 = vmatmul.mubr.f32.gmra.mrb[6].mxu1 %v10291_v30  ;;  %v8217_v30 = vpack.c.bf16 %v4294_v59, %v4293_v23  ;;  %v11904_v23 = vpop.f32.mrb[60].mxu0 }
 0x3bf   :  { %5663 = vmatprep.mubr.f32.mxu1 %v10322_v57  ;;  %8212 = vmatpush1.bf16.msra.mxu1 %v8211_v60  ;;  %v4300_v60 = vld [vmem:[%s13266_s3 + $0x688] sm:$0xff] }
 0x3c0   :  { %8213 = vmatprep.subr.bf16.mxu1 %v13309_v2  ;;  %v8226_v1 = vpack.c.bf16 %v4300_v60, %v4299_v53  ;;  %v4306_v53 = vld [vmem:[%s13266_s3 + $0x6b8] sm:$0xff] }
 0x3c2   :  { %5664 = vmatmul.mubr.f32.gmra.mrb[8].mxu1 %v10306_v51  ;;  %v8220_v51 = vpack.c.bf16 %v4296_v44, %v4295_v22  ;;  %v4303_v22 = vld [vmem:[%s13266_s3 + $0x6a0] sm:$0xff]  ;;  %v4304_v44 = vld [vmem:[%s13266_s3 + $0x6a8] sm:$0xff] }
 0x3c3   :  { %5668 = vmatprep.mubr.f32.mxu1 %v13308_v0  ;;  %8215 = vmatpush1.bf16.msra.mxu1 %v8214_v13  ;;  %v4302_v13 = vld [vmem:[%s13266_s3 + $0x698] sm:$0xff] }
 0x3c4   :  { %8216 = vmatprep.subr.bf16.mxu1 %v13309_v2  ;;  %v8229_v59 = vpack.c.bf16 %v4302_v13, %v4301_v6  ;;  %v4307_v13 = vld [vmem:[%s13266_s3 + $0x6c0] sm:$0xff] }
 0x3c6   :  { %5669 = vmatmul.mubr.f32.gmra.mrb[10].mxu1 %v10322_v57  ;;  %v8223_v57 = vpack.c.bf16 %v4298_v37, %v4297_v49  ;;  %v8232_v49 = vpack.c.bf16 %v4304_v44, %v4303_v22 }
 0x3c7   :  { %5673 = vmatprep.mubr.f32.mxu1 %v10482_v10  ;;  %8218 = vmatpush1.bf16.msra.mxu1 %v8217_v30  ;;  %v6257_v30 = vpop.f32.mrb[61].mxu0 }
 0x3c8   :  { %8219 = vmatprep.subr.bf16.mxu1 %v13309_v2 }
 0x3ca   :  { %5674 = vmatmul.mubr.f32.gmra.mrb[12].mxu1 %v10469_v12 }
 0x3cb   :  { %5678 = vmatprep.mubr.f32.mxu1 %v10509_v43  ;;  %8221 = vmatpush1.bf16.msra.mxu1 %v8220_v51  ;;  %v11915_v51 = vpop.f32.mrb[62].mxu0 }
 0x3cc   :  { %8222 = vmatprep.subr.bf16.mxu1 %v13309_v2  ;;  %v6262_v37 = vpop.f32.mrb[63].mxu0 }
 0x3cd   :  { %v11926_v60 = vpop.f32.mrb[64].mxu0  ;;  %v4310_v37 = vld [vmem:[%s13266_s3 + $0x6d8] sm:$0xff] }
 0x3ce   :  { %5679 = vmatmul.mubr.f32.gmra.mrb[14].mxu1 %v10482_v10  ;;  %v6267_v6 = vpop.f32.mrb[65].mxu0 }
 0x3cf   :  { %5683 = vmatprep.mubr.f32.mxu1 %v10525_v62  ;;  %8224 = vmatpush1.bf16.msra.mxu1 %v8223_v57  ;;  %v4305_v57 = vld [vmem:[%s13266_s3 + $0x6b0] sm:$0xff]  ;;  %v11937_v30 = vpop.f32.mrb[66].mxu0  ;;  %v4312_v6 = vld [vmem:[%s13266_s3 + $0x6e8] sm:$0xff] }
 0x3d0   :  { %8225 = vmatprep.subr.bf16.mxu1 %v13309_v2  ;;  %v6272_v44 = vpop.f32.mrb[67].mxu0 }
 0x3d1   :  { %v4313_v44 = vld [vmem:[%s13266_s3 + $0x6f0] sm:$0xff] }
 0x3d2   :  { %5684 = vmatmul.mubr.f32.gmra.mrb[16].mxu1 %v10509_v43 }
 0x3d3   :  { %5688 = vmatprep.mubr.f32.mxu1 %v10541_v4  ;;  %8227 = vmatpush1.bf16.msra.mxu1 %v8226_v1  ;;  %v8235_v1 = vpack.c.bf16 %v4306_v53, %v4305_v57 }
 0x3d4   :  { %8228 = vmatprep.subr.bf16.mxu1 %v13309_v2 }
 0x3d6   :  { %5689 = vmatmul.mubr.f32.gmra.mrb[18].mxu1 %v10525_v62 }
 0x3d7   :  { %5693 = vmatprep.mubr.f32.mxu1 %v10556_v18  ;;  %8230 = vmatpush1.bf16.msra.mxu1 %v8229_v59  ;;  %v4308_v59 = vld [vmem:[%s13266_s3 + $0x6c8] sm:$0xff] }
 0x3d8   :  { %8231 = vmatprep.subr.bf16.mxu1 %v13309_v2  ;;  %v8238_v22 = vpack.c.bf16 %v4308_v59, %v4307_v13 }
 0x3da   :  { %5694 = vmatmul.mubr.f32.gmra.mrb[20].mxu1 %v10541_v4 }
 0x3db   :  { %5698 = vmatprep.mubr.f32.mxu1 %v13308_v0  ;;  %8233 = vmatpush1.bf16.msra.mxu1 %v8232_v49  ;;  %v4309_v49 = vld [vmem:[%s13266_s3 + $0x6d0] sm:$0xff] }
 0x3dc   :  { %8234 = vmatprep.subr.bf16.mxu1 %v13309_v2  ;;  %v8241_v57 = vpack.c.bf16 %v4310_v37, %v4309_v49  ;;  %v4314_v49 = vld [vmem:[%s13266_s3 + $0x6f8] sm:$0xff] }
 0x3dd   :  { %v8247_v37 = vpack.c.bf16 %v4314_v49, %v4313_v44  ;;  %v13358_v44 = vld [vmem:[#allocation5_spill] sm:$0xff] }
 0x3de   :  { %5699 = vmatmul.mubr.f32.gmra.mrb[22].mxu1 %v10556_v18  ;;  %v11948_v18 = vpop.f32.mrb[68].mxu0 }
 0x3df   :  { %5703 = vmatprep.mubr.f32.mxu1 %v10714_v8  ;;  %8236 = vmatpush1.bf16.msra.mxu1 %v8235_v1  ;;  %v6277_v53 = vpop.f32.mrb[69].mxu0  ;;  %v4311_v1 = vld [vmem:[%s13266_s3 + $0x6e0] sm:$0xff] }
 0x3e0   :  { %8237 = vmatprep.subr.bf16.mxu1 %v13309_v2  ;;  %v11959_v13 = vpop.f32.mrb[70].mxu0  ;;  %v8244_v59 = vpack.c.bf16 %v4312_v6, %v4311_v1  ;;  %v6397_v53 = vld [vmem:[%s13268_s5 + $0x10] sm:$0xff]  ;;  %v6400_v6 = vld [vmem:[%s13268_s5 + $0x28] sm:$0xff] }
 0x3e2   :  { %5704 = vmatmul.mubr.f32.gmra.mrb[24].mxu1 %v10697_v26 }
 0x3e3   :  { %5708 = vmatprep.mubr.f32.mxu1 %v10732_v38  ;;  %8239 = vmatpush1.bf16.msra.mxu1 %v8238_v22  ;;  %v6282_v22 = vpop.f32.mrb[71].mxu0 }
 0x3e4   :  { %8240 = vmatprep.subr.bf16.mxu1 %v13309_v2  ;;  %v6399_v22 = vld [vmem:[%s13268_s5 + $0x20] sm:$0xff] }
 0x3e6   :  { %5709 = vmatmul.mubr.f32.gmra.mrb[26].mxu1 %v10714_v8 }
 0x3e7   :  { %5713 = vmatprep.mubr.f32.mxu1 %v10751_v16  ;;  %8242 = vmatpush1.bf16.msra.mxu1 %v8241_v57 }
 0x3e8   :  { %8243 = vmatprep.subr.bf16.mxu1 %v13309_v2 }
 0x3ea   :  { %5714 = vmatmul.mubr.f32.gmra.mrb[28].mxu1 %v10732_v38 }
 0x3eb   :  { %5718 = vmatprep.mubr.f32.mxu1 %v10770_v32  ;;  %8245 = vmatpush1.bf16.msra.mxu1 %v8244_v59  ;;  %v6402_v59 = vld [vmem:[%s13268_s5 + $0x38] sm:$0xff] }
 0x3ec   :  { %8246 = vmatprep.subr.bf16.mxu1 %v13309_v2 }
 0x3ee   :  { %5719 = vmatmul.mubr.f32.gmra.mrb[30].mxu1 %v10751_v16 }
 0x3ef   :  { %5723 = vmatprep.mubr.f32.mxu1 %v10789_v27  ;;  %8248 = vmatpush1.bf16.msra.mxu1 %v8247_v37  ;;  %v6404_v37 = vld [vmem:[%s13268_s5 + $0x48] sm:$0xff] }
 0x3f0   :  { %8617 = vmatprep.subr.bf16.mxu1 %v13309_v2 }
 0x3f2   :  { %5724 = vmatmul.mubr.f32.gmra.mrb[32].mxu1 %v10770_v32 }
 0x3f3   :  { %5728 = vmatprep.mubr.f32.mxu1 %v13308_v0 }
 0x3f6   :  { %5729 = vmatmul.mubr.f32.gmra.mrb[34].mxu1 %v10789_v27  ;;  %v6396_v27 = vld [vmem:[%s13268_s5 + $0x8] sm:$0xff] }
 0x3f7   :  { %5733 = vmatprep.mubr.f32.mxu1 %v10888_v45 }
 0x3fa   :  { %5734 = vmatmul.mubr.f32.gmra.mrb[36].mxu1 %v10881_v15 }
 0x3fb   :  { %5738 = vmatprep.mubr.f32.mxu1 %v10897_v14 }
 0x3fe   :  { %5739 = vmatmul.mubr.f32.gmra.mrb[38].mxu1 %v10888_v45 }
 0x3ff   :  { %5743 = vmatprep.mubr.f32.mxu1 %v10906_v58 }
 0x402   :  { %5744 = vmatmul.mubr.f32.gmra.mrb[40].mxu1 %v10897_v14 }
 0x403   :  { %5748 = vmatprep.mubr.f32.mxu1 %v10915_v19 }
 0x406   :  { %5749 = vmatmul.mubr.f32.gmra.mrb[42].mxu1 %v10906_v58 }
 0x407   :  { %5753 = vmatprep.mubr.f32.mxu1 %v10929_v40 }
 0x40a   :  { %5754 = vmatmul.mubr.f32.gmra.mrb[44].mxu1 %v10915_v19 }
 0x40b   :  { %5758 = vmatprep.mubr.f32.mxu1 %v13308_v0 }
 0x40e   :  { %5759 = vmatmul.mubr.f32.gmra.mrb[46].mxu1 %v10929_v40  ;;  %v6398_v40 = vld [vmem:[%s13268_s5 + $0x18] sm:$0xff] }
 0x40f   :  { %5763 = vmatprep.mubr.f32.mxu1 %v11074_v31  ;;  %v8297_v57 = vpack.c.bf16 %v6398_v40, %v6396_v27  ;;  %v6406_v27 = vld [vmem:[%s13268_s5 + $0x58] sm:$0xff] }
 0x410   :  { %v8305_v40 = vpack.c.bf16 %v6406_v27, %v6404_v37  ;;  %v6416_v37 = vld [vmem:[%s13268_s5 + $0xa8] sm:$0xff]  ;;  %v6418_v27 = vld [vmem:[%s13268_s5 + $0xb8] sm:$0xff] }
 0x411   :  { %8298 = vmatprep.subr.bf16.mxu0 %v8297_v57  ;;  %v13360_v57 = vld [vmem:[#allocation7_spill] sm:$0xff] }
 0x412   :  { %5764 = vmatmul.mubr.f32.gmra.mrb[48].mxu1 %v11058_v20 }
 0x413   :  { %5768 = vmatprep.mubr.f32.mxu1 %v11090_v34 }
 0x416   :  { %5769 = vmatmul.mubr.f32.gmra.mrb[50].mxu1 %v11074_v31 }
 0x417   :  { %5773 = vmatprep.mubr.f32.mxu1 %v11106_v7 }
 0x41a   :  { %5774 = vmatmul.mubr.f32.gmra.mrb[52].mxu1 %v11090_v34 }
 0x41b   :  { %5778 = vmatprep.mubr.f32.mxu1 %v11122_v24 }
 0x41e   :  { %5779 = vmatmul.mubr.f32.gmra.mrb[54].mxu1 %v11106_v7 }
 0x41f   :  { %5783 = vmatprep.mubr.f32.mxu1 %v11138_v17 }
 0x422   :  { %5784 = vmatmul.mubr.f32.gmra.mrb[56].mxu1 %v11122_v24 }
 0x423   :  { %5788 = vmatprep.mubr.f32.mxu1 %v13308_v0 }
 0x426   :  { %5789 = vmatmul.mubr.f32.gmra.mrb[58].mxu1 %v11138_v17  ;;  %v6395_v17 = vld [vmem:[%s13268_s5] sm:$0xff] }
 0x427   :  { %5793 = vmatprep.mubr.f32.mxu1 %v11244_v54  ;;  %v8299_v1 = vpack.c.bf16 %v6397_v53, %v6395_v17  ;;  %v6405_v17 = vld [vmem:[%s13268_s5 + $0x50] sm:$0xff] }
 0x429   :  { %8300 = vmatpush1.bf16.msra.mxu0 %v8299_v1  ;;  %v6408_v1 = vld [vmem:[%s13268_s5 + $0x68] sm:$0xff] }
 0x42a   :  { %5794 = vmatmul.mubr.f32.gmra.mrb[60].mxu1 %v11235_v41 }
 0x42b   :  { %5798 = vmatprep.mubr.f32.mxu1 %v11253_v50 }
 0x42e   :  { %5799 = vmatmul.mubr.f32.gmra.mrb[62].mxu1 %v11244_v54 }
 0x42f   :  { %5803 = vmatprep.mubr.f32.mxu1 %v11262_v39 }
 0x432   :  { %5804 = vmatmul.mubr.f32.gmra.mrb[64].mxu1 %v11253_v50 }
 0x433   :  { %5808 = vmatprep.mubr.f32.mxu1 %v11271_v46 }
 0x436   :  { %5809 = vmatmul.mubr.f32.gmra.mrb[66].mxu1 %v11262_v39 }
 0x437   :  { %5813 = vmatprep.mubr.f32.mxu1 %v11280_v29 }
 0x43a   :  { %5814 = vmatmul.mubr.f32.gmra.mrb[68].mxu1 %v11271_v46 }
 0x43b   :  { %5818 = vmatprep.mubr.f32.mxu1 %v13308_v0 }
 0x43e   :  { %5819 = vmatmul.mubr.f32.gmra.mrb[70].mxu1 %v11280_v29  ;;  %v8301_v29 = vpack.c.bf16 %v6402_v59, %v6400_v6  ;;  %v6410_v6 = vld [vmem:[%s13268_s5 + $0x78] sm:$0xff] }
 0x43f   :  { %5888 = vmatprep.mubr.f32.mxu1 %v10455_v48  ;;  %v8309_v59 = vpack.c.bf16 %v6410_v6, %v6408_v1  ;;  %v6422_v1 = vld [vmem:[%s13268_s5 + $0xd8] sm:$0xff] }
 0x440   :  { %8302 = vmatprep.subr.bf16.mxu0 %v8301_v29  ;;  %v6412_v29 = vld [vmem:[%s13268_s5 + $0x88] sm:$0xff] }
 0x442   :  { %5889 = vmatmul.mubr.f32.vlgmr.msra.gmra.mrb[0].mxu1 %v13308_v0 }
 0x443   :  { %5893 = vmatprep.mubr.f32.mxu1 %v10469_v12  ;;  %8633 = vmatpush1.bf16.msra.mxu1 %v10582_v3  ;;  %v6401_v3 = vld [vmem:[%s13268_s5 + $0x30] sm:$0xff] }
 0x444   :  { %8618 = vmatprep.subr.bf16.mxu1 %v13309_v2  ;;  %v8303_v49 = vpack.c.bf16 %v6401_v3, %v6399_v22  ;;  %v6414_v22 = vld [vmem:[%s13268_s5 + $0x98] sm:$0xff] }
 0x446   :  { %5894 = vmatmul.mubr.f32.gmra.mrb[2].mxu1 %v10455_v48  ;;  %8304 = vmatpush1.bf16.msra.mxu0 %v8303_v49  ;;  %v13359_v48 = vld [vmem:[#allocation6_spill] sm:$0xff]  ;;  %v6411_v49 = vld [vmem:[%s13268_s5 + $0x80] sm:$0xff] }
 0x447   :  { %5898 = vmatprep.mubr.f32.mxu1 %v10482_v10  ;;  %8634 = vmatpush1.bf16.msra.mxu1 %v13358_v44  ;;  %v8313_v44 = vpack.c.bf16 %v6414_v22, %v6412_v29  ;;  %v6426_v29 = vld [vmem:[%s13268_s5 + $0xf8] sm:$0xff] }
 0x448   :  { %8619 = vmatprep.subr.bf16.mxu1 %v13309_v2  ;;  %8306 = vmatprep.subr.bf16.mxu0 %v8305_v40 }
 0x44a   :  { %5899 = vmatmul.mubr.f32.gmra.mrb[4].mxu1 %v10469_v12  ;;  %v6403_v12 = vld [vmem:[%s13268_s5 + $0x40] sm:$0xff] }
 0x44b   :  { %5903 = vmatprep.mubr.f32.mxu1 %v10509_v43  ;;  %8635 = vmatpush1.bf16.msra.mxu1 %v13359_v48  ;;  %v8307_v53 = vpack.c.bf16 %v6405_v17, %v6403_v12  ;;  %v6413_v48 = vld [vmem:[%s13268_s5 + $0x90] sm:$0xff]  ;;  %v13363_v12 = vld [vmem:[#allocation10_spill] sm:$0xff]  ;;  %v6415_v17 = vld [vmem:[%s13268_s5 + $0xa0] sm:$0xff] }
 0x44c   :  { %8620 = vmatprep.subr.bf16.mxu1 %v13309_v2  ;;  %v8315_v40 = vpack.c.bf16 %v6413_v48, %v6411_v49  ;;  %v6425_v49 = vld [vmem:[%s13268_s5 + $0xf0] sm:$0xff] }
 0x44d   :  { %8308 = vmatpush1.bf16.msra.mxu0 %v8307_v53  ;;  %v8317_v53 = vpack.c.bf16 %v6418_v27, %v6416_v37  ;;  %v6430_v37 = vld [vmem:[%s13268_s5 + $0x118] sm:$0xff] }
 0x44e   :  { %5904 = vmatmul.mubr.f32.gmra.mrb[6].mxu1 %v10482_v10  ;;  %v13361_v10 = vld [vmem:[#allocation8_spill] sm:$0xff]  ;;  %8310 = vmatprep.subr.bf16.mxu0 %v8309_v59  ;;  %v6421_v59 = vld [vmem:[%s13268_s5 + $0xd0] sm:$0xff] }
 0x44f   :  { %5908 = vmatprep.mubr.f32.mxu1 %v10525_v62  ;;  %8636 = vmatpush1.bf16.msra.mxu1 %v13360_v57  ;;  %v6417_v57 = vld [vmem:[%s13268_s5 + $0xb0] sm:$0xff] }
 0x450   :  { %8621 = vmatprep.subr.bf16.mxu1 %v13309_v2  ;;  %v8319_v6 = vpack.c.bf16 %v6417_v57, %v6415_v17  ;;  %v6429_v17 = vld [vmem:[%s13268_s5 + $0x110] sm:$0xff] }
 0x452   :  { %5909 = vmatmul.mubr.f32.gmra.mrb[8].mxu1 %v10509_v43  ;;  %v6407_v43 = vld [vmem:[%s13268_s5 + $0x60] sm:$0xff] }
 0x453   :  { %5913 = vmatprep.mubr.f32.mxu1 %v10541_v4  ;;  %8637 = vmatpush1.bf16.msra.mxu1 %v13361_v10  ;;  %v13362_v4 = vld [vmem:[#allocation9_spill] sm:$0xff]  ;;  %v6420_v10 = vld [vmem:[%s13268_s5 + $0xc8] sm:$0xff] }
 0x454   :  { %8622 = vmatprep.subr.bf16.mxu1 %v13309_v2 }
 0x456   :  { %5914 = vmatmul.mubr.f32.gmra.mrb[10].mxu1 %v10525_v62  ;;  %v6409_v62 = vld [vmem:[%s13268_s5 + $0x70] sm:$0xff] }
 0x457   :  { %5918 = vmatprep.mubr.f32.mxu1 %v10686_v33  ;;  %8638 = vmatpush1.bf16.msra.mxu1 %v13362_v4  ;;  %v8311_v3 = vpack.c.bf16 %v6409_v62, %v6407_v43  ;;  %v13364_v43 = vld [vmem:[#allocation11_spill] sm:$0xff]  ;;  %v6419_v4 = vld [vmem:[%s13268_s5 + $0xc0] sm:$0xff]  ;;  %v8321_v62 = vpack.c.bf16 %v6422_v1, %v6420_v10  ;;  %v13367_v1 = vld [vmem:[#allocation14_spill] sm:$0xff] }
 0x458   :  { %8623 = vmatprep.subr.bf16.mxu1 %v13309_v2  ;;  %v8323_v22 = vpack.c.bf16 %v6421_v59, %v6419_v4 }
 0x459   :  { %8312 = vmatpush1.bf16.msra.mxu0 %v8311_v3  ;;  %v13365_v3 = vld [vmem:[#allocation12_spill] sm:$0xff] }
 0x45a   :  { %5919 = vmatmul.mubr.f32.gmra.mrb[12].mxu1 %v13308_v0  ;;  %8314 = vmatprep.subr.bf16.mxu0 %v8313_v44  ;;  %v6423_v44 = vld [vmem:[%s13268_s5 + $0xe0] sm:$0xff] }
 0x45b   :  { %5923 = vmatprep.mubr.f32.mxu1 %v10697_v26  ;;  %8639 = vmatpush1.bf16.msra.mxu1 %v13363_v12  ;;  %v8327_v27 = vpack.c.bf16 %v6425_v49, %v6423_v44  ;;  %v6427_v12 = vld [vmem:[%s13268_s5 + $0x100] sm:$0xff]  ;;  %v13371_v49 = vld [vmem:[#allocation18_spill] sm:$0xff] }
 0x45c   :  { %8624 = vmatprep.subr.bf16.mxu1 %v13309_v2  ;;  %v8331_v10 = vpack.c.bf16 %v6429_v17, %v6427_v12  ;;  %v13370_v44 = vld [vmem:[#allocation17_spill] sm:$0xff]  ;;  %v6456_v17 = vld [vmem:[%s13268_s5 + $0x1e8] sm:$0xff] }
 0x45d   :  { %8316 = vmatpush1.bf16.msra.mxu0 %v8315_v40  ;;  %v13366_v40 = vld [vmem:[#allocation13_spill] sm:$0xff] }
 0x45e   :  { %5924 = vmatmul.mubr.f32.gmra.mrb[14].mxu1 %v10686_v33  ;;  %8318 = vmatprep.subr.bf16.mxu0 %v8317_v53  ;;  %v6424_v33 = vld [vmem:[%s13268_s5 + $0xe8] sm:$0xff]  ;;  %v6434_v53 = vld [vmem:[%s13268_s5 + $0x138] sm:$0xff] }
 0x45f   :  { %5928 = vmatprep.mubr.f32.mxu1 %v10714_v8  ;;  %8640 = vmatpush1.bf16.msra.mxu1 %v13364_v43  ;;  %v8325_v48 = vpack.c.bf16 %v6426_v29, %v6424_v33  ;;  %v6433_v43 = vld [vmem:[%s13268_s5 + $0x130] sm:$0xff]  ;;  %v6435_v33 = vld [vmem:[%s13268_s5 + $0x140] sm:$0xff] }
 0x460   :  { %8625 = vmatprep.subr.bf16.mxu1 %v13309_v2  ;;  %v6437_v29 = vld [vmem:[%s13268_s5 + $0x150] sm:$0xff] }
 0x461   :  { %8320 = vmatpush1.bf16.msra.mxu0 %v8319_v6  ;;  %v6431_v6 = vld [vmem:[%s13268_s5 + $0x120] sm:$0xff] }
 0x462   :  { %5929 = vmatmul.mubr.f32.gmra.mrb[16].mxu1 %v10697_v26  ;;  %8322 = vmatprep.subr.bf16.mxu0 %v8321_v62  ;;  %v6428_v26 = vld [vmem:[%s13268_s5 + $0x108] sm:$0xff]  ;;  %v8335_v59 = vpack.c.bf16 %v6433_v43, %v6431_v6  ;;  %v13368_v62 = vld [vmem:[#allocation15_spill] sm:$0xff]  ;;  %v6462_v43 = vld [vmem:[%s13268_s5 + $0x218] sm:$0xff] }
 0x463   :  { %5933 = vmatprep.mubr.f32.mxu1 %v10732_v38  ;;  %8641 = vmatpush1.bf16.msra.mxu1 %v13365_v3  ;;  %v8329_v57 = vpack.c.bf16 %v6430_v37, %v6428_v26  ;;  %v13369_v3 = vld [vmem:[#allocation16_spill] sm:$0xff]  ;;  %v6449_v37 = vld [vmem:[%s13268_s5 + $0x1b0] sm:$0xff]  ;;  %v6460_v6 = vld [vmem:[%s13268_s5 + $0x208] sm:$0xff] }
 0x464   :  { %8626 = vmatprep.subr.bf16.mxu1 %v13309_v2 }
 0x465   :  { %8324 = vmatpush1.bf16.msra.mxu0 %v8323_v22 }
 0x466   :  { %5934 = vmatmul.mubr.f32.gmra.mrb[18].mxu1 %v10714_v8  ;;  %8326 = vmatprep.subr.bf16.mxu0 %v8325_v48  ;;  %v6432_v8 = vld [vmem:[%s13268_s5 + $0x128] sm:$0xff]  ;;  %v6450_v48 = vld [vmem:[%s13268_s5 + $0x1b8] sm:$0xff] }
 0x467   :  { %5938 = vmatprep.mubr.f32.mxu1 %v10751_v16  ;;  %8642 = vmatpush1.bf16.msra.mxu1 %v13366_v40  ;;  %v8333_v4 = vpack.c.bf16 %v6434_v53, %v6432_v8  ;;  %v6454_v40 = vld [vmem:[%s13268_s5 + $0x1d8] sm:$0xff]  ;;  %v6455_v53 = vld [vmem:[%s13268_s5 + $0x1e0] sm:$0xff] }
 0x468   :  { %8627 = vmatprep.subr.bf16.mxu1 %v13309_v2 }
 0x469   :  { %8328 = vmatpush1.bf16.msra.mxu0 %v8327_v27  ;;  %v6452_v27 = vld [vmem:[%s13268_s5 + $0x1c8] sm:$0xff] }
 0x46a   :  { %5939 = vmatmul.mubr.f32.gmra.mrb[20].mxu1 %v10732_v38  ;;  %8330 = vmatprep.subr.bf16.mxu0 %v8329_v57  ;;  %v6436_v38 = vld [vmem:[%s13268_s5 + $0x148] sm:$0xff]  ;;  %v6458_v57 = vld [vmem:[%s13268_s5 + $0x1f8] sm:$0xff] }
 0x46b   :  { %5943 = vmatprep.mubr.f32.mxu1 %v10770_v32  ;;  %8643 = vmatpush1.bf16.msra.mxu1 %v13367_v1  ;;  %v6438_v32 = vld [vmem:[%s13268_s5 + $0x158] sm:$0xff]  ;;  %v8357_v8 = vpack.c.bf16 %v6458_v57, %v6456_v17 }
 0x46c   :  { %8628 = vmatprep.subr.bf16.mxu1 %v13309_v2  ;;  %v8337_v22 = vpack.c.bf16 %v6438_v32, %v6436_v38  ;;  %v12319_v38 = vpop.f32.mrb[72].mxu0 }
 0x46d   :  { %8332 = vmatpush1.bf16.msra.mxu0 %v8331_v10  ;;  %v6457_v10 = vld [vmem:[%s13268_s5 + $0x1f0] sm:$0xff]  ;;  %v6287_v32 = vpop.f32.mrb[73].mxu0 }
 0x46e   :  { %5944 = vmatmul.mubr.f32.gmra.mrb[22].mxu1 %v10751_v16  ;;  %8334 = vmatprep.subr.bf16.mxu0 %v8333_v4  ;;  %v8339_v16 = vpack.c.bf16 %v6437_v29, %v6435_v33  ;;  %v8359_v1 = vpack.c.bf16 %v6457_v10, %v6455_v53  ;;  %v8361_v4 = vpack.c.bf16 %v6462_v43, %v6460_v6  ;;  %v13375_v53 = vld [vmem:[#allocation21_spill] sm:$0xff] }
 0x46f   :  { %5948 = vmatprep.mubr.f32.mxu1 %v10874_v55  ;;  %8644 = vmatpush1.bf16.msra.mxu1 %v13368_v62  ;;  %v12326_v62 = vld [vmem:[%s13269_s4] ss:$0 sm:$0xff] }
 0x470   :  { %8629 = vmatprep.subr.bf16.mxu1 %v13309_v2  ;;  %v4421_v29 = vadd.f32 %v12326_v62, %v11273_v28  ;;  %v4431_v28 = vadd.f32 %v12326_v62, %v11288_v21  ;;  %v4441_v21 = vadd.f32 %v12326_v62, %v11300_v63  ;;  %v4451_v10 = vadd.f32 %v12326_v62, %v13375_v53  ;;  %v13376_v63 = vld [vmem:[#allocation52_spill] sm:$0xff] }
 0x471   :  { %8336 = vmatpush1.bf16.msra.mxu0 %v8335_v59  ;;  %v12321_v59 = vpop.f32.mrb[74].mxu0 }
 0x472   :  { %5949 = vmatmul.mubr.f32.gmra.mrb[24].mxu1 %v13308_v0  ;;  %8338 = vmatprep.subr.bf16.mxu0 %v8337_v22  ;;  %v6292_v33 = vpop.f32.mrb[75].mxu0 }
 0x473   :  { %5953 = vmatprep.mubr.f32.mxu1 %v10881_v15  ;;  %8645 = vmatpush1.bf16.msra.mxu1 %v13369_v3  ;;  %v13377_v33 = vld [vmem:[#allocation22_spill] sm:$0xff] }
 0x474   :  { %8630 = vmatprep.subr.bf16.mxu1 %v13309_v2 }
 0x475   :  { %8340 = vmatpush1.bf16.msra.mxu0 %v8339_v16 }
 0x476   :  { %5954 = vmatmul.mubr.f32.gmra.mrb[26].mxu1 %v10874_v55  ;;  %v13372_v55 = vld [vmem:[#allocation19_spill] sm:$0xff] }
 0x477   :  { %5958 = vmatprep.mubr.f32.mxu1 %v10888_v45  ;;  %8646 = vmatpush1.bf16.msra.mxu1 %v13370_v44  ;;  %v4426_v44 = vadd.f32 %v12326_v62, %v11282_v11 }
 0x478   :  { %8631 = vmatprep.subr.bf16.mxu1 %v13309_v2 }
 0x47a   :  { %5959 = vmatmul.mubr.f32.gmra.mrb[28].mxu1 %v10881_v15  ;;  %v6442_v15 = vld [vmem:[%s13268_s5 + $0x178] sm:$0xff] }
 0x47b   :  { %5963 = vmatprep.mubr.f32.mxu1 %v10897_v14  ;;  %8647 = vmatpush1.bf16.msra.mxu1 %v13371_v49 }
 0x47c   :  { %8632 = vmatprep.subr.bf16.mxu1 %v13309_v2  ;;  %v6440_v2 = vld [vmem:[%s13268_s5 + $0x168] sm:$0xff] }
 0x47e   :  { %5964 = vmatmul.mubr.f32.gmra.mrb[30].mxu1 %v10888_v45  ;;  %v6439_v45 = vld [vmem:[%s13268_s5 + $0x160] sm:$0xff] }
 0x47f   :  { %5968 = vmatprep.mubr.f32.mxu1 %v10906_v58  ;;  %8648 = vmatpush1.bf16.msra.mxu1 %v13372_v55  ;;  %v12333_v55 = vpop.f32.mrb[76].mxu0 }
 0x482   :  { %5969 = vmatmul.mubr.f32.gmra.mrb[32].mxu1 %v10897_v14  ;;  %v8341_v14 = vpack.c.bf16 %v6442_v15, %v6440_v2  ;;  %v6297_v15 = vpop.f32.mrb[77].mxu0 }
 0x483   :  { %5973 = vmatprep.mubr.f32.mxu1 %v10915_v19  ;;  %v13379_v15 = vld [vmem:[#allocation23_spill] sm:$0xff] }
 0x484   :  { %8342 = vmatprep.subr.bf16.mxu0 %v8341_v14 }
 0x486   :  { %5974 = vmatmul.mubr.f32.gmra.mrb[34].mxu1 %v10906_v58  ;;  %v6441_v58 = vld [vmem:[%s13268_s5 + $0x170] sm:$0xff] }
 0x487   :  { %5978 = vmatprep.mubr.f32.mxu1 %v11042_v36  ;;  %v8343_v19 = vpack.c.bf16 %v6441_v58, %v6439_v45  ;;  %v12335_v58 = vpop.f32.mrb[78].mxu0 }
 0x489   :  { %8344 = vmatpush1.bf16.msra.mxu0 %v8343_v19  ;;  %v6302_v19 = vpop.f32.mrb[79].mxu0 }
 0x48a   :  { %5979 = vmatmul.mubr.f32.gmra.mrb[36].mxu1 %v13308_v0 }
 0x48b   :  { %5983 = vmatprep.mubr.f32.mxu1 %v11058_v20 }
 0x48e   :  { %5984 = vmatmul.mubr.f32.gmra.mrb[38].mxu1 %v11042_v36  ;;  %v6444_v36 = vld [vmem:[%s13268_s5 + $0x188] sm:$0xff] }
 0x48f   :  { %5988 = vmatprep.mubr.f32.mxu1 %v11074_v31 }
 0x492   :  { %5989 = vmatmul.mubr.f32.gmra.mrb[40].mxu1 %v11058_v20  ;;  %v6446_v20 = vld [vmem:[%s13268_s5 + $0x198] sm:$0xff] }
 0x493   :  { %5993 = vmatprep.mubr.f32.mxu1 %v11090_v34 }
 0x496   :  { %5994 = vmatmul.mubr.f32.gmra.mrb[42].mxu1 %v11074_v31  ;;  %v6443_v31 = vld [vmem:[%s13268_s5 + $0x180] sm:$0xff] }
 0x497   :  { %5998 = vmatprep.mubr.f32.mxu1 %v11106_v7 }
 0x49a   :  { %5999 = vmatmul.mubr.f32.gmra.mrb[44].mxu1 %v11090_v34  ;;  %v8345_v34 = vpack.c.bf16 %v6446_v20, %v6444_v36 }
 0x49b   :  { %6003 = vmatprep.mubr.f32.mxu1 %v11122_v24 }
 0x49c   :  { %8346 = vmatprep.subr.bf16.mxu0 %v8345_v34 }
 0x49e   :  { %6004 = vmatmul.mubr.f32.gmra.mrb[46].mxu1 %v11106_v7  ;;  %v6445_v7 = vld [vmem:[%s13268_s5 + $0x190] sm:$0xff] }
 0x49f   :  { %6008 = vmatprep.mubr.f32.mxu1 %v11226_v25  ;;  %v8347_v24 = vpack.c.bf16 %v6445_v7, %v6443_v31 }
 0x4a1   :  { %8348 = vmatpush1.bf16.msra.mxu0 %v8347_v24 }
 0x4a2   :  { %6009 = vmatmul.mubr.f32.gmra.mrb[48].mxu1 %v13308_v0 }
 0x4a3   :  { %6013 = vmatprep.mubr.f32.mxu1 %v11235_v41 }
 0x4a6   :  { %6014 = vmatmul.mubr.f32.gmra.mrb[50].mxu1 %v11226_v25  ;;  %v6448_v25 = vld [vmem:[%s13268_s5 + $0x1a8] sm:$0xff] }
 0x4a7   :  { %6018 = vmatprep.mubr.f32.mxu1 %v11244_v54  ;;  %v8349_v26 = vpack.c.bf16 %v6450_v48, %v6448_v25 }
 0x4a9   :  { %8350 = vmatprep.subr.bf16.mxu0 %v8349_v26 }
 0x4aa   :  { %6019 = vmatmul.mubr.f32.gmra.mrb[52].mxu1 %v11235_v41  ;;  %v6447_v41 = vld [vmem:[%s13268_s5 + $0x1a0] sm:$0xff] }
 0x4ab   :  { %6023 = vmatprep.mubr.f32.mxu1 %v11253_v50 }
 0x4ae   :  { %6024 = vmatmul.mubr.f32.gmra.mrb[54].mxu1 %v11244_v54  ;;  %v8351_v54 = vpack.c.bf16 %v6449_v37, %v6447_v41 }
 0x4af   :  { %6028 = vmatprep.mubr.f32.mxu1 %v11262_v39 }
 0x4b0   :  { %8352 = vmatpush1.bf16.msra.mxu0 %v8351_v54 }
 0x4b2   :  { %6029 = vmatmul.mubr.f32.gmra.mrb[56].mxu1 %v11253_v50  ;;  %v8353_v50 = vpack.c.bf16 %v6454_v40, %v6452_v27 }
 0x4b3   :  { %6033 = vmatprep.mubr.f32.mxu1 %v11271_v46  ;;  %v6451_v46 = vld [vmem:[%s13268_s5 + $0x1c0] sm:$0xff] }
 0x4b4   :  { %8354 = vmatprep.subr.bf16.mxu0 %v8353_v50 }
 0x4b6   :  { %6034 = vmatmul.mubr.f32.gmra.mrb[58].mxu1 %v11262_v39  ;;  %v6453_v39 = vld [vmem:[%s13268_s5 + $0x1d0] sm:$0xff] }
 0x4b7   :  { %6038 = vmatprep.mubr.f32.mxu1 %v13308_v0  ;;  %v8355_v12 = vpack.c.bf16 %v6453_v39, %v6451_v46  ;;  %v13373_v46 = vld [vmem:[#allocation20_spill] sm:$0xff] }
 0x4b9   :  { %8356 = vmatpush1.bf16.msra.mxu0 %v8355_v12  ;;  %v13374_v12 = vld [vmem:[#allocation51_spill] sm:$0xff] }
 0x4ba   :  { %6039 = vmatmul.mubr.f32.gmra.mrb[60].mxu1 %v13308_v0  ;;  %8358 = vmatprep.subr.bf16.mxu0 %v8357_v8 }
 0x4bb   :  { %6043 = vmatprep.mubr.f32.mxu1 %v13308_v0 }
 0x4bd   :  { %8360 = vmatpush1.bf16.msra.mxu0 %v8359_v1 }
 0x4be   :  { %6044 = vmatmul.mubr.f32.gmra.mrb[62].mxu1 %v13308_v0  ;;  %8362 = vmatprep.subr.bf16.mxu0 %v8361_v4 }
 0x4bf   :  { %6048 = vmatprep.mubr.f32.mxu1 %v13308_v0 }
 0x4c2   :  { %6049 = vmatmul.mubr.f32.gmra.mrb[64].mxu1 %v13308_v0 }
 0x4c3   :  { %6053 = vmatprep.mubr.f32.mxu1 %v13308_v0 }
 0x4c6   :  { %6054 = vmatmul.mubr.f32.gmra.mrb[66].mxu1 %v13308_v0 }
 0x4c7   :  { %6058 = vmatprep.mubr.f32.mxu1 %v13308_v0 }
 0x4ca   :  { %6059 = vmatmul.mubr.f32.gmra.mrb[68].mxu1 %v13308_v0 }
 0x4cb   :  { %6063 = vmatprep.mubr.f32.mxu1 %v13308_v0 }
 0x4ce   :  { %6064 = vmatmul.mubr.f32.gmra.mrb[70].mxu1 %v13308_v0 }
 0x4cf   :  { %6303 = vmatprep.mubr.f32.mxu1 %v13308_v0 }
 0x4d2   :  { %6304 = vmatmul.mubr.f32.vlgmr.msra.gmra.mrb[68].mxu1 %v13308_v0 }
 0x4d3   :  { %6308 = vmatprep.mubr.f32.mxu1 %v13308_v0 }
 0x4d6   :  { %6309 = vmatmul.mubr.f32.gmra.mrb[70].mxu1 %v13308_v0 }
 0x515   :  { %v5890_v22 = vpop.f32.mrb[0].mxu1 }
 0x516   :  { %v8650_v16 = vadd.f32 %v5890_v22, %v4421_v29  ;;  %v5892_v3 = vpop.f32.mrb[1].mxu1  ;;  %v4456_v29 = vadd.f32 %v12326_v62, %v13377_v33 }
 0x518   :  { %v8651_v49 = vadd.f32 %v8650_v16, %v11565_v52  ;;  %v4436_v52 = vadd.f32 %v12326_v62, %v11294_v42  ;;  %v4446_v42 = vadd.f32 %v12326_v62, %v13373_v46  ;;  %v13378_v16 = vld [vmem:[#allocation53_spill] sm:$0xff] }
 0x519   :  { %v5895_v2 = vpop.f32.mrb[2].mxu1 }
 0x51a   :  { %v8653_v45 = vadd.f32 %v5895_v2, %v4426_v44  ;;  %v5897_v14 = vpop.f32.mrb[3].mxu1  ;;  %v6314_v31 = vmax.f32 %v8651_v49, 0.0 }
 0x51b   :  { %v13380_v14 = vld [vmem:[#allocation54_spill] sm:$0xff] }
 0x51c   :  { %v8654_v36 = vadd.f32 %v8653_v45, %v11569_v47  ;;  %v4461_v45 = vadd.f32 %v12326_v62, %v13379_v15  ;;  %v6470_v15 = vld [vmem:[%s13268_s5 + $0x258] sm:$0xff] }
 0x51d   :  { %v5900_v20 = vpop.f32.mrb[4].mxu1 }
 0x51e   :  { %v6315_v34 = vmax.f32 %v8654_v36, 0.0  ;;  %v8656_v11 = vadd.f32 %v5900_v20, %v4431_v28  ;;  %v5902_v7 = vpop.f32.mrb[5].mxu1 }
 0x520   :  { %v12342_v24 = vmax.f32 %v6314_v31, %v6315_v34  ;;  %v8657_v25 = vadd.f32 %v8656_v11, %v11573_v5  ;;  %v13381_v11 = vld [vmem:[#allocation24_spill] sm:$0xff] }
 0x521   :  { %v5905_v48 = vpop.f32.mrb[6].mxu1  ;;  %v4466_v7 = vadd.f32 %v12326_v62, %v13381_v11  ;;  %v13388_v11 = vld [vmem:[#allocation28_spill] sm:$0xff] }
 0x522   :  { %v8659_v41 = vadd.f32 %v5905_v48, %v4436_v52  ;;  %v5907_v26 = vpop.f32.mrb[7].mxu1  ;;  %v6316_v54 = vmax.f32 %v8657_v25, 0.0  ;;  %v13382_v25 = vld [vmem:[#allocation55_spill] sm:$0xff] }
 0x524   :  { %v8660_v47 = vadd.f32 %v8659_v41, %v11577_v61 }
 0x525   :  { %v5910_v37 = vpop.f32.mrb[8].mxu1 }
 0x526   :  { %v6317_v27 = vmax.f32 %v8660_v47, 0.0  ;;  %v8662_v40 = vadd.f32 %v5910_v37, %v4441_v21  ;;  %v5912_v50 = vpop.f32.mrb[9].mxu1  ;;  %v13383_v37 = vld [vmem:[#allocation25_spill] sm:$0xff] }
 0x528   :  { %v6351_v39 = vmax.f32 %v6316_v54, %v6317_v27  ;;  %v8663_v17 = vadd.f32 %v8662_v40, %v13374_v12  ;;  %v4471_v54 = vadd.f32 %v12326_v62, %v13383_v37  ;;  %v13384_v27 = vld [vmem:[#allocation56_spill] sm:$0xff] }
 0x529   :  { %v5915_v5 = vpop.f32.mrb[10].mxu1 }
 0x52a   :  { %v8665_v57 = vadd.f32 %v5915_v5, %v4446_v42  ;;  %v5917_v8 = vpop.f32.mrb[11].mxu1  ;;  %v6318_v6 = vmax.f32 %v8663_v17, 0.0  ;;  %v6459_v5 = vld [vmem:[%s13268_s5 + $0x200] sm:$0xff] }
 0x52c   :  { %v8666_v1 = vadd.f32 %v8665_v57, %v13376_v63  ;;  %v13385_v57 = vld [vmem:[#allocation26_spill] sm:$0xff] }
 0x52d   :  { %v5920_v61 = vpop.f32.mrb[12].mxu1  ;;  %v4476_v8 = vadd.f32 %v12326_v62, %v13385_v57 }
 0x52e   :  { %v6319_v43 = vmax.f32 %v8666_v1, 0.0  ;;  %v8668_v4 = vadd.f32 %v5920_v61, %v4451_v10  ;;  %v5922_v32 = vpop.f32.mrb[13].mxu1  ;;  %v13386_v10 = vld [vmem:[#allocation57_spill] sm:$0xff]  ;;  %v6464_v1 = vld [vmem:[%s13268_s5 + $0x228] sm:$0xff]  ;;  %v6466_v61 = vld [vmem:[%s13268_s5 + $0x238] sm:$0xff] }
 0x530   :  { %v12356_v22 = vmax.f32 %v6318_v6, %v6319_v43  ;;  %v8669_v3 = vadd.f32 %v8668_v4, %v13378_v16  ;;  %v6463_v16 = vld [vmem:[%s13268_s5 + $0x220] sm:$0xff] }
 0x531   :  { %v5925_v44 = vpop.f32.mrb[14].mxu1 }
 0x532   :  { %v8671_v49 = vadd.f32 %v5925_v44, %v4456_v29  ;;  %v5927_v2 = vpop.f32.mrb[15].mxu1  ;;  %v6320_v36 = vmax.f32 %v8669_v3, 0.0  ;;  %v8365_v29 = vpack.c.bf16 %v6466_v61, %v6464_v1  ;;  %v6465_v3 = vld [vmem:[%s13268_s5 + $0x230] sm:$0xff]  ;;  %v6475_v61 = vld [vmem:[%s13268_s5 + $0x280] sm:$0xff] }
 0x533   :  { %v13387_v44 = vld [vmem:[#allocation27_spill] sm:$0xff] }
 0x534   :  { %v8672_v19 = vadd.f32 %v8671_v49, %v13380_v14  ;;  %v4481_v49 = vadd.f32 %v12326_v62, %v13387_v44 }
 0x535   :  { %v5930_v28 = vpop.f32.mrb[16].mxu1 }
 0x536   :  { %v6321_v20 = vmax.f32 %v8672_v19, 0.0  ;;  %v8674_v31 = vadd.f32 %v5930_v28, %v4461_v45  ;;  %v5932_v34 = vpop.f32.mrb[17].mxu1 }
 0x537   :  { %v6469_v34 = vld [vmem:[%s13268_s5 + $0x250] sm:$0xff] }
 0x538   :  { %v6353_v52 = vmax.f32 %v6320_v36, %v6321_v20  ;;  %v8675_v48 = vadd.f32 %v8674_v31, %v13382_v25  ;;  %v8367_v20 = vpack.c.bf16 %v6465_v3, %v6463_v16  ;;  %v6480_v16 = vld [vmem:[%s13268_s5 + $0x2a8] sm:$0xff]  ;;  %v6482_v3 = vld [vmem:[%s13268_s5 + $0x2b8] sm:$0xff] }
 0x539   :  { %v5935_v41 = vpop.f32.mrb[18].mxu1 }
 0x53a   :  { %v6368_v26 = vmax.f32 %v12342_v24, %v6353_v52  ;;  %v8677_v21 = vadd.f32 %v5935_v41, %v4466_v7  ;;  %v5937_v47 = vpop.f32.mrb[19].mxu1  ;;  %v6322_v46 = vmax.f32 %v8675_v48, 0.0  ;;  %v6461_v24 = vld [vmem:[%s13268_s5 + $0x210] sm:$0xff]  ;;  %v4486_v7 = vadd.f32 %v12326_v62, %v13388_v11  ;;  %v6472_v48 = vld [vmem:[%s13268_s5 + $0x268] sm:$0xff]  ;;  %v6474_v41 = vld [vmem:[%s13268_s5 + $0x278] sm:$0xff] }
 0x53b   :  { %v8363_v33 = vpack.c.bf16 %v6461_v24, %v6459_v5  ;;  %v6478_v5 = vld [vmem:[%s13268_s5 + $0x298] sm:$0xff] }
 0x53c   :  { %v8678_v40 = vadd.f32 %v8677_v21, %v13384_v27  ;;  %v8373_v27 = vpack.c.bf16 %v6474_v41, %v6472_v48 }
 0x53d   :  { %v5940_v50 = vpop.f32.mrb[20].mxu1 }
 0x53e   :  { %v6323_v42 = vmax.f32 %v8678_v40, 0.0  ;;  %v8680_v12 = vadd.f32 %v5940_v50, %v4471_v54  ;;  %v5942_v17 = vpop.f32.mrb[21].mxu1  ;;  %v6473_v40 = vld [vmem:[%s13268_s5 + $0x270] sm:$0xff]  ;;  %v13389_v50 = vld [vmem:[#allocation29_spill] sm:$0xff] }
 0x53f   :  { %v6476_v17 = vld [vmem:[%s13268_s5 + $0x288] sm:$0xff] }
 0x540   :  { %v6354_v53 = vmax.f32 %v6322_v46, %v6323_v42  ;;  %v8681_v63 = vadd.f32 %v8680_v12, %v13386_v10  ;;  %v4491_v46 = vadd.f32 %v12326_v62, %v13389_v50  ;;  %v13390_v42 = vld [vmem:[#allocation58_spill] sm:$0xff]  ;;  %v8377_v1 = vpack.c.bf16 %v6478_v5, %v6476_v17 }
 0x541   :  { %v5945_v6 = vpop.f32.mrb[22].mxu1 }
 0x542   :  { %v8683_v43 = vadd.f32 %v5945_v6, %v4476_v8  ;;  %v5947_v4 = vpop.f32.mrb[23].mxu1  ;;  %v6369_v32 = vmax.f32 %v6351_v39, %v6354_v53  ;;  %v6468_v39 = vld [vmem:[%s13268_s5 + $0x248] sm:$0xff]  ;;  %v6324_v14 = vmax.f32 %v8681_v63, 0.0  ;;  %v6477_v6 = vld [vmem:[%s13268_s5 + $0x290] sm:$0xff] }
 0x543   :  { %v8369_v31 = vpack.c.bf16 %v6470_v15, %v6468_v39  ;;  %v8379_v39 = vpack.c.bf16 %v6477_v6, %v6475_v61  ;;  %v8381_v15 = vpack.c.bf16 %v6482_v3, %v6480_v16  ;;  %v6492_v6 = vld [vmem:[%s13268_s5 + $0x308] sm:$0xff] }
 0x544   :  { %v8684_v2 = vadd.f32 %v8683_v43, %v11615_v9  ;;  %6759 = vmatprep.mubr.f32.mxu0 %v6369_v32  ;;  %v6467_v9 = vld [vmem:[%s13268_s5 + $0x240] sm:$0xff]  ;;  %v13391_v43 = vld [vmem:[#allocation30_spill] sm:$0xff] }
 0x545   :  { %v5950_v45 = vpop.f32.mrb[24].mxu1  ;;  %6760 = vmatmul.mubr.f32.vlgmr.msra.gmra.mrb[80].mxu0 %v6368_v26  ;;  %v8371_v54 = vpack.c.bf16 %v6469_v34, %v6467_v9  ;;  %v4496_v4 = vadd.f32 %v12326_v62, %v13391_v43  ;;  %v6486_v9 = vld [vmem:[%s13268_s5 + $0x2d8] sm:$0xff] }
 0x546   :  { %v6325_v19 = vmax.f32 %v8684_v2, 0.0  ;;  %v8686_v28 = vadd.f32 %v5950_v45, %v4481_v49  ;;  %8364 = vmatpush1.bf16.msra.mxu0 %v8363_v33  ;;  %v5952_v36 = vpop.f32.mrb[25].mxu1  ;;  %v13392_v33 = vld [vmem:[#allocation59_spill] sm:$0xff]  ;;  %v6479_v45 = vld [vmem:[%s13268_s5 + $0x2a0] sm:$0xff]  ;;  %v6494_v43 = vld [vmem:[%s13268_s5 + $0x318] sm:$0xff] }
 0x547   :  { %8366 = vmatprep.subr.bf16.mxu0 %v8365_v29  ;;  %v13394_v36 = vld [vmem:[#allocation60_spill] sm:$0xff] }
 0x548   :  { %v12407_v52 = vmax.f32 %v6324_v14, %v6325_v19  ;;  %v8687_v25 = vadd.f32 %v8686_v28, %v11625_v35  ;;  %v6471_v35 = vld [vmem:[%s13268_s5 + $0x260] sm:$0xff]  ;;  %v6481_v14 = vld [vmem:[%s13268_s5 + $0x2b0] sm:$0xff] }
 0x549   :  { %v5955_v26 = vpop.f32.mrb[26].mxu1  ;;  %v8375_v63 = vpack.c.bf16 %v6473_v40, %v6471_v35  ;;  %v13393_v19 = vld [vmem:[#allocation31_spill] sm:$0xff]  ;;  %v8383_v41 = vpack.c.bf16 %v6481_v14, %v6479_v45  ;;  %v13396_v40 = vld [vmem:[#allocation61_spill] sm:$0xff] }
 0x54a   :  { %v6370_v21 = vmax.f32 %v12356_v22, %v12407_v52  ;;  %v8689_v47 = vadd.f32 %v5955_v26, %v4486_v7  ;;  %8368 = vmatpush1.bf16.msra.mxu0 %v8367_v20  ;;  %v5957_v37 = vpop.f32.mrb[27].mxu1  ;;  %v6326_v57 = vmax.f32 %v8687_v25, 0.0  ;;  %v4501_v28 = vadd.f32 %v12326_v62, %v13393_v19  ;;  %v13400_v19 = vld [vmem:[#allocation63_spill] sm:$0xff]  ;;  %v13414_v22 = vld [vmem:[#allocation44_spill] sm:$0xff] }
 0x54b   :  { %8370 = vmatprep.subr.bf16.mxu0 %v8369_v31  ;;  %v6484_v31 = vld [vmem:[%s13268_s5 + $0x2c8] sm:$0xff]  ;;  %v6485_v37 = vld [vmem:[%s13268_s5 + $0x2d0] sm:$0xff]  ;;  %v4566_v52 = vadd.f32 %v12326_v62, %v13414_v22 }
 0x54c   :  { %v8690_v12 = vadd.f32 %v8689_v47, %v13390_v42  ;;  %v8385_v26 = vpack.c.bf16 %v6486_v9, %v6484_v31  ;;  %v6483_v47 = vld [vmem:[%s13268_s5 + $0x2c0] sm:$0xff]  ;;  %v6490_v42 = vld [vmem:[%s13268_s5 + $0x2f8] sm:$0xff] }
 0x54d   :  { %v5960_v24 = vpop.f32.mrb[28].mxu1 }
 0x54e   :  { %v6327_v8 = vmax.f32 %v8690_v12, 0.0  ;;  %v8692_v53 = vadd.f32 %v5960_v24, %v4491_v46  ;;  %8372 = vmatpush1.bf16.msra.mxu0 %v8371_v54  ;;  %v5962_v10 = vpop.f32.mrb[29].mxu1  ;;  %v13395_v54 = vld [vmem:[#allocation32_spill] sm:$0xff]  ;;  %v6488_v46 = vld [vmem:[%s13268_s5 + $0x2e8] sm:$0xff]  ;;  %v8387_v24 = vpack.c.bf16 %v6485_v37, %v6483_v47 }
 0x54f   :  { %8374 = vmatprep.subr.bf16.mxu0 %v8373_v27  ;;  %v4506_v27 = vadd.f32 %v12326_v62, %v13395_v54  ;;  %v13397_v10 = vld [vmem:[#allocation33_spill] sm:$0xff]  ;;  %v13402_v47 = vld [vmem:[#allocation64_spill] sm:$0xff]  ;;  %v6500_v54 = vld [vmem:[%s13268_s5 + $0x348] sm:$0xff] }
 0x550   :  { %v12441_v32 = vmax.f32 %v6326_v57, %v6327_v8  ;;  %v8693_v29 = vadd.f32 %v8692_v53, %v13392_v33  ;;  %v8389_v57 = vpack.c.bf16 %v6490_v42, %v6488_v46  ;;  %v6487_v8 = vld [vmem:[%s13268_s5 + $0x2e0] sm:$0xff]  ;;  %v6489_v53 = vld [vmem:[%s13268_s5 + $0x2f0] sm:$0xff] }
 0x551   :  { %v5965_v44 = vpop.f32.mrb[30].mxu1 }
 0x552   :  { %v8695_v49 = vadd.f32 %v5965_v44, %v4496_v4  ;;  %8376 = vmatpush1.bf16.msra.mxu0 %v8375_v63  ;;  %v5967_v2 = vpop.f32.mrb[31].mxu1  ;;  %v6328_v11 = vmax.f32 %v8693_v29, 0.0  ;;  %v4511_v63 = vadd.f32 %v12326_v62, %v13397_v10  ;;  %v8391_v44 = vpack.c.bf16 %v6489_v53, %v6487_v8  ;;  %v13403_v8 = vld [vmem:[#allocation36_spill] sm:$0xff] }
 0x553   :  { %8378 = vmatprep.subr.bf16.mxu0 %v8377_v1  ;;  %v13398_v1 = vld [vmem:[#allocation62_spill] sm:$0xff]  ;;  %v6491_v2 = vld [vmem:[%s13268_s5 + $0x300] sm:$0xff]  ;;  %v4526_v53 = vadd.f32 %v12326_v62, %v13403_v8 }
 0x554   :  { %v8696_v20 = vadd.f32 %v8695_v49, %v13394_v36  ;;  %v8393_v49 = vpack.c.bf16 %v6494_v43, %v6492_v6  ;;  %v6496_v36 = vld [vmem:[%s13268_s5 + $0x328] sm:$0xff]  ;;  %v6506_v6 = vld [vmem:[%s13268_s5 + $0x378] sm:$0xff] }
 0x555   :  { %v5970_v34 = vpop.f32.mrb[32].mxu1 }
 0x556   :  { %v6329_v7 = vmax.f32 %v8696_v20, 0.0  ;;  %v8698_v25 = vadd.f32 %v5970_v34, %v4501_v28  ;;  %8380 = vmatpush1.bf16.msra.mxu0 %v8379_v39  ;;  %v5972_v48 = vpop.f32.mrb[33].mxu1  ;;  %v6493_v39 = vld [vmem:[%s13268_s5 + $0x310] sm:$0xff]  ;;  %v6498_v20 = vld [vmem:[%s13268_s5 + $0x338] sm:$0xff] }
 0x557   :  { %8382 = vmatprep.subr.bf16.mxu0 %v8381_v15  ;;  %v13399_v15 = vld [vmem:[#allocation34_spill] sm:$0xff]  ;;  %v6497_v48 = vld [vmem:[%s13268_s5 + $0x330] sm:$0xff] }
 0x558   :  { %v12473_v35 = vmax.f32 %v6328_v11, %v6329_v7  ;;  %v8699_v50 = vadd.f32 %v8698_v25, %v13396_v40  ;;  %v4516_v45 = vadd.f32 %v12326_v62, %v13399_v15  ;;  %v8395_v11 = vpack.c.bf16 %v6493_v39, %v6491_v2  ;;  %v6495_v25 = vld [vmem:[%s13268_s5 + $0x320] sm:$0xff]  ;;  %v13406_v15 = vld [vmem:[#allocation66_spill] sm:$0xff] }
 0x559   :  { %v5975_v12 = vpop.f32.mrb[34].mxu1  ;;  %v8397_v7 = vpack.c.bf16 %v6498_v20, %v6496_v36  ;;  %v13405_v2 = vld [vmem:[#allocation37_spill] sm:$0xff] }
 0x55a   :  { %v8701_v17 = vadd.f32 %v5975_v12, %v4506_v27  ;;  %8384 = vmatpush1.bf16.msra.mxu0 %v8383_v41  ;;  %v5977_v5 = vpop.f32.mrb[35].mxu1  ;;  %v6330_v33 = vmax.f32 %v8699_v50, 0.0  ;;  %v13401_v41 = vld [vmem:[#allocation35_spill] sm:$0xff]  ;;  %v6502_v27 = vld [vmem:[%s13268_s5 + $0x358] sm:$0xff]  ;;  %v4531_v39 = vadd.f32 %v12326_v62, %v13405_v2 }
 0x55b   :  { %8386 = vmatprep.subr.bf16.mxu0 %v8385_v26  ;;  %v4521_v26 = vadd.f32 %v12326_v62, %v13401_v41  ;;  %v8401_v5 = vpack.c.bf16 %v6502_v27, %v6500_v54  ;;  %v6512_v54 = vld [vmem:[%s13268_s5 + $0x3a8] sm:$0xff]  ;;  %v6514_v27 = vld [vmem:[%s13268_s5 + $0x3b8] sm:$0xff] }
 0x55c   :  { %v8702_v61 = vadd.f32 %v8701_v17, %v13398_v1  ;;  %v8399_v17 = vpack.c.bf16 %v6497_v48, %v6495_v25  ;;  %v6509_v25 = vld [vmem:[%s13268_s5 + $0x390] sm:$0xff]  ;;  %v13407_v48 = vld [vmem:[#allocation38_spill] sm:$0xff] }
 0x55d   :  { %v5980_v4 = vpop.f32.mrb[36].mxu1  ;;  %v4536_v41 = vadd.f32 %v12326_v62, %v13407_v48 }
 0x55e   :  { %v6331_v29 = vmax.f32 %v8702_v61, 0.0  ;;  %v8704_v16 = vadd.f32 %v5980_v4, %v4511_v63  ;;  %8388 = vmatpush1.bf16.msra.mxu0 %v8387_v24  ;;  %v5982_v3 = vpop.f32.mrb[37].mxu1  ;;  %v6499_v24 = vld [vmem:[%s13268_s5 + $0x340] sm:$0xff]  ;;  %v6504_v61 = vld [vmem:[%s13268_s5 + $0x368] sm:$0xff] }
 0x55f   :  { %8390 = vmatprep.subr.bf16.mxu0 %v8389_v57  ;;  %v6501_v57 = vld [vmem:[%s13268_s5 + $0x350] sm:$0xff]  ;;  %v13404_v63 = vld [vmem:[#allocation65_spill] sm:$0xff]  ;;  %v8405_v3 = vpack.c.bf16 %v6506_v6, %v6504_v61 }
 0x560   :  { %v12505_v14 = vmax.f32 %v6330_v33, %v6331_v29  ;;  %v8705_v28 = vadd.f32 %v8704_v16, %v13400_v19  ;;  %v8403_v16 = vpack.c.bf16 %v6501_v57, %v6499_v24  ;;  %v6510_v19 = vld [vmem:[%s13268_s5 + $0x398] sm:$0xff]  ;;  %v6513_v24 = vld [vmem:[%s13268_s5 + $0x3b0] sm:$0xff] }
 0x561   :  { %v5985_v31 = vpop.f32.mrb[38].mxu1  ;;  %v13409_v57 = vld [vmem:[#allocation39_spill] sm:$0xff] }
 0x562   :  { %v8707_v9 = vadd.f32 %v5985_v31, %v4516_v45  ;;  %8392 = vmatpush1.bf16.msra.mxu0 %v8391_v44  ;;  %v5987_v34 = vpop.f32.mrb[39].mxu1  ;;  %v6332_v50 = vmax.f32 %v8705_v28, 0.0  ;;  %v6503_v44 = vld [vmem:[%s13268_s5 + $0x360] sm:$0xff]  ;;  %v4541_v8 = vadd.f32 %v12326_v62, %v13409_v57 }
 0x563   :  { %8394 = vmatprep.subr.bf16.mxu0 %v8393_v49  ;;  %v6505_v49 = vld [vmem:[%s13268_s5 + $0x370] sm:$0xff] }
 0x564   :  { %v8708_v37 = vadd.f32 %v8707_v9, %v13402_v47  ;;  %v8407_v34 = vpack.c.bf16 %v6505_v49, %v6503_v44  ;;  %v13408_v47 = vld [vmem:[#allocation67_spill] sm:$0xff] }
 0x565   :  { %v5990_v40 = vpop.f32.mrb[40].mxu1 }
 0x566   :  { %v6333_v46 = vmax.f32 %v8708_v37, 0.0  ;;  %v8710_v42 = vadd.f32 %v5990_v40, %v4521_v26  ;;  %8396 = vmatpush1.bf16.msra.mxu0 %v8395_v11  ;;  %v5992_v12 = vpop.f32.mrb[41].mxu1 }
 0x567   :  { %8398 = vmatprep.subr.bf16.mxu0 %v8397_v7  ;;  %v6507_v7 = vld [vmem:[%s13268_s5 + $0x380] sm:$0xff] }
 0x568   :  { %v6359_v10 = vmax.f32 %v6332_v50, %v6333_v46  ;;  %v8711_v1 = vadd.f32 %v8710_v42, %v13404_v63  ;;  %v8411_v12 = vpack.c.bf16 %v6509_v25, %v6507_v7  ;;  %v6518_v63 = vld [vmem:[%s13268_s5 + $0x3d8] sm:$0xff]  ;;  %v6524_v7 = vld [vmem:[%s13268_s5 + $0x408] sm:$0xff] }
 0x569   :  { %v5995_v43 = vpop.f32.mrb[42].mxu1 }
 0x56a   :  { %v8713_v4 = vadd.f32 %v5995_v43, %v4526_v53  ;;  %8400 = vmatpush1.bf16.msra.mxu0 %v8399_v17  ;;  %v5997_v33 = vpop.f32.mrb[43].mxu1  ;;  %v6371_v29 = vmax.f32 %v12441_v32, %v6359_v10  ;;  %v6508_v32 = vld [vmem:[%s13268_s5 + $0x388] sm:$0xff]  ;;  %v6334_v36 = vmax.f32 %v8711_v1, 0.0  ;;  %v8413_v17 = vpack.c.bf16 %v6514_v27, %v6512_v54 }
 0x56b   :  { %8402 = vmatprep.subr.bf16.mxu0 %v8401_v5  ;;  %v8409_v11 = vpack.c.bf16 %v6510_v19, %v6508_v32  ;;  %v6511_v5 = vld [vmem:[%s13268_s5 + $0x3a0] sm:$0xff]  ;;  %v6516_v10 = vld [vmem:[%s13268_s5 + $0x3c8] sm:$0xff] }
 0x56c   :  { %v8714_v45 = vadd.f32 %v8713_v4, %v13406_v15  ;;  %6830 = vmatprep.mubr.f32.mxu0 %v6371_v29  ;;  %v8415_v33 = vpack.c.bf16 %v6513_v24, %v6511_v5  ;;  %v8417_v29 = vpack.c.bf16 %v6518_v63, %v6516_v10  ;;  %v6522_v15 = vld [vmem:[%s13268_s5 + $0x3f8] sm:$0xff]  ;;  %v6528_v5 = vld [vmem:[%s13268_s5 + $0x428] sm:$0xff] }
 0x56d   :  { %v6000_v28 = vpop.f32.mrb[44].mxu1  ;;  %v6530_v24 = vld [vmem:[%s13268_s5 + $0x438] sm:$0xff] }
 0x56e   :  { %v6335_v20 = vmax.f32 %v8714_v45, 0.0  ;;  %v8716_v31 = vadd.f32 %v6000_v28, %v4531_v39  ;;  %8404 = vmatpush1.bf16.msra.mxu0 %v8403_v16  ;;  %v6002_v9 = vpop.f32.mrb[45].mxu1  ;;  %v6517_v16 = vld [vmem:[%s13268_s5 + $0x3d0] sm:$0xff]  ;;  %v6520_v39 = vld [vmem:[%s13268_s5 + $0x3e8] sm:$0xff]  ;;  %v8429_v63 = vpack.c.bf16 %v6530_v24, %v6528_v5  ;;  %v6546_v24 = vld [vmem:[%s13268_s5 + $0x4b8] sm:$0xff] }
 0x56f   :  { %8406 = vmatprep.subr.bf16.mxu0 %v8405_v3  ;;  %v13410_v3 = vld [vmem:[#allocation40_spill] sm:$0xff]  ;;  %v13411_v9 = vld [vmem:[#allocation41_spill] sm:$0xff]  ;;  %v6544_v5 = vld [vmem:[%s13268_s5 + $0x4a8] sm:$0xff] }
 0x570   :  { %v12568_v26 = vmax.f32 %v6334_v36, %v6335_v20  ;;  %v8717_v37 = vadd.f32 %v8716_v31, %v13408_v47  ;;  %v4546_v44 = vadd.f32 %v12326_v62, %v13410_v3  ;;  %v8421_v20 = vpack.c.bf16 %v6522_v15, %v6520_v39  ;;  %v6521_v31 = vld [vmem:[%s13268_s5 + $0x3f0] sm:$0xff] }
 0x571   :  { %v6005_v40 = vpop.f32.mrb[46].mxu1  ;;  %v6533_v39 = vld [vmem:[%s13268_s5 + $0x450] sm:$0xff] }
 0x572   :  { %v6372_v50 = vmax.f32 %v12473_v35, %v12568_v26  ;;  %v8719_v46 = vadd.f32 %v6005_v40, %v4536_v41  ;;  %8408 = vmatpush1.bf16.msra.mxu0 %v8407_v34  ;;  %v6007_v42 = vpop.f32.mrb[47].mxu1  ;;  %v6336_v61 = vmax.f32 %v8717_v37, 0.0  ;;  %v4551_v34 = vadd.f32 %v12326_v62, %v13411_v9  ;;  %v6525_v40 = vld [vmem:[%s13268_s5 + $0x410] sm:$0xff]  ;;  %v13415_v9 = vld [vmem:[#allocation45_spill] sm:$0xff]  ;;  %v6600_v35 = vld [vmem:[%s13268_s5 + $0x668] sm:$0xff] }
 0x573   :  { %8410 = vmatprep.subr.bf16.mxu0 %v8409_v11  ;;  %v6602_v26 = vld [vmem:[%s13268_s5 + $0x678] sm:$0xff] }
 0x574   :  { %v8720_v53 = vadd.f32 %v8719_v46, %v11746_v56  ;;  %v6515_v56 = vld [vmem:[%s13268_s5 + $0x3c0] sm:$0xff]  ;;  %v13412_v46 = vld [vmem:[#allocation42_spill] sm:$0xff] }
 0x575   :  { %v6010_v1 = vpop.f32.mrb[48].mxu1  ;;  %v8419_v28 = vpack.c.bf16 %v6517_v16, %v6515_v56  ;;  %v4556_v42 = vadd.f32 %v12326_v62, %v13412_v46 }
 0x576   :  { %v6337_v6 = vmax.f32 %v8720_v53, 0.0  ;;  %v8722_v43 = vadd.f32 %v6010_v1, %v4541_v8  ;;  %8412 = vmatpush1.bf16.msra.mxu0 %v8411_v12  ;;  %v6012_v4 = vpop.f32.mrb[49].mxu1  ;;  %v6527_v1 = vld [vmem:[%s13268_s5 + $0x420] sm:$0xff] }
 0x577   :  { %8414 = vmatprep.subr.bf16.mxu0 %v8413_v17  ;;  %v6532_v4 = vld [vmem:[%s13268_s5 + $0x448] sm:$0xff] }
 0x578   :  { %v6361_v49 = vmax.f32 %v6336_v61, %v6337_v6  ;;  %v8723_v2 = vadd.f32 %v8722_v43, %v11904_v23  ;;  %v6519_v23 = vld [vmem:[%s13268_s5 + $0x3e0] sm:$0xff]  ;;  %v13413_v61 = vld [vmem:[#allocation43_spill] sm:$0xff] }
 0x579   :  { %v6015_v45 = vpop.f32.mrb[50].mxu1  ;;  %v8423_v54 = vpack.c.bf16 %v6521_v31, %v6519_v23  ;;  %v4561_v6 = vadd.f32 %v12326_v62, %v13413_v61  ;;  %v6535_v31 = vld [vmem:[%s13268_s5 + $0x460] sm:$0xff] }
 0x57a   :  { %v8725_v32 = vadd.f32 %v6015_v45, %v4546_v44  ;;  %8416 = vmatpush1.bf16.msra.mxu0 %v8415_v33  ;;  %v6017_v19 = vpop.f32.mrb[51].mxu1  ;;  %v6373_v36 = vmax.f32 %v12505_v14, %v6361_v49  ;;  %v6526_v14 = vld [vmem:[%s13268_s5 + $0x418] sm:$0xff]  ;;  %v6338_v48 = vmax.f32 %v8723_v2, 0.0  ;;  %v6531_v2 = vld [vmem:[%s13268_s5 + $0x440] sm:$0xff]  ;;  %v6536_v45 = vld [vmem:[%s13268_s5 + $0x468] sm:$0xff] }
 0x57b   :  { %8418 = vmatprep.subr.bf16.mxu0 %v8417_v29  ;;  %v8425_v27 = vpack.c.bf16 %v6526_v14, %v6524_v7  ;;  %v6534_v33 = vld [vmem:[%s13268_s5 + $0x458] sm:$0xff]  ;;  %v6540_v7 = vld [vmem:[%s13268_s5 + $0x488] sm:$0xff] }
 0x57c   :  { %v8726_v11 = vadd.f32 %v8725_v32, %v11915_v51  ;;  %v6523_v51 = vld [vmem:[%s13268_s5 + $0x400] sm:$0xff]  ;;  %v8433_v49 = vpack.c.bf16 %v6534_v33, %v6532_v4  ;;  %v6538_v32 = vld [vmem:[%s13268_s5 + $0x478] sm:$0xff] }
 0x57d   :  { %v6020_v25 = vpop.f32.mrb[52].mxu1  ;;  %v8427_v10 = vpack.c.bf16 %v6525_v40, %v6523_v51  ;;  %v8437_v23 = vpack.c.bf16 %v6538_v32, %v6536_v45  ;;  %v6542_v14 = vld [vmem:[%s13268_s5 + $0x498] sm:$0xff]  ;;  %v6541_v51 = vld [vmem:[%s13268_s5 + $0x490] sm:$0xff]  ;;  %v13416_v40 = vld [vmem:[#allocation46_spill] sm:$0xff] }
 0x57e   :  { %v6339_v41 = vmax.f32 %v8726_v11, 0.0  ;;  %v8728_v47 = vadd.f32 %v6020_v25, %v4551_v34  ;;  %8420 = vmatpush1.bf16.msra.mxu0 %v8419_v28  ;;  %v6022_v37 = vpop.f32.mrb[53].mxu1  ;;  %v4571_v34 = vadd.f32 %v12326_v62, %v13415_v9  ;;  %v4576_v46 = vadd.f32 %v12326_v62, %v13416_v40  ;;  %v6550_v4 = vld [vmem:[%s13268_s5 + $0x4d8] sm:$0xff]  ;;  %v6556_v9 = vld [vmem:[%s13268_s5 + $0x508] sm:$0xff]  ;;  %v6561_v40 = vld [vmem:[%s13268_s5 + $0x530] sm:$0xff] }
 0x57f   :  { %8422 = vmatprep.subr.bf16.mxu0 %v8421_v20  ;;  %v8435_v20 = vpack.c.bf16 %v6533_v39, %v6531_v2  ;;  %v13418_v2 = vld [vmem:[#allocation48_spill] sm:$0xff] }
 0x580   :  { %v12633_v12 = vmax.f32 %v6338_v48, %v6339_v41  ;;  %v8729_v17 = vadd.f32 %v8728_v47, %v11926_v60  ;;  %v6529_v60 = vld [vmem:[%s13268_s5 + $0x430] sm:$0xff]  ;;  %v4586_v39 = vadd.f32 %v12326_v62, %v13418_v2  ;;  %v6554_v45 = vld [vmem:[%s13268_s5 + $0x4f8] sm:$0xff] }
 0x581   :  { %v6025_v57 = vpop.f32.mrb[54].mxu1 }
 0x582   :  { %v8731_v8 = vadd.f32 %v6025_v57, %v4556_v42  ;;  %8424 = vmatpush1.bf16.msra.mxu0 %v8423_v54  ;;  %v6027_v53 = vpop.f32.mrb[55].mxu1  ;;  %v6340_v56 = vmax.f32 %v8729_v17, 0.0 }
 0x583   :  { %8426 = vmatprep.subr.bf16.mxu0 %v8425_v27  ;;  %v8441_v27 = vpack.c.bf16 %v6542_v14, %v6540_v7 }
 0x584   :  { %v8732_v43 = vadd.f32 %v8731_v8, %v11937_v30  ;;  %v8431_v30 = vpack.c.bf16 %v6529_v60, %v6527_v1  ;;  %v6543_v1 = vld [vmem:[%s13268_s5 + $0x4a0] sm:$0xff]  ;;  %v13417_v60 = vld [vmem:[#allocation47_spill] sm:$0xff] }
 0x585   :  { %6831 = vmatmul.mubr.f32.vlgmr.msra.gmra.mrb[80].mxu0 %v6370_v21  ;;  %v6030_v29 = vpop.f32.mrb[56].mxu1  ;;  %v4581_v61 = vadd.f32 %v12326_v62, %v13417_v60  ;;  %v13420_v60 = vld [vmem:[#allocation50_spill] sm:$0xff] }
 0x586   :  { %v6341_v16 = vmax.f32 %v8732_v43, 0.0  ;;  %v8734_v3 = vadd.f32 %v6030_v29, %v4561_v6  ;;  %8428 = vmatpush1.bf16.msra.mxu0 %v8427_v10  ;;  %6901 = vmatprep.mubr.f32.mxu0 %v6373_v36  ;;  %v6032_v44 = vpop.f32.mrb[57].mxu1  ;;  %v6548_v43 = vld [vmem:[%s13268_s5 + $0x4c8] sm:$0xff] }
 0x587   :  { %8430 = vmatprep.subr.bf16.mxu0 %v8429_v63  ;;  %v8445_v63 = vpack.c.bf16 %v6546_v24, %v6544_v5  ;;  %v6564_v5 = vld [vmem:[%s13268_s5 + $0x548] sm:$0xff]  ;;  %v6566_v24 = vld [vmem:[%s13268_s5 + $0x558] sm:$0xff] }
 0x588   :  { %v12668_v21 = vmax.f32 %v6340_v56, %v6341_v16  ;;  %v8735_v15 = vadd.f32 %v8734_v3, %v11948_v18  ;;  %v6537_v18 = vld [vmem:[%s13268_s5 + $0x470] sm:$0xff] }
 0x589   :  { %v6035_v19 = vpop.f32.mrb[58].mxu1  ;;  %v8439_v54 = vpack.c.bf16 %v6537_v18, %v6535_v31  ;;  %v6553_v31 = vld [vmem:[%s13268_s5 + $0x4f0] sm:$0xff] }
 0x58a   :  { %v8737_v28 = vadd.f32 %v6035_v19, %v4566_v52  ;;  %8432 = vmatpush1.bf16.msra.mxu0 %v8431_v30  ;;  %v6037_v36 = vpop.f32.mrb[59].mxu1  ;;  %v6342_v48 = vmax.f32 %v8735_v15, 0.0  ;;  %v8449_v30 = vpack.c.bf16 %v6550_v4, %v6548_v43  ;;  %v6552_v15 = vld [vmem:[%s13268_s5 + $0x4e8] sm:$0xff]  ;;  %v6570_v43 = vld [vmem:[%s13268_s5 + $0x578] sm:$0xff] }
 0x58b   :  { %8434 = vmatprep.subr.bf16.mxu0 %v8433_v49  ;;  %v6549_v49 = vld [vmem:[%s13268_s5 + $0x4d0] sm:$0xff] }
 0x58c   :  { %v8738_v11 = vadd.f32 %v8737_v28, %v11959_v13  ;;  %v6539_v13 = vld [vmem:[%s13268_s5 + $0x480] sm:$0xff] }
 0x58d   :  { %v6040_v25 = vpop.f32.mrb[60].mxu1  ;;  %v8443_v10 = vpack.c.bf16 %v6541_v51, %v6539_v13  ;;  %v6559_v51 = vld [vmem:[%s13268_s5 + $0x520] sm:$0xff] }
 0x58e   :  { %v6343_v41 = vmax.f32 %v8738_v11, 0.0  ;;  %v8740_v47 = vadd.f32 %v6040_v25, %v4571_v34  ;;  %8436 = vmatpush1.bf16.msra.mxu0 %v8435_v20  ;;  %v6042_v37 = vpop.f32.mrb[61].mxu1  ;;  %v6558_v34 = vld [vmem:[%s13268_s5 + $0x518] sm:$0xff] }
 0x58f   :  { %8438 = vmatprep.subr.bf16.mxu0 %v8437_v23  ;;  %v8453_v23 = vpack.c.bf16 %v6554_v45, %v6552_v15  ;;  %v8457_v25 = vpack.c.bf16 %v6558_v34, %v6556_v9  ;;  %v6562_v37 = vld [vmem:[%s13268_s5 + $0x538] sm:$0xff]  ;;  %v6571_v15 = vld [vmem:[%s13268_s5 + $0x580] sm:$0xff]  ;;  %v6573_v45 = vld [vmem:[%s13268_s5 + $0x590] sm:$0xff] }
 0x590   :  { %v12700_v42 = vmax.f32 %v6342_v48, %v6343_v41  ;;  %v8741_v17 = vadd.f32 %v8740_v47, %v12319_v38  ;;  %v6545_v38 = vld [vmem:[%s13268_s5 + $0x4b0] sm:$0xff]  ;;  %v6555_v48 = vld [vmem:[%s13268_s5 + $0x500] sm:$0xff]  ;;  %v6560_v47 = vld [vmem:[%s13268_s5 + $0x528] sm:$0xff] }
 0x591   :  { %v6045_v57 = vpop.f32.mrb[62].mxu1  ;;  %v8447_v44 = vpack.c.bf16 %v6545_v38, %v6543_v1  ;;  %v8461_v13 = vpack.c.bf16 %v6562_v37, %v6560_v47  ;;  %v6563_v1 = vld [vmem:[%s13268_s5 + $0x540] sm:$0xff]  ;;  %v6565_v38 = vld [vmem:[%s13268_s5 + $0x550] sm:$0xff]  ;;  %v6582_v9 = vld [vmem:[%s13268_s5 + $0x5d8] sm:$0xff] }
 0x592   :  { %v8743_v8 = vadd.f32 %v6045_v57, %v4576_v46  ;;  %8440 = vmatpush1.bf16.msra.mxu0 %v8439_v54  ;;  %v6047_v53 = vpop.f32.mrb[63].mxu1  ;;  %v6344_v29 = vmax.f32 %v8741_v17, 0.0  ;;  %v13419_v46 = vld [vmem:[#allocation49_spill] sm:$0xff] }
 0x593   :  { %8442 = vmatprep.subr.bf16.mxu0 %v8441_v27  ;;  %v4591_v17 = vadd.f32 %v12326_v62, %v13419_v46  ;;  %v6583_v37 = vld [vmem:[%s13268_s5 + $0x5e0] sm:$0xff] }
 0x594   :  { %v8744_v6 = vadd.f32 %v8743_v8, %v12321_v59  ;;  %v6547_v59 = vld [vmem:[%s13268_s5 + $0x4c0] sm:$0xff] }
 0x595   :  { %v6050_v33 = vpop.f32.mrb[64].mxu1  ;;  %v8451_v20 = vpack.c.bf16 %v6549_v49, %v6547_v59  ;;  %v6572_v59 = vld [vmem:[%s13268_s5 + $0x588] sm:$0xff]  ;;  %v6574_v49 = vld [vmem:[%s13268_s5 + $0x598] sm:$0xff] }
 0x596   :  { %v6345_v56 = vmax.f32 %v8744_v6, 0.0  ;;  %v8746_v16 = vadd.f32 %v6050_v33, %v4581_v61  ;;  %8444 = vmatpush1.bf16.msra.mxu0 %v8443_v10  ;;  %v6052_v3 = vpop.f32.mrb[65].mxu1  ;;  %v8463_v10 = vpack.c.bf16 %v6561_v40, %v6559_v51  ;;  %v4596_v61 = vadd.f32 %v12326_v62, %v13420_v60  ;;  %v6568_v6 = vld [vmem:[%s13268_s5 + $0x568] sm:$0xff]  ;;  %v6569_v62 = vld [vmem:[%s13268_s5 + $0x570] sm:$0xff]  ;;  %v6590_v51 = vld [vmem:[%s13268_s5 + $0x618] sm:$0xff] }
 0x597   :  { %8446 = vmatprep.subr.bf16.mxu0 %v8445_v63  ;;  %v8465_v63 = vpack.c.bf16 %v6566_v24, %v6564_v5  ;;  %v6567_v3 = vld [vmem:[%s13268_s5 + $0x560] sm:$0xff]  ;;  %v6589_v5 = vld [vmem:[%s13268_s5 + $0x610] sm:$0xff]  ;;  %v6592_v24 = vld [vmem:[%s13268_s5 + $0x628] sm:$0xff] }
 0x598   :  { %v12732_v22 = vmax.f32 %v6344_v29, %v6345_v56  ;;  %v8747_v52 = vadd.f32 %v8746_v16, %v12333_v55  ;;  %v6551_v55 = vld [vmem:[%s13268_s5 + $0x4e0] sm:$0xff]  ;;  %v8467_v56 = vpack.c.bf16 %v6565_v38, %v6563_v1  ;;  %v8469_v16 = vpack.c.bf16 %v6570_v43, %v6568_v6  ;;  %v6596_v1 = vld [vmem:[%s13268_s5 + $0x648] sm:$0xff]  ;;  %v6598_v38 = vld [vmem:[%s13268_s5 + $0x658] sm:$0xff] }
 0x599   :  { %v6055_v32 = vpop.f32.mrb[66].mxu1  ;;  %v8455_v14 = vpack.c.bf16 %v6553_v31, %v6551_v55  ;;  %v6575_v55 = vld [vmem:[%s13268_s5 + $0x5a0] sm:$0xff]  ;;  %v6577_v31 = vld [vmem:[%s13268_s5 + $0x5b0] sm:$0xff] }
 0x59a   :  { %v6374_v19 = vmax.f32 %v12633_v12, %v12732_v22  ;;  %v8749_v28 = vadd.f32 %v6055_v32, %v4586_v39  ;;  %8448 = vmatpush1.bf16.msra.mxu0 %v8447_v44  ;;  %v6057_v36 = vpop.f32.mrb[67].mxu1  ;;  %v6346_v11 = vmax.f32 %v8747_v52, 0.0  ;;  %v8471_v39 = vpack.c.bf16 %v6569_v62, %v6567_v3  ;;  %v6595_v6 = vld [vmem:[%s13268_s5 + $0x640] sm:$0xff]  ;;  %v6597_v43 = vld [vmem:[%s13268_s5 + $0x650] sm:$0xff]  ;;  %v6608_v62 = vld [vmem:[%s13268_s5 + $0x6a8] sm:$0xff] }
 0x59b   :  { %8450 = vmatprep.subr.bf16.mxu0 %v8449_v30  ;;  %v8473_v52 = vpack.c.bf16 %v6574_v49, %v6572_v59  ;;  %v6578_v36 = vld [vmem:[%s13268_s5 + $0x5b8] sm:$0xff]  ;;  %v8479_v34 = vpack.c.bf16 %v6577_v31, %v6575_v55  ;;  %v6605_v3 = vld [vmem:[%s13268_s5 + $0x690] sm:$0xff]  ;;  %v6607_v49 = vld [vmem:[%s13268_s5 + $0x6a0] sm:$0xff] }
 0x59c   :  { %v8750_v18 = vadd.f32 %v8749_v28, %v12335_v58  ;;  %v6557_v58 = vld [vmem:[%s13268_s5 + $0x510] sm:$0xff]  ;;  %v6576_v28 = vld [vmem:[%s13268_s5 + $0x5a8] sm:$0xff]  ;;  %v6618_v55 = vld [vmem:[%s13268_s5 + $0x6f8] sm:$0xff] }
 0x59d   :  { %v8459_v54 = vpack.c.bf16 %v6557_v58, %v6555_v48  ;;  %v6586_v48 = vld [vmem:[%s13268_s5 + $0x5f8] sm:$0xff] }
 0x59e   :  { %v6347_v7 = vmax.f32 %v8750_v18, 0.0  ;;  %8452 = vmatpush1.bf16.msra.mxu0 %v8451_v20  ;;  %v8475_v20 = vpack.c.bf16 %v6573_v45, %v6571_v15  ;;  %v6580_v18 = vld [vmem:[%s13268_s5 + $0x5c8] sm:$0xff]  ;;  %v6614_v15 = vld [vmem:[%s13268_s5 + $0x6d8] sm:$0xff] }
 0x59f   :  { %8454 = vmatprep.subr.bf16.mxu0 %v8453_v23  ;;  %v8477_v23 = vpack.c.bf16 %v6578_v36, %v6576_v28  ;;  %v6611_v36 = vld [vmem:[%s13268_s5 + $0x6c0] sm:$0xff]  ;;  %v6666_v12 = vld [vmem:[%s13268_s5 + $0x878] sm:$0xff] }
 0x5a0   :  { %v12762_v41 = vmax.f32 %v6346_v11, %v6347_v7  ;;  %v8481_v11 = vpack.c.bf16 %v6582_v9, %v6580_v18  ;;  %v6579_v7 = vld [vmem:[%s13268_s5 + $0x5c0] sm:$0xff] }
 0x5a1   :  { %v6615_v9 = vld [vmem:[%s13268_s5 + $0x6e0] sm:$0xff] }
 0x5a2   :  { %8456 = vmatpush1.bf16.msra.mxu0 %v8455_v14  ;;  %v6375_v27 = vmax.f32 %v12668_v21, %v12762_v41  ;;  %v6581_v14 = vld [vmem:[%s13268_s5 + $0x5d0] sm:$0xff]  ;;  %v8501_v21 = vpack.c.bf16 %v6602_v26, %v6600_v35  ;;  %v6599_v41 = vld [vmem:[%s13268_s5 + $0x660] sm:$0xff] }
 0x5a3   :  { %8458 = vmatprep.subr.bf16.mxu0 %v8457_v25  ;;  %v6584_v25 = vld [vmem:[%s13268_s5 + $0x5e8] sm:$0xff]  ;;  %v8483_v58 = vpack.c.bf16 %v6581_v14, %v6579_v7  ;;  %v6622_v7 = vld [vmem:[%s13268_s5 + $0x718] sm:$0xff]  ;;  %v6635_v26 = vld [vmem:[%s13268_s5 + $0x780] sm:$0xff] }
 0x5a4   :  { %v8485_v47 = vpack.c.bf16 %v6586_v48, %v6584_v25  ;;  %v6619_v48 = vld [vmem:[%s13268_s5 + $0x700] sm:$0xff] }
 0x5a5   :  { %v6305_v57 = vpop.f32.mrb[68].mxu1 }
 0x5a6   :  { %v8752_v8 = vadd.f32 %v6305_v57, %v4591_v17  ;;  %8460 = vmatpush1.bf16.msra.mxu0 %v8459_v54  ;;  %v6307_v53 = vpop.f32.mrb[69].mxu1  ;;  %v6585_v54 = vld [vmem:[%s13268_s5 + $0x5f0] sm:$0xff]  ;;  %v6587_v17 = vld [vmem:[%s13268_s5 + $0x600] sm:$0xff]  ;;  %v6594_v57 = vld [vmem:[%s13268_s5 + $0x638] sm:$0xff] }
 0x5a7   :  { %8462 = vmatprep.subr.bf16.mxu0 %v8461_v13  ;;  %v6588_v13 = vld [vmem:[%s13268_s5 + $0x608] sm:$0xff]  ;;  %v8487_v40 = vpack.c.bf16 %v6585_v54, %v6583_v37  ;;  %v8493_v53 = vpack.c.bf16 %v6594_v57, %v6592_v24  ;;  %v6626_v37 = vld [vmem:[%s13268_s5 + $0x738] sm:$0xff]  ;;  %v6627_v57 = vld [vmem:[%s13268_s5 + $0x740] sm:$0xff] }
 0x5a8   :  { %v6348_v44 = vmax.f32 %v8752_v8, 0.0  ;;  %v8489_v46 = vpack.c.bf16 %v6590_v51, %v6588_v13  ;;  %v8491_v8 = vpack.c.bf16 %v6589_v5, %v6587_v17  ;;  %v6623_v51 = vld [vmem:[%s13268_s5 + $0x720] sm:$0xff]  ;;  %v6630_v17 = vld [vmem:[%s13268_s5 + $0x758] sm:$0xff] }
 0x5a9   :  { %v6310_v4 = vpop.f32.mrb[70].mxu1 }
 0x5aa   :  { %v8754_v33 = vadd.f32 %v6310_v4, %v4596_v61  ;;  %8464 = vmatpush1.bf16.msra.mxu0 %v8463_v10  ;;  %v6312_v29 = vpop.f32.mrb[71].mxu1  ;;  %v6591_v10 = vld [vmem:[%s13268_s5 + $0x620] sm:$0xff]  ;;  %v8497_v61 = vpack.c.bf16 %v6598_v38, %v6596_v1  ;;  %v6604_v4 = vld [vmem:[%s13268_s5 + $0x688] sm:$0xff] }
 0x5ab   :  { %8466 = vmatprep.subr.bf16.mxu0 %v8465_v63  ;;  %v6593_v63 = vld [vmem:[%s13268_s5 + $0x630] sm:$0xff]  ;;  %v6631_v38 = vld [vmem:[%s13268_s5 + $0x760] sm:$0xff] }
 0x5ac   :  { %v6349_v30 = vmax.f32 %v8754_v33, 0.0  ;;  %v8495_v60 = vpack.c.bf16 %v6593_v63, %v6591_v10  ;;  %v6606_v33 = vld [vmem:[%s13268_s5 + $0x698] sm:$0xff] }
 0x5ad   :  { %v6634_v10 = vld [vmem:[%s13268_s5 + $0x778] sm:$0xff] }
 0x5ae   :  { %v12812_v2 = vmax.f32 %v6348_v44, %v6349_v30  ;;  %8468 = vmatpush1.bf16.msra.mxu0 %v8467_v56  ;;  %v8505_v56 = vpack.c.bf16 %v6606_v33, %v6604_v4  ;;  %v6610_v44 = vld [vmem:[%s13268_s5 + $0x6b8] sm:$0xff]  ;;  %v6639_v33 = vld [vmem:[%s13268_s5 + $0x7a0] sm:$0xff] }
 0x5af   :  { %8470 = vmatprep.subr.bf16.mxu0 %v8469_v16  ;;  %v6603_v16 = vld [vmem:[%s13268_s5 + $0x680] sm:$0xff]  ;;  %v8509_v59 = vpack.c.bf16 %v6610_v44, %v6608_v62 }
 0x5b0   :  { %v6376_v32 = vmax.f32 %v12700_v42, %v12812_v2  ;;  %v8507_v30 = vpack.c.bf16 %v6605_v3, %v6603_v16  ;;  %v6646_v16 = vld [vmem:[%s13268_s5 + $0x7d8] sm:$0xff]  ;;  %v6643_v44 = vld [vmem:[%s13268_s5 + $0x7c0] sm:$0xff] }
 0x5b1   :  { %v7073_v42 = vld [vmem:[%s13270_s7 + $0xb8] sm:$0xff] }
 0x5b2   :  { %8472 = vmatpush1.bf16.msra.mxu0 %v8471_v39  ;;  %v6609_v39 = vld [vmem:[%s13268_s5 + $0x6b0] sm:$0xff] }
 0x5b3   :  { %8474 = vmatprep.subr.bf16.mxu0 %v8473_v52  ;;  %v6612_v52 = vld [vmem:[%s13268_s5 + $0x6c8] sm:$0xff]  ;;  %v8511_v45 = vpack.c.bf16 %v6609_v39, %v6607_v49  ;;  %v6650_v49 = vld [vmem:[%s13268_s5 + $0x7f8] sm:$0xff] }
 0x5b4   :  { %v8513_v28 = vpack.c.bf16 %v6614_v15, %v6612_v52  ;;  %v6647_v15 = vld [vmem:[%s13268_s5 + $0x7e0] sm:$0xff] }
 0x5b6   :  { %8476 = vmatpush1.bf16.msra.mxu0 %v8475_v20  ;;  %v6613_v20 = vld [vmem:[%s13268_s5 + $0x6d0] sm:$0xff] }
 0x5b7   :  { %8478 = vmatprep.subr.bf16.mxu0 %v8477_v23  ;;  %v6616_v23 = vld [vmem:[%s13268_s5 + $0x6e8] sm:$0xff]  ;;  %v8515_v31 = vpack.c.bf16 %v6613_v20, %v6611_v36  ;;  %v6654_v36 = vld [vmem:[%s13268_s5 + $0x818] sm:$0xff] }
 0x5b8   :  { %v8517_v18 = vpack.c.bf16 %v6618_v55, %v6616_v23  ;;  %v6651_v55 = vld [vmem:[%s13268_s5 + $0x800] sm:$0xff] }
 0x5ba   :  { %8480 = vmatpush1.bf16.msra.mxu0 %v8479_v34  ;;  %v6617_v34 = vld [vmem:[%s13268_s5 + $0x6f0] sm:$0xff] }
 0x5bb   :  { %8482 = vmatprep.subr.bf16.mxu0 %v8481_v11  ;;  %v6620_v11 = vld [vmem:[%s13268_s5 + $0x708] sm:$0xff]  ;;  %v8519_v14 = vpack.c.bf16 %v6617_v34, %v6615_v9  ;;  %v6658_v9 = vld [vmem:[%s13268_s5 + $0x838] sm:$0xff] }
 0x5bc   :  { %v8521_v25 = vpack.c.bf16 %v6622_v7, %v6620_v11  ;;  %v6655_v7 = vld [vmem:[%s13268_s5 + $0x820] sm:$0xff] }
 0x5be   :  { %8484 = vmatpush1.bf16.msra.mxu0 %v8483_v58  ;;  %v6621_v58 = vld [vmem:[%s13268_s5 + $0x710] sm:$0xff] }
 0x5bf   :  { %8486 = vmatprep.subr.bf16.mxu0 %v8485_v47  ;;  %v6624_v47 = vld [vmem:[%s13268_s5 + $0x728] sm:$0xff]  ;;  %v8523_v54 = vpack.c.bf16 %v6621_v58, %v6619_v48  ;;  %v6662_v48 = vld [vmem:[%s13268_s5 + $0x858] sm:$0xff] }
 0x5c0   :  { %v8525_v13 = vpack.c.bf16 %v6626_v37, %v6624_v47  ;;  %v6659_v37 = vld [vmem:[%s13268_s5 + $0x840] sm:$0xff] }
 0x5c2   :  { %8488 = vmatpush1.bf16.msra.mxu0 %v8487_v40  ;;  %v6625_v40 = vld [vmem:[%s13268_s5 + $0x730] sm:$0xff] }
 0x5c3   :  { %8490 = vmatprep.subr.bf16.mxu0 %v8489_v46  ;;  %v6628_v46 = vld [vmem:[%s13268_s5 + $0x748] sm:$0xff]  ;;  %v8527_v5 = vpack.c.bf16 %v6625_v40, %v6623_v51  ;;  %v6665_v51 = vld [vmem:[%s13268_s5 + $0x870] sm:$0xff] }
 0x5c4   :  { %v8529_v24 = vpack.c.bf16 %v6630_v17, %v6628_v46  ;;  %v6668_v40 = vld [vmem:[%s13268_s5 + $0x888] sm:$0xff]  ;;  %v6670_v46 = vld [vmem:[%s13268_s5 + $0x898] sm:$0xff] }
 0x5c5   :  { %6902 = vmatmul.mubr.f32.vlgmr.msra.gmra.mrb[80].mxu0 %v6372_v50  ;;  %v8499_v50 = vpack.c.bf16 %v6597_v43, %v6595_v6  ;;  %v6638_v6 = vld [vmem:[%s13268_s5 + $0x798] sm:$0xff] }
 0x5c6   :  { %8492 = vmatpush1.bf16.msra.mxu0 %v8491_v8  ;;  %6972 = vmatprep.mubr.f32.mxu0 %v6375_v27  ;;  %v6601_v27 = vld [vmem:[%s13268_s5 + $0x670] sm:$0xff] }
 0x5c7   :  { %8494 = vmatprep.subr.bf16.mxu0 %v8493_v53  ;;  %v8503_v29 = vpack.c.bf16 %v6601_v27, %v6599_v41  ;;  %v6629_v8 = vld [vmem:[%s13268_s5 + $0x750] sm:$0xff]  ;;  %v6632_v53 = vld [vmem:[%s13268_s5 + $0x768] sm:$0xff]  ;;  %v6642_v41 = vld [vmem:[%s13268_s5 + $0x7b8] sm:$0xff] }
 0x5c8   :  { %v8531_v63 = vpack.c.bf16 %v6629_v8, %v6627_v57  ;;  %v8533_v1 = vpack.c.bf16 %v6634_v10, %v6632_v53  ;;  %v6669_v57 = vld [vmem:[%s13268_s5 + $0x890] sm:$0xff]  ;;  %v6672_v8 = vld [vmem:[%s13268_s5 + $0x8a8] sm:$0xff]  ;;  %v6674_v53 = vld [vmem:[%s13268_s5 + $0x8b8] sm:$0xff] }
 0x5ca   :  { %8496 = vmatpush1.bf16.msra.mxu0 %v8495_v60  ;;  %v6633_v60 = vld [vmem:[%s13268_s5 + $0x770] sm:$0xff] }
 0x5cb   :  { %8498 = vmatprep.subr.bf16.mxu0 %v8497_v61  ;;  %v6636_v61 = vld [vmem:[%s13268_s5 + $0x788] sm:$0xff]  ;;  %v8535_v43 = vpack.c.bf16 %v6633_v60, %v6631_v38  ;;  %v6673_v38 = vld [vmem:[%s13268_s5 + $0x8b0] sm:$0xff] }
 0x5cc   :  { %v8537_v35 = vpack.c.bf16 %v6638_v6, %v6636_v61  ;;  %v6676_v60 = vld [vmem:[%s13268_s5 + $0x8c8] sm:$0xff]  ;;  %v6678_v61 = vld [vmem:[%s13268_s5 + $0x8d8] sm:$0xff] }
 0x5ce   :  { %8500 = vmatpush1.bf16.msra.mxu0 %v8499_v50  ;;  %v6637_v50 = vld [vmem:[%s13268_s5 + $0x790] sm:$0xff] }
 0x5cf   :  { %8502 = vmatprep.subr.bf16.mxu0 %v8501_v21  ;;  %v6640_v21 = vld [vmem:[%s13268_s5 + $0x7a8] sm:$0xff]  ;;  %v8539_v27 = vpack.c.bf16 %v6637_v50, %v6635_v26  ;;  %v6677_v26 = vld [vmem:[%s13268_s5 + $0x8d0] sm:$0xff] }
 0x5d0   :  { %v8541_v4 = vpack.c.bf16 %v6642_v41, %v6640_v21  ;;  %v6680_v50 = vld [vmem:[%s13268_s5 + $0x8e8] sm:$0xff]  ;;  %v6682_v21 = vld [vmem:[%s13268_s5 + $0x8f8] sm:$0xff] }
 0x5d2   :  { %8504 = vmatpush1.bf16.msra.mxu0 %v8503_v29  ;;  %v6641_v29 = vld [vmem:[%s13268_s5 + $0x7b0] sm:$0xff] }
 0x5d3   :  { %8506 = vmatprep.subr.bf16.mxu0 %v8505_v56  ;;  %v6644_v56 = vld [vmem:[%s13268_s5 + $0x7c8] sm:$0xff]  ;;  %v8543_v3 = vpack.c.bf16 %v6641_v29, %v6639_v33  ;;  %v6681_v33 = vld [vmem:[%s13268_s5 + $0x8f0] sm:$0xff]  ;;  %v7066_v29 = vld [vmem:[%s13270_s7 + $0x80] sm:$0xff] }
 0x5d4   :  { %v8545_v62 = vpack.c.bf16 %v6646_v16, %v6644_v56  ;;  %v7067_v56 = vld [vmem:[%s13270_s7 + $0x88] sm:$0xff] }
 0x5d6   :  { %8508 = vmatpush1.bf16.msra.mxu0 %v8507_v30  ;;  %v6645_v30 = vld [vmem:[%s13268_s5 + $0x7d0] sm:$0xff] }
 0x5d7   :  { %8510 = vmatprep.subr.bf16.mxu0 %v8509_v59  ;;  %v6648_v59 = vld [vmem:[%s13268_s5 + $0x7e8] sm:$0xff]  ;;  %v8547_v39 = vpack.c.bf16 %v6645_v30, %v6643_v44  ;;  %v7068_v30 = vld [vmem:[%s13270_s7 + $0x90] sm:$0xff] }
 0x5d8   :  { %v8549_v52 = vpack.c.bf16 %v6650_v49, %v6648_v59  ;;  %v7051_v44 = vld [vmem:[%s13270_s7 + $0x8] sm:$0xff]  ;;  %v7069_v59 = vld [vmem:[%s13270_s7 + $0x98] sm:$0xff] }
 0x5da   :  { %8512 = vmatpush1.bf16.msra.mxu0 %v8511_v45  ;;  %v6649_v45 = vld [vmem:[%s13268_s5 + $0x7f0] sm:$0xff] }
 0x5db   :  { %8514 = vmatprep.subr.bf16.mxu0 %v8513_v28  ;;  %v6652_v28 = vld [vmem:[%s13268_s5 + $0x808] sm:$0xff]  ;;  %v8551_v20 = vpack.c.bf16 %v6649_v45, %v6647_v15  ;;  %v7053_v15 = vld [vmem:[%s13270_s7 + $0x18] sm:$0xff]  ;;  %v7070_v45 = vld [vmem:[%s13270_s7 + $0xa0] sm:$0xff] }
 0x5dc   :  { %v8553_v23 = vpack.c.bf16 %v6654_v36, %v6652_v28  ;;  %v7071_v28 = vld [vmem:[%s13270_s7 + $0xa8] sm:$0xff] }
 0x5de   :  { %8516 = vmatpush1.bf16.msra.mxu0 %v8515_v31  ;;  %v6653_v31 = vld [vmem:[%s13268_s5 + $0x810] sm:$0xff] }
 0x5df   :  { %8518 = vmatprep.subr.bf16.mxu0 %v8517_v18  ;;  %v6656_v18 = vld [vmem:[%s13268_s5 + $0x828] sm:$0xff]  ;;  %v8555_v34 = vpack.c.bf16 %v6653_v31, %v6651_v55  ;;  %v7072_v31 = vld [vmem:[%s13270_s7 + $0xb0] sm:$0xff] }
 0x5e0   :  { %v8557_v11 = vpack.c.bf16 %v6658_v9, %v6656_v18  ;;  %v7055_v55 = vld [vmem:[%s13270_s7 + $0x28] sm:$0xff]  ;;  %v7056_v18 = vld [vmem:[%s13270_s7 + $0x30] sm:$0xff]  ;;  %v7057_v9 = vld [vmem:[%s13270_s7 + $0x38] sm:$0xff] }
 0x5e2   :  { %8520 = vmatpush1.bf16.msra.mxu0 %v8519_v14  ;;  %v6657_v14 = vld [vmem:[%s13268_s5 + $0x830] sm:$0xff] }
 0x5e3   :  { %8522 = vmatprep.subr.bf16.mxu0 %v8521_v25  ;;  %v6660_v25 = vld [vmem:[%s13268_s5 + $0x848] sm:$0xff]  ;;  %v8559_v58 = vpack.c.bf16 %v6657_v14, %v6655_v7  ;;  %v8599_v7 = vpack.c.bf16 %v7057_v9, %v7056_v18 }
 0x5e4   :  { %v8561_v47 = vpack.c.bf16 %v6662_v48, %v6660_v25  ;;  %v7058_v25 = vld [vmem:[%s13270_s7 + $0x40] sm:$0xff]  ;;  %v7059_v48 = vld [vmem:[%s13270_s7 + $0x48] sm:$0xff] }
 0x5e6   :  { %8524 = vmatpush1.bf16.msra.mxu0 %v8523_v54  ;;  %v6661_v54 = vld [vmem:[%s13268_s5 + $0x850] sm:$0xff] }
 0x5e7   :  { %8526 = vmatprep.subr.bf16.mxu0 %v8525_v13  ;;  %v6664_v13 = vld [vmem:[%s13268_s5 + $0x868] sm:$0xff] }
 0x5e8   :  { %v8565_v22 = vpack.c.bf16 %v6666_v12, %v6664_v13  ;;  %v7060_v13 = vld [vmem:[%s13270_s7 + $0x50] sm:$0xff]  ;;  %v7061_v12 = vld [vmem:[%s13270_s7 + $0x58] sm:$0xff] }
 0x5ea   :  { %8528 = vmatpush1.bf16.msra.mxu0 %v8527_v5  ;;  %v8569_v5 = vpack.c.bf16 %v6670_v46, %v6668_v40  ;;  %v7062_v40 = vld [vmem:[%s13270_s7 + $0x60] sm:$0xff]  ;;  %v7063_v46 = vld [vmem:[%s13270_s7 + $0x68] sm:$0xff] }
 0x5eb   :  { %8530 = vmatprep.subr.bf16.mxu0 %v8529_v24  ;;  %v6667_v24 = vld [vmem:[%s13268_s5 + $0x880] sm:$0xff] }
 0x5ec   :  { %v8571_v10 = vpack.c.bf16 %v6669_v57, %v6667_v24  ;;  %v7081_v24 = vld [vmem:[%s13270_s7 + $0xf8] sm:$0xff] }
 0x5ee   :  { %8532 = vmatpush1.bf16.msra.mxu0 %v8531_v63  ;;  %v8573_v63 = vpack.c.bf16 %v6674_v53, %v6672_v8  ;;  %v7064_v8 = vld [vmem:[%s13270_s7 + $0x70] sm:$0xff]  ;;  %v7065_v53 = vld [vmem:[%s13270_s7 + $0x78] sm:$0xff] }
 0x5ef   :  { %8534 = vmatprep.subr.bf16.mxu0 %v8533_v1  ;;  %v6671_v1 = vld [vmem:[%s13268_s5 + $0x8a0] sm:$0xff] }
 0x5f0   :  { %v8575_v6 = vpack.c.bf16 %v6673_v38, %v6671_v1 }
 0x5f2   :  { %8536 = vmatpush1.bf16.msra.mxu0 %v8535_v43  ;;  %v8577_v43 = vpack.c.bf16 %v6678_v61, %v6676_v60  ;;  %v6683_v60 = vld [vmem:[%s13271_s6] sm:$0x3] }
 0x5f3   :  { %8538 = vmatprep.subr.bf16.mxu0 %v8537_v35  ;;  %v6675_v35 = vld [vmem:[%s13268_s5 + $0x8c0] sm:$0xff] }
 0x5f4   :  { %v8579_v41 = vpack.c.bf16 %v6677_v26, %v6675_v35 }
 0x5f6   :  { %8540 = vmatpush1.bf16.msra.mxu0 %v8539_v27  ;;  %v8581_v27 = vpack.c.bf16 %v6682_v21, %v6680_v50 }
 0x5f7   :  { %8542 = vmatprep.subr.bf16.mxu0 %v8541_v4  ;;  %v6679_v4 = vld [vmem:[%s13268_s5 + $0x8e0] sm:$0xff] }
 0x5f8   :  { %v8583_v16 = vpack.c.bf16 %v6681_v33, %v6679_v4  ;;  %v7375_v4 = vld [vmem:[%s13272_s8] ss:$0 sm:$0xff] }
 0x5fa   :  { %8544 = vmatpush1.bf16.msra.mxu0 %v8543_v3  ;;  %v8585_v3 = vpack.c.bf16 %v7067_v56, %v7066_v29 }
 0x5fb   :  { %8546 = vmatprep.subr.bf16.mxu0 %v8545_v62  ;;  %v7050_v62 = vld [vmem:[%s13270_s7] sm:$0xff] }
 0x5fc   :  { %v8587_v49 = vpack.c.bf16 %v7051_v44, %v7050_v62 }
 0x5fe   :  { %8548 = vmatpush1.bf16.msra.mxu0 %v8547_v39  ;;  %v8589_v39 = vpack.c.bf16 %v7069_v59, %v7068_v30 }
 0x5ff   :  { %8550 = vmatprep.subr.bf16.mxu0 %v8549_v52  ;;  %v7052_v52 = vld [vmem:[%s13270_s7 + $0x10] sm:$0xff] }
 0x600   :  { %v8591_v36 = vpack.c.bf16 %v7053_v15, %v7052_v52 }
 0x602   :  { %8552 = vmatpush1.bf16.msra.mxu0 %v8551_v20  ;;  %v8593_v20 = vpack.c.bf16 %v7071_v28, %v7070_v45 }
 0x603   :  { %8554 = vmatprep.subr.bf16.mxu0 %v8553_v23  ;;  %v7054_v23 = vld [vmem:[%s13270_s7 + $0x20] sm:$0xff] }
 0x604   :  { %v8595_v2 = vpack.c.bf16 %v7055_v55, %v7054_v23 }
 0x605   :  { %6973 = vmatmul.mubr.f32.vlgmr.msra.gmra.mrb[80].mxu0 %v6374_v19  ;;  %v6663_v19 = vld [vmem:[%s13268_s5 + $0x860] sm:$0xff] }
 0x606   :  { %8556 = vmatpush1.bf16.msra.mxu0 %v8555_v34  ;;  %7043 = vmatprep.mubr.f32.mxu0 %v13308_v0  ;;  %v8563_v0 = vpack.c.bf16 %v6661_v54, %v6659_v37  ;;  %v8567_v17 = vpack.c.bf16 %v6665_v51, %v6663_v19  ;;  %v7074_v34 = vld [vmem:[%s13270_s7 + $0xc0] sm:$0xff]  ;;  %v8603_v37 = vpack.c.bf16 %v7059_v48, %v7058_v25 }
 0x607   :  { %8558 = vmatprep.subr.bf16.mxu0 %v8557_v11  ;;  %v7075_v11 = vld [vmem:[%s13270_s7 + $0xc8] sm:$0xff]  ;;  %v8607_v19 = vpack.c.bf16 %v7061_v12, %v7060_v13 }
 0x608   :  { %v8601_v14 = vpack.c.bf16 %v7075_v11, %v7074_v34 }
 0x60a   :  { %8560 = vmatpush1.bf16.msra.mxu0 %v8559_v58  ;;  %v7076_v58 = vld [vmem:[%s13270_s7 + $0xd0] sm:$0xff] }
 0x60b   :  { %8562 = vmatprep.subr.bf16.mxu0 %v8561_v47  ;;  %v7077_v47 = vld [vmem:[%s13270_s7 + $0xd8] sm:$0xff] }
 0x60c   :  { %v8605_v54 = vpack.c.bf16 %v7077_v47, %v7076_v58 }
 0x60e   :  { %8564 = vmatpush1.bf16.msra.mxu0 %v8563_v0  ;;  %v7078_v0 = vld [vmem:[%s13270_s7 + $0xe0] sm:$0xff] }
 0x60f   :  { %8566 = vmatprep.subr.bf16.mxu0 %v8565_v22  ;;  %v7079_v22 = vld [vmem:[%s13270_s7 + $0xe8] sm:$0xff] }
 0x610   :  { %v8609_v51 = vpack.c.bf16 %v7079_v22, %v7078_v0 }
 0x612   :  { %8568 = vmatpush1.bf16.msra.mxu0 %v8567_v17  ;;  %v8611_v17 = vpack.c.bf16 %v7063_v46, %v7062_v40 }
 0x613   :  { %8570 = vmatprep.subr.bf16.mxu0 %v8569_v5  ;;  %v7080_v5 = vld [vmem:[%s13270_s7 + $0xf0] sm:$0xff] }
 0x614   :  { %v8613_v57 = vpack.c.bf16 %v7081_v24, %v7080_v5 }
 0x616   :  { %8572 = vmatpush1.bf16.msra.mxu0 %v8571_v10  ;;  %v8615_v10 = vpack.c.bf16 %v7065_v53, %v7064_v8 }
 0x617   :  { %8574 = vmatprep.subr.bf16.mxu0 %v8573_v63  ;;  %v6685_v63 = vlaneseq }
 0x619   :  { %v6686_v1 = vshrl.u32 %v6685_v63, 7 }
 0x61a   :  { %8576 = vmatpush1.bf16.msra.mxu0 %v8575_v6 }
 0x61b   :  { %8578 = vmatprep.subr.bf16.mxu0 %v8577_v43  ;;  %v6691_v38 = vsub.s32 1, %v6686_v1  ;;  %v6687_v61 = vsub.s32 0, %v6686_v1 }
 0x61d   :  { %v6692_v6 = vrot.slane %v6683_v60, %v6691_v38  ;;  %v6688_v43 = vrot.slane %v6683_v60, %v6687_v61 }
 0x61e   :  { %8580 = vmatpush1.bf16.msra.mxu0 %v8579_v41 }
 0x61f   :  { %8582 = vmatprep.subr.bf16.mxu0 %v8581_v27 }
 0x622   :  { %8584 = vmatpush1.bf16.msra.mxu0 %v8583_v16 }
 0x623   :  { %8586 = vmatprep.subr.bf16.mxu0 %v8585_v3 }
 0x625   :  { %7044 = vmatmul.mubr.f32.vlgmr.msra.gmra.mrb[80].mxu0 %v6376_v32  ;;  %v8597_v32 = vpack.c.bf16 %v7073_v42, %v7072_v31 }
 0x626   :  { %8588 = vmatpush3.bf16.msra.mxu0 %v8587_v49 }
 0x627   :  { %8590 = vmatprep.subr.bf16.mxu0 %v8589_v39 }
 0x62a   :  { %8592 = vmatpush3.bf16.msra.mxu0 %v8591_v36 }
 0x62b   :  { %8594 = vmatprep.subr.bf16.mxu0 %v8593_v20 }
 0x62e   :  { %8596 = vmatpush3.bf16.msra.mxu0 %v8595_v2 }
 0x62f   :  { %8598 = vmatprep.subr.bf16.mxu0 %v8597_v32 }
 0x632   :  { %8600 = vmatpush3.bf16.msra.mxu0 %v8599_v7 }
 0x633   :  { %8602 = vmatprep.subr.bf16.mxu0 %v8601_v14 }
 0x636   :  { %8604 = vmatpush3.bf16.msra.mxu0 %v8603_v37 }
 0x637   :  { %8606 = vmatprep.subr.bf16.mxu0 %v8605_v54 }
 0x63a   :  { %8608 = vmatpush3.bf16.msra.mxu0 %v8607_v19 }
 0x63b   :  { %8610 = vmatprep.subr.bf16.mxu0 %v8609_v51 }
 0x63e   :  { %8612 = vmatpush3.bf16.msra.mxu0 %v8611_v17 }
 0x63f   :  { %8614 = vmatprep.subr.bf16.mxu0 %v8613_v57 }
 0x642   :  { %8616 = vmatpush3.bf16.msra.mxu0 %v8615_v10 }
 0x6f8   :  { %v7045_v35 = vpop.f32.mrb[80].mxu0 }
 0x6f9   :  { %v7047_v26 = vpop.f32.mrb[81].mxu0  ;;  %v8755_v21 = vadd.f32 %v7045_v35, %v6688_v43 }
 0x6fa   :  { %v8756_v50 = vadd.f32 %v7047_v26, %v6692_v6 }
 0x6fc   :  { %7153 = vmatprep.mubr.f32.mxu0 %v8756_v50 }
 0x6fd   :  { %7154 = vmatmul.mubr.f32.vlgmr.msra.gmra.mrb[82].mxu0 %v8755_v21 }
 0x7d0   :  { %v7606_v41 = vpop.f32.mrb[82].mxu0 }
 0x7d1   :  { %v7607_v27 = vpop.f32.mrb[83].mxu0 }
 0x7d2   :  { %v7608_v33 = vadd.f32 %v7607_v27, %v7606_v41 }
 0x7d4   :  { %v7156_v29 = vadd.f32 %v7608_v33, %v7375_v4 }
 0x7d6   :  { %7159 = vmax.xlane.f32.xlu0 %v7156_v29 }
 0x863   :  { %v7160_v56 = vpop.xlane.xlu0 %7159 }
 0x864   :  { %v7161_v16 = vsub.f32 %v7156_v29, %v7160_v56 }
 0x866   :  { %v7162_v3 = vmul.f32 1.442695, %v7161_v16 }
 0x868   :  { %9132 = vpow2.f32 %v7162_v3 }
 0x872   :  { %v9133_v62 = vpop.eup %9132 }
 0x873   :  { %7164 = vadd.xlane.f32.xlu0 %v9133_v62 }
 0x900   :  { %v7165_v44 = vpop.xlane.xlu0 %7164 }
 0x901   :  { %9134 = vrcp.f32 %v7165_v44 }
 0x90b   :  { %v9135_v30 = vpop.eup %9134 }
 0x90c   :  { %v7167_v59 = vmul.f32 %v9135_v30, %v7165_v44 }
 0x90e   :  { %v7168_v49 = vsub.f32 2.0, %v7167_v59 }
 0x910   :  { %v7169_v39 = vmul.f32 %v9135_v30, %v7168_v49 }
 0x912   :  { %v7170_v52 = vmul.f32 %v9133_v62, %v7169_v39 }
 0x914   :  { %7171 = vst [vmem:[%s13273_s9] sm:$0xff] %v7170_v52 }

</bundles_post_ra>
